<compile_context>
chip_gen: v7x
topology: tpu7x:2x2x1
jax: 0.10.0
libtpu: 0.0.40
codegen_flags: <defaults>
</compile_context>

<pallas_src>
import functools

import jax
import jax.numpy as jnp
from jax.experimental import pallas as pl
from jax.experimental.pallas import tpu as pltpu


# ----------------------------- Kernel A: conv stages ------------------------

def _conv_stages_kernel(x1_ref, w1_ref, b1_ref, w2_ref, b2_ref, o_ref,
                        acc1_ref, xp2_ref, acc2_ref, *, B):
    # ---- conv1: 5 matmuls, K = 40 (kx and cin folded), f32 accumulation ----
    # x1_ref: (B, 36, 32, 40) bf16, w1_ref: (5, 40, 128) bf16
    for ky in range(5):
        lhs = x1_ref[:, ky:ky + 32, :, :].reshape(B * 1024, 40)
        part = jnp.dot(lhs, w1_ref[ky], preferred_element_type=jnp.float32)
        if ky == 0:
            acc1_ref[...] = part            # first tap assigns (no zero-fill)
        else:
            acc1_ref[...] += part

    # 2x2 maxpool fused on the raw accumulator (pool commutes with the
    # per-channel bias + ReLU): W-pool via stride-2 sublane reads, H-pool via
    # an outer-dim split reshape.
    wp = jnp.maximum(acc1_ref[pl.ds(0, B * 512, 2), :],
                     acc1_ref[pl.ds(1, B * 512, 2), :])         # (B*512, 128)
    wp = wp.reshape(B * 16, 2, 16, 128)
    p1 = jnp.maximum(wp[:, 0], wp[:, 1])                        # (B*16, 16, 128)
    p1 = jnp.maximum(p1 + b1_ref[...], 0.0).astype(jnp.bfloat16)

    # Write pooled conv1 activation (bf16) into the padded conv2 input.  Only
    # the 1-pixel border is zeroed; the interior is fully overwritten.  Done
    # per step so it stays correct when the batch grid is core-sharded.
    xp2_ref[:, 0:1, :, :] = jnp.zeros((B, 1, 18, 128), jnp.bfloat16)
    xp2_ref[:, 17:18, :, :] = jnp.zeros((B, 1, 18, 128), jnp.bfloat16)
    xp2_ref[:, 1:17, 0:1, :] = jnp.zeros((B, 16, 1, 128), jnp.bfloat16)
    xp2_ref[:, 1:17, 17:18, :] = jnp.zeros((B, 16, 1, 128), jnp.bfloat16)
    xp2_ref[:, 1:17, 1:17, :] = p1.reshape(B, 16, 16, 128)

    # ---- conv2: 3 matmuls, K = 384 (3 kx taps lane-concatenated) -----------
    for ky in range(3):
        lhs = jnp.concatenate(
            [xp2_ref[:, ky:ky + 16, kx:kx + 16, :].reshape(B * 256, 128)
             for kx in range(3)],
            axis=-1)                                            # (B*256, 384)
        part = jnp.dot(lhs, w2_ref[ky], preferred_element_type=jnp.float32)
        if ky == 0:
            acc2_ref[...] = part
        else:
            acc2_ref[...] += part

    wp2 = jnp.maximum(acc2_ref[pl.ds(0, B * 128, 2), :],
                      acc2_ref[pl.ds(1, B * 128, 2), :])        # (B*128, 128)
    wp2 = wp2.reshape(B * 8, 2, 8, 128)
    p2 = jnp.maximum(wp2[:, 0], wp2[:, 1])                      # (B*8, 8, 128)
    p2 = jnp.maximum(p2 + b2_ref[...], 0.0)
    o_ref[...] = p2.reshape(B, 8, 8, 128).astype(o_ref.dtype)


def _pick_batch_block(n):
    # Largest block of 8/4/2 images that divides N while keeping >= 2 grid
    # steps (so both v7x TensorCores get work); fall back to per-image.
    for b in (8, 4, 2):
        if n % b == 0 and n // b >= 2:
            return b
    return 1


def conv_stages(x1, c1w, c1b, c2w, c2b):
    """x1: (N, 36, 32, 40) bf16 kx-folded padded input -> (N, 8, 8, 128) bf16."""
    N = x1.shape[0]
    assert x1.shape[1:] == (36, 32, 40)
    B = _pick_batch_block(N)
    return pl.pallas_call(
        functools.partial(_conv_stages_kernel, B=B),
        out_shape=jax.ShapeDtypeStruct((N, 8, 8, 128), jnp.bfloat16),
        grid_spec=pltpu.PrefetchScalarGridSpec(
            num_scalar_prefetch=0,
            grid=(N // B,),
            in_specs=[
                pl.BlockSpec((B, 36, 32, 40), lambda n: (n, 0, 0, 0)),
                pl.BlockSpec((5, 40, 128), lambda n: (0, 0, 0)),
                pl.BlockSpec((1, 128), lambda n: (0, 0)),
                pl.BlockSpec((3, 384, 128), lambda n: (0, 0, 0)),
                pl.BlockSpec((1, 128), lambda n: (0, 0)),
            ],
            out_specs=pl.BlockSpec((B, 8, 8, 128), lambda n: (n, 0, 0, 0)),
            scratch_shapes=[
                pltpu.VMEM((B * 1024, 128), jnp.float32),    # conv1 accumulator
                pltpu.VMEM((B, 18, 18, 128), jnp.bfloat16),  # padded conv2 input
                pltpu.VMEM((B * 256, 128), jnp.float32),     # conv2 accumulator
            ]),
        compiler_params=pltpu.CompilerParams(
            dimension_semantics=("parallel",),
            vmem_limit_bytes=32 * 1024 * 1024),
    )(x1, c1w, c1b, c2w, c2b)


# ------------------------------- Kernel B: FC head --------------------------

def _fc_head_kernel(a_ref, w1_ref, b1_ref, w2_ref, b2_ref, o_ref, *, ncls):
    # fc1 over the whole K=8192 in one matmul (no reduction grid axis).
    h = jnp.dot(a_ref[...], w1_ref[...], preferred_element_type=jnp.float32)
    h = jnp.maximum(h + b1_ref[...], 0.0)                        # fc1 + relu
    z = jnp.dot(h.astype(jnp.bfloat16), w2_ref[...],
                preferred_element_type=jnp.float32)
    z = jnp.maximum(z + b2_ref[...], 0.0)                        # fc2 + relu
    col = jax.lax.broadcasted_iota(jnp.int32, z.shape, 1)
    zm = jnp.where(col < ncls, z, -1e30)                         # mask pad lanes
    m = jnp.max(zm, axis=1, keepdims=True)
    lse = jnp.log(jnp.sum(jnp.exp(zm - m), axis=1, keepdims=True))
    o_ref[...] = zm - m - lse                                    # lane-dense (TM,128)


def fc_head(a, w1, b1, w2, b2, *, ncls=2):
    """a: (M, 8192) bf16 -> (M, ncls) f32 log-probabilities."""
    M, K = a.shape
    assert K == 8192
    TM = 512 if M > 512 else ((M + 7) // 8) * 8                  # 8-aligned rows
    Mp = ((M + TM - 1) // TM) * TM
    if Mp != M:
        a = jnp.pad(a, ((0, Mp - M), (0, 0)))
    out = pl.pallas_call(
        functools.partial(_fc_head_kernel, ncls=ncls),
        out_shape=jax.ShapeDtypeStruct((Mp, 128), jnp.float32),
        grid_spec=pltpu.PrefetchScalarGridSpec(
            num_scalar_prefetch=0,
            grid=(Mp // TM,),
            in_specs=[
                pl.BlockSpec((TM, K), lambda i: (i, 0)),
                pl.BlockSpec((K, 128), lambda i: (0, 0)),
                pl.BlockSpec((1, 128), lambda i: (0, 0)),
                pl.BlockSpec((128, 128), lambda i: (0, 0)),
                pl.BlockSpec((1, 128), lambda i: (0, 0)),
            ],
            out_specs=pl.BlockSpec((TM, 128), lambda i: (i, 0))),
        compiler_params=pltpu.CompilerParams(
            dimension_semantics=("parallel",),
            vmem_limit_bytes=40 * 1024 * 1024),
    )(a, w1, b1, w2, b2)
    return out[:M, :ncls]


# ------------------------------- JAX glue ------------------------------------

def prepare_params(p):
    """One-time re-layout of PyTorch-layout weights into kernel layout."""
    # conv1: (64,3,5,5) -> (ky, kx*8+ci, co); ci padded 3->8, co padded 64->128.
    c1 = jnp.transpose(p["conv1_w"], (2, 3, 1, 0))               # (5,5,3,64)
    c1 = jnp.pad(c1, ((0, 0), (0, 0), (0, 5), (0, 64)))
    c1 = c1.reshape(5, 40, 128).astype(jnp.bfloat16)
    c1b = jnp.pad(p["conv1_b"], (0, 64)).reshape(1, 128).astype(jnp.float32)
    # conv2: (128,64,3,3) -> (ky, kx*128+ci, co); ci padded 64->128 with zeros.
    c2 = jnp.transpose(p["conv2_w"], (2, 3, 1, 0))               # (3,3,64,128)
    c2 = jnp.pad(c2, ((0, 0), (0, 0), (0, 64), (0, 0)))
    c2 = c2.reshape(3, 384, 128).astype(jnp.bfloat16)
    c2b = p["conv2_b"].reshape(1, 128).astype(jnp.float32)
    # fc1: permute the K axis from PyTorch CHW order to our NHWC flatten order.
    f1 = p["fc1_w"].reshape(128, 128, 8, 8).transpose(2, 3, 1, 0)
    f1 = f1.reshape(8 * 8 * 128, 128).astype(jnp.bfloat16)
    f1b = p["fc1_b"].reshape(1, 128).astype(jnp.float32)
    # fc2: (2, 128) -> (128, 2) padded to (128, 128) lane-dense columns.
    f2 = jnp.pad(p["fc2_w"].T, ((0, 0), (0, 126))).astype(jnp.bfloat16)
    f2b = jnp.pad(p["fc2_b"], (0, 126)).reshape(1, 128).astype(jnp.float32)
    return dict(c1w=c1, c1b=c1b, c2w=c2, c2b=c2b,
                f1w=f1, f1b=f1b, f2w=f2, f2b=f2b)


def cnn_forward(x_nchw, kp):
    N = x_nchw.shape[0]
    # NCHW -> NHWC, spatial pad=2, channel pad 3 -> 8.
    x = jnp.transpose(x_nchw, (0, 2, 3, 1)).astype(jnp.float32)
    xpad = jnp.pad(x, ((0, 0), (2, 2), (2, 2), (0, 5)))          # (N,36,36,8)
    # Fold the 5 kx taps + 8 channels into a single 40-wide contraction axis
    # and cast to bf16 once (single HBM copy; K=40 matmuls inside the kernel).
    x1 = jnp.concatenate([xpad[:, :, kx:kx + 32, :] for kx in range(5)],
                         axis=-1).astype(jnp.bfloat16)           # (N,36,32,40)
    feat = conv_stages(x1, kp["c1w"], kp["c1b"], kp["c2w"], kp["c2b"])
    a = feat.reshape(N, 8 * 8 * 128)                             # free NHWC flatten
    return fc_head(a, kp["f1w"], kp["f1b"], kp["f2w"], kp["f2b"])


def init_params(key):
    ks = jax.random.split(key, 8)

    def nrm(k, shape, scale):
        return (scale * jax.random.normal(k, shape)).astype(jnp.float32)

    return {
        "conv1_w": nrm(ks[0], (64, 3, 5, 5), 0.05),
        "conv1_b": nrm(ks[1], (64,), 0.05),
        "conv2_w": nrm(ks[2], (128, 64, 3, 3), 0.05),
        "conv2_b": nrm(ks[3], (128,), 0.05),
        "fc1_w": nrm(ks[4], (128, 128 * 8 * 8), 0.02),
        "fc1_b": nrm(ks[5], (128,), 0.02),
        "fc2_w": nrm(ks[6], (2, 128), 0.05),
        "fc2_b": nrm(ks[7], (2,), 0.05),
    }


def cnn_reference(x_nchw, p):
    """Pure-JAX reference of the PyTorch forward (f32-ish, for sanity check)."""
    dn = ("NCHW", "OIHW", "NCHW")
    prec = jax.lax.Precision.HIGHEST
    x = jax.lax.conv_general_dilated(x_nchw, p["conv1_w"], (1, 1),
                                     [(2, 2), (2, 2)], dimension_numbers=dn,
                                     precision=prec)
    x = jax.nn.relu(x + p["conv1_b"][None, :, None, None])
    x = jax.lax.reduce_window(x, -jnp.inf, jax.lax.max,
                              (1, 1, 2, 2), (1, 1, 2, 2), "VALID")
    x = jax.lax.conv_general_dilated(x, p["conv2_w"], (1, 1),
                                     [(1, 1), (1, 1)], dimension_numbers=dn,
                                     precision=prec)
    x = jax.nn.relu(x + p["conv2_b"][None, :, None, None])
    x = jax.lax.reduce_window(x, -jnp.inf, jax.lax.max,
                              (1, 1, 2, 2), (1, 1, 2, 2), "VALID")
    x = x.reshape(x.shape[0], -1)                                # (N, C*H*W)
    x = jax.nn.relu(x @ p["fc1_w"].T + p["fc1_b"])
    x = jax.nn.relu(x @ p["fc2_w"].T + p["fc2_b"])
    return jax.nn.log_softmax(x, axis=1)


if __name__ == "__main__":
    key = jax.random.PRNGKey(0)
    kx_, kp_ = jax.random.split(key)
    # fc1 in-features = 128*8*8 implies 32x32 spatial input (32 -> 16 -> 8).
    x = jax.random.normal(kx_, (2, 3, 32, 32), dtype=jnp.float32)
    params = init_params(kp_)
    kparams = prepare_params(params)         # one-time weight re-layout

    out = jax.jit(cnn_forward)(x, kparams)
    out = jax.block_until_ready(out)
    assert out.shape == (2, 2) and out.dtype == jnp.float32
    assert bool(jnp.all(jnp.isfinite(out)))

    # loose-tolerance sanity check vs a pure-JAX reference (bf16 operand drift)
    ref = cnn_reference(x, params)
    assert bool(jnp.max(jnp.abs(out - ref)) < 0.2)
    print("KERNEL_OK")
</pallas_src>

<mosaic_0001>
module attributes {stable_mosaic.version = 11 : i64} {
  func.func @_conv_stages_kernel(%arg0: i32, %arg1: memref<1x36x32x40xbf16, #tpu.memory_space<vmem>>, %arg2: memref<5x40x128xbf16, #tpu.memory_space<vmem>>, %arg3: memref<1x128xf32, #tpu.memory_space<vmem>>, %arg4: memref<3x384x128xbf16, #tpu.memory_space<vmem>>, %arg5: memref<1x128xf32, #tpu.memory_space<vmem>>, %arg6: memref<1x8x8x128xbf16, #tpu.memory_space<vmem>>, %arg7: memref<1024x128xf32, #tpu.memory_space<vmem>>, %arg8: memref<1x18x18x128xbf16, #tpu.memory_space<vmem>>, %arg9: memref<256x128xf32, #tpu.memory_space<vmem>>) attributes {dimension_semantics = [#tpu.dimension_semantics<parallel>], iteration_bounds = array<i64: 2>, scalar_prefetch = 0 : i64, scratch_operands = 3 : i64, tpu.core_type = #tpu.core_type<tc>, window_params = [{transform_indices = @transform_0, window_bounds = array<i64: 1, 36, 32, 40>}, {pipeline_mode = #tpu.pipeline_mode<synchronous>, transform_indices = @transform_1, window_bounds = array<i64: 5, 40, 128>}, {pipeline_mode = #tpu.pipeline_mode<synchronous>, transform_indices = @transform_2, window_bounds = array<i64: 1, 128>}, {pipeline_mode = #tpu.pipeline_mode<synchronous>, transform_indices = @transform_3, window_bounds = array<i64: 3, 384, 128>}, {pipeline_mode = #tpu.pipeline_mode<synchronous>, transform_indices = @transform_4, window_bounds = array<i64: 1, 128>}, {transform_indices = @transform_5, window_bounds = array<i64: 1, 8, 8, 128>}]} {
    %c0 = arith.constant 0 : index
    %c0_0 = arith.constant 0 : index
    %c0_1 = arith.constant 0 : index
    %c0_2 = arith.constant 0 : index
    %0 = vector.load %arg1[%c0, %c0_0, %c0_1, %c0_2] : memref<1x36x32x40xbf16, #tpu.memory_space<vmem>>, vector<1x32x32x40xbf16>
    %1 = vector.shape_cast %0 : vector<1x32x32x40xbf16> to vector<1024x40xbf16>
    %c0_3 = arith.constant 0 : index
    %c0_4 = arith.constant 0 : index
    %c0_5 = arith.constant 0 : index
    %2 = vector.load %arg2[%c0_3, %c0_4, %c0_5] : memref<5x40x128xbf16, #tpu.memory_space<vmem>>, vector<1x40x128xbf16>
    %3 = vector.shape_cast %2 : vector<1x40x128xbf16> to vector<40x128xbf16>
    %cst = arith.constant dense<0.000000e+00> : vector<1024x128xf32>
    %4 = tpu.matmul %1, %3, %cst {dimension_numbers = #tpu.dot_dimension_numbers<[1], [0], [0], [1], [0, 0, 1, 1], [], []>} : vector<1024x40xbf16>, vector<40x128xbf16>, vector<1024x128xf32> -> vector<1024x128xf32>
    %c0_6 = arith.constant 0 : index
    %c0_7 = arith.constant 0 : index
    %5 = vector.load %arg7[%c0_6, %c0_7] : memref<1024x128xf32, #tpu.memory_space<vmem>>, vector<1024x128xf32>
    tpu.vector_store %arg7[%c0_6, %c0_7], %4 {strides = array<i32>} : memref<1024x128xf32, #tpu.memory_space<vmem>>, vector<1024x128xf32>,
    %c0_8 = arith.constant 0 : index
    %c1 = arith.constant 1 : index
    %c0_9 = arith.constant 0 : index
    %c0_10 = arith.constant 0 : index
    %6 = vector.load %arg1[%c0_8, %c1, %c0_9, %c0_10] : memref<1x36x32x40xbf16, #tpu.memory_space<vmem>>, vector<1x32x32x40xbf16>
    %7 = vector.shape_cast %6 : vector<1x32x32x40xbf16> to vector<1024x40xbf16>
    %c1_11 = arith.constant 1 : index
    %c0_12 = arith.constant 0 : index
    %c0_13 = arith.constant 0 : index
    %8 = vector.load %arg2[%c1_11, %c0_12, %c0_13] : memref<5x40x128xbf16, #tpu.memory_space<vmem>>, vector<1x40x128xbf16>
    %9 = vector.shape_cast %8 : vector<1x40x128xbf16> to vector<40x128xbf16>
    %cst_14 = arith.constant dense<0.000000e+00> : vector<1024x128xf32>
    %10 = tpu.matmul %7, %9, %cst_14 {dimension_numbers = #tpu.dot_dimension_numbers<[1], [0], [0], [1], [0, 0, 1, 1], [], []>} : vector<1024x40xbf16>, vector<40x128xbf16>, vector<1024x128xf32> -> vector<1024x128xf32>
    %c0_15 = arith.constant 0 : index
    %c0_16 = arith.constant 0 : index
    %11 = vector.load %arg7[%c0_15, %c0_16] : memref<1024x128xf32, #tpu.memory_space<vmem>>, vector<1024x128xf32>
    %12 = arith.addf %11, %10 : vector<1024x128xf32>
    %c0_17 = arith.constant 0 : index
    %c0_18 = arith.constant 0 : index
    %13 = vector.load %arg7[%c0_17, %c0_18] : memref<1024x128xf32, #tpu.memory_space<vmem>>, vector<1024x128xf32>
    tpu.vector_store %arg7[%c0_17, %c0_18], %12 {strides = array<i32>} : memref<1024x128xf32, #tpu.memory_space<vmem>>, vector<1024x128xf32>,
    %c0_19 = arith.constant 0 : index
    %c2 = arith.constant 2 : index
    %c0_20 = arith.constant 0 : index
    %c0_21 = arith.constant 0 : index
    %14 = vector.load %arg1[%c0_19, %c2, %c0_20, %c0_21] : memref<1x36x32x40xbf16, #tpu.memory_space<vmem>>, vector<1x32x32x40xbf16>
    %15 = vector.shape_cast %14 : vector<1x32x32x40xbf16> to vector<1024x40xbf16>
    %c2_22 = arith.constant 2 : index
    %c0_23 = arith.constant 0 : index
    %c0_24 = arith.constant 0 : index
    %16 = vector.load %arg2[%c2_22, %c0_23, %c0_24] : memref<5x40x128xbf16, #tpu.memory_space<vmem>>, vector<1x40x128xbf16>
    %17 = vector.shape_cast %16 : vector<1x40x128xbf16> to vector<40x128xbf16>
    %cst_25 = arith.constant dense<0.000000e+00> : vector<1024x128xf32>
    %18 = tpu.matmul %15, %17, %cst_25 {dimension_numbers = #tpu.dot_dimension_numbers<[1], [0], [0], [1], [0, 0, 1, 1], [], []>} : vector<1024x40xbf16>, vector<40x128xbf16>, vector<1024x128xf32> -> vector<1024x128xf32>
    %c0_26 = arith.constant 0 : index
    %c0_27 = arith.constant 0 : index
    %19 = vector.load %arg7[%c0_26, %c0_27] : memref<1024x128xf32, #tpu.memory_space<vmem>>, vector<1024x128xf32>
    %20 = arith.addf %19, %18 : vector<1024x128xf32>
    %c0_28 = arith.constant 0 : index
    %c0_29 = arith.constant 0 : index
    %21 = vector.load %arg7[%c0_28, %c0_29] : memref<1024x128xf32, #tpu.memory_space<vmem>>, vector<1024x128xf32>
    tpu.vector_store %arg7[%c0_28, %c0_29], %20 {strides = array<i32>} : memref<1024x128xf32, #tpu.memory_space<vmem>>, vector<1024x128xf32>,
    %c0_30 = arith.constant 0 : index
    %c3 = arith.constant 3 : index
    %c0_31 = arith.constant 0 : index
    %c0_32 = arith.constant 0 : index
    %22 = vector.load %arg1[%c0_30, %c3, %c0_31, %c0_32] : memref<1x36x32x40xbf16, #tpu.memory_space<vmem>>, vector<1x32x32x40xbf16>
    %23 = vector.shape_cast %22 : vector<1x32x32x40xbf16> to vector<1024x40xbf16>
    %c3_33 = arith.constant 3 : index
    %c0_34 = arith.constant 0 : index
    %c0_35 = arith.constant 0 : index
    %24 = vector.load %arg2[%c3_33, %c0_34, %c0_35] : memref<5x40x128xbf16, #tpu.memory_space<vmem>>, vector<1x40x128xbf16>
    %25 = vector.shape_cast %24 : vector<1x40x128xbf16> to vector<40x128xbf16>
    %cst_36 = arith.constant dense<0.000000e+00> : vector<1024x128xf32>
    %26 = tpu.matmul %23, %25, %cst_36 {dimension_numbers = #tpu.dot_dimension_numbers<[1], [0], [0], [1], [0, 0, 1, 1], [], []>} : vector<1024x40xbf16>, vector<40x128xbf16>, vector<1024x128xf32> -> vector<1024x128xf32>
    %c0_37 = arith.constant 0 : index
    %c0_38 = arith.constant 0 : index
    %27 = vector.load %arg7[%c0_37, %c0_38] : memref<1024x128xf32, #tpu.memory_space<vmem>>, vector<1024x128xf32>
    %28 = arith.addf %27, %26 : vector<1024x128xf32>
    %c0_39 = arith.constant 0 : index
    %c0_40 = arith.constant 0 : index
    %29 = vector.load %arg7[%c0_39, %c0_40] : memref<1024x128xf32, #tpu.memory_space<vmem>>, vector<1024x128xf32>
    tpu.vector_store %arg7[%c0_39, %c0_40], %28 {strides = array<i32>} : memref<1024x128xf32, #tpu.memory_space<vmem>>, vector<1024x128xf32>,
    %c0_41 = arith.constant 0 : index
    %c4 = arith.constant 4 : index
    %c0_42 = arith.constant 0 : index
    %c0_43 = arith.constant 0 : index
    %30 = vector.load %arg1[%c0_41, %c4, %c0_42, %c0_43] : memref<1x36x32x40xbf16, #tpu.memory_space<vmem>>, vector<1x32x32x40xbf16>
    %31 = vector.shape_cast %30 : vector<1x32x32x40xbf16> to vector<1024x40xbf16>
    %c4_44 = arith.constant 4 : index
    %c0_45 = arith.constant 0 : index
    %c0_46 = arith.constant 0 : index
    %32 = vector.load %arg2[%c4_44, %c0_45, %c0_46] : memref<5x40x128xbf16, #tpu.memory_space<vmem>>, vector<1x40x128xbf16>
    %33 = vector.shape_cast %32 : vector<1x40x128xbf16> to vector<40x128xbf16>
    %cst_47 = arith.constant dense<0.000000e+00> : vector<1024x128xf32>
    %34 = tpu.matmul %31, %33, %cst_47 {dimension_numbers = #tpu.dot_dimension_numbers<[1], [0], [0], [1], [0, 0, 1, 1], [], []>} : vector<1024x40xbf16>, vector<40x128xbf16>, vector<1024x128xf32> -> vector<1024x128xf32>
    %c0_48 = arith.constant 0 : index
    %c0_49 = arith.constant 0 : index
    %35 = vector.load %arg7[%c0_48, %c0_49] : memref<1024x128xf32, #tpu.memory_space<vmem>>, vector<1024x128xf32>
    %36 = arith.addf %35, %34 : vector<1024x128xf32>
    %c0_50 = arith.constant 0 : index
    %c0_51 = arith.constant 0 : index
    %37 = vector.load %arg7[%c0_50, %c0_51] : memref<1024x128xf32, #tpu.memory_space<vmem>>, vector<1024x128xf32>
    tpu.vector_store %arg7[%c0_50, %c0_51], %36 {strides = array<i32>} : memref<1024x128xf32, #tpu.memory_space<vmem>>, vector<1024x128xf32>,
    %c0_52 = arith.constant 0 : index
    %c0_53 = arith.constant 0 : index
    %38 = tpu.strided_load %arg7[%c0_52, %c0_53] {strides = array<i32: 2, 1>} : memref<1024x128xf32, #tpu.memory_space<vmem>>, vector<512x128xf32>
    %c1_54 = arith.constant 1 : index
    %c0_55 = arith.constant 0 : index
    %39 = tpu.strided_load %arg7[%c1_54, %c0_55] {strides = array<i32: 2, 1>} : memref<1024x128xf32, #tpu.memory_space<vmem>>, vector<512x128xf32>
    %40 = arith.maximumf %38, %39 : vector<512x128xf32>
    %41 = vector.shape_cast %40 : vector<512x128xf32> to vector<16x2x16x128xf32>
    %42 = vector.extract_strided_slice %41 {offsets = [0, 0, 0, 0], sizes = [16, 1, 16, 128], strides = [1, 1, 1, 1]} : vector<16x2x16x128xf32> to vector<16x1x16x128xf32>
    %43 = vector.shape_cast %42 : vector<16x1x16x128xf32> to vector<16x16x128xf32>
    %44 = vector.extract_strided_slice %41 {offsets = [0, 1, 0, 0], sizes = [16, 1, 16, 128], strides = [1, 1, 1, 1]} : vector<16x2x16x128xf32> to vector<16x1x16x128xf32>
    %45 = vector.shape_cast %44 : vector<16x1x16x128xf32> to vector<16x16x128xf32>
    %46 = arith.maximumf %43, %45 : vector<16x16x128xf32>
    %c0_56 = arith.constant 0 : index
    %c0_57 = arith.constant 0 : index
    %47 = vector.load %arg3[%c0_56, %c0_57] : memref<1x128xf32, #tpu.memory_space<vmem>>, vector<1x128xf32>
    %48 = vector.shape_cast %47 : vector<1x128xf32> to vector<1x1x128xf32>
    %49 = vector.broadcast %48 : vector<1x1x128xf32> to vector<16x16x128xf32>
    %50 = arith.addf %46, %49 : vector<16x16x128xf32>
    %cst_58 = arith.constant 0.000000e+00 : f32
    %51 = vector.broadcast %cst_58 : f32 to vector<16x16x128xf32>
    %52 = arith.maximumf %50, %51 : vector<16x16x128xf32>
    %53 = arith.truncf %52 : vector<16x16x128xf32> to vector<16x16x128xbf16>
    %cst_59 = arith.constant 0.000000e+00 : bf16
    %54 = vector.broadcast %cst_59 : bf16 to vector<1x1x18x128xbf16>
    %c0_60 = arith.constant 0 : index
    %c0_61 = arith.constant 0 : index
    %c0_62 = arith.constant 0 : index
    %c0_63 = arith.constant 0 : index
    %55 = vector.load %arg8[%c0_60, %c0_61, %c0_62, %c0_63] : memref<1x18x18x128xbf16, #tpu.memory_space<vmem>>, vector<1x1x18x128xbf16>
    tpu.vector_store %arg8[%c0_60, %c0_61, %c0_62, %c0_63], %54 {strides = array<i32>} : memref<1x18x18x128xbf16, #tpu.memory_space<vmem>>, vector<1x1x18x128xbf16>,
    %cst_64 = arith.constant 0.000000e+00 : bf16
    %56 = vector.broadcast %cst_64 : bf16 to vector<1x1x18x128xbf16>
    %c0_65 = arith.constant 0 : index
    %c17 = arith.constant 17 : index
    %c0_66 = arith.constant 0 : index
    %c0_67 = arith.constant 0 : index
    %57 = vector.load %arg8[%c0_65, %c17, %c0_66, %c0_67] : memref<1x18x18x128xbf16, #tpu.memory_space<vmem>>, vector<1x1x18x128xbf16>
    tpu.vector_store %arg8[%c0_65, %c17, %c0_66, %c0_67], %56 {strides = array<i32>} : memref<1x18x18x128xbf16, #tpu.memory_space<vmem>>, vector<1x1x18x128xbf16>,
    %cst_68 = arith.constant 0.000000e+00 : bf16
    %58 = vector.broadcast %cst_68 : bf16 to vector<1x16x1x128xbf16>
    %c0_69 = arith.constant 0 : index
    %c1_70 = arith.constant 1 : index
    %c0_71 = arith.constant 0 : index
    %c0_72 = arith.constant 0 : index
    %59 = vector.load %arg8[%c0_69, %c1_70, %c0_71, %c0_72] : memref<1x18x18x128xbf16, #tpu.memory_space<vmem>>, vector<1x16x1x128xbf16>
    tpu.vector_store %arg8[%c0_69, %c1_70, %c0_71, %c0_72], %58 {strides = array<i32>} : memref<1x18x18x128xbf16, #tpu.memory_space<vmem>>, vector<1x16x1x128xbf16>,
    %cst_73 = arith.constant 0.000000e+00 : bf16
    %60 = vector.broadcast %cst_73 : bf16 to vector<1x16x1x128xbf16>
    %c0_74 = arith.constant 0 : index
    %c1_75 = arith.constant 1 : index
    %c17_76 = arith.constant 17 : index
    %c0_77 = arith.constant 0 : index
    %61 = vector.load %arg8[%c0_74, %c1_75, %c17_76, %c0_77] : memref<1x18x18x128xbf16, #tpu.memory_space<vmem>>, vector<1x16x1x128xbf16>
    tpu.vector_store %arg8[%c0_74, %c1_75, %c17_76, %c0_77], %60 {strides = array<i32>} : memref<1x18x18x128xbf16, #tpu.memory_space<vmem>>, vector<1x16x1x128xbf16>,
    %62 = vector.shape_cast %53 : vector<16x16x128xbf16> to vector<1x16x16x128xbf16>
    %c0_78 = arith.constant 0 : index
    %c1_79 = arith.constant 1 : index
    %c1_80 = arith.constant 1 : index
    %c0_81 = arith.constant 0 : index
    %63 = vector.load %arg8[%c0_78, %c1_79, %c1_80, %c0_81] : memref<1x18x18x128xbf16, #tpu.memory_space<vmem>>, vector<1x16x16x128xbf16>
    tpu.vector_store %arg8[%c0_78, %c1_79, %c1_80, %c0_81], %62 {strides = array<i32>} : memref<1x18x18x128xbf16, #tpu.memory_space<vmem>>, vector<1x16x16x128xbf16>,
    %c0_82 = arith.constant 0 : index
    %c0_83 = arith.constant 0 : index
    %c0_84 = arith.constant 0 : index
    %c0_85 = arith.constant 0 : index
    %64 = vector.load %arg8[%c0_82, %c0_83, %c0_84, %c0_85] : memref<1x18x18x128xbf16, #tpu.memory_space<vmem>>, vector<1x16x16x128xbf16>
    %65 = vector.shape_cast %64 : vector<1x16x16x128xbf16> to vector<256x128xbf16>
    %c0_86 = arith.constant 0 : index
    %c0_87 = arith.constant 0 : index
    %c1_88 = arith.constant 1 : index
    %c0_89 = arith.constant 0 : index
    %66 = vector.load %arg8[%c0_86, %c0_87, %c1_88, %c0_89] : memref<1x18x18x128xbf16, #tpu.memory_space<vmem>>, vector<1x16x16x128xbf16>
    %67 = vector.shape_cast %66 : vector<1x16x16x128xbf16> to vector<256x128xbf16>
    %c0_90 = arith.constant 0 : index
    %c0_91 = arith.constant 0 : index
    %c2_92 = arith.constant 2 : index
    %c0_93 = arith.constant 0 : index
    %68 = vector.load %arg8[%c0_90, %c0_91, %c2_92, %c0_93] : memref<1x18x18x128xbf16, #tpu.memory_space<vmem>>, vector<1x16x16x128xbf16>
    %69 = vector.shape_cast %68 : vector<1x16x16x128xbf16> to vector<256x128xbf16>
    %70 = tpu.concatenate %65, %67, %69 in 1 : vector<256x128xbf16>, vector<256x128xbf16>, vector<256x128xbf16> -> vector<256x384xbf16>
    %c0_94 = arith.constant 0 : index
    %c0_95 = arith.constant 0 : index
    %c0_96 = arith.constant 0 : index
    %71 = vector.load %arg4[%c0_94, %c0_95, %c0_96] : memref<3x384x128xbf16, #tpu.memory_space<vmem>>, vector<1x384x128xbf16>
    %72 = vector.shape_cast %71 : vector<1x384x128xbf16> to vector<384x128xbf16>
    %cst_97 = arith.constant dense<0.000000e+00> : vector<256x128xf32>
    %73 = tpu.matmul %70, %72, %cst_97 {dimension_numbers = #tpu.dot_dimension_numbers<[1], [0], [0], [1], [0, 0, 1, 1], [], []>} : vector<256x384xbf16>, vector<384x128xbf16>, vector<256x128xf32> -> vector<256x128xf32>
    %c0_98 = arith.constant 0 : index
    %c0_99 = arith.constant 0 : index
    %74 = vector.load %arg9[%c0_98, %c0_99] : memref<256x128xf32, #tpu.memory_space<vmem>>, vector<256x128xf32>
    tpu.vector_store %arg9[%c0_98, %c0_99], %73 {strides = array<i32>} : memref<256x128xf32, #tpu.memory_space<vmem>>, vector<256x128xf32>,
    %c0_100 = arith.constant 0 : index
    %c1_101 = arith.constant 1 : index
    %c0_102 = arith.constant 0 : index
    %c0_103 = arith.constant 0 : index
    %75 = vector.load %arg8[%c0_100, %c1_101, %c0_102, %c0_103] : memref<1x18x18x128xbf16, #tpu.memory_space<vmem>>, vector<1x16x16x128xbf16>
    %76 = vector.shape_cast %75 : vector<1x16x16x128xbf16> to vector<256x128xbf16>
    %c0_104 = arith.constant 0 : index
    %c1_105 = arith.constant 1 : index
    %c1_106 = arith.constant 1 : index
    %c0_107 = arith.constant 0 : index
    %77 = vector.load %arg8[%c0_104, %c1_105, %c1_106, %c0_107] : memref<1x18x18x128xbf16, #tpu.memory_space<vmem>>, vector<1x16x16x128xbf16>
    %78 = vector.shape_cast %77 : vector<1x16x16x128xbf16> to vector<256x128xbf16>
    %c0_108 = arith.constant 0 : index
    %c1_109 = arith.constant 1 : index
    %c2_110 = arith.constant 2 : index
    %c0_111 = arith.constant 0 : index
    %79 = vector.load %arg8[%c0_108, %c1_109, %c2_110, %c0_111] : memref<1x18x18x128xbf16, #tpu.memory_space<vmem>>, vector<1x16x16x128xbf16>
    %80 = vector.shape_cast %79 : vector<1x16x16x128xbf16> to vector<256x128xbf16>
    %81 = tpu.concatenate %76, %78, %80 in 1 : vector<256x128xbf16>, vector<256x128xbf16>, vector<256x128xbf16> -> vector<256x384xbf16>
    %c1_112 = arith.constant 1 : index
    %c0_113 = arith.constant 0 : index
    %c0_114 = arith.constant 0 : index
    %82 = vector.load %arg4[%c1_112, %c0_113, %c0_114] : memref<3x384x128xbf16, #tpu.memory_space<vmem>>, vector<1x384x128xbf16>
    %83 = vector.shape_cast %82 : vector<1x384x128xbf16> to vector<384x128xbf16>
    %cst_115 = arith.constant dense<0.000000e+00> : vector<256x128xf32>
    %84 = tpu.matmul %81, %83, %cst_115 {dimension_numbers = #tpu.dot_dimension_numbers<[1], [0], [0], [1], [0, 0, 1, 1], [], []>} : vector<256x384xbf16>, vector<384x128xbf16>, vector<256x128xf32> -> vector<256x128xf32>
    %c0_116 = arith.constant 0 : index
    %c0_117 = arith.constant 0 : index
    %85 = vector.load %arg9[%c0_116, %c0_117] : memref<256x128xf32, #tpu.memory_space<vmem>>, vector<256x128xf32>
    %86 = arith.addf %85, %84 : vector<256x128xf32>
    %c0_118 = arith.constant 0 : index
    %c0_119 = arith.constant 0 : index
    %87 = vector.load %arg9[%c0_118, %c0_119] : memref<256x128xf32, #tpu.memory_space<vmem>>, vector<256x128xf32>
    tpu.vector_store %arg9[%c0_118, %c0_119], %86 {strides = array<i32>} : memref<256x128xf32, #tpu.memory_space<vmem>>, vector<256x128xf32>,
    %c0_120 = arith.constant 0 : index
    %c2_121 = arith.constant 2 : index
    %c0_122 = arith.constant 0 : index
    %c0_123 = arith.constant 0 : index
    %88 = vector.load %arg8[%c0_120, %c2_121, %c0_122, %c0_123] : memref<1x18x18x128xbf16, #tpu.memory_space<vmem>>, vector<1x16x16x128xbf16>
    %89 = vector.shape_cast %88 : vector<1x16x16x128xbf16> to vector<256x128xbf16>
    %c0_124 = arith.constant 0 : index
    %c2_125 = arith.constant 2 : index
    %c1_126 = arith.constant 1 : index
    %c0_127 = arith.constant 0 : index
    %90 = vector.load %arg8[%c0_124, %c2_125, %c1_126, %c0_127] : memref<1x18x18x128xbf16, #tpu.memory_space<vmem>>, vector<1x16x16x128xbf16>
    %91 = vector.shape_cast %90 : vector<1x16x16x128xbf16> to vector<256x128xbf16>
    %c0_128 = arith.constant 0 : index
    %c2_129 = arith.constant 2 : index
    %c2_130 = arith.constant 2 : index
    %c0_131 = arith.constant 0 : index
    %92 = vector.load %arg8[%c0_128, %c2_129, %c2_130, %c0_131] : memref<1x18x18x128xbf16, #tpu.memory_space<vmem>>, vector<1x16x16x128xbf16>
    %93 = vector.shape_cast %92 : vector<1x16x16x128xbf16> to vector<256x128xbf16>
    %94 = tpu.concatenate %89, %91, %93 in 1 : vector<256x128xbf16>, vector<256x128xbf16>, vector<256x128xbf16> -> vector<256x384xbf16>
    %c2_132 = arith.constant 2 : index
    %c0_133 = arith.constant 0 : index
    %c0_134 = arith.constant 0 : index
    %95 = vector.load %arg4[%c2_132, %c0_133, %c0_134] : memref<3x384x128xbf16, #tpu.memory_space<vmem>>, vector<1x384x128xbf16>
    %96 = vector.shape_cast %95 : vector<1x384x128xbf16> to vector<384x128xbf16>
    %cst_135 = arith.constant dense<0.000000e+00> : vector<256x128xf32>
    %97 = tpu.matmul %94, %96, %cst_135 {dimension_numbers = #tpu.dot_dimension_numbers<[1], [0], [0], [1], [0, 0, 1, 1], [], []>} : vector<256x384xbf16>, vector<384x128xbf16>, vector<256x128xf32> -> vector<256x128xf32>
    %c0_136 = arith.constant 0 : index
    %c0_137 = arith.constant 0 : index
    %98 = vector.load %arg9[%c0_136, %c0_137] : memref<256x128xf32, #tpu.memory_space<vmem>>, vector<256x128xf32>
    %99 = arith.addf %98, %97 : vector<256x128xf32>
    %c0_138 = arith.constant 0 : index
    %c0_139 = arith.constant 0 : index
    %100 = vector.load %arg9[%c0_138, %c0_139] : memref<256x128xf32, #tpu.memory_space<vmem>>, vector<256x128xf32>
    tpu.vector_store %arg9[%c0_138, %c0_139], %99 {strides = array<i32>} : memref<256x128xf32, #tpu.memory_space<vmem>>, vector<256x128xf32>,
    %c0_140 = arith.constant 0 : index
    %c0_141 = arith.constant 0 : index
    %101 = tpu.strided_load %arg9[%c0_140, %c0_141] {strides = array<i32: 2, 1>} : memref<256x128xf32, #tpu.memory_space<vmem>>, vector<128x128xf32>
    %c1_142 = arith.constant 1 : index
    %c0_143 = arith.constant 0 : index
    %102 = tpu.strided_load %arg9[%c1_142, %c0_143] {strides = array<i32: 2, 1>} : memref<256x128xf32, #tpu.memory_space<vmem>>, vector<128x128xf32>
    %103 = arith.maximumf %101, %102 : vector<128x128xf32>
    %104 = vector.shape_cast %103 : vector<128x128xf32> to vector<8x2x8x128xf32>
    %105 = vector.extract_strided_slice %104 {offsets = [0, 0, 0, 0], sizes = [8, 1, 8, 128], strides = [1, 1, 1, 1]} : vector<8x2x8x128xf32> to vector<8x1x8x128xf32>
    %106 = vector.shape_cast %105 : vector<8x1x8x128xf32> to vector<8x8x128xf32>
    %107 = vector.extract_strided_slice %104 {offsets = [0, 1, 0, 0], sizes = [8, 1, 8, 128], strides = [1, 1, 1, 1]} : vector<8x2x8x128xf32> to vector<8x1x8x128xf32>
    %108 = vector.shape_cast %107 : vector<8x1x8x128xf32> to vector<8x8x128xf32>
    %109 = arith.maximumf %106, %108 : vector<8x8x128xf32>
    %c0_144 = arith.constant 0 : index
    %c0_145 = arith.constant 0 : index
    %110 = vector.load %arg5[%c0_144, %c0_145] : memref<1x128xf32, #tpu.memory_space<vmem>>, vector<1x128xf32>
    %111 = vector.shape_cast %110 : vector<1x128xf32> to vector<1x1x128xf32>
    %112 = vector.broadcast %111 : vector<1x1x128xf32> to vector<8x8x128xf32>
    %113 = arith.addf %109, %112 : vector<8x8x128xf32>
    %cst_146 = arith.constant 0.000000e+00 : f32
    %114 = vector.broadcast %cst_146 : f32 to vector<8x8x128xf32>
    %115 = arith.maximumf %113, %114 : vector<8x8x128xf32>
    %116 = vector.shape_cast %115 : vector<8x8x128xf32> to vector<1x8x8x128xf32>
    %117 = arith.truncf %116 : vector<1x8x8x128xf32> to vector<1x8x8x128xbf16>
    %c0_147 = arith.constant 0 : index
    %c0_148 = arith.constant 0 : index
    %c0_149 = arith.constant 0 : index
    %c0_150 = arith.constant 0 : index
    %118 = vector.load %arg6[%c0_147, %c0_148, %c0_149, %c0_150] : memref<1x8x8x128xbf16, #tpu.memory_space<vmem>>, vector<1x8x8x128xbf16>
    tpu.vector_store %arg6[%c0_147, %c0_148, %c0_149, %c0_150], %117 {strides = array<i32>} : memref<1x8x8x128xbf16, #tpu.memory_space<vmem>>, vector<1x8x8x128xbf16>,
    return
  }
  func.func @transform_0(%arg0: i32) -> (i32, i32, i32, i32) {
    %c0_i32 = arith.constant 0 : i32
    %c0_i32_0 = arith.constant 0 : i32
    %c0_i32_1 = arith.constant 0 : i32
    %c0_i32_2 = arith.constant 0 : i32
    return %arg0, %c0_i32, %c0_i32_0, %c0_i32_1 : i32, i32, i32, i32
  }
  func.func @transform_1(%arg0: i32) -> (i32, i32, i32) {
    %c0_i32 = arith.constant 0 : i32
    %c0_i32_0 = arith.constant 0 : i32
    %c0_i32_1 = arith.constant 0 : i32
    %c0_i32_2 = arith.constant 0 : i32
    return %c0_i32, %c0_i32_0, %c0_i32_1 : i32, i32, i32
  }
  func.func @transform_2(%arg0: i32) -> (i32, i32) {
    %c0_i32 = arith.constant 0 : i32
    %c0_i32_0 = arith.constant 0 : i32
    %c0_i32_1 = arith.constant 0 : i32
    return %c0_i32, %c0_i32_0 : i32, i32
  }
  func.func @transform_3(%arg0: i32) -> (i32, i32, i32) {
    %c0_i32 = arith.constant 0 : i32
    %c0_i32_0 = arith.constant 0 : i32
    %c0_i32_1 = arith.constant 0 : i32
    %c0_i32_2 = arith.constant 0 : i32
    return %c0_i32, %c0_i32_0, %c0_i32_1 : i32, i32, i32
  }
  func.func @transform_4(%arg0: i32) -> (i32, i32) {
    %c0_i32 = arith.constant 0 : i32
    %c0_i32_0 = arith.constant 0 : i32
    %c0_i32_1 = arith.constant 0 : i32
    return %c0_i32, %c0_i32_0 : i32, i32
  }
  func.func @transform_5(%arg0: i32) -> (i32, i32, i32, i32) {
    %c0_i32 = arith.constant 0 : i32
    %c0_i32_0 = arith.constant 0 : i32
    %c0_i32_1 = arith.constant 0 : i32
    %c0_i32_2 = arith.constant 0 : i32
    return %arg0, %c0_i32, %c0_i32_0, %c0_i32_1 : i32, i32, i32, i32
  }
}

module attributes {stable_mosaic.version = 11 : i64} {
  func.func @_fc_head_kernel(%arg0: i32, %arg1: memref<8x8192xbf16, #tpu.memory_space<vmem>>, %arg2: memref<8192x128xbf16, #tpu.memory_space<vmem>>, %arg3: memref<1x128xf32, #tpu.memory_space<vmem>>, %arg4: memref<128x128xbf16, #tpu.memory_space<vmem>>, %arg5: memref<1x128xf32, #tpu.memory_space<vmem>>, %arg6: memref<8x128xf32, #tpu.memory_space<vmem>>) attributes {dimension_semantics = [#tpu.dimension_semantics<parallel>], iteration_bounds = array<i64: 1>, scalar_prefetch = 0 : i64, scratch_operands = 0 : i64, tpu.core_type = #tpu.core_type<tc>, window_params = [{transform_indices = @transform_0, window_bounds = array<i64: 8, 8192>}, {pipeline_mode = #tpu.pipeline_mode<synchronous>, transform_indices = @transform_1, window_bounds = array<i64: 8192, 128>}, {pipeline_mode = #tpu.pipeline_mode<synchronous>, transform_indices = @transform_2, window_bounds = array<i64: 1, 128>}, {pipeline_mode = #tpu.pipeline_mode<synchronous>, transform_indices = @transform_3, window_bounds = array<i64: 128, 128>}, {pipeline_mode = #tpu.pipeline_mode<synchronous>, transform_indices = @transform_4, window_bounds = array<i64: 1, 128>}, {transform_indices = @transform_5, window_bounds = array<i64: 8, 128>}]} {
    %c0 = arith.constant 0 : index
    %c0_0 = arith.constant 0 : index
    %0 = vector.load %arg1[%c0, %c0_0] : memref<8x8192xbf16, #tpu.memory_space<vmem>>, vector<8x8192xbf16>
    %c0_1 = arith.constant 0 : index
    %c0_2 = arith.constant 0 : index
    %1 = vector.load %arg2[%c0_1, %c0_2] : memref<8192x128xbf16, #tpu.memory_space<vmem>>, vector<8192x128xbf16>
    %cst = arith.constant dense<0.000000e+00> : vector<8x128xf32>
    %2 = tpu.matmul %0, %1, %cst {dimension_numbers = #tpu.dot_dimension_numbers<[1], [0], [0], [1], [0, 0, 1, 1], [], []>} : vector<8x8192xbf16>, vector<8192x128xbf16>, vector<8x128xf32> -> vector<8x128xf32>
    %c0_3 = arith.constant 0 : index
    %c0_4 = arith.constant 0 : index
    %3 = vector.load %arg3[%c0_3, %c0_4] : memref<1x128xf32, #tpu.memory_space<vmem>>, vector<1x128xf32>
    %4 = vector.broadcast %3 : vector<1x128xf32> to vector<8x128xf32>
    %5 = arith.addf %2, %4 : vector<8x128xf32>
    %cst_5 = arith.constant 0.000000e+00 : f32
    %6 = vector.broadcast %cst_5 : f32 to vector<8x128xf32>
    %7 = arith.maximumf %5, %6 : vector<8x128xf32>
    %8 = arith.truncf %7 : vector<8x128xf32> to vector<8x128xbf16>
    %c0_6 = arith.constant 0 : index
    %c0_7 = arith.constant 0 : index
    %9 = vector.load %arg4[%c0_6, %c0_7] : memref<128x128xbf16, #tpu.memory_space<vmem>>, vector<128x128xbf16>
    %cst_8 = arith.constant dense<0.000000e+00> : vector<8x128xf32>
    %10 = tpu.matmul %8, %9, %cst_8 {dimension_numbers = #tpu.dot_dimension_numbers<[1], [0], [0], [1], [0, 0, 1, 1], [], []>} : vector<8x128xbf16>, vector<128x128xbf16>, vector<8x128xf32> -> vector<8x128xf32>
    %c0_9 = arith.constant 0 : index
    %c0_10 = arith.constant 0 : index
    %11 = vector.load %arg5[%c0_9, %c0_10] : memref<1x128xf32, #tpu.memory_space<vmem>>, vector<1x128xf32>
    %12 = vector.broadcast %11 : vector<1x128xf32> to vector<8x128xf32>
    %13 = arith.addf %10, %12 : vector<8x128xf32>
    %cst_11 = arith.constant 0.000000e+00 : f32
    %14 = vector.broadcast %cst_11 : f32 to vector<8x128xf32>
    %15 = arith.maximumf %13, %14 : vector<8x128xf32>
    %16 = tpu.iota {dimensions = array<i32: 1>} : vector<8x128xi32>
    %c2_i32 = arith.constant 2 : i32
    %17 = vector.broadcast %c2_i32 : i32 to vector<8x128xi32>
    %18 = arith.cmpi slt, %16, %17 : vector<8x128xi32>
    %cst_12 = arith.constant -1.000000e+30 : f32
    %19 = vector.broadcast %cst_12 : f32 to vector<8x128xf32>
    %20 = arith.select %18, %15, %19 : vector<8x128xi1>, vector<8x128xf32>
    %cst_13 = arith.constant dense<0xFF800000> : vector<8xf32>
    %21 = vector.multi_reduction <maximumf>, %20, %cst_13 [1] : vector<8x128xf32> to vector<8xf32>
    %22 = vector.shape_cast %21 : vector<8xf32> to vector<8x1xf32>
    %23 = vector.broadcast %22 : vector<8x1xf32> to vector<8x128xf32>
    %24 = arith.subf %20, %23 : vector<8x128xf32>
    %25 = math.exp %24 : vector<8x128xf32>
    %cst_14 = arith.constant dense<0.000000e+00> : vector<8xf32>
    %26 = vector.multi_reduction <add>, %25, %cst_14 [1] : vector<8x128xf32> to vector<8xf32>
    %27 = vector.shape_cast %26 : vector<8xf32> to vector<8x1xf32>
    %28 = math.log %27 : vector<8x1xf32>
    %29 = vector.broadcast %22 : vector<8x1xf32> to vector<8x128xf32>
    %30 = arith.subf %20, %29 : vector<8x128xf32>
    %31 = vector.broadcast %28 : vector<8x1xf32> to vector<8x128xf32>
    %32 = arith.subf %30, %31 : vector<8x128xf32>
    %c0_15 = arith.constant 0 : index
    %c0_16 = arith.constant 0 : index
    %33 = vector.load %arg6[%c0_15, %c0_16] : memref<8x128xf32, #tpu.memory_space<vmem>>, vector<8x128xf32>
    tpu.vector_store %arg6[%c0_15, %c0_16], %32 {strides = array<i32>} : memref<8x128xf32, #tpu.memory_space<vmem>>, vector<8x128xf32>,
    return
  }
  func.func @transform_0(%arg0: i32) -> (i32, i32) {
    %c0_i32 = arith.constant 0 : i32
    %c0_i32_0 = arith.constant 0 : i32
    return %arg0, %c0_i32 : i32, i32
  }
  func.func @transform_1(%arg0: i32) -> (i32, i32) {
    %c0_i32 = arith.constant 0 : i32
    %c0_i32_0 = arith.constant 0 : i32
    %c0_i32_1 = arith.constant 0 : i32
    return %c0_i32, %c0_i32_0 : i32, i32
  }
  func.func @transform_2(%arg0: i32) -> (i32, i32) {
    %c0_i32 = arith.constant 0 : i32
    %c0_i32_0 = arith.constant 0 : i32
    %c0_i32_1 = arith.constant 0 : i32
    return %c0_i32, %c0_i32_0 : i32, i32
  }
  func.func @transform_3(%arg0: i32) -> (i32, i32) {
    %c0_i32 = arith.constant 0 : i32
    %c0_i32_0 = arith.constant 0 : i32
    %c0_i32_1 = arith.constant 0 : i32
    return %c0_i32, %c0_i32_0 : i32, i32
  }
  func.func @transform_4(%arg0: i32) -> (i32, i32) {
    %c0_i32 = arith.constant 0 : i32
    %c0_i32_0 = arith.constant 0 : i32
    %c0_i32_1 = arith.constant 0 : i32
    return %c0_i32, %c0_i32_0 : i32, i32
  }
  func.func @transform_5(%arg0: i32) -> (i32, i32) {
    %c0_i32 = arith.constant 0 : i32
    %c0_i32_0 = arith.constant 0 : i32
    return %arg0, %c0_i32 : i32, i32
  }
}

</mosaic_0001>

<bundles_post_ra>
// kernel: cnn_forward.3
= control target key start
LH: loop header
LB: loop body
LE: loop exit
PB: predicated region body
PF: predicated region fallthrough
CT: control target
= control target key end

     0   :  { %vm7703_vm0 = vmmov 0   ;;  %s9423_s1 = inlined_call_operand.vmem [shape: bf16[8192,128], index: 1, kind: input, shape index: {}]   ;;  %s9424_s0 = inlined_call_operand.vmem [shape: bf16[8,8192], index: 0, kind: input, shape index: {}]   ;;  %s9425_s2 = inlined_call_operand.vmem [shape: f32[1,128], index: 2, kind: input, shape index: {}]   ;;  %s9426_s3 = inlined_call_operand.vmem [shape: bf16[128,128], index: 3, kind: input, shape index: {}]   ;;  %s9427_s4 = inlined_call_operand.vmem [shape: f32[1,128], index: 4, kind: input, shape index: {}]   ;;  %s9428_s5 = inlined_call_operand.vmem [shape: f32[8,128], index: 5, kind: output, shape index: {}]  }
   0x1   :  { %v7114_v0 = vld [vmem:[%s9423_s1 + $0x40] sm:$0xff]   ;;  %v7118_v4 = vld [vmem:[%s9423_s1 + $0x48] sm:$0xff]   ;;  %v7122_v8 = vld [vmem:[%s9423_s1 + $0x50] sm:$0xff]  }
   0x2   :  { %v7115_v1 = vld [vmem:[%s9423_s1 + $0xc0] sm:$0xff]   ;;  %6379 = vmatprep.subr.bf16.mxu0 %v7114_v0  ;;  %v7119_v5 = vld [vmem:[%s9423_s1 + $0xc8] sm:$0xff]   ;;  %v7123_v9 = vld [vmem:[%s9423_s1 + $0xd0] sm:$0xff]  }
   0x3   :  { %v7116_v2 = vld [vmem:[%s9423_s1] sm:$0xff]   ;;  %6401 = vmatprep.subr.bf16.mxu1 %v7115_v1  ;;  %v7120_v6 = vld [vmem:[%s9423_s1 + $0x8] sm:$0xff]   ;;  %v7124_v10 = vld [vmem:[%s9423_s1 + $0x10] sm:$0xff]  }
   0x4   :  { %v7117_v3 = vld [vmem:[%s9423_s1 + $0x80] sm:$0xff]   ;;  %6380 = vmatpush3.bf16.msra.mxu0 %v7116_v2  ;;  %v7121_v7 = vld [vmem:[%s9423_s1 + $0x88] sm:$0xff]   ;;  %v7125_v11 = vld [vmem:[%s9423_s1 + $0x90] sm:$0xff]  }
   0x5   :  { %6402 = vmatpush3.bf16.msra.mxu1 %v7117_v3  ;;  %6381 = vmatprep.subr.bf16.mxu0 %v7118_v4  ;;  %v7126_v12 = vld [vmem:[%s9423_s1 + $0x58] sm:$0xff]   ;;  %v7130_v16 = vld [vmem:[%s9423_s1 + $0x60] sm:$0xff]   ;;  %v7134_v20 = vld [vmem:[%s9423_s1 + $0x68] sm:$0xff]  }
   0x6   :  { %6403 = vmatprep.subr.bf16.mxu1 %v7119_v5  ;;  %v7127_v13 = vld [vmem:[%s9423_s1 + $0xd8] sm:$0xff]   ;;  %v7131_v17 = vld [vmem:[%s9423_s1 + $0xe0] sm:$0xff]   ;;  %v7135_v21 = vld [vmem:[%s9423_s1 + $0xe8] sm:$0xff]  }
   0x7   :  { %v7128_v14 = vld [vmem:[%s9423_s1 + $0x18] sm:$0xff]   ;;  %v7132_v18 = vld [vmem:[%s9423_s1 + $0x20] sm:$0xff]   ;;  %v7136_v22 = vld [vmem:[%s9423_s1 + $0x28] sm:$0xff]  }
   0x8   :  { %6382 = vmatpush3.bf16.msra.mxu0 %v7120_v6  ;;  %v7129_v15 = vld [vmem:[%s9423_s1 + $0x98] sm:$0xff]   ;;  %v7133_v19 = vld [vmem:[%s9423_s1 + $0xa0] sm:$0xff]   ;;  %v7137_v23 = vld [vmem:[%s9423_s1 + $0xa8] sm:$0xff]  }
   0x9   :  { %6404 = vmatpush3.bf16.msra.mxu1 %v7121_v7  ;;  %6383 = vmatprep.subr.bf16.mxu0 %v7122_v8  ;;  %v7138_v24 = vld [vmem:[%s9423_s1 + $0x70] sm:$0xff]   ;;  %v7142_v28 = vld [vmem:[%s9423_s1 + $0x78] sm:$0xff]   ;;  %v21_v32 = vld [vmem:[%s9424_s0] sm:$0xff] }
   0xa   :  { %6405 = vmatprep.subr.bf16.mxu1 %v7123_v9  ;;  %v7139_v25 = vld [vmem:[%s9423_s1 + $0xf0] sm:$0xff]   ;;  %v7143_v29 = vld [vmem:[%s9423_s1 + $0xf8] sm:$0xff]   ;;  %v22_v33 = vld [vmem:[%s9424_s0 + $0x8] sm:$0xff]  ;;  %v5794_v34 = vcombine.low %v21_v32, %v21_v32  ;;  %v5795_v35 = vcombine.high %v21_v32, %v21_v32 }
   0xb   :  { %v7140_v26 = vld [vmem:[%s9423_s1 + $0x30] sm:$0xff]   ;;  %v7144_v30 = vld [vmem:[%s9423_s1 + $0x38] sm:$0xff]   ;;  %v5796_v36 = vcombine.low %v22_v33, %v22_v33  ;;  %v5797_v37 = vcombine.high %v22_v33, %v22_v33  ;;  %v7150_v38 = vld [vmem:[%s9423_s1 + $0x140] sm:$0xff]  }
   0xc   :  { %6384 = vmatpush3.bf16.msra.mxu0 %v7124_v10  ;;  %v7141_v27 = vld [vmem:[%s9423_s1 + $0xb0] sm:$0xff]   ;;  %v7145_v31 = vld [vmem:[%s9423_s1 + $0xb8] sm:$0xff]   ;;  %v7151_v39 = vld [vmem:[%s9423_s1 + $0x1c0] sm:$0xff]   ;;  %4412 = vmatprep.mubr.bf16.mxu0 %v5795_v35 }
   0xd   :  { %6406 = vmatpush3.bf16.msra.mxu1 %v7125_v11  ;;  %6385 = vmatprep.subr.bf16.mxu0 %v7126_v12  ;;  %v7152_v40 = vld [vmem:[%s9423_s1 + $0x100] sm:$0xff]   ;;  %v7154_v42 = vld [vmem:[%s9423_s1 + $0x148] sm:$0xff]   ;;  %v7158_v46 = vld [vmem:[%s9423_s1 + $0x150] sm:$0xff]  }
   0xe   :  { %6407 = vmatprep.subr.bf16.mxu1 %v7127_v13  ;;  %4452 = vmatprep.mubr.bf16.mxu1 %v5797_v37  ;;  %v7153_v41 = vld [vmem:[%s9423_s1 + $0x180] sm:$0xff]   ;;  %v7155_v43 = vld [vmem:[%s9423_s1 + $0x1c8] sm:$0xff]   ;;  %v7159_v47 = vld [vmem:[%s9423_s1 + $0x1d0] sm:$0xff]  }
   0xf   :  { %v7156_v44 = vld [vmem:[%s9423_s1 + $0x108] sm:$0xff]   ;;  %v7160_v48 = vld [vmem:[%s9423_s1 + $0x110] sm:$0xff]   ;;  %v7162_v50 = vld [vmem:[%s9423_s1 + $0x158] sm:$0xff]  }
  0x10   :  { %6386 = vmatpush3.bf16.msra.mxu0 %v7128_v14  ;;  %v7157_v45 = vld [vmem:[%s9423_s1 + $0x188] sm:$0xff]   ;;  %v7161_v49 = vld [vmem:[%s9423_s1 + $0x190] sm:$0xff]   ;;  %v7163_v51 = vld [vmem:[%s9423_s1 + $0x1d8] sm:$0xff]  }
  0x11   :  { %6408 = vmatpush3.bf16.msra.mxu1 %v7129_v15  ;;  %6387 = vmatprep.subr.bf16.mxu0 %v7130_v16  ;;  %v7164_v52 = vld [vmem:[%s9423_s1 + $0x118] sm:$0xff]   ;;  %v7166_v54 = vld [vmem:[%s9423_s1 + $0x160] sm:$0xff]   ;;  %v7170_v58 = vld [vmem:[%s9423_s1 + $0x168] sm:$0xff]  }
  0x12   :  { %6409 = vmatprep.subr.bf16.mxu1 %v7131_v17  ;;  %v7165_v53 = vld [vmem:[%s9423_s1 + $0x198] sm:$0xff]   ;;  %v7167_v55 = vld [vmem:[%s9423_s1 + $0x1e0] sm:$0xff]   ;;  %v7171_v59 = vld [vmem:[%s9423_s1 + $0x1e8] sm:$0xff]  }
  0x13   :  { %v7168_v56 = vld [vmem:[%s9423_s1 + $0x120] sm:$0xff]   ;;  %v7172_v60 = vld [vmem:[%s9423_s1 + $0x128] sm:$0xff]   ;;  %v7174_v62 = vld [vmem:[%s9423_s1 + $0x170] sm:$0xff]  }
  0x14   :  { %6388 = vmatpush3.bf16.msra.mxu0 %v7132_v18  ;;  %v7169_v57 = vld [vmem:[%s9423_s1 + $0x1a0] sm:$0xff]   ;;  %v7173_v61 = vld [vmem:[%s9423_s1 + $0x1a8] sm:$0xff]   ;;  %v7175_v63 = vld [vmem:[%s9423_s1 + $0x1f0] sm:$0xff]  }
  0x15   :  { %6410 = vmatpush3.bf16.msra.mxu1 %v7133_v19  ;;  %6389 = vmatprep.subr.bf16.mxu0 %v7134_v20  ;;  %v7176_v0 = vld [vmem:[%s9423_s1 + $0x130] sm:$0xff]   ;;  %v7178_v2 = vld [vmem:[%s9423_s1 + $0x178] sm:$0xff]   ;;  %v7186_v12 = vld [vmem:[%s9423_s1 + $0x240] sm:$0xff]  }
  0x16   :  { %6411 = vmatprep.subr.bf16.mxu1 %v7135_v21  ;;  %v7177_v1 = vld [vmem:[%s9423_s1 + $0x1b0] sm:$0xff]   ;;  %v7179_v3 = vld [vmem:[%s9423_s1 + $0x1f8] sm:$0xff]   ;;  %v7187_v13 = vld [vmem:[%s9423_s1 + $0x2c0] sm:$0xff]  }
  0x17   :  { %v7180_v4 = vld [vmem:[%s9423_s1 + $0x138] sm:$0xff]   ;;  %v23_v6 = vld [vmem:[%s9424_s0 + $0x10] sm:$0xff]  ;;  %v7188_v14 = vld [vmem:[%s9423_s1 + $0x200] sm:$0xff]  }
  0x18   :  { %6390 = vmatpush3.bf16.msra.mxu0 %v7136_v22  ;;  %v7181_v5 = vld [vmem:[%s9423_s1 + $0x1b8] sm:$0xff]   ;;  %v5798_v7 = vcombine.low %v23_v6, %v23_v6  ;;  %v5799_v8 = vcombine.high %v23_v6, %v23_v6  ;;  %v7189_v15 = vld [vmem:[%s9423_s1 + $0x280] sm:$0xff]   ;;  %v7190_v16 = vld [vmem:[%s9423_s1 + $0x248] sm:$0xff]  }
  0x19   :  { %6412 = vmatpush3.bf16.msra.mxu1 %v7137_v23  ;;  %6391 = vmatprep.subr.bf16.mxu0 %v7138_v24  ;;  %v24_v9 = vld [vmem:[%s9424_s0 + $0x18] sm:$0xff]  ;;  %v7191_v17 = vld [vmem:[%s9423_s1 + $0x2c8] sm:$0xff]   ;;  %v7194_v20 = vld [vmem:[%s9423_s1 + $0x250] sm:$0xff]  }
  0x1a   :  { %6413 = vmatprep.subr.bf16.mxu1 %v7139_v25  ;;  %v5800_v10 = vcombine.low %v24_v9, %v24_v9  ;;  %v5801_v11 = vcombine.high %v24_v9, %v24_v9  ;;  %v7192_v18 = vld [vmem:[%s9423_s1 + $0x208] sm:$0xff]   ;;  %v7195_v21 = vld [vmem:[%s9423_s1 + $0x2d0] sm:$0xff]   ;;  %v7198_v24 = vld [vmem:[%s9423_s1 + $0x258] sm:$0xff]  }
  0x1b   :  { %v7193_v19 = vld [vmem:[%s9423_s1 + $0x288] sm:$0xff]   ;;  %v7196_v22 = vld [vmem:[%s9423_s1 + $0x210] sm:$0xff]   ;;  %v7199_v25 = vld [vmem:[%s9423_s1 + $0x2d8] sm:$0xff]  }
  0x1c   :  { %6392 = vmatpush3.bf16.msra.mxu0 %v7140_v26  ;;  %v7197_v23 = vld [vmem:[%s9423_s1 + $0x290] sm:$0xff]   ;;  %v7200_v26 = vld [vmem:[%s9423_s1 + $0x218] sm:$0xff]   ;;  %v7206_v32 = vld [vmem:[%s9423_s1 + $0x268] sm:$0xff]  }
  0x1d   :  { %6414 = vmatpush3.bf16.msra.mxu1 %v7141_v27  ;;  %6393 = vmatprep.subr.bf16.mxu0 %v7142_v28  ;;  %v7201_v27 = vld [vmem:[%s9423_s1 + $0x298] sm:$0xff]   ;;  %v7202_v28 = vld [vmem:[%s9423_s1 + $0x260] sm:$0xff]   ;;  %v7207_v33 = vld [vmem:[%s9423_s1 + $0x2e8] sm:$0xff]  }
  0x1e   :  { %6415 = vmatprep.subr.bf16.mxu1 %v7143_v29  ;;  %v7203_v29 = vld [vmem:[%s9423_s1 + $0x2e0] sm:$0xff]   ;;  %v7209_v35 = vld [vmem:[%s9423_s1 + $0x2a8] sm:$0xff]   ;;  %v7211_v37 = vld [vmem:[%s9423_s1 + $0x2f0] sm:$0xff]  }
  0x1f   :  { %v7242_v6 = vld [vmem:[%s9423_s1 + $0x368] sm:$0xff]  }
  0x20   :  { %6394 = vmatpush3.bf16.msra.mxu0 %v7144_v30  ;;  %v7204_v30 = vld [vmem:[%s9423_s1 + $0x220] sm:$0xff]   ;;  %v7245_v9 = vld [vmem:[%s9423_s1 + $0x3a8] sm:$0xff]  }
  0x21   :  { %6416 = vmatpush3.bf16.msra.mxu1 %v7145_v31  ;;  %6423 = vmatprep.subr.bf16.mxu0 %v7150_v38  ;;  %v7205_v31 = vld [vmem:[%s9423_s1 + $0x2a0] sm:$0xff]   ;;  %v7212_v38 = vld [vmem:[%s9423_s1 + $0x230] sm:$0xff]  }
  0x22   :  { %6445 = vmatprep.subr.bf16.mxu1 %v7151_v39  ;;  %v7213_v39 = vld [vmem:[%s9423_s1 + $0x2b0] sm:$0xff]  }
  0x23   :  { %4413 = vmatmul.mubr.bf16.vlgmr.msra.gmra.mrb[0].mxu0 %v5794_v34  ;;  %v7208_v34 = vld [vmem:[%s9423_s1 + $0x228] sm:$0xff]  }
  0x24   :  { %4453 = vmatmul.mubr.bf16.vlgmr.msra.gmra.mrb[0].mxu1 %v5796_v36  ;;  %6424 = vmatpush3.bf16.msra.mxu0 %v7152_v40  ;;  %v7210_v36 = vld [vmem:[%s9423_s1 + $0x270] sm:$0xff]   ;;  %v7214_v40 = vld [vmem:[%s9423_s1 + $0x278] sm:$0xff]  }
  0x25   :  { %6446 = vmatpush3.bf16.msra.mxu1 %v7153_v41  ;;  %6425 = vmatprep.subr.bf16.mxu0 %v7154_v42  ;;  %v7215_v41 = vld [vmem:[%s9423_s1 + $0x2f8] sm:$0xff]  }
  0x26   :  { %6447 = vmatprep.subr.bf16.mxu1 %v7155_v43  ;;  %4492 = vmatprep.mubr.bf16.mxu0 %v5799_v8  ;;  %v7216_v42 = vld [vmem:[%s9423_s1 + $0x238] sm:$0xff]   ;;  %v7244_v8 = vld [vmem:[%s9423_s1 + $0x328] sm:$0xff]  }
  0x27   :  { %4532 = vmatprep.mubr.bf16.mxu1 %v5801_v11  ;;  %v7217_v43 = vld [vmem:[%s9423_s1 + $0x2b8] sm:$0xff]   ;;  %v7247_v11 = vld [vmem:[%s9423_s1 + $0x3f0] sm:$0xff]  }
  0x28   :  { %6426 = vmatpush3.bf16.msra.mxu0 %v7156_v44  ;;  %v25_v44 = vld [vmem:[%s9424_s0 + $0x20] sm:$0xff] }
  0x29   :  { %6448 = vmatpush3.bf16.msra.mxu1 %v7157_v45  ;;  %6427 = vmatprep.subr.bf16.mxu0 %v7158_v46  ;;  %v26_v45 = vld [vmem:[%s9424_s0 + $0x28] sm:$0xff]  ;;  %v5802_v46 = vcombine.low %v25_v44, %v25_v44 }
  0x2a   :  { %6449 = vmatprep.subr.bf16.mxu1 %v7159_v47  ;;  %v5803_v47 = vcombine.high %v25_v44, %v25_v44  ;;  %v7278_v44 = vld [vmem:[%s9423_s1 + $0x468] sm:$0xff]  }
  0x2c   :  { %6428 = vmatpush3.bf16.msra.mxu0 %v7160_v48  ;;  %v5804_v48 = vcombine.low %v26_v45, %v26_v45 }
  0x2d   :  { %6450 = vmatpush3.bf16.msra.mxu1 %v7161_v49  ;;  %6429 = vmatprep.subr.bf16.mxu0 %v7162_v50  ;;  %v5805_v49 = vcombine.high %v26_v45, %v26_v45  ;;  %v7222_v50 = vld [vmem:[%s9423_s1 + $0x340] sm:$0xff]   ;;  %v7279_v45 = vld [vmem:[%s9423_s1 + $0x4e8] sm:$0xff]  }
  0x2e   :  { %6451 = vmatprep.subr.bf16.mxu1 %v7163_v51  ;;  %v7223_v51 = vld [vmem:[%s9423_s1 + $0x3c0] sm:$0xff]  }
  0x30   :  { %6430 = vmatpush3.bf16.msra.mxu0 %v7164_v52  ;;  %v7224_v52 = vld [vmem:[%s9423_s1 + $0x300] sm:$0xff]  }
  0x31   :  { %6452 = vmatpush3.bf16.msra.mxu1 %v7165_v53  ;;  %6431 = vmatprep.subr.bf16.mxu0 %v7166_v54  ;;  %v7225_v53 = vld [vmem:[%s9423_s1 + $0x380] sm:$0xff]   ;;  %v7226_v54 = vld [vmem:[%s9423_s1 + $0x348] sm:$0xff]  }
  0x32   :  { %6453 = vmatprep.subr.bf16.mxu1 %v7167_v55  ;;  %v7227_v55 = vld [vmem:[%s9423_s1 + $0x3c8] sm:$0xff]  }
  0x34   :  { %6432 = vmatpush3.bf16.msra.mxu0 %v7168_v56  ;;  %v7228_v56 = vld [vmem:[%s9423_s1 + $0x308] sm:$0xff]  }
  0x35   :  { %6454 = vmatpush3.bf16.msra.mxu1 %v7169_v57  ;;  %6433 = vmatprep.subr.bf16.mxu0 %v7170_v58  ;;  %v7229_v57 = vld [vmem:[%s9423_s1 + $0x388] sm:$0xff]   ;;  %v7230_v58 = vld [vmem:[%s9423_s1 + $0x350] sm:$0xff]  }
  0x36   :  { %6455 = vmatprep.subr.bf16.mxu1 %v7171_v59  ;;  %v7231_v59 = vld [vmem:[%s9423_s1 + $0x3d0] sm:$0xff]  }
  0x38   :  { %6434 = vmatpush3.bf16.msra.mxu0 %v7172_v60  ;;  %v7232_v60 = vld [vmem:[%s9423_s1 + $0x310] sm:$0xff]  }
  0x39   :  { %6456 = vmatpush3.bf16.msra.mxu1 %v7173_v61  ;;  %6435 = vmatprep.subr.bf16.mxu0 %v7174_v62  ;;  %v7233_v61 = vld [vmem:[%s9423_s1 + $0x390] sm:$0xff]   ;;  %v7234_v62 = vld [vmem:[%s9423_s1 + $0x358] sm:$0xff]  }
  0x3a   :  { %6457 = vmatprep.subr.bf16.mxu1 %v7175_v63  ;;  %v7235_v63 = vld [vmem:[%s9423_s1 + $0x3d8] sm:$0xff]  }
  0x3c   :  { %6436 = vmatpush3.bf16.msra.mxu0 %v7176_v0  ;;  %v7236_v0 = vld [vmem:[%s9423_s1 + $0x318] sm:$0xff]  }
  0x3d   :  { %6458 = vmatpush3.bf16.msra.mxu1 %v7177_v1  ;;  %6437 = vmatprep.subr.bf16.mxu0 %v7178_v2  ;;  %v7237_v1 = vld [vmem:[%s9423_s1 + $0x398] sm:$0xff]   ;;  %v7238_v2 = vld [vmem:[%s9423_s1 + $0x360] sm:$0xff]  }
  0x3e   :  { %6459 = vmatprep.subr.bf16.mxu1 %v7179_v3  ;;  %v7239_v3 = vld [vmem:[%s9423_s1 + $0x3e0] sm:$0xff]  }
  0x40   :  { %6438 = vmatpush3.bf16.msra.mxu0 %v7180_v4  ;;  %v7240_v4 = vld [vmem:[%s9423_s1 + $0x320] sm:$0xff]  }
  0x41   :  { %6460 = vmatpush3.bf16.msra.mxu1 %v7181_v5  ;;  %6467 = vmatprep.subr.bf16.mxu0 %v7186_v12  ;;  %v7241_v5 = vld [vmem:[%s9423_s1 + $0x3a0] sm:$0xff]   ;;  %v7248_v12 = vld [vmem:[%s9423_s1 + $0x330] sm:$0xff]  }
  0x42   :  { %6489 = vmatprep.subr.bf16.mxu1 %v7187_v13  ;;  %v7249_v13 = vld [vmem:[%s9423_s1 + $0x3b0] sm:$0xff]  }
  0x43   :  { %4493 = vmatmul.mubr.bf16.vlgmr.msra.gmra.mrb[4].mxu0 %v5798_v7  ;;  %v7243_v7 = vld [vmem:[%s9423_s1 + $0x3e8] sm:$0xff]  }
  0x44   :  { %4533 = vmatmul.mubr.bf16.vlgmr.msra.gmra.mrb[4].mxu1 %v5800_v10  ;;  %6468 = vmatpush3.bf16.msra.mxu0 %v7188_v14  ;;  %v7246_v10 = vld [vmem:[%s9423_s1 + $0x370] sm:$0xff]   ;;  %v7250_v14 = vld [vmem:[%s9423_s1 + $0x378] sm:$0xff]  }
  0x45   :  { %6490 = vmatpush3.bf16.msra.mxu1 %v7189_v15  ;;  %6469 = vmatprep.subr.bf16.mxu0 %v7190_v16  ;;  %v7251_v15 = vld [vmem:[%s9423_s1 + $0x3f8] sm:$0xff]  }
  0x46   :  { %6491 = vmatprep.subr.bf16.mxu1 %v7191_v17  ;;  %4572 = vmatprep.mubr.bf16.mxu0 %v5803_v47  ;;  %v7252_v16 = vld [vmem:[%s9423_s1 + $0x338] sm:$0xff]   ;;  %v7281_v47 = vld [vmem:[%s9423_s1 + $0x4a8] sm:$0xff]  }
  0x47   :  { %4612 = vmatprep.mubr.bf16.mxu1 %v5805_v49  ;;  %v7253_v17 = vld [vmem:[%s9423_s1 + $0x3b8] sm:$0xff]   ;;  %v7283_v49 = vld [vmem:[%s9423_s1 + $0x4f0] sm:$0xff]  }
  0x48   :  { %6470 = vmatpush3.bf16.msra.mxu0 %v7192_v18  ;;  %v27_v18 = vld [vmem:[%s9424_s0 + $0x30] sm:$0xff] }
  0x49   :  { %6492 = vmatpush3.bf16.msra.mxu1 %v7193_v19  ;;  %6471 = vmatprep.subr.bf16.mxu0 %v7194_v20  ;;  %v28_v19 = vld [vmem:[%s9424_s0 + $0x38] sm:$0xff]  ;;  %v5806_v20 = vcombine.low %v27_v18, %v27_v18 }
  0x4a   :  { %6493 = vmatprep.subr.bf16.mxu1 %v7195_v21  ;;  %v5807_v21 = vcombine.high %v27_v18, %v27_v18  ;;  %v7314_v18 = vld [vmem:[%s9423_s1 + $0x568] sm:$0xff]  }
  0x4c   :  { %6472 = vmatpush3.bf16.msra.mxu0 %v7196_v22  ;;  %v5808_v22 = vcombine.low %v28_v19, %v28_v19 }
  0x4d   :  { %6494 = vmatpush3.bf16.msra.mxu1 %v7197_v23  ;;  %6473 = vmatprep.subr.bf16.mxu0 %v7198_v24  ;;  %v7258_v23 = vld [vmem:[%s9423_s1 + $0x440] sm:$0xff]   ;;  %v5809_v24 = vcombine.high %v28_v19, %v28_v19  ;;  %v7315_v19 = vld [vmem:[%s9423_s1 + $0x5e8] sm:$0xff]  }
  0x4e   :  { %6495 = vmatprep.subr.bf16.mxu1 %v7199_v25  ;;  %v7259_v25 = vld [vmem:[%s9423_s1 + $0x4c0] sm:$0xff]  }
  0x50   :  { %6474 = vmatpush3.bf16.msra.mxu0 %v7200_v26  ;;  %v7260_v26 = vld [vmem:[%s9423_s1 + $0x400] sm:$0xff]  }
  0x51   :  { %6496 = vmatpush3.bf16.msra.mxu1 %v7201_v27  ;;  %6475 = vmatprep.subr.bf16.mxu0 %v7202_v28  ;;  %v7261_v27 = vld [vmem:[%s9423_s1 + $0x480] sm:$0xff]   ;;  %v7262_v28 = vld [vmem:[%s9423_s1 + $0x448] sm:$0xff]  }
  0x52   :  { %6497 = vmatprep.subr.bf16.mxu1 %v7203_v29  ;;  %v7263_v29 = vld [vmem:[%s9423_s1 + $0x4c8] sm:$0xff]  }
  0x54   :  { %6476 = vmatpush3.bf16.msra.mxu0 %v7204_v30  ;;  %v7264_v30 = vld [vmem:[%s9423_s1 + $0x408] sm:$0xff]  }
  0x55   :  { %6498 = vmatpush3.bf16.msra.mxu1 %v7205_v31  ;;  %6477 = vmatprep.subr.bf16.mxu0 %v7206_v32  ;;  %v7265_v31 = vld [vmem:[%s9423_s1 + $0x488] sm:$0xff]   ;;  %v7266_v32 = vld [vmem:[%s9423_s1 + $0x450] sm:$0xff]  }
  0x56   :  { %6499 = vmatprep.subr.bf16.mxu1 %v7207_v33  ;;  %v7267_v33 = vld [vmem:[%s9423_s1 + $0x4d0] sm:$0xff]  }
  0x58   :  { %6478 = vmatpush3.bf16.msra.mxu0 %v7208_v34  ;;  %v7268_v34 = vld [vmem:[%s9423_s1 + $0x410] sm:$0xff]  }
  0x59   :  { %6500 = vmatpush3.bf16.msra.mxu1 %v7209_v35  ;;  %6479 = vmatprep.subr.bf16.mxu0 %v7210_v36  ;;  %v7269_v35 = vld [vmem:[%s9423_s1 + $0x490] sm:$0xff]   ;;  %v7270_v36 = vld [vmem:[%s9423_s1 + $0x458] sm:$0xff]  }
  0x5a   :  { %6501 = vmatprep.subr.bf16.mxu1 %v7211_v37  ;;  %v7271_v37 = vld [vmem:[%s9423_s1 + $0x4d8] sm:$0xff]  }
  0x5c   :  { %6480 = vmatpush3.bf16.msra.mxu0 %v7212_v38  ;;  %v7272_v38 = vld [vmem:[%s9423_s1 + $0x418] sm:$0xff]  }
  0x5d   :  { %6502 = vmatpush3.bf16.msra.mxu1 %v7213_v39  ;;  %6481 = vmatprep.subr.bf16.mxu0 %v7214_v40  ;;  %v7273_v39 = vld [vmem:[%s9423_s1 + $0x498] sm:$0xff]   ;;  %v7274_v40 = vld [vmem:[%s9423_s1 + $0x460] sm:$0xff]  }
  0x5e   :  { %6503 = vmatprep.subr.bf16.mxu1 %v7215_v41  ;;  %v7275_v41 = vld [vmem:[%s9423_s1 + $0x4e0] sm:$0xff]  }
  0x60   :  { %6482 = vmatpush3.bf16.msra.mxu0 %v7216_v42  ;;  %v7276_v42 = vld [vmem:[%s9423_s1 + $0x420] sm:$0xff]  }
  0x61   :  { %6504 = vmatpush3.bf16.msra.mxu1 %v7217_v43  ;;  %6511 = vmatprep.subr.bf16.mxu0 %v7222_v50  ;;  %v7277_v43 = vld [vmem:[%s9423_s1 + $0x4a0] sm:$0xff]   ;;  %v7284_v50 = vld [vmem:[%s9423_s1 + $0x430] sm:$0xff]  }
  0x62   :  { %6533 = vmatprep.subr.bf16.mxu1 %v7223_v51  ;;  %v7285_v51 = vld [vmem:[%s9423_s1 + $0x4b0] sm:$0xff]  }
  0x63   :  { %4573 = vmatmul.mubr.bf16.vlgmr.msra.gmra.mrb[8].mxu0 %v5802_v46  ;;  %v7280_v46 = vld [vmem:[%s9423_s1 + $0x428] sm:$0xff]  }
  0x64   :  { %4613 = vmatmul.mubr.bf16.vlgmr.msra.gmra.mrb[8].mxu1 %v5804_v48  ;;  %6512 = vmatpush3.bf16.msra.mxu0 %v7224_v52  ;;  %v7282_v48 = vld [vmem:[%s9423_s1 + $0x470] sm:$0xff]   ;;  %v7286_v52 = vld [vmem:[%s9423_s1 + $0x478] sm:$0xff]  }
  0x65   :  { %6534 = vmatpush3.bf16.msra.mxu1 %v7225_v53  ;;  %6513 = vmatprep.subr.bf16.mxu0 %v7226_v54  ;;  %v7287_v53 = vld [vmem:[%s9423_s1 + $0x4f8] sm:$0xff]  }
  0x66   :  { %6535 = vmatprep.subr.bf16.mxu1 %v7227_v55  ;;  %4652 = vmatprep.mubr.bf16.mxu0 %v5807_v21  ;;  %v7288_v54 = vld [vmem:[%s9423_s1 + $0x438] sm:$0xff]   ;;  %v7317_v21 = vld [vmem:[%s9423_s1 + $0x5a8] sm:$0xff]  }
  0x67   :  { %4692 = vmatprep.mubr.bf16.mxu1 %v5809_v24  ;;  %v7289_v55 = vld [vmem:[%s9423_s1 + $0x4b8] sm:$0xff]   ;;  %v7320_v24 = vld [vmem:[%s9423_s1 + $0x530] sm:$0xff]  }
  0x68   :  { %6514 = vmatpush3.bf16.msra.mxu0 %v7228_v56  ;;  %v29_v56 = vld [vmem:[%s9424_s0 + $0x40] sm:$0xff] }
  0x69   :  { %6536 = vmatpush3.bf16.msra.mxu1 %v7229_v57  ;;  %6515 = vmatprep.subr.bf16.mxu0 %v7230_v58  ;;  %v5810_v57 = vcombine.low %v29_v56, %v29_v56  ;;  %v5811_v58 = vcombine.high %v29_v56, %v29_v56  ;;  %v7350_v56 = vld [vmem:[%s9423_s1 + $0x668] sm:$0xff]  }
  0x6a   :  { %6537 = vmatprep.subr.bf16.mxu1 %v7231_v59  ;;  %v30_v59 = vld [vmem:[%s9424_s0 + $0x48] sm:$0xff] }
  0x6c   :  { %6516 = vmatpush3.bf16.msra.mxu0 %v7232_v60  ;;  %v5812_v60 = vcombine.low %v30_v59, %v30_v59 }
  0x6d   :  { %6538 = vmatpush3.bf16.msra.mxu1 %v7233_v61  ;;  %6517 = vmatprep.subr.bf16.mxu0 %v7234_v62  ;;  %v5813_v61 = vcombine.high %v30_v59, %v30_v59  ;;  %v7294_v62 = vld [vmem:[%s9423_s1 + $0x540] sm:$0xff]   ;;  %v7353_v59 = vld [vmem:[%s9423_s1 + $0x6a8] sm:$0xff]  }
  0x6e   :  { %6539 = vmatprep.subr.bf16.mxu1 %v7235_v63  ;;  %v7295_v63 = vld [vmem:[%s9423_s1 + $0x5c0] sm:$0xff]  }
  0x70   :  { %6518 = vmatpush3.bf16.msra.mxu0 %v7236_v0  ;;  %v7296_v0 = vld [vmem:[%s9423_s1 + $0x500] sm:$0xff]  }
  0x71   :  { %6540 = vmatpush3.bf16.msra.mxu1 %v7237_v1  ;;  %6519 = vmatprep.subr.bf16.mxu0 %v7238_v2  ;;  %v7297_v1 = vld [vmem:[%s9423_s1 + $0x580] sm:$0xff]   ;;  %v7298_v2 = vld [vmem:[%s9423_s1 + $0x548] sm:$0xff]  }
  0x72   :  { %6541 = vmatprep.subr.bf16.mxu1 %v7239_v3  ;;  %v7299_v3 = vld [vmem:[%s9423_s1 + $0x5c8] sm:$0xff]  }
  0x74   :  { %6520 = vmatpush3.bf16.msra.mxu0 %v7240_v4  ;;  %v7300_v4 = vld [vmem:[%s9423_s1 + $0x508] sm:$0xff]  }
  0x75   :  { %6542 = vmatpush3.bf16.msra.mxu1 %v7241_v5  ;;  %6521 = vmatprep.subr.bf16.mxu0 %v7242_v6  ;;  %v7301_v5 = vld [vmem:[%s9423_s1 + $0x588] sm:$0xff]   ;;  %v7302_v6 = vld [vmem:[%s9423_s1 + $0x550] sm:$0xff]  }
  0x76   :  { %6543 = vmatprep.subr.bf16.mxu1 %v7243_v7  ;;  %v7303_v7 = vld [vmem:[%s9423_s1 + $0x5d0] sm:$0xff]  }
  0x78   :  { %6522 = vmatpush3.bf16.msra.mxu0 %v7244_v8  ;;  %v7304_v8 = vld [vmem:[%s9423_s1 + $0x510] sm:$0xff]  }
  0x79   :  { %6544 = vmatpush3.bf16.msra.mxu1 %v7245_v9  ;;  %6523 = vmatprep.subr.bf16.mxu0 %v7246_v10  ;;  %v7305_v9 = vld [vmem:[%s9423_s1 + $0x590] sm:$0xff]   ;;  %v7306_v10 = vld [vmem:[%s9423_s1 + $0x558] sm:$0xff]  }
  0x7a   :  { %6545 = vmatprep.subr.bf16.mxu1 %v7247_v11  ;;  %v7307_v11 = vld [vmem:[%s9423_s1 + $0x5d8] sm:$0xff]  }
  0x7c   :  { %6524 = vmatpush3.bf16.msra.mxu0 %v7248_v12  ;;  %v7308_v12 = vld [vmem:[%s9423_s1 + $0x518] sm:$0xff]  }
  0x7d   :  { %6546 = vmatpush3.bf16.msra.mxu1 %v7249_v13  ;;  %6525 = vmatprep.subr.bf16.mxu0 %v7250_v14  ;;  %v7309_v13 = vld [vmem:[%s9423_s1 + $0x598] sm:$0xff]   ;;  %v7310_v14 = vld [vmem:[%s9423_s1 + $0x560] sm:$0xff]  }
  0x7e   :  { %6547 = vmatprep.subr.bf16.mxu1 %v7251_v15  ;;  %v7311_v15 = vld [vmem:[%s9423_s1 + $0x5e0] sm:$0xff]  }
  0x80   :  { %6526 = vmatpush3.bf16.msra.mxu0 %v7252_v16  ;;  %v7312_v16 = vld [vmem:[%s9423_s1 + $0x520] sm:$0xff]  }
  0x81   :  { %6548 = vmatpush3.bf16.msra.mxu1 %v7253_v17  ;;  %6555 = vmatprep.subr.bf16.mxu0 %v7258_v23  ;;  %v7313_v17 = vld [vmem:[%s9423_s1 + $0x5a0] sm:$0xff]   ;;  %v7319_v23 = vld [vmem:[%s9423_s1 + $0x5f0] sm:$0xff]  }
  0x82   :  { %6577 = vmatprep.subr.bf16.mxu1 %v7259_v25  ;;  %v7321_v25 = vld [vmem:[%s9423_s1 + $0x5b0] sm:$0xff]  }
  0x83   :  { %4653 = vmatmul.mubr.bf16.vlgmr.msra.gmra.mrb[12].mxu0 %v5806_v20  ;;  %v7316_v20 = vld [vmem:[%s9423_s1 + $0x528] sm:$0xff]  }
  0x84   :  { %4693 = vmatmul.mubr.bf16.vlgmr.msra.gmra.mrb[12].mxu1 %v5808_v22  ;;  %6556 = vmatpush3.bf16.msra.mxu0 %v7260_v26  ;;  %v7318_v22 = vld [vmem:[%s9423_s1 + $0x570] sm:$0xff]   ;;  %v7322_v26 = vld [vmem:[%s9423_s1 + $0x578] sm:$0xff]  }
  0x85   :  { %6578 = vmatpush3.bf16.msra.mxu1 %v7261_v27  ;;  %6557 = vmatprep.subr.bf16.mxu0 %v7262_v28  ;;  %v7323_v27 = vld [vmem:[%s9423_s1 + $0x5f8] sm:$0xff]  }
  0x86   :  { %6579 = vmatprep.subr.bf16.mxu1 %v7263_v29  ;;  %4732 = vmatprep.mubr.bf16.mxu0 %v5811_v58  ;;  %v7324_v28 = vld [vmem:[%s9423_s1 + $0x538] sm:$0xff]   ;;  %v7352_v58 = vld [vmem:[%s9423_s1 + $0x628] sm:$0xff]  }
  0x87   :  { %4772 = vmatprep.mubr.bf16.mxu1 %v5813_v61  ;;  %v7325_v29 = vld [vmem:[%s9423_s1 + $0x5b8] sm:$0xff]   ;;  %v7355_v61 = vld [vmem:[%s9423_s1 + $0x6f0] sm:$0xff]  }
  0x88   :  { %6558 = vmatpush3.bf16.msra.mxu0 %v7264_v30  ;;  %v31_v30 = vld [vmem:[%s9424_s0 + $0x50] sm:$0xff] }
  0x89   :  { %6580 = vmatpush3.bf16.msra.mxu1 %v7265_v31  ;;  %6559 = vmatprep.subr.bf16.mxu0 %v7266_v32  ;;  %v32_v31 = vld [vmem:[%s9424_s0 + $0x58] sm:$0xff]  ;;  %v5814_v32 = vcombine.low %v31_v30, %v31_v30 }
  0x8a   :  { %6581 = vmatprep.subr.bf16.mxu1 %v7267_v33  ;;  %v5815_v33 = vcombine.high %v31_v30, %v31_v30  ;;  %v7385_v30 = vld [vmem:[%s9423_s1 + $0x7a0] sm:$0xff]  }
  0x8c   :  { %6560 = vmatpush3.bf16.msra.mxu0 %v7268_v34  ;;  %v5816_v34 = vcombine.low %v32_v31, %v32_v31 }
  0x8d   :  { %6582 = vmatpush3.bf16.msra.mxu1 %v7269_v35  ;;  %6561 = vmatprep.subr.bf16.mxu0 %v7270_v36  ;;  %v5817_v35 = vcombine.high %v32_v31, %v32_v31  ;;  %v7330_v36 = vld [vmem:[%s9423_s1 + $0x640] sm:$0xff]  }
  0x8e   :  { %6583 = vmatprep.subr.bf16.mxu1 %v7271_v37  ;;  %v7331_v37 = vld [vmem:[%s9423_s1 + $0x6c0] sm:$0xff]  }
  0x90   :  { %6562 = vmatpush3.bf16.msra.mxu0 %v7272_v38  ;;  %v7332_v38 = vld [vmem:[%s9423_s1 + $0x600] sm:$0xff]  }
  0x91   :  { %6584 = vmatpush3.bf16.msra.mxu1 %v7273_v39  ;;  %6563 = vmatprep.subr.bf16.mxu0 %v7274_v40  ;;  %v7333_v39 = vld [vmem:[%s9423_s1 + $0x680] sm:$0xff]   ;;  %v7334_v40 = vld [vmem:[%s9423_s1 + $0x648] sm:$0xff]  }
  0x92   :  { %6585 = vmatprep.subr.bf16.mxu1 %v7275_v41  ;;  %v7335_v41 = vld [vmem:[%s9423_s1 + $0x6c8] sm:$0xff]  }
  0x94   :  { %6564 = vmatpush3.bf16.msra.mxu0 %v7276_v42  ;;  %v7336_v42 = vld [vmem:[%s9423_s1 + $0x608] sm:$0xff]  }
  0x95   :  { %6586 = vmatpush3.bf16.msra.mxu1 %v7277_v43  ;;  %6565 = vmatprep.subr.bf16.mxu0 %v7278_v44  ;;  %v7337_v43 = vld [vmem:[%s9423_s1 + $0x688] sm:$0xff]   ;;  %v7338_v44 = vld [vmem:[%s9423_s1 + $0x650] sm:$0xff]  }
  0x96   :  { %6587 = vmatprep.subr.bf16.mxu1 %v7279_v45  ;;  %v7339_v45 = vld [vmem:[%s9423_s1 + $0x6d0] sm:$0xff]  }
  0x98   :  { %6566 = vmatpush3.bf16.msra.mxu0 %v7280_v46  ;;  %v7340_v46 = vld [vmem:[%s9423_s1 + $0x610] sm:$0xff]  }
  0x99   :  { %6588 = vmatpush3.bf16.msra.mxu1 %v7281_v47  ;;  %6567 = vmatprep.subr.bf16.mxu0 %v7282_v48  ;;  %v7341_v47 = vld [vmem:[%s9423_s1 + $0x690] sm:$0xff]   ;;  %v7342_v48 = vld [vmem:[%s9423_s1 + $0x658] sm:$0xff]  }
  0x9a   :  { %6589 = vmatprep.subr.bf16.mxu1 %v7283_v49  ;;  %v7343_v49 = vld [vmem:[%s9423_s1 + $0x6d8] sm:$0xff]  }
  0x9c   :  { %6568 = vmatpush3.bf16.msra.mxu0 %v7284_v50  ;;  %v7344_v50 = vld [vmem:[%s9423_s1 + $0x618] sm:$0xff]  }
  0x9d   :  { %6590 = vmatpush3.bf16.msra.mxu1 %v7285_v51  ;;  %6569 = vmatprep.subr.bf16.mxu0 %v7286_v52  ;;  %v7345_v51 = vld [vmem:[%s9423_s1 + $0x698] sm:$0xff]   ;;  %v7346_v52 = vld [vmem:[%s9423_s1 + $0x660] sm:$0xff]  }
  0x9e   :  { %6591 = vmatprep.subr.bf16.mxu1 %v7287_v53  ;;  %v7347_v53 = vld [vmem:[%s9423_s1 + $0x6e0] sm:$0xff]  }
  0xa0   :  { %6570 = vmatpush3.bf16.msra.mxu0 %v7288_v54  ;;  %v7348_v54 = vld [vmem:[%s9423_s1 + $0x620] sm:$0xff]  }
  0xa1   :  { %6592 = vmatpush3.bf16.msra.mxu1 %v7289_v55  ;;  %6599 = vmatprep.subr.bf16.mxu0 %v7294_v62  ;;  %v7349_v55 = vld [vmem:[%s9423_s1 + $0x6a0] sm:$0xff]   ;;  %v7356_v62 = vld [vmem:[%s9423_s1 + $0x630] sm:$0xff]  }
  0xa2   :  { %6621 = vmatprep.subr.bf16.mxu1 %v7295_v63  ;;  %v7357_v63 = vld [vmem:[%s9423_s1 + $0x6b0] sm:$0xff]  }
  0xa3   :  { %4733 = vmatmul.mubr.bf16.vlgmr.msra.gmra.mrb[16].mxu0 %v5810_v57  ;;  %v7351_v57 = vld [vmem:[%s9423_s1 + $0x6e8] sm:$0xff]  }
  0xa4   :  { %4773 = vmatmul.mubr.bf16.vlgmr.msra.gmra.mrb[16].mxu1 %v5812_v60  ;;  %6600 = vmatpush3.bf16.msra.mxu0 %v7296_v0  ;;  %v7354_v60 = vld [vmem:[%s9423_s1 + $0x670] sm:$0xff]   ;;  %v7358_v0 = vld [vmem:[%s9423_s1 + $0x678] sm:$0xff]  }
  0xa5   :  { %6622 = vmatpush3.bf16.msra.mxu1 %v7297_v1  ;;  %6601 = vmatprep.subr.bf16.mxu0 %v7298_v2  ;;  %v7359_v1 = vld [vmem:[%s9423_s1 + $0x6f8] sm:$0xff]  }
  0xa6   :  { %6623 = vmatprep.subr.bf16.mxu1 %v7299_v3  ;;  %4812 = vmatprep.mubr.bf16.mxu0 %v5815_v33  ;;  %v7360_v2 = vld [vmem:[%s9423_s1 + $0x638] sm:$0xff]  }
  0xa7   :  { %4852 = vmatprep.mubr.bf16.mxu1 %v5817_v35  ;;  %v7361_v3 = vld [vmem:[%s9423_s1 + $0x6b8] sm:$0xff]  }
  0xa8   :  { %6602 = vmatpush3.bf16.msra.mxu0 %v7300_v4  ;;  %v33_v4 = vld [vmem:[%s9424_s0 + $0x60] sm:$0xff] }
  0xa9   :  { %6624 = vmatpush3.bf16.msra.mxu1 %v7301_v5  ;;  %6603 = vmatprep.subr.bf16.mxu0 %v7302_v6  ;;  %v34_v5 = vld [vmem:[%s9424_s0 + $0x68] sm:$0xff]  ;;  %v5818_v6 = vcombine.low %v33_v4, %v33_v4 }
  0xaa   :  { %6625 = vmatprep.subr.bf16.mxu1 %v7303_v7  ;;  %v5819_v7 = vcombine.high %v33_v4, %v33_v4  ;;  %v7409_v4 = vld [vmem:[%s9423_s1 + $0x888] sm:$0xff]  }
  0xac   :  { %6604 = vmatpush3.bf16.msra.mxu0 %v7304_v8  ;;  %v5820_v8 = vcombine.low %v34_v5, %v34_v5 }
  0xad   :  { %6626 = vmatpush3.bf16.msra.mxu1 %v7305_v9  ;;  %6605 = vmatprep.subr.bf16.mxu0 %v7306_v10  ;;  %v7366_v9 = vld [vmem:[%s9423_s1 + $0x740] sm:$0xff]   ;;  %v5821_v10 = vcombine.high %v34_v5, %v34_v5  ;;  %v7410_v5 = vld [vmem:[%s9423_s1 + $0x850] sm:$0xff]  }
  0xae   :  { %6627 = vmatprep.subr.bf16.mxu1 %v7307_v11  ;;  %v7367_v11 = vld [vmem:[%s9423_s1 + $0x7c0] sm:$0xff]  }
  0xb0   :  { %6606 = vmatpush3.bf16.msra.mxu0 %v7308_v12  ;;  %v7368_v12 = vld [vmem:[%s9423_s1 + $0x700] sm:$0xff]  }
  0xb1   :  { %6628 = vmatpush3.bf16.msra.mxu1 %v7309_v13  ;;  %6607 = vmatprep.subr.bf16.mxu0 %v7310_v14  ;;  %v7369_v13 = vld [vmem:[%s9423_s1 + $0x780] sm:$0xff]   ;;  %v7370_v14 = vld [vmem:[%s9423_s1 + $0x748] sm:$0xff]  }
  0xb2   :  { %6629 = vmatprep.subr.bf16.mxu1 %v7311_v15  ;;  %v7371_v15 = vld [vmem:[%s9423_s1 + $0x7c8] sm:$0xff]  }
  0xb4   :  { %6608 = vmatpush3.bf16.msra.mxu0 %v7312_v16  ;;  %v7372_v16 = vld [vmem:[%s9423_s1 + $0x708] sm:$0xff]  }
  0xb5   :  { %6630 = vmatpush3.bf16.msra.mxu1 %v7313_v17  ;;  %6609 = vmatprep.subr.bf16.mxu0 %v7314_v18  ;;  %v7373_v17 = vld [vmem:[%s9423_s1 + $0x788] sm:$0xff]   ;;  %v7374_v18 = vld [vmem:[%s9423_s1 + $0x750] sm:$0xff]  }
  0xb6   :  { %6631 = vmatprep.subr.bf16.mxu1 %v7315_v19  ;;  %v7375_v19 = vld [vmem:[%s9423_s1 + $0x7d0] sm:$0xff]  }
  0xb8   :  { %6610 = vmatpush3.bf16.msra.mxu0 %v7316_v20  ;;  %v7376_v20 = vld [vmem:[%s9423_s1 + $0x710] sm:$0xff]  }
  0xb9   :  { %6632 = vmatpush3.bf16.msra.mxu1 %v7317_v21  ;;  %6611 = vmatprep.subr.bf16.mxu0 %v7318_v22  ;;  %v7377_v21 = vld [vmem:[%s9423_s1 + $0x790] sm:$0xff]   ;;  %v7378_v22 = vld [vmem:[%s9423_s1 + $0x758] sm:$0xff]  }
  0xba   :  { %6633 = vmatprep.subr.bf16.mxu1 %v7319_v23  ;;  %v7379_v23 = vld [vmem:[%s9423_s1 + $0x7d8] sm:$0xff]  }
  0xbc   :  { %6612 = vmatpush3.bf16.msra.mxu0 %v7320_v24  ;;  %v7380_v24 = vld [vmem:[%s9423_s1 + $0x718] sm:$0xff]  }
  0xbd   :  { %6634 = vmatpush3.bf16.msra.mxu1 %v7321_v25  ;;  %6613 = vmatprep.subr.bf16.mxu0 %v7322_v26  ;;  %v7381_v25 = vld [vmem:[%s9423_s1 + $0x798] sm:$0xff]   ;;  %v7382_v26 = vld [vmem:[%s9423_s1 + $0x760] sm:$0xff]  }
  0xbe   :  { %6635 = vmatprep.subr.bf16.mxu1 %v7323_v27  ;;  %v7383_v27 = vld [vmem:[%s9423_s1 + $0x7e0] sm:$0xff]  }
  0xc0   :  { %6614 = vmatpush3.bf16.msra.mxu0 %v7324_v28  ;;  %v7384_v28 = vld [vmem:[%s9423_s1 + $0x720] sm:$0xff]  }
  0xc1   :  { %6636 = vmatpush3.bf16.msra.mxu1 %v7325_v29  ;;  %6643 = vmatprep.subr.bf16.mxu0 %v7330_v36 }
  0xc2   :  { %6665 = vmatprep.subr.bf16.mxu1 %v7331_v37  ;;  %v7386_v37 = vld [vmem:[%s9423_s1 + $0x768] sm:$0xff]  }
  0xc3   :  { %4813 = vmatmul.mubr.bf16.vlgmr.msra.gmra.mrb[20].mxu0 %v5814_v32  ;;  %v5793_v32 = vld [vmem:[%s9425_s2] ss:$0 sm:$0xff] }
  0xc4   :  { %4853 = vmatmul.mubr.bf16.vlgmr.msra.gmra.mrb[20].mxu1 %v5816_v34  ;;  %6644 = vmatpush3.bf16.msra.mxu0 %v7332_v38 }
  0xc5   :  { %6666 = vmatpush3.bf16.msra.mxu1 %v7333_v39  ;;  %6645 = vmatprep.subr.bf16.mxu0 %v7334_v40  ;;  %v7387_v39 = vld [vmem:[%s9423_s1 + $0x7e8] sm:$0xff]  }
  0xc6   :  { %6667 = vmatprep.subr.bf16.mxu1 %v7335_v41  ;;  %4892 = vmatprep.mubr.bf16.mxu0 %v5819_v7  ;;  %v7412_v7 = vld [vmem:[%s9423_s1 + $0x810] sm:$0xff]  }
  0xc7   :  { %4932 = vmatprep.mubr.bf16.mxu1 %v5821_v10  ;;  %v7415_v10 = vld [vmem:[%s9423_s1 + $0x8d8] sm:$0xff]  }
  0xc8   :  { %6646 = vmatpush3.bf16.msra.mxu0 %v7336_v42  ;;  %v7388_v42 = vld [vmem:[%s9423_s1 + $0x728] sm:$0xff]  }
  0xc9   :  { %6668 = vmatpush3.bf16.msra.mxu1 %v7337_v43  ;;  %6647 = vmatprep.subr.bf16.mxu0 %v7338_v44  ;;  %v7389_v44 = vld [vmem:[%s9423_s1 + $0x7a8] sm:$0xff]  }
  0xca   :  { %6669 = vmatprep.subr.bf16.mxu1 %v7339_v45 }
  0xcc   :  { %6648 = vmatpush3.bf16.msra.mxu0 %v7340_v46 }
  0xcd   :  { %6670 = vmatpush3.bf16.msra.mxu1 %v7341_v47  ;;  %6649 = vmatprep.subr.bf16.mxu0 %v7342_v48  ;;  %v7390_v47 = vld [vmem:[%s9423_s1 + $0x770] sm:$0xff]  }
  0xce   :  { %6671 = vmatprep.subr.bf16.mxu1 %v7343_v49  ;;  %v7391_v48 = vld [vmem:[%s9423_s1 + $0x7f0] sm:$0xff]  }
  0xcf   :  { %v7392_v49 = vld [vmem:[%s9423_s1 + $0x730] sm:$0xff]  }
  0xd0   :  { %6650 = vmatpush3.bf16.msra.mxu0 %v7344_v50  ;;  %v7393_v50 = vld [vmem:[%s9423_s1 + $0x7b0] sm:$0xff]  }
  0xd1   :  { %6672 = vmatpush3.bf16.msra.mxu1 %v7345_v51  ;;  %6651 = vmatprep.subr.bf16.mxu0 %v7346_v52  ;;  %v7394_v51 = vld [vmem:[%s9423_s1 + $0x778] sm:$0xff]  }
  0xd2   :  { %6673 = vmatprep.subr.bf16.mxu1 %v7347_v53  ;;  %v7395_v52 = vld [vmem:[%s9423_s1 + $0x7f8] sm:$0xff]  }
  0xd3   :  { %v7396_v53 = vld [vmem:[%s9423_s1 + $0x738] sm:$0xff]  }
  0xd4   :  { %6652 = vmatpush3.bf16.msra.mxu0 %v7348_v54  ;;  %v7397_v54 = vld [vmem:[%s9423_s1 + $0x7b8] sm:$0xff]  }
  0xd5   :  { %6674 = vmatpush3.bf16.msra.mxu1 %v7349_v55  ;;  %6653 = vmatprep.subr.bf16.mxu0 %v7350_v56  ;;  %v35_v55 = vld [vmem:[%s9424_s0 + $0x70] sm:$0xff]  ;;  %v36_v56 = vld [vmem:[%s9424_s0 + $0x78] sm:$0xff] }
  0xd6   :  { %6675 = vmatprep.subr.bf16.mxu1 %v7351_v57  ;;  %v5822_v57 = vcombine.low %v35_v55, %v35_v55 }
  0xd8   :  { %6654 = vmatpush3.bf16.msra.mxu0 %v7352_v58  ;;  %v5823_v58 = vcombine.high %v35_v55, %v35_v55  ;;  %v7446_v55 = vld [vmem:[%s9423_s1 + $0x950] sm:$0xff]  }
  0xd9   :  { %6676 = vmatpush3.bf16.msra.mxu1 %v7353_v59  ;;  %6655 = vmatprep.subr.bf16.mxu0 %v7354_v60  ;;  %v5824_v59 = vcombine.low %v36_v56, %v36_v56  ;;  %v5825_v60 = vcombine.high %v36_v56, %v36_v56  ;;  %v7447_v56 = vld [vmem:[%s9423_s1 + $0x9d0] sm:$0xff]  }
  0xda   :  { %6677 = vmatprep.subr.bf16.mxu1 %v7355_v61  ;;  %v7402_v61 = vld [vmem:[%s9423_s1 + $0x840] sm:$0xff]  }
  0xdc   :  { %6656 = vmatpush3.bf16.msra.mxu0 %v7356_v62  ;;  %v7403_v62 = vld [vmem:[%s9423_s1 + $0x8c0] sm:$0xff]  }
  0xdd   :  { %6678 = vmatpush3.bf16.msra.mxu1 %v7357_v63  ;;  %6657 = vmatprep.subr.bf16.mxu0 %v7358_v0  ;;  %v7404_v63 = vld [vmem:[%s9423_s1 + $0x800] sm:$0xff]  }
  0xde   :  { %6679 = vmatprep.subr.bf16.mxu1 %v7359_v1  ;;  %v7405_v0 = vld [vmem:[%s9423_s1 + $0x880] sm:$0xff]   ;;  %v7406_v1 = vld [vmem:[%s9423_s1 + $0x848] sm:$0xff]  }
  0xe0   :  { %6658 = vmatpush3.bf16.msra.mxu0 %v7360_v2  ;;  %v7407_v2 = vld [vmem:[%s9423_s1 + $0x8c8] sm:$0xff]  }
  0xe1   :  { %6680 = vmatpush3.bf16.msra.mxu1 %v7361_v3  ;;  %6687 = vmatprep.subr.bf16.mxu0 %v7366_v9  ;;  %v7408_v3 = vld [vmem:[%s9423_s1 + $0x808] sm:$0xff]   ;;  %v7414_v9 = vld [vmem:[%s9423_s1 + $0x858] sm:$0xff]  }
  0xe2   :  { %6709 = vmatprep.subr.bf16.mxu1 %v7367_v11  ;;  %v7416_v11 = vld [vmem:[%s9423_s1 + $0x818] sm:$0xff]  }
  0xe3   :  { %4893 = vmatmul.mubr.bf16.vlgmr.msra.gmra.mrb[24].mxu0 %v5818_v6  ;;  %v7411_v6 = vld [vmem:[%s9423_s1 + $0x8d0] sm:$0xff]  }
  0xe4   :  { %4933 = vmatmul.mubr.bf16.vlgmr.msra.gmra.mrb[24].mxu1 %v5820_v8  ;;  %6688 = vmatpush3.bf16.msra.mxu0 %v7368_v12  ;;  %v7413_v8 = vld [vmem:[%s9423_s1 + $0x890] sm:$0xff]   ;;  %v7417_v12 = vld [vmem:[%s9423_s1 + $0x898] sm:$0xff]  }
  0xe5   :  { %6710 = vmatpush3.bf16.msra.mxu1 %v7369_v13  ;;  %6689 = vmatprep.subr.bf16.mxu0 %v7370_v14  ;;  %v7418_v13 = vld [vmem:[%s9423_s1 + $0x860] sm:$0xff]  }
  0xe6   :  { %6711 = vmatprep.subr.bf16.mxu1 %v7371_v15  ;;  %4972 = vmatprep.mubr.bf16.mxu0 %v5823_v58  ;;  %v7419_v14 = vld [vmem:[%s9423_s1 + $0x8e0] sm:$0xff]   ;;  %v7449_v58 = vld [vmem:[%s9423_s1 + $0x990] sm:$0xff]  }
  0xe7   :  { %5012 = vmatprep.mubr.bf16.mxu1 %v5825_v60  ;;  %v7420_v15 = vld [vmem:[%s9423_s1 + $0x820] sm:$0xff]   ;;  %v7451_v60 = vld [vmem:[%s9423_s1 + $0x9d8] sm:$0xff]  }
  0xe8   :  { %6690 = vmatpush3.bf16.msra.mxu0 %v7372_v16 }
  0xe9   :  { %6712 = vmatpush3.bf16.msra.mxu1 %v7373_v17  ;;  %6691 = vmatprep.subr.bf16.mxu0 %v7374_v18  ;;  %v7421_v17 = vld [vmem:[%s9423_s1 + $0x8a0] sm:$0xff]  }
  0xea   :  { %6713 = vmatprep.subr.bf16.mxu1 %v7375_v19 }
  0xec   :  { %6692 = vmatpush3.bf16.msra.mxu0 %v7376_v20 }
  0xed   :  { %6714 = vmatpush3.bf16.msra.mxu1 %v7377_v21  ;;  %6693 = vmatprep.subr.bf16.mxu0 %v7378_v22 }
  0xee   :  { %6715 = vmatprep.subr.bf16.mxu1 %v7379_v23  ;;  %v7422_v23 = vld [vmem:[%s9423_s1 + $0x868] sm:$0xff]  }
  0xf0   :  { %6694 = vmatpush3.bf16.msra.mxu0 %v7380_v24 }
  0xf1   :  { %6716 = vmatpush3.bf16.msra.mxu1 %v7381_v25  ;;  %6695 = vmatprep.subr.bf16.mxu0 %v7382_v26  ;;  %v7423_v25 = vld [vmem:[%s9423_s1 + $0x8e8] sm:$0xff]  }
  0xf2   :  { %6717 = vmatprep.subr.bf16.mxu1 %v7383_v27 }
  0xf4   :  { %6696 = vmatpush3.bf16.msra.mxu0 %v7384_v28  ;;  %v7424_v28 = vld [vmem:[%s9423_s1 + $0x828] sm:$0xff]  }
  0xf5   :  { %6718 = vmatpush3.bf16.msra.mxu1 %v7385_v30  ;;  %6697 = vmatprep.subr.bf16.mxu0 %v7386_v37  ;;  %v7425_v30 = vld [vmem:[%s9423_s1 + $0x8a8] sm:$0xff]   ;;  %v7430_v37 = vld [vmem:[%s9423_s1 + $0x878] sm:$0xff]  }
  0xf6   :  { %v6395_v29 = vpop.f32.mrb[0].mxu0  ;;  %6719 = vmatprep.subr.bf16.mxu1 %v7387_v39  ;;  %v7432_v39 = vld [vmem:[%s9423_s1 + $0x838] sm:$0xff]  }
  0xf7   :  { %v6417_v31 = vpop.f32.mrb[0].mxu1  ;;  %v6396_v33 = vpop.f32.mrb[1].mxu0 }
  0xf8   :  { %v6418_v34 = vpop.f32.mrb[1].mxu1  ;;  %v6397_v35 = vadd.f32 %v6396_v33, %v6395_v29  ;;  %v6398_v38 = vpop.f32.mrb[2].mxu0  ;;  %6698 = vmatpush3.bf16.msra.mxu0 %v7388_v42  ;;  %v7426_v33 = vld [vmem:[%s9423_s1 + $0x870] sm:$0xff]   ;;  %v38_v42 = vld [vmem:[%s9424_s0 + $0x88] sm:$0xff] }
  0xf9   :  { %v6419_v36 = vadd.f32 %v6418_v34, %v6417_v31  ;;  %v6420_v40 = vpop.f32.mrb[2].mxu1  ;;  %v6399_v43 = vpop.f32.mrb[3].mxu0  ;;  %6720 = vmatpush3.bf16.msra.mxu1 %v7389_v44  ;;  %6699 = vmatprep.subr.bf16.mxu0 %v7390_v47  ;;  %v7427_v34 = vld [vmem:[%s9423_s1 + $0x8f0] sm:$0xff]   ;;  %v7431_v38 = vld [vmem:[%s9423_s1 + $0x8f8] sm:$0xff]   ;;  %v7438_v47 = vld [vmem:[%s9423_s1 + $0x940] sm:$0xff]  }
  0xfa   :  { %v4415_v41 = vadd.f32 %v6397_v35, %v5793_v32  ;;  %v6421_v45 = vpop.f32.mrb[3].mxu1  ;;  %6721 = vmatprep.subr.bf16.mxu1 %v7391_v48  ;;  %v7428_v35 = vld [vmem:[%s9423_s1 + $0x830] sm:$0xff]   ;;  %v7433_v40 = vld [vmem:[%s9423_s1 + $0x8b8] sm:$0xff]   ;;  %v7439_v48 = vld [vmem:[%s9423_s1 + $0x9c0] sm:$0xff]  }
  0xfb   :  { %v5828_v45 = vcombine.low %v38_v42, %v38_v42 }
  0xfc   :  { %v8523_v46 = vadd.f32 %v6419_v36, %v4415_v41  ;;  %6700 = vmatpush3.bf16.msra.mxu0 %v7392_v49  ;;  %v7429_v36 = vld [vmem:[%s9423_s1 + $0x8b0] sm:$0xff]   ;;  %v37_v41 = vld [vmem:[%s9424_s0 + $0x80] sm:$0xff] }
  0xfd   :  { %6722 = vmatpush3.bf16.msra.mxu1 %v7393_v50  ;;  %6701 = vmatprep.subr.bf16.mxu0 %v7394_v51  ;;  %v5826_v43 = vcombine.low %v37_v41, %v37_v41  ;;  %v5827_v44 = vcombine.high %v37_v41, %v37_v41  ;;  %v7440_v49 = vld [vmem:[%s9423_s1 + $0x900] sm:$0xff]   ;;  %v7442_v51 = vld [vmem:[%s9423_s1 + $0x948] sm:$0xff]   ;;  %v7482_v41 = vld [vmem:[%s9423_s1 + $0xa50] sm:$0xff]  }
  0xfe   :  { %6723 = vmatprep.subr.bf16.mxu1 %v7395_v52  ;;  %v7441_v50 = vld [vmem:[%s9423_s1 + $0x980] sm:$0xff]   ;;  %v7443_v52 = vld [vmem:[%s9423_s1 + $0x9c8] sm:$0xff]  }
 0x100   :  { %6702 = vmatpush3.bf16.msra.mxu0 %v7396_v53  ;;  %v7444_v53 = vld [vmem:[%s9423_s1 + $0x908] sm:$0xff]  }
 0x101   :  { %6724 = vmatpush3.bf16.msra.mxu1 %v7397_v54  ;;  %6731 = vmatprep.subr.bf16.mxu0 %v7402_v61  ;;  %v7445_v54 = vld [vmem:[%s9423_s1 + $0x988] sm:$0xff]   ;;  %v7452_v61 = vld [vmem:[%s9423_s1 + $0x918] sm:$0xff]  }
 0x102   :  { %6753 = vmatprep.subr.bf16.mxu1 %v7403_v62  ;;  %v7453_v62 = vld [vmem:[%s9423_s1 + $0x998] sm:$0xff]  }
 0x103   :  { %4973 = vmatmul.mubr.bf16.vlgmr.msra.gmra.mrb[28].mxu0 %v5822_v57  ;;  %v7448_v57 = vld [vmem:[%s9423_s1 + $0x910] sm:$0xff]  }
 0x104   :  { %5013 = vmatmul.mubr.bf16.vlgmr.msra.gmra.mrb[28].mxu1 %v5824_v59  ;;  %6732 = vmatpush3.bf16.msra.mxu0 %v7404_v63  ;;  %v7450_v59 = vld [vmem:[%s9423_s1 + $0x958] sm:$0xff]   ;;  %v7454_v63 = vld [vmem:[%s9423_s1 + $0x960] sm:$0xff]  }
 0x105   :  { %6754 = vmatpush3.bf16.msra.mxu1 %v7405_v0  ;;  %6733 = vmatprep.subr.bf16.mxu0 %v7406_v1  ;;  %v7455_v0 = vld [vmem:[%s9423_s1 + $0x9e0] sm:$0xff]  }
 0x106   :  { %6755 = vmatprep.subr.bf16.mxu1 %v7407_v2  ;;  %5052 = vmatprep.mubr.bf16.mxu0 %v5827_v44  ;;  %v7456_v2 = vld [vmem:[%s9423_s1 + $0x920] sm:$0xff]   ;;  %v7485_v44 = vld [vmem:[%s9423_s1 + $0xa90] sm:$0xff]  }
 0x108   :  { %6734 = vmatpush3.bf16.msra.mxu0 %v7408_v3 }
 0x109   :  { %6756 = vmatpush3.bf16.msra.mxu1 %v7409_v4  ;;  %6735 = vmatprep.subr.bf16.mxu0 %v7410_v5  ;;  %v7457_v4 = vld [vmem:[%s9423_s1 + $0x9a0] sm:$0xff]  }
 0x10a   :  { %6757 = vmatprep.subr.bf16.mxu1 %v7411_v6 }
 0x10c   :  { %6736 = vmatpush3.bf16.msra.mxu0 %v7412_v7 }
 0x10d   :  { %6758 = vmatpush3.bf16.msra.mxu1 %v7413_v8  ;;  %6737 = vmatprep.subr.bf16.mxu0 %v7414_v9  ;;  %v7458_v8 = vld [vmem:[%s9423_s1 + $0x968] sm:$0xff]  }
 0x10e   :  { %6759 = vmatprep.subr.bf16.mxu1 %v7415_v10  ;;  %v7459_v10 = vld [vmem:[%s9423_s1 + $0x9e8] sm:$0xff]  }
 0x110   :  { %6738 = vmatpush3.bf16.msra.mxu0 %v7416_v11 }
 0x111   :  { %6760 = vmatpush3.bf16.msra.mxu1 %v7417_v12  ;;  %6739 = vmatprep.subr.bf16.mxu0 %v7418_v13 }
 0x112   :  { %6761 = vmatprep.subr.bf16.mxu1 %v7419_v14  ;;  %v7460_v14 = vld [vmem:[%s9423_s1 + $0x928] sm:$0xff]  }
 0x114   :  { %6740 = vmatpush3.bf16.msra.mxu0 %v7420_v15  ;;  %v7461_v15 = vld [vmem:[%s9423_s1 + $0x9a8] sm:$0xff]  }
 0x115   :  { %6762 = vmatpush3.bf16.msra.mxu1 %v7421_v17  ;;  %6741 = vmatprep.subr.bf16.mxu0 %v7422_v23  ;;  %v7466_v23 = vld [vmem:[%s9423_s1 + $0x978] sm:$0xff]  }
 0x116   :  { %v6439_v16 = vpop.f32.mrb[4].mxu0  ;;  %6763 = vmatprep.subr.bf16.mxu1 %v7423_v25  ;;  %v7468_v25 = vld [vmem:[%s9423_s1 + $0x938] sm:$0xff]  }
 0x117   :  { %v6461_v18 = vpop.f32.mrb[4].mxu1  ;;  %v6440_v19 = vpop.f32.mrb[5].mxu0 }
 0x118   :  { %v6462_v20 = vpop.f32.mrb[5].mxu1  ;;  %v6441_v21 = vadd.f32 %v6440_v19, %v6439_v16  ;;  %v6442_v24 = vpop.f32.mrb[6].mxu0  ;;  %6742 = vmatpush3.bf16.msra.mxu0 %v7424_v28  ;;  %v7462_v19 = vld [vmem:[%s9423_s1 + $0x970] sm:$0xff]   ;;  %v40_v28 = vld [vmem:[%s9424_s0 + $0x98] sm:$0xff] }
 0x119   :  { %v6463_v22 = vadd.f32 %v6462_v20, %v6461_v18  ;;  %v6464_v26 = vpop.f32.mrb[6].mxu1  ;;  %v6443_v29 = vpop.f32.mrb[7].mxu0  ;;  %6764 = vmatpush3.bf16.msra.mxu1 %v7425_v30  ;;  %6743 = vmatprep.subr.bf16.mxu0 %v7426_v33  ;;  %v7463_v20 = vld [vmem:[%s9423_s1 + $0x9f0] sm:$0xff]   ;;  %v7467_v24 = vld [vmem:[%s9423_s1 + $0x9f8] sm:$0xff]   ;;  %v5833_v33 = vcombine.high %v40_v28, %v40_v28 }
 0x11a   :  { %v4495_v27 = vadd.f32 %v6441_v21, %v8523_v46  ;;  %v6465_v31 = vpop.f32.mrb[7].mxu1  ;;  %6765 = vmatprep.subr.bf16.mxu1 %v7427_v34  ;;  %v5829_v46 = vcombine.high %v38_v42, %v38_v42  ;;  %v7464_v21 = vld [vmem:[%s9423_s1 + $0x930] sm:$0xff]   ;;  %v7469_v26 = vld [vmem:[%s9423_s1 + $0x9b8] sm:$0xff]   ;;  %v7475_v34 = vld [vmem:[%s9423_s1 + $0xac0] sm:$0xff]  }
 0x11b   :  { %v5832_v31 = vcombine.low %v40_v28, %v40_v28  ;;  %v7483_v42 = vld [vmem:[%s9423_s1 + $0xad0] sm:$0xff]  }
 0x11c   :  { %v8628_v32 = vadd.f32 %v6463_v22, %v4495_v27  ;;  %6744 = vmatpush3.bf16.msra.mxu0 %v7428_v35  ;;  %5092 = vmatprep.mubr.bf16.mxu1 %v5829_v46  ;;  %v7465_v22 = vld [vmem:[%s9423_s1 + $0x9b0] sm:$0xff]   ;;  %v7476_v35 = vld [vmem:[%s9423_s1 + $0xa00] sm:$0xff]   ;;  %v7487_v46 = vld [vmem:[%s9423_s1 + $0xad8] sm:$0xff]  }
 0x11d   :  { %6766 = vmatpush3.bf16.msra.mxu1 %v7429_v36  ;;  %6745 = vmatprep.subr.bf16.mxu0 %v7430_v37  ;;  %v39_v27 = vld [vmem:[%s9424_s0 + $0x90] sm:$0xff]  ;;  %v7477_v36 = vld [vmem:[%s9423_s1 + $0xa80] sm:$0xff]   ;;  %v7478_v37 = vld [vmem:[%s9423_s1 + $0xa48] sm:$0xff]  }
 0x11e   :  { %6767 = vmatprep.subr.bf16.mxu1 %v7431_v38  ;;  %v5830_v29 = vcombine.low %v39_v27, %v39_v27  ;;  %v5831_v30 = vcombine.high %v39_v27, %v39_v27  ;;  %v7479_v38 = vld [vmem:[%s9423_s1 + $0xac8] sm:$0xff]   ;;  %v7518_v27 = vld [vmem:[%s9423_s1 + $0xb50] sm:$0xff]  }
 0x11f   :  { %v7519_v28 = vld [vmem:[%s9423_s1 + $0xbd0] sm:$0xff]  }
 0x120   :  { %6746 = vmatpush3.bf16.msra.mxu0 %v7432_v39  ;;  %v7480_v39 = vld [vmem:[%s9423_s1 + $0xa08] sm:$0xff]  }
 0x121   :  { %6768 = vmatpush3.bf16.msra.mxu1 %v7433_v40  ;;  %6775 = vmatprep.subr.bf16.mxu0 %v7438_v47  ;;  %v7481_v40 = vld [vmem:[%s9423_s1 + $0xa88] sm:$0xff]   ;;  %v7488_v47 = vld [vmem:[%s9423_s1 + $0xa18] sm:$0xff]  }
 0x122   :  { %6797 = vmatprep.subr.bf16.mxu1 %v7439_v48  ;;  %v7489_v48 = vld [vmem:[%s9423_s1 + $0xa98] sm:$0xff]  }
 0x123   :  { %5053 = vmatmul.mubr.bf16.vlgmr.msra.gmra.mrb[32].mxu0 %v5826_v43  ;;  %v7484_v43 = vld [vmem:[%s9423_s1 + $0xa10] sm:$0xff]  }
 0x124   :  { %5093 = vmatmul.mubr.bf16.vlgmr.msra.gmra.mrb[32].mxu1 %v5828_v45  ;;  %6776 = vmatpush3.bf16.msra.mxu0 %v7440_v49  ;;  %v7486_v45 = vld [vmem:[%s9423_s1 + $0xa58] sm:$0xff]   ;;  %v7490_v49 = vld [vmem:[%s9423_s1 + $0xa60] sm:$0xff]  }
 0x125   :  { %6798 = vmatpush3.bf16.msra.mxu1 %v7441_v50  ;;  %6777 = vmatprep.subr.bf16.mxu0 %v7442_v51  ;;  %v7491_v50 = vld [vmem:[%s9423_s1 + $0xae0] sm:$0xff]  }
 0x126   :  { %6799 = vmatprep.subr.bf16.mxu1 %v7443_v52  ;;  %5132 = vmatprep.mubr.bf16.mxu0 %v5831_v30  ;;  %v7492_v52 = vld [vmem:[%s9423_s1 + $0xa20] sm:$0xff]   ;;  %v7521_v30 = vld [vmem:[%s9423_s1 + $0xb90] sm:$0xff]  }
 0x127   :  { %5172 = vmatprep.mubr.bf16.mxu1 %v5833_v33  ;;  %v7524_v33 = vld [vmem:[%s9423_s1 + $0xb18] sm:$0xff]  }
 0x128   :  { %6778 = vmatpush3.bf16.msra.mxu0 %v7444_v53 }
 0x129   :  { %6800 = vmatpush3.bf16.msra.mxu1 %v7445_v54  ;;  %6779 = vmatprep.subr.bf16.mxu0 %v7446_v55  ;;  %v7493_v54 = vld [vmem:[%s9423_s1 + $0xaa0] sm:$0xff]  }
 0x12a   :  { %6801 = vmatprep.subr.bf16.mxu1 %v7447_v56 }
 0x12c   :  { %6780 = vmatpush3.bf16.msra.mxu0 %v7448_v57  ;;  %v7494_v57 = vld [vmem:[%s9423_s1 + $0xa68] sm:$0xff]  }
 0x12d   :  { %6802 = vmatpush3.bf16.msra.mxu1 %v7449_v58  ;;  %6781 = vmatprep.subr.bf16.mxu0 %v7450_v59 }
 0x12e   :  { %6803 = vmatprep.subr.bf16.mxu1 %v7451_v60  ;;  %v7495_v60 = vld [vmem:[%s9423_s1 + $0xae8] sm:$0xff]  }
 0x130   :  { %6782 = vmatpush3.bf16.msra.mxu0 %v7452_v61 }
 0x131   :  { %6804 = vmatpush3.bf16.msra.mxu1 %v7453_v62  ;;  %6783 = vmatprep.subr.bf16.mxu0 %v7454_v63  ;;  %v7496_v63 = vld [vmem:[%s9423_s1 + $0xa28] sm:$0xff]  }
 0x132   :  { %6805 = vmatprep.subr.bf16.mxu1 %v7455_v0 }
 0x134   :  { %6784 = vmatpush3.bf16.msra.mxu0 %v7456_v2 }
 0x135   :  { %6806 = vmatpush3.bf16.msra.mxu1 %v7457_v4  ;;  %6785 = vmatprep.subr.bf16.mxu0 %v7458_v8  ;;  %v7498_v4 = vld [vmem:[%s9423_s1 + $0xa70] sm:$0xff]  }
 0x136   :  { %v6483_v1 = vpop.f32.mrb[8].mxu0  ;;  %6807 = vmatprep.subr.bf16.mxu1 %v7459_v10  ;;  %v7501_v8 = vld [vmem:[%s9423_s1 + $0xab0] sm:$0xff]   ;;  %v7503_v10 = vld [vmem:[%s9423_s1 + $0xaf8] sm:$0xff]  }
 0x137   :  { %v6505_v3 = vpop.f32.mrb[8].mxu1  ;;  %v6484_v5 = vpop.f32.mrb[9].mxu0 }
 0x138   :  { %v6485_v6 = vadd.f32 %v6484_v5, %v6483_v1  ;;  %v6506_v7 = vpop.f32.mrb[9].mxu1  ;;  %v6486_v11 = vpop.f32.mrb[10].mxu0  ;;  %6786 = vmatpush3.bf16.msra.mxu0 %v7460_v14  ;;  %v7497_v1 = vld [vmem:[%s9423_s1 + $0xaa8] sm:$0xff]  }
 0x139   :  { %v6507_v9 = vadd.f32 %v6506_v7, %v6505_v3  ;;  %v6508_v13 = vpop.f32.mrb[10].mxu1  ;;  %v6487_v16 = vpop.f32.mrb[11].mxu0  ;;  %6808 = vmatpush3.bf16.msra.mxu1 %v7461_v15  ;;  %6787 = vmatprep.subr.bf16.mxu0 %v7462_v19  ;;  %v7500_v7 = vld [vmem:[%s9423_s1 + $0xa30] sm:$0xff]   ;;  %v7504_v11 = vld [vmem:[%s9423_s1 + $0xa38] sm:$0xff]   ;;  %v7510_v19 = vld [vmem:[%s9423_s1 + $0xb40] sm:$0xff]  }
 0x13a   :  { %v4575_v12 = vadd.f32 %v6485_v6, %v8628_v32  ;;  %v6509_v18 = vpop.f32.mrb[11].mxu1  ;;  %6809 = vmatprep.subr.bf16.mxu1 %v7463_v20  ;;  %v7474_v32 = vld [vmem:[%s9423_s1 + $0xa40] sm:$0xff]   ;;  %v7499_v6 = vld [vmem:[%s9423_s1 + $0xaf0] sm:$0xff]   ;;  %v42_v16 = vld [vmem:[%s9424_s0 + $0xa8] sm:$0xff] }
 0x13b   :  { %v41_v13 = vld [vmem:[%s9424_s0 + $0xa0] sm:$0xff]  ;;  %v5837_v18 = vcombine.high %v42_v16, %v42_v16 }
 0x13c   :  { %v8733_v17 = vadd.f32 %v6507_v9, %v4575_v12  ;;  %6788 = vmatpush3.bf16.msra.mxu0 %v7464_v21  ;;  %v7502_v9 = vld [vmem:[%s9423_s1 + $0xa78] sm:$0xff]   ;;  %v5834_v14 = vcombine.low %v41_v13, %v41_v13  ;;  %v5835_v15 = vcombine.high %v41_v13, %v41_v13  ;;  %v7511_v20 = vld [vmem:[%s9423_s1 + $0xbc0] sm:$0xff]   ;;  %v7554_v13 = vld [vmem:[%s9423_s1 + $0xc50] sm:$0xff]  }
 0x13d   :  { %6810 = vmatpush3.bf16.msra.mxu1 %v7465_v22  ;;  %6789 = vmatprep.subr.bf16.mxu0 %v7466_v23  ;;  %v7505_v12 = vld [vmem:[%s9423_s1 + $0xab8] sm:$0xff]   ;;  %v7512_v21 = vld [vmem:[%s9423_s1 + $0xb00] sm:$0xff]   ;;  %v7514_v23 = vld [vmem:[%s9423_s1 + $0xb48] sm:$0xff]  }
 0x13e   :  { %6811 = vmatprep.subr.bf16.mxu1 %v7467_v24  ;;  %v7513_v22 = vld [vmem:[%s9423_s1 + $0xb80] sm:$0xff]   ;;  %v7515_v24 = vld [vmem:[%s9423_s1 + $0xbc8] sm:$0xff]  }
 0x140   :  { %6790 = vmatpush3.bf16.msra.mxu0 %v7468_v25  ;;  %v7516_v25 = vld [vmem:[%s9423_s1 + $0xb08] sm:$0xff]  }
 0x141   :  { %6812 = vmatpush3.bf16.msra.mxu1 %v7469_v26  ;;  %6819 = vmatprep.subr.bf16.mxu0 %v7474_v32  ;;  %v7517_v26 = vld [vmem:[%s9423_s1 + $0xb88] sm:$0xff]   ;;  %v7523_v32 = vld [vmem:[%s9423_s1 + $0xbd8] sm:$0xff]  }
 0x142   :  { %6841 = vmatprep.subr.bf16.mxu1 %v7475_v34  ;;  %v7525_v34 = vld [vmem:[%s9423_s1 + $0xb98] sm:$0xff]  }
 0x143   :  { %5133 = vmatmul.mubr.bf16.vlgmr.msra.gmra.mrb[36].mxu0 %v5830_v29  ;;  %v7520_v29 = vld [vmem:[%s9423_s1 + $0xb10] sm:$0xff]  }
 0x144   :  { %5173 = vmatmul.mubr.bf16.vlgmr.msra.gmra.mrb[36].mxu1 %v5832_v31  ;;  %6820 = vmatpush3.bf16.msra.mxu0 %v7476_v35  ;;  %v7522_v31 = vld [vmem:[%s9423_s1 + $0xb58] sm:$0xff]   ;;  %v7526_v35 = vld [vmem:[%s9423_s1 + $0xb60] sm:$0xff]  }
 0x145   :  { %6842 = vmatpush3.bf16.msra.mxu1 %v7477_v36  ;;  %6821 = vmatprep.subr.bf16.mxu0 %v7478_v37  ;;  %v7527_v36 = vld [vmem:[%s9423_s1 + $0xbe0] sm:$0xff]  }
 0x146   :  { %6843 = vmatprep.subr.bf16.mxu1 %v7479_v38  ;;  %5212 = vmatprep.mubr.bf16.mxu0 %v5835_v15  ;;  %v7528_v38 = vld [vmem:[%s9423_s1 + $0xb20] sm:$0xff]   ;;  %v7556_v15 = vld [vmem:[%s9423_s1 + $0xc10] sm:$0xff]  }
 0x147   :  { %5252 = vmatprep.mubr.bf16.mxu1 %v5837_v18  ;;  %v7559_v18 = vld [vmem:[%s9423_s1 + $0xcd8] sm:$0xff]  }
 0x148   :  { %6822 = vmatpush3.bf16.msra.mxu0 %v7480_v39 }
 0x149   :  { %6844 = vmatpush3.bf16.msra.mxu1 %v7481_v40  ;;  %6823 = vmatprep.subr.bf16.mxu0 %v7482_v41  ;;  %v7529_v40 = vld [vmem:[%s9423_s1 + $0xba0] sm:$0xff]  }
 0x14a   :  { %6845 = vmatprep.subr.bf16.mxu1 %v7483_v42 }
 0x14c   :  { %6824 = vmatpush3.bf16.msra.mxu0 %v7484_v43  ;;  %v7530_v43 = vld [vmem:[%s9423_s1 + $0xb68] sm:$0xff]  }
 0x14d   :  { %6846 = vmatpush3.bf16.msra.mxu1 %v7485_v44  ;;  %6825 = vmatprep.subr.bf16.mxu0 %v7486_v45 }
 0x14e   :  { %6847 = vmatprep.subr.bf16.mxu1 %v7487_v46  ;;  %v7531_v46 = vld [vmem:[%s9423_s1 + $0xbe8] sm:$0xff]  }
 0x150   :  { %6826 = vmatpush3.bf16.msra.mxu0 %v7488_v47 }
 0x151   :  { %6848 = vmatpush3.bf16.msra.mxu1 %v7489_v48  ;;  %6827 = vmatprep.subr.bf16.mxu0 %v7490_v49  ;;  %v7532_v49 = vld [vmem:[%s9423_s1 + $0xb28] sm:$0xff]  }
 0x152   :  { %6849 = vmatprep.subr.bf16.mxu1 %v7491_v50 }
 0x154   :  { %6828 = vmatpush3.bf16.msra.mxu0 %v7492_v52 }
 0x155   :  { %6850 = vmatpush3.bf16.msra.mxu1 %v7493_v54  ;;  %6829 = vmatprep.subr.bf16.mxu0 %v7494_v57  ;;  %v7534_v54 = vld [vmem:[%s9423_s1 + $0xb70] sm:$0xff]  }
 0x156   :  { %v6527_v51 = vpop.f32.mrb[12].mxu0  ;;  %6851 = vmatprep.subr.bf16.mxu1 %v7495_v60  ;;  %v7536_v57 = vld [vmem:[%s9423_s1 + $0xb30] sm:$0xff]   ;;  %v7539_v60 = vld [vmem:[%s9423_s1 + $0xbf8] sm:$0xff]  }
 0x157   :  { %v6549_v53 = vpop.f32.mrb[12].mxu1  ;;  %v6528_v55 = vpop.f32.mrb[13].mxu0 }
 0x158   :  { %v6550_v56 = vpop.f32.mrb[13].mxu1  ;;  %v6529_v58 = vadd.f32 %v6528_v55, %v6527_v51  ;;  %v6530_v61 = vpop.f32.mrb[14].mxu0  ;;  %6830 = vmatpush3.bf16.msra.mxu0 %v7496_v63  ;;  %v7533_v51 = vld [vmem:[%s9423_s1 + $0xba8] sm:$0xff]   ;;  %v43_v63 = vld [vmem:[%s9424_s0 + $0xb0] sm:$0xff] }
 0x159   :  { %v6551_v59 = vadd.f32 %v6550_v56, %v6549_v53  ;;  %v6552_v62 = vpop.f32.mrb[14].mxu1  ;;  %v6531_v2 = vpop.f32.mrb[15].mxu0  ;;  %6852 = vmatpush3.bf16.msra.mxu1 %v7497_v1  ;;  %6831 = vmatprep.subr.bf16.mxu0 %v7498_v4  ;;  %v7535_v56 = vld [vmem:[%s9423_s1 + $0xbf0] sm:$0xff]   ;;  %v7540_v61 = vld [vmem:[%s9423_s1 + $0xb38] sm:$0xff]   ;;  %v5838_v1 = vcombine.low %v43_v63, %v43_v63 }
 0x15a   :  { %v4655_v0 = vadd.f32 %v6529_v58, %v8733_v17  ;;  %v6553_v3 = vpop.f32.mrb[15].mxu1  ;;  %6853 = vmatprep.subr.bf16.mxu1 %v7499_v6  ;;  %v5836_v17 = vcombine.low %v42_v16, %v42_v16  ;;  %v7537_v58 = vld [vmem:[%s9423_s1 + $0xbb0] sm:$0xff]   ;;  %v7541_v62 = vld [vmem:[%s9423_s1 + $0xbb8] sm:$0xff]   ;;  %v5839_v2 = vcombine.high %v43_v63, %v43_v63  ;;  %v7547_v6 = vld [vmem:[%s9423_s1 + $0xcc0] sm:$0xff]  }
 0x15b   :  { %v7557_v16 = vld [vmem:[%s9423_s1 + $0xc90] sm:$0xff]  }
 0x15c   :  { %v8841_v5 = vadd.f32 %v6551_v59, %v4655_v0  ;;  %6832 = vmatpush3.bf16.msra.mxu0 %v7500_v7  ;;  %v7538_v59 = vld [vmem:[%s9423_s1 + $0xb78] sm:$0xff]   ;;  %v7548_v7 = vld [vmem:[%s9423_s1 + $0xc00] sm:$0xff]   ;;  %v7590_v63 = vld [vmem:[%s9423_s1 + $0xd50] sm:$0xff]  }
 0x15d   :  { %6854 = vmatpush3.bf16.msra.mxu1 %v7501_v8  ;;  %6833 = vmatprep.subr.bf16.mxu0 %v7502_v9  ;;  %v44_v0 = vld [vmem:[%s9424_s0 + $0xb8] sm:$0xff]  ;;  %v7549_v8 = vld [vmem:[%s9423_s1 + $0xc80] sm:$0xff]   ;;  %v7550_v9 = vld [vmem:[%s9423_s1 + $0xc48] sm:$0xff]  }
 0x15e   :  { %6855 = vmatprep.subr.bf16.mxu1 %v7503_v10  ;;  %v5840_v3 = vcombine.low %v44_v0, %v44_v0  ;;  %v5841_v4 = vcombine.high %v44_v0, %v44_v0  ;;  %v7551_v10 = vld [vmem:[%s9423_s1 + $0xcc8] sm:$0xff]   ;;  %v7591_v0 = vld [vmem:[%s9423_s1 + $0xdd0] sm:$0xff]  }
 0x160   :  { %6834 = vmatpush3.bf16.msra.mxu0 %v7504_v11  ;;  %v7552_v11 = vld [vmem:[%s9423_s1 + $0xc08] sm:$0xff]  }
 0x161   :  { %6856 = vmatpush3.bf16.msra.mxu1 %v7505_v12  ;;  %6863 = vmatprep.subr.bf16.mxu0 %v7510_v19  ;;  %v7553_v12 = vld [vmem:[%s9423_s1 + $0xc88] sm:$0xff]   ;;  %v7560_v19 = vld [vmem:[%s9423_s1 + $0xc18] sm:$0xff]  }
 0x162   :  { %6885 = vmatprep.subr.bf16.mxu1 %v7511_v20  ;;  %v7561_v20 = vld [vmem:[%s9423_s1 + $0xc98] sm:$0xff]  }
 0x163   :  { %5213 = vmatmul.mubr.bf16.vlgmr.msra.gmra.mrb[40].mxu0 %v5834_v14  ;;  %v7555_v14 = vld [vmem:[%s9423_s1 + $0xcd0] sm:$0xff]  }
 0x164   :  { %5253 = vmatmul.mubr.bf16.vlgmr.msra.gmra.mrb[40].mxu1 %v5836_v17  ;;  %6864 = vmatpush3.bf16.msra.mxu0 %v7512_v21  ;;  %v7558_v17 = vld [vmem:[%s9423_s1 + $0xc58] sm:$0xff]   ;;  %v7562_v21 = vld [vmem:[%s9423_s1 + $0xc60] sm:$0xff]  }
 0x165   :  { %6886 = vmatpush3.bf16.msra.mxu1 %v7513_v22  ;;  %6865 = vmatprep.subr.bf16.mxu0 %v7514_v23  ;;  %v7563_v22 = vld [vmem:[%s9423_s1 + $0xce0] sm:$0xff]  }
 0x166   :  { %6887 = vmatprep.subr.bf16.mxu1 %v7515_v24  ;;  %5292 = vmatprep.mubr.bf16.mxu0 %v5839_v2  ;;  %v7564_v24 = vld [vmem:[%s9423_s1 + $0xc20] sm:$0xff]   ;;  %v7593_v2 = vld [vmem:[%s9423_s1 + $0xd90] sm:$0xff]  }
 0x167   :  { %5332 = vmatprep.mubr.bf16.mxu1 %v5841_v4  ;;  %v7595_v4 = vld [vmem:[%s9423_s1 + $0xdd8] sm:$0xff]  }
 0x168   :  { %6866 = vmatpush3.bf16.msra.mxu0 %v7516_v25 }
 0x169   :  { %6888 = vmatpush3.bf16.msra.mxu1 %v7517_v26  ;;  %6867 = vmatprep.subr.bf16.mxu0 %v7518_v27  ;;  %v7565_v26 = vld [vmem:[%s9423_s1 + $0xca0] sm:$0xff]  }
 0x16a   :  { %6889 = vmatprep.subr.bf16.mxu1 %v7519_v28 }
 0x16c   :  { %6868 = vmatpush3.bf16.msra.mxu0 %v7520_v29 }
 0x16d   :  { %6890 = vmatpush3.bf16.msra.mxu1 %v7521_v30  ;;  %6869 = vmatprep.subr.bf16.mxu0 %v7522_v31  ;;  %v7566_v30 = vld [vmem:[%s9423_s1 + $0xc68] sm:$0xff]  }
 0x16e   :  { %6891 = vmatprep.subr.bf16.mxu1 %v7523_v32  ;;  %v7567_v32 = vld [vmem:[%s9423_s1 + $0xce8] sm:$0xff]  }
 0x170   :  { %6870 = vmatpush3.bf16.msra.mxu0 %v7524_v33 }
 0x171   :  { %6892 = vmatpush3.bf16.msra.mxu1 %v7525_v34  ;;  %6871 = vmatprep.subr.bf16.mxu0 %v7526_v35 }
 0x172   :  { %6893 = vmatprep.subr.bf16.mxu1 %v7527_v36  ;;  %v7568_v36 = vld [vmem:[%s9423_s1 + $0xc28] sm:$0xff]  }
 0x174   :  { %6872 = vmatpush3.bf16.msra.mxu0 %v7528_v38 }
 0x175   :  { %6894 = vmatpush3.bf16.msra.mxu1 %v7529_v40  ;;  %6873 = vmatprep.subr.bf16.mxu0 %v7530_v43  ;;  %v7572_v43 = vld [vmem:[%s9423_s1 + $0xc30] sm:$0xff]  }
 0x176   :  { %v6571_v37 = vpop.f32.mrb[16].mxu0  ;;  %6895 = vmatprep.subr.bf16.mxu1 %v7531_v46  ;;  %v7575_v46 = vld [vmem:[%s9423_s1 + $0xcf8] sm:$0xff]  }
 0x177   :  { %v6593_v39 = vpop.f32.mrb[16].mxu1  ;;  %v6572_v41 = vpop.f32.mrb[17].mxu0 }
 0x178   :  { %v6594_v42 = vpop.f32.mrb[17].mxu1  ;;  %v6573_v44 = vadd.f32 %v6572_v41, %v6571_v37  ;;  %v6574_v47 = vpop.f32.mrb[18].mxu0  ;;  %6874 = vmatpush3.bf16.msra.mxu0 %v7532_v49  ;;  %v7569_v37 = vld [vmem:[%s9423_s1 + $0xca8] sm:$0xff]   ;;  %v7570_v41 = vld [vmem:[%s9423_s1 + $0xc70] sm:$0xff]   ;;  %v45_v49 = vld [vmem:[%s9424_s0 + $0xc0] sm:$0xff] }
 0x179   :  { %v6595_v45 = vadd.f32 %v6594_v42, %v6593_v39  ;;  %v6596_v48 = vpop.f32.mrb[18].mxu1  ;;  %v6575_v52 = vpop.f32.mrb[19].mxu0  ;;  %6896 = vmatpush3.bf16.msra.mxu1 %v7533_v51  ;;  %6875 = vmatprep.subr.bf16.mxu0 %v7534_v54  ;;  %v7571_v42 = vld [vmem:[%s9423_s1 + $0xcf0] sm:$0xff]   ;;  %v7576_v47 = vld [vmem:[%s9423_s1 + $0xc38] sm:$0xff]   ;;  %v5842_v51 = vcombine.low %v45_v49, %v45_v49  ;;  %v7582_v54 = vld [vmem:[%s9423_s1 + $0xd40] sm:$0xff]  }
 0x17a   :  { %v4735_v50 = vadd.f32 %v6573_v44, %v8841_v5  ;;  %v6597_v53 = vpop.f32.mrb[19].mxu1  ;;  %6897 = vmatprep.subr.bf16.mxu1 %v7535_v56  ;;  %v7546_v5 = vld [vmem:[%s9423_s1 + $0xc40] sm:$0xff]   ;;  %v7573_v44 = vld [vmem:[%s9423_s1 + $0xcb0] sm:$0xff]   ;;  %v7577_v48 = vld [vmem:[%s9423_s1 + $0xcb8] sm:$0xff]   ;;  %v5843_v52 = vcombine.high %v45_v49, %v45_v49 }
 0x17b   :  { %v7583_v56 = vld [vmem:[%s9423_s1 + $0xdc0] sm:$0xff]   ;;  %v7626_v49 = vld [vmem:[%s9423_s1 + $0xe50] sm:$0xff]  }
 0x17c   :  { %v8946_v55 = vadd.f32 %v6595_v45, %v4735_v50  ;;  %6876 = vmatpush3.bf16.msra.mxu0 %v7536_v57  ;;  %v7574_v45 = vld [vmem:[%s9423_s1 + $0xc78] sm:$0xff]   ;;  %v46_v50 = vld [vmem:[%s9424_s0 + $0xc8] sm:$0xff]  ;;  %v7584_v57 = vld [vmem:[%s9423_s1 + $0xd00] sm:$0xff]  }
 0x17d   :  { %6898 = vmatpush3.bf16.msra.mxu1 %v7537_v58  ;;  %6877 = vmatprep.subr.bf16.mxu0 %v7538_v59  ;;  %v5844_v53 = vcombine.low %v46_v50, %v46_v50  ;;  %v7585_v58 = vld [vmem:[%s9423_s1 + $0xd80] sm:$0xff]   ;;  %v7586_v59 = vld [vmem:[%s9423_s1 + $0xd48] sm:$0xff]  }
 0x17e   :  { %6899 = vmatprep.subr.bf16.mxu1 %v7539_v60  ;;  %v7587_v60 = vld [vmem:[%s9423_s1 + $0xdc8] sm:$0xff]  }
 0x180   :  { %6878 = vmatpush3.bf16.msra.mxu0 %v7540_v61  ;;  %v7588_v61 = vld [vmem:[%s9423_s1 + $0xd08] sm:$0xff]  }
 0x181   :  { %6900 = vmatpush3.bf16.msra.mxu1 %v7541_v62  ;;  %6907 = vmatprep.subr.bf16.mxu0 %v7546_v5  ;;  %v7589_v62 = vld [vmem:[%s9423_s1 + $0xd88] sm:$0xff]   ;;  %v7596_v5 = vld [vmem:[%s9423_s1 + $0xd18] sm:$0xff]  }
 0x182   :  { %6929 = vmatprep.subr.bf16.mxu1 %v7547_v6  ;;  %v7597_v6 = vld [vmem:[%s9423_s1 + $0xd98] sm:$0xff]  }
 0x183   :  { %5293 = vmatmul.mubr.bf16.vlgmr.msra.gmra.mrb[44].mxu0 %v5838_v1  ;;  %v7592_v1 = vld [vmem:[%s9423_s1 + $0xd10] sm:$0xff]  }
 0x184   :  { %5333 = vmatmul.mubr.bf16.vlgmr.msra.gmra.mrb[44].mxu1 %v5840_v3  ;;  %6908 = vmatpush3.bf16.msra.mxu0 %v7548_v7  ;;  %v7594_v3 = vld [vmem:[%s9423_s1 + $0xd58] sm:$0xff]   ;;  %v7598_v7 = vld [vmem:[%s9423_s1 + $0xd60] sm:$0xff]  }
 0x185   :  { %6930 = vmatpush3.bf16.msra.mxu1 %v7549_v8  ;;  %6909 = vmatprep.subr.bf16.mxu0 %v7550_v9  ;;  %v7599_v8 = vld [vmem:[%s9423_s1 + $0xde0] sm:$0xff]  }
 0x186   :  { %6931 = vmatprep.subr.bf16.mxu1 %v7551_v10  ;;  %5372 = vmatprep.mubr.bf16.mxu0 %v5843_v52  ;;  %v7600_v10 = vld [vmem:[%s9423_s1 + $0xd20] sm:$0xff]   ;;  %v7629_v52 = vld [vmem:[%s9423_s1 + $0xe90] sm:$0xff]  }
 0x188   :  { %6910 = vmatpush3.bf16.msra.mxu0 %v7552_v11 }
 0x189   :  { %6932 = vmatpush3.bf16.msra.mxu1 %v7553_v12  ;;  %6911 = vmatprep.subr.bf16.mxu0 %v7554_v13  ;;  %v7601_v12 = vld [vmem:[%s9423_s1 + $0xda0] sm:$0xff]  }
 0x18a   :  { %6933 = vmatprep.subr.bf16.mxu1 %v7555_v14 }
 0x18c   :  { %6912 = vmatpush3.bf16.msra.mxu0 %v7556_v15  ;;  %v7602_v15 = vld [vmem:[%s9423_s1 + $0xd68] sm:$0xff]  }
 0x18d   :  { %6934 = vmatpush3.bf16.msra.mxu1 %v7557_v16  ;;  %6913 = vmatprep.subr.bf16.mxu0 %v7558_v17 }
 0x18e   :  { %6935 = vmatprep.subr.bf16.mxu1 %v7559_v18  ;;  %v7603_v18 = vld [vmem:[%s9423_s1 + $0xde8] sm:$0xff]  }
 0x190   :  { %6914 = vmatpush3.bf16.msra.mxu0 %v7560_v19 }
 0x191   :  { %6936 = vmatpush3.bf16.msra.mxu1 %v7561_v20  ;;  %6915 = vmatprep.subr.bf16.mxu0 %v7562_v21  ;;  %v7604_v21 = vld [vmem:[%s9423_s1 + $0xd28] sm:$0xff]  }
 0x192   :  { %6937 = vmatprep.subr.bf16.mxu1 %v7563_v22 }
 0x194   :  { %6916 = vmatpush3.bf16.msra.mxu0 %v7564_v24 }
 0x195   :  { %6938 = vmatpush3.bf16.msra.mxu1 %v7565_v26  ;;  %6917 = vmatprep.subr.bf16.mxu0 %v7566_v30  ;;  %v7606_v26 = vld [vmem:[%s9423_s1 + $0xd70] sm:$0xff]  }
 0x196   :  { %v6615_v23 = vpop.f32.mrb[20].mxu0  ;;  %6939 = vmatprep.subr.bf16.mxu1 %v7567_v32  ;;  %v7609_v30 = vld [vmem:[%s9423_s1 + $0xdb0] sm:$0xff]   ;;  %v7611_v32 = vld [vmem:[%s9423_s1 + $0xdf8] sm:$0xff]  }
 0x197   :  { %v6637_v25 = vpop.f32.mrb[20].mxu1  ;;  %v6616_v27 = vpop.f32.mrb[21].mxu0 }
 0x198   :  { %v6617_v28 = vadd.f32 %v6616_v27, %v6615_v23  ;;  %v6638_v29 = vpop.f32.mrb[21].mxu1  ;;  %v6618_v33 = vpop.f32.mrb[22].mxu0  ;;  %6918 = vmatpush3.bf16.msra.mxu0 %v7568_v36  ;;  %v7605_v23 = vld [vmem:[%s9423_s1 + $0xda8] sm:$0xff]  }
 0x199   :  { %v6639_v31 = vadd.f32 %v6638_v29, %v6637_v25  ;;  %v6640_v35 = vpop.f32.mrb[22].mxu1  ;;  %v6619_v38 = vpop.f32.mrb[23].mxu0  ;;  %6940 = vmatpush3.bf16.msra.mxu1 %v7569_v37  ;;  %6919 = vmatprep.subr.bf16.mxu0 %v7570_v41  ;;  %v7608_v29 = vld [vmem:[%s9423_s1 + $0xd30] sm:$0xff]   ;;  %v7612_v33 = vld [vmem:[%s9423_s1 + $0xd38] sm:$0xff]   ;;  %v7618_v41 = vld [vmem:[%s9423_s1 + $0xe40] sm:$0xff]  }
 0x19a   :  { %v4815_v34 = vadd.f32 %v6617_v28, %v8946_v55  ;;  %v6641_v40 = vpop.f32.mrb[23].mxu1  ;;  %6941 = vmatprep.subr.bf16.mxu1 %v7571_v42  ;;  %v5845_v55 = vcombine.high %v46_v50, %v46_v50  ;;  %v7607_v28 = vld [vmem:[%s9423_s1 + $0xdf0] sm:$0xff]   ;;  %v48_v38 = vld [vmem:[%s9424_s0 + $0xd8] sm:$0xff]  ;;  %v7619_v42 = vld [vmem:[%s9423_s1 + $0xec0] sm:$0xff]  }
 0x19b   :  { %v47_v35 = vld [vmem:[%s9424_s0 + $0xd0] sm:$0xff]  ;;  %v5849_v40 = vcombine.high %v48_v38, %v48_v38 }
 0x19c   :  { %v9048_v39 = vadd.f32 %v6639_v31, %v4815_v34  ;;  %6920 = vmatpush3.bf16.msra.mxu0 %v7572_v43  ;;  %5412 = vmatprep.mubr.bf16.mxu1 %v5845_v55  ;;  %v7610_v31 = vld [vmem:[%s9423_s1 + $0xd78] sm:$0xff]   ;;  %v5846_v36 = vcombine.low %v47_v35, %v47_v35  ;;  %v5847_v37 = vcombine.high %v47_v35, %v47_v35  ;;  %v7620_v43 = vld [vmem:[%s9423_s1 + $0xe00] sm:$0xff]   ;;  %v7627_v50 = vld [vmem:[%s9423_s1 + $0xed0] sm:$0xff]  }
 0x19d   :  { %6942 = vmatpush3.bf16.msra.mxu1 %v7573_v44  ;;  %6921 = vmatprep.subr.bf16.mxu0 %v7574_v45  ;;  %v7613_v34 = vld [vmem:[%s9423_s1 + $0xdb8] sm:$0xff]   ;;  %v7621_v44 = vld [vmem:[%s9423_s1 + $0xe80] sm:$0xff]   ;;  %v7622_v45 = vld [vmem:[%s9423_s1 + $0xe48] sm:$0xff]  }
 0x19e   :  { %6943 = vmatprep.subr.bf16.mxu1 %v7575_v46  ;;  %v7623_v46 = vld [vmem:[%s9423_s1 + $0xec8] sm:$0xff]   ;;  %v7632_v55 = vld [vmem:[%s9423_s1 + $0xe18] sm:$0xff]   ;;  %v7662_v35 = vld [vmem:[%s9423_s1 + $0xf50] sm:$0xff]  }
 0x1a0   :  { %6922 = vmatpush3.bf16.msra.mxu0 %v7576_v47  ;;  %v7624_v47 = vld [vmem:[%s9423_s1 + $0xe08] sm:$0xff]  }
 0x1a1   :  { %6944 = vmatpush3.bf16.msra.mxu1 %v7577_v48  ;;  %6951 = vmatprep.subr.bf16.mxu0 %v7582_v54  ;;  %v7625_v48 = vld [vmem:[%s9423_s1 + $0xe88] sm:$0xff]   ;;  %v7631_v54 = vld [vmem:[%s9423_s1 + $0xed8] sm:$0xff]  }
 0x1a2   :  { %6973 = vmatprep.subr.bf16.mxu1 %v7583_v56  ;;  %v7633_v56 = vld [vmem:[%s9423_s1 + $0xe98] sm:$0xff]  }
 0x1a3   :  { %5373 = vmatmul.mubr.bf16.vlgmr.msra.gmra.mrb[48].mxu0 %v5842_v51  ;;  %v7628_v51 = vld [vmem:[%s9423_s1 + $0xe10] sm:$0xff]  }
 0x1a4   :  { %5413 = vmatmul.mubr.bf16.vlgmr.msra.gmra.mrb[48].mxu1 %v5844_v53  ;;  %6952 = vmatpush3.bf16.msra.mxu0 %v7584_v57  ;;  %v7630_v53 = vld [vmem:[%s9423_s1 + $0xe58] sm:$0xff]   ;;  %v7634_v57 = vld [vmem:[%s9423_s1 + $0xe60] sm:$0xff]  }
 0x1a5   :  { %6974 = vmatpush3.bf16.msra.mxu1 %v7585_v58  ;;  %6953 = vmatprep.subr.bf16.mxu0 %v7586_v59  ;;  %v7635_v58 = vld [vmem:[%s9423_s1 + $0xee0] sm:$0xff]  }
 0x1a6   :  { %6975 = vmatprep.subr.bf16.mxu1 %v7587_v60  ;;  %5452 = vmatprep.mubr.bf16.mxu0 %v5847_v37  ;;  %v7636_v60 = vld [vmem:[%s9423_s1 + $0xe20] sm:$0xff]   ;;  %v7664_v37 = vld [vmem:[%s9423_s1 + $0xf10] sm:$0xff]  }
 0x1a7   :  { %5492 = vmatprep.mubr.bf16.mxu1 %v5849_v40  ;;  %v7667_v40 = vld [vmem:[%s9423_s1 + $0xfd8] sm:$0xff]  }
 0x1a8   :  { %6954 = vmatpush3.bf16.msra.mxu0 %v7588_v61 }
 0x1a9   :  { %6976 = vmatpush3.bf16.msra.mxu1 %v7589_v62  ;;  %6955 = vmatprep.subr.bf16.mxu0 %v7590_v63  ;;  %v7637_v62 = vld [vmem:[%s9423_s1 + $0xea0] sm:$0xff]  }
 0x1aa   :  { %6977 = vmatprep.subr.bf16.mxu1 %v7591_v0 }
 0x1ac   :  { %6956 = vmatpush3.bf16.msra.mxu0 %v7592_v1  ;;  %v7638_v1 = vld [vmem:[%s9423_s1 + $0xe68] sm:$0xff]  }
 0x1ad   :  { %6978 = vmatpush3.bf16.msra.mxu1 %v7593_v2  ;;  %6957 = vmatprep.subr.bf16.mxu0 %v7594_v3 }
 0x1ae   :  { %6979 = vmatprep.subr.bf16.mxu1 %v7595_v4  ;;  %v7639_v4 = vld [vmem:[%s9423_s1 + $0xee8] sm:$0xff]  }
 0x1b0   :  { %6958 = vmatpush3.bf16.msra.mxu0 %v7596_v5 }
 0x1b1   :  { %6980 = vmatpush3.bf16.msra.mxu1 %v7597_v6  ;;  %6959 = vmatprep.subr.bf16.mxu0 %v7598_v7  ;;  %v7640_v7 = vld [vmem:[%s9423_s1 + $0xe28] sm:$0xff]  }
 0x1b2   :  { %6981 = vmatprep.subr.bf16.mxu1 %v7599_v8 }
 0x1b4   :  { %6960 = vmatpush3.bf16.msra.mxu0 %v7600_v10 }
 0x1b5   :  { %6982 = vmatpush3.bf16.msra.mxu1 %v7601_v12  ;;  %6961 = vmatprep.subr.bf16.mxu0 %v7602_v15  ;;  %v7642_v12 = vld [vmem:[%s9423_s1 + $0xe70] sm:$0xff]  }
 0x1b6   :  { %v6659_v9 = vpop.f32.mrb[24].mxu0  ;;  %6983 = vmatprep.subr.bf16.mxu1 %v7603_v18  ;;  %v7644_v15 = vld [vmem:[%s9423_s1 + $0xe30] sm:$0xff]   ;;  %v7647_v18 = vld [vmem:[%s9423_s1 + $0xef8] sm:$0xff]  }
 0x1b7   :  { %v6681_v11 = vpop.f32.mrb[24].mxu1  ;;  %v6660_v13 = vpop.f32.mrb[25].mxu0 }
 0x1b8   :  { %v6682_v14 = vpop.f32.mrb[25].mxu1  ;;  %v6661_v16 = vadd.f32 %v6660_v13, %v6659_v9  ;;  %v6662_v19 = vpop.f32.mrb[26].mxu0  ;;  %6962 = vmatpush3.bf16.msra.mxu0 %v7604_v21  ;;  %v7641_v9 = vld [vmem:[%s9423_s1 + $0xea8] sm:$0xff]   ;;  %v49_v21 = vld [vmem:[%s9424_s0 + $0xe0] sm:$0xff] }
 0x1b9   :  { %v6683_v17 = vadd.f32 %v6682_v14, %v6681_v11  ;;  %v6684_v20 = vpop.f32.mrb[26].mxu1  ;;  %v6663_v24 = vpop.f32.mrb[27].mxu0  ;;  %6984 = vmatpush3.bf16.msra.mxu1 %v7605_v23  ;;  %6963 = vmatprep.subr.bf16.mxu0 %v7606_v26  ;;  %v7643_v14 = vld [vmem:[%s9423_s1 + $0xef0] sm:$0xff]   ;;  %v7648_v19 = vld [vmem:[%s9423_s1 + $0xe38] sm:$0xff]   ;;  %v5850_v23 = vcombine.low %v49_v21, %v49_v21 }
 0x1ba   :  { %v4895_v22 = vadd.f32 %v6661_v16, %v9048_v39  ;;  %v6685_v25 = vpop.f32.mrb[27].mxu1  ;;  %6985 = vmatprep.subr.bf16.mxu1 %v7607_v28  ;;  %v5848_v39 = vcombine.low %v48_v38, %v48_v38  ;;  %v7645_v16 = vld [vmem:[%s9423_s1 + $0xeb0] sm:$0xff]   ;;  %v7649_v20 = vld [vmem:[%s9423_s1 + $0xeb8] sm:$0xff]   ;;  %v5851_v24 = vcombine.high %v49_v21, %v49_v21  ;;  %v7655_v28 = vld [vmem:[%s9423_s1 + $0xfc0] sm:$0xff]  }
 0x1bb   :  { %v7665_v38 = vld [vmem:[%s9423_s1 + $0xf90] sm:$0xff]  }
 0x1bc   :  { %v9156_v27 = vadd.f32 %v6683_v17, %v4895_v22  ;;  %6964 = vmatpush3.bf16.msra.mxu0 %v7608_v29  ;;  %v7646_v17 = vld [vmem:[%s9423_s1 + $0xe78] sm:$0xff]   ;;  %v50_v22 = vld [vmem:[%s9424_s0 + $0xe8] sm:$0xff]  ;;  %v7656_v29 = vld [vmem:[%s9423_s1 + $0xf00] sm:$0xff]  }
 0x1bd   :  { %6986 = vmatpush3.bf16.msra.mxu1 %v7609_v30  ;;  %6965 = vmatprep.subr.bf16.mxu0 %v7610_v31  ;;  %v5852_v25 = vcombine.low %v50_v22, %v50_v22  ;;  %v5853_v26 = vcombine.high %v50_v22, %v50_v22  ;;  %v7657_v30 = vld [vmem:[%s9423_s1 + $0xf80] sm:$0xff]   ;;  %v7658_v31 = vld [vmem:[%s9423_s1 + $0xf48] sm:$0xff]  }
 0x1be   :  { %6987 = vmatprep.subr.bf16.mxu1 %v7611_v32  ;;  %v7659_v32 = vld [vmem:[%s9423_s1 + $0xfc8] sm:$0xff]  }
 0x1c0   :  { %6966 = vmatpush3.bf16.msra.mxu0 %v7612_v33  ;;  %v7660_v33 = vld [vmem:[%s9423_s1 + $0xf08] sm:$0xff]  }
 0x1c1   :  { %6988 = vmatpush3.bf16.msra.mxu1 %v7613_v34  ;;  %6995 = vmatprep.subr.bf16.mxu0 %v7618_v41  ;;  %v7661_v34 = vld [vmem:[%s9423_s1 + $0xf88] sm:$0xff]   ;;  %v7668_v41 = vld [vmem:[%s9423_s1 + $0xf18] sm:$0xff]  }
 0x1c2   :  { %7017 = vmatprep.subr.bf16.mxu1 %v7619_v42  ;;  %v7669_v42 = vld [vmem:[%s9423_s1 + $0xf98] sm:$0xff]  }
 0x1c3   :  { %5453 = vmatmul.mubr.bf16.vlgmr.msra.gmra.mrb[52].mxu0 %v5846_v36  ;;  %v7663_v36 = vld [vmem:[%s9423_s1 + $0xfd0] sm:$0xff]  }
 0x1c4   :  { %5493 = vmatmul.mubr.bf16.vlgmr.msra.gmra.mrb[52].mxu1 %v5848_v39  ;;  %6996 = vmatpush3.bf16.msra.mxu0 %v7620_v43  ;;  %v7666_v39 = vld [vmem:[%s9423_s1 + $0xf58] sm:$0xff]   ;;  %v7670_v43 = vld [vmem:[%s9423_s1 + $0xf60] sm:$0xff]  }
 0x1c5   :  { %7018 = vmatpush3.bf16.msra.mxu1 %v7621_v44  ;;  %6997 = vmatprep.subr.bf16.mxu0 %v7622_v45  ;;  %v7671_v44 = vld [vmem:[%s9423_s1 + $0xfe0] sm:$0xff]  }
 0x1c6   :  { %7019 = vmatprep.subr.bf16.mxu1 %v7623_v46  ;;  %5532 = vmatprep.mubr.bf16.mxu0 %v5851_v24  ;;  %v7672_v45 = vld [vmem:[%s9423_s1 + $0xf20] sm:$0xff]  }
 0x1c7   :  { %5572 = vmatprep.mubr.bf16.mxu1 %v5853_v26 }
 0x1c8   :  { %6998 = vmatpush3.bf16.msra.mxu0 %v7624_v47  ;;  %v7673_v47 = vld [vmem:[%s9423_s1 + $0xfa0] sm:$0xff]  }
 0x1c9   :  { %7020 = vmatpush3.bf16.msra.mxu1 %v7625_v48  ;;  %6999 = vmatprep.subr.bf16.mxu0 %v7626_v49 }
 0x1ca   :  { %7021 = vmatprep.subr.bf16.mxu1 %v7627_v50 }
 0x1cc   :  { %7000 = vmatpush3.bf16.msra.mxu0 %v7628_v51 }
 0x1cd   :  { %7022 = vmatpush3.bf16.msra.mxu1 %v7629_v52  ;;  %7001 = vmatprep.subr.bf16.mxu0 %v7630_v53  ;;  %v7674_v53 = vld [vmem:[%s9423_s1 + $0xf68] sm:$0xff]  }
 0x1ce   :  { %7023 = vmatprep.subr.bf16.mxu1 %v7631_v54 }
 0x1d0   :  { %7002 = vmatpush3.bf16.msra.mxu0 %v7632_v55  ;;  %v7675_v55 = vld [vmem:[%s9423_s1 + $0xfe8] sm:$0xff]  }
 0x1d1   :  { %7024 = vmatpush3.bf16.msra.mxu1 %v7633_v56  ;;  %7003 = vmatprep.subr.bf16.mxu0 %v7634_v57 }
 0x1d2   :  { %7025 = vmatprep.subr.bf16.mxu1 %v7635_v58  ;;  %v7676_v58 = vld [vmem:[%s9423_s1 + $0xf28] sm:$0xff]  }
 0x1d4   :  { %7004 = vmatpush3.bf16.msra.mxu0 %v7636_v60  ;;  %v7677_v60 = vld [vmem:[%s9423_s1 + $0xfa8] sm:$0xff]  }
 0x1d5   :  { %7026 = vmatpush3.bf16.msra.mxu1 %v7637_v62  ;;  %7005 = vmatprep.subr.bf16.mxu0 %v7638_v1  ;;  %v7680_v1 = vld [vmem:[%s9423_s1 + $0xf30] sm:$0xff]  }
 0x1d6   :  { %v6703_v59 = vpop.f32.mrb[28].mxu0  ;;  %7027 = vmatprep.subr.bf16.mxu1 %v7639_v4  ;;  %v7683_v4 = vld [vmem:[%s9423_s1 + $0xff8] sm:$0xff]  }
 0x1d7   :  { %v6725_v61 = vpop.f32.mrb[28].mxu1  ;;  %v6704_v63 = vpop.f32.mrb[29].mxu0 }
 0x1d8   :  { %v6726_v0 = vpop.f32.mrb[29].mxu1  ;;  %v6705_v2 = vadd.f32 %v6704_v63, %v6703_v59  ;;  %v6706_v5 = vpop.f32.mrb[30].mxu0  ;;  %7006 = vmatpush3.bf16.msra.mxu0 %v7640_v7  ;;  %v7678_v63 = vld [vmem:[%s9423_s1 + $0xf70] sm:$0xff]  }
 0x1d9   :  { %v6727_v3 = vadd.f32 %v6726_v0, %v6725_v61  ;;  %v6728_v6 = vpop.f32.mrb[30].mxu1  ;;  %v6707_v10 = vpop.f32.mrb[31].mxu0  ;;  %7028 = vmatpush3.bf16.msra.mxu1 %v7641_v9  ;;  %7007 = vmatprep.subr.bf16.mxu0 %v7642_v12  ;;  %v7679_v0 = vld [vmem:[%s9423_s1 + $0xff0] sm:$0xff]   ;;  %v7684_v5 = vld [vmem:[%s9423_s1 + $0xf38] sm:$0xff]  }
 0x1da   :  { %v4975_v8 = vadd.f32 %v6705_v2, %v9156_v27  ;;  %v6729_v11 = vpop.f32.mrb[31].mxu1  ;;  %7029 = vmatprep.subr.bf16.mxu1 %v7643_v14  ;;  %v7654_v27 = vld [vmem:[%s9423_s1 + $0xf40] sm:$0xff]   ;;  %v7681_v2 = vld [vmem:[%s9423_s1 + $0xfb0] sm:$0xff]   ;;  %v7685_v6 = vld [vmem:[%s9423_s1 + $0xfb8] sm:$0xff]  }
 0x1db   :  { %v51_v7 = vld [vmem:[%s9424_s0 + $0xf0] sm:$0xff] }
 0x1dc   :  { %v9261_v13 = vadd.f32 %v6727_v3, %v4975_v8  ;;  %7008 = vmatpush3.bf16.msra.mxu0 %v7644_v15  ;;  %v7682_v3 = vld [vmem:[%s9423_s1 + $0xf78] sm:$0xff]   ;;  %v5854_v9 = vcombine.low %v51_v7, %v51_v7  ;;  %v5855_v10 = vcombine.high %v51_v7, %v51_v7 }
 0x1dd   :  { %7030 = vmatpush3.bf16.msra.mxu1 %v7645_v16  ;;  %7009 = vmatprep.subr.bf16.mxu0 %v7646_v17  ;;  %v52_v8 = vld [vmem:[%s9424_s0 + $0xf8] sm:$0xff] }
 0x1de   :  { %7031 = vmatprep.subr.bf16.mxu1 %v7647_v18  ;;  %v5856_v11 = vcombine.low %v52_v8, %v52_v8  ;;  %v5857_v12 = vcombine.high %v52_v8, %v52_v8 }
 0x1e0   :  { %7010 = vmatpush3.bf16.msra.mxu0 %v7648_v19 }
 0x1e1   :  { %7032 = vmatpush3.bf16.msra.mxu1 %v7649_v20  ;;  %7039 = vmatprep.subr.bf16.mxu0 %v7654_v27 }
 0x1e2   :  { %7061 = vmatprep.subr.bf16.mxu1 %v7655_v28 }
 0x1e3   :  { %5533 = vmatmul.mubr.bf16.vlgmr.msra.gmra.mrb[56].mxu0 %v5850_v23 }
 0x1e4   :  { %5573 = vmatmul.mubr.bf16.vlgmr.msra.gmra.mrb[56].mxu1 %v5852_v25  ;;  %7040 = vmatpush3.bf16.msra.mxu0 %v7656_v29 }
 0x1e5   :  { %7062 = vmatpush3.bf16.msra.mxu1 %v7657_v30  ;;  %7041 = vmatprep.subr.bf16.mxu0 %v7658_v31 }
 0x1e6   :  { %7063 = vmatprep.subr.bf16.mxu1 %v7659_v32  ;;  %5612 = vmatprep.mubr.bf16.mxu0 %v5855_v10 }
 0x1e7   :  { %5652 = vmatprep.mubr.bf16.mxu1 %v5857_v12 }
 0x1e8   :  { %7042 = vmatpush3.bf16.msra.mxu0 %v7660_v33 }
 0x1e9   :  { %7064 = vmatpush3.bf16.msra.mxu1 %v7661_v34  ;;  %7043 = vmatprep.subr.bf16.mxu0 %v7662_v35 }
 0x1ea   :  { %7065 = vmatprep.subr.bf16.mxu1 %v7663_v36 }
 0x1ec   :  { %7044 = vmatpush3.bf16.msra.mxu0 %v7664_v37  ;;  %v7702_v37 = vmov 0.0  }
 0x1ed   :  { %7066 = vmatpush3.bf16.msra.mxu1 %v7665_v38  ;;  %7045 = vmatprep.subr.bf16.mxu0 %v7666_v39  ;;  %v7690_v38 = vld [vmem:[%s9426_s3] sm:$0xff]   ;;  %v7691_v39 = vld [vmem:[%s9426_s3 + $0x8] sm:$0xff]  }
 0x1ee   :  { %7067 = vmatprep.subr.bf16.mxu1 %v7667_v40  ;;  %v7692_v40 = vld [vmem:[%s9426_s3 + $0x10] sm:$0xff]  }
 0x1f0   :  { %7046 = vmatpush3.bf16.msra.mxu0 %v7668_v41  ;;  %v7693_v41 = vld [vmem:[%s9426_s3 + $0x18] sm:$0xff]  }
 0x1f1   :  { %7068 = vmatpush3.bf16.msra.mxu1 %v7669_v42  ;;  %7047 = vmatprep.subr.bf16.mxu0 %v7670_v43  ;;  %v7694_v42 = vld [vmem:[%s9426_s3 + $0x20] sm:$0xff]  }
 0x1f2   :  { %7069 = vmatprep.subr.bf16.mxu1 %v7671_v44 }
 0x1f4   :  { %7048 = vmatpush3.bf16.msra.mxu0 %v7672_v45 }
 0x1f5   :  { %7070 = vmatpush3.bf16.msra.mxu1 %v7673_v47  ;;  %7049 = vmatprep.subr.bf16.mxu0 %v7674_v53 }
 0x1f6   :  { %v6747_v46 = vpop.f32.mrb[32].mxu0  ;;  %7071 = vmatprep.subr.bf16.mxu1 %v7675_v55 }
 0x1f7   :  { %v6769_v48 = vpop.f32.mrb[32].mxu1  ;;  %v6748_v49 = vpop.f32.mrb[33].mxu0 }
 0x1f8   :  { %v6770_v50 = vpop.f32.mrb[33].mxu1  ;;  %v6749_v51 = vadd.f32 %v6748_v49, %v6747_v46  ;;  %v6750_v54 = vpop.f32.mrb[34].mxu0  ;;  %7050 = vmatpush3.bf16.msra.mxu0 %v7676_v58 }
 0x1f9   :  { %v6771_v52 = vadd.f32 %v6770_v50, %v6769_v48  ;;  %v6772_v56 = vpop.f32.mrb[34].mxu1  ;;  %v6751_v59 = vpop.f32.mrb[35].mxu0  ;;  %7072 = vmatpush3.bf16.msra.mxu1 %v7677_v60  ;;  %7051 = vmatprep.subr.bf16.mxu0 %v7678_v63 }
 0x1fa   :  { %v5055_v57 = vadd.f32 %v6749_v51, %v9261_v13  ;;  %v6773_v61 = vpop.f32.mrb[35].mxu1  ;;  %7073 = vmatprep.subr.bf16.mxu1 %v7679_v0  ;;  %v7696_v56 = vld [vmem:[%s9426_s3 + $0x30] sm:$0xff]  }
 0x1fc   :  { %v5095_v62 = vadd.f32 %v6771_v52, %v5055_v57  ;;  %7052 = vmatpush3.bf16.msra.mxu0 %v7680_v1  ;;  %v7695_v52 = vld [vmem:[%s9426_s3 + $0x28] sm:$0xff]   ;;  %v7697_v57 = vld [vmem:[%s9426_s3 + $0x38] sm:$0xff]  }
 0x1fd   :  { %7074 = vmatpush3.bf16.msra.mxu1 %v7681_v2  ;;  %7053 = vmatprep.subr.bf16.mxu0 %v7682_v3 }
 0x1fe   :  { %7075 = vmatprep.subr.bf16.mxu1 %v7683_v4 }
 0x200   :  { %7054 = vmatpush3.bf16.msra.mxu0 %v7684_v5 }
 0x201   :  { %7076 = vmatpush3.bf16.msra.mxu1 %v7685_v6  ;;  %7092 = vmatprep.subr.bf16.mxu0 %v7702_v37 }
 0x203   :  { %5613 = vmatmul.mubr.bf16.vlgmr.msra.gmra.mrb[60].mxu0 %v5854_v9 }
 0x204   :  { %5653 = vmatmul.mubr.bf16.vlgmr.msra.gmra.mrb[60].mxu1 %v5856_v11  ;;  %7093 = vmatpush3.bf16.msra.mxu0 %v7690_v38 }
 0x205   :  { %7094 = vmatprep.subr.bf16.mxu0 %v7702_v37  ;;  %7108 = vmatprep.mubr.msk.bf16.mxu0 %vm7703_vm0, %v7702_v37 }
 0x208   :  { %7095 = vmatpush3.bf16.msra.mxu0 %v7691_v39 }
 0x209   :  { %7096 = vmatprep.subr.bf16.mxu0 %v7702_v37 }
 0x20c   :  { %7097 = vmatpush3.bf16.msra.mxu0 %v7692_v40 }
 0x20d   :  { %7098 = vmatprep.subr.bf16.mxu0 %v7702_v37 }
 0x210   :  { %7099 = vmatpush3.bf16.msra.mxu0 %v7693_v41 }
 0x211   :  { %7100 = vmatprep.subr.bf16.mxu0 %v7702_v37 }
 0x214   :  { %7101 = vmatpush3.bf16.msra.mxu0 %v7694_v42 }
 0x215   :  { %7102 = vmatprep.subr.bf16.mxu0 %v7702_v37 }
 0x216   :  { %v6791_v13 = vpop.f32.mrb[36].mxu0 }
 0x217   :  { %v6813_v14 = vpop.f32.mrb[36].mxu1  ;;  %v6792_v15 = vpop.f32.mrb[37].mxu0 }
 0x218   :  { %v6793_v16 = vadd.f32 %v6792_v15, %v6791_v13  ;;  %v6814_v17 = vpop.f32.mrb[37].mxu1  ;;  %v6794_v18 = vpop.f32.mrb[38].mxu0  ;;  %7103 = vmatpush3.bf16.msra.mxu0 %v7695_v52 }
 0x219   :  { %v6815_v19 = vadd.f32 %v6814_v17, %v6813_v14  ;;  %v6816_v20 = vpop.f32.mrb[38].mxu1  ;;  %v6795_v21 = vpop.f32.mrb[39].mxu0  ;;  %7104 = vmatprep.subr.bf16.mxu0 %v7702_v37 }
 0x21a   :  { %v5135_v22 = vadd.f32 %v6793_v16, %v5095_v62  ;;  %v6817_v23 = vpop.f32.mrb[39].mxu1 }
 0x21c   :  { %v5175_v24 = vadd.f32 %v6815_v19, %v5135_v22  ;;  %7105 = vmatpush3.bf16.msra.mxu0 %v7696_v56 }
 0x21d   :  { %7106 = vmatprep.subr.bf16.mxu0 %v7702_v37 }
 0x220   :  { %7107 = vmatpush3.bf16.msra.mxu0 %v7697_v57 }
 0x236   :  { %v6835_v25 = vpop.f32.mrb[40].mxu0 }
 0x237   :  { %v6857_v26 = vpop.f32.mrb[40].mxu1  ;;  %v6836_v27 = vpop.f32.mrb[41].mxu0 }
 0x238   :  { %v6858_v28 = vpop.f32.mrb[41].mxu1  ;;  %v6837_v29 = vadd.f32 %v6836_v27, %v6835_v25  ;;  %v6838_v31 = vpop.f32.mrb[42].mxu0 }
 0x239   :  { %v6859_v30 = vadd.f32 %v6858_v28, %v6857_v26  ;;  %v6860_v32 = vpop.f32.mrb[42].mxu1  ;;  %v6839_v33 = vpop.f32.mrb[43].mxu0 }
 0x23a   :  { %v6861_v34 = vpop.f32.mrb[43].mxu1  ;;  %v5215_v35 = vadd.f32 %v6837_v29, %v5175_v24 }
 0x23c   :  { %v5255_v36 = vadd.f32 %v6859_v30, %v5215_v35 }
 0x256   :  { %v6879_v43 = vpop.f32.mrb[44].mxu0 }
 0x257   :  { %v6901_v44 = vpop.f32.mrb[44].mxu1  ;;  %v6880_v45 = vpop.f32.mrb[45].mxu0 }
 0x258   :  { %v6881_v46 = vadd.f32 %v6880_v45, %v6879_v43  ;;  %v6902_v47 = vpop.f32.mrb[45].mxu1  ;;  %v6882_v48 = vpop.f32.mrb[46].mxu0  ;;  %v6370_v45 = vld [vmem:[%s9427_s4] ss:$0 sm:$0xff] }
 0x259   :  { %v6903_v49 = vadd.f32 %v6902_v47, %v6901_v44  ;;  %v6904_v50 = vpop.f32.mrb[46].mxu1  ;;  %v6883_v51 = vpop.f32.mrb[47].mxu0  ;;  %v5774_v44 = vlaneseq }
 0x25a   :  { %v5295_v53 = vadd.f32 %v6881_v46, %v5255_v36  ;;  %v6905_v54 = vpop.f32.mrb[47].mxu1 }
 0x25b   :  { %v5775_v46 = vand.u32 127, %v5774_v44 }
 0x25c   :  { %v5335_v55 = vadd.f32 %v6903_v49, %v5295_v53 }
 0x25d   :  { %vm5776_vm1 = vcmp.lt.s32.totalorder %v5775_v46, 2 }
 0x276   :  { %v6923_v58 = vpop.f32.mrb[48].mxu0 }
 0x277   :  { %v6945_v59 = vpop.f32.mrb[48].mxu1  ;;  %v6924_v60 = vpop.f32.mrb[49].mxu0 }
 0x278   :  { %v6925_v61 = vadd.f32 %v6924_v60, %v6923_v58  ;;  %v6946_v62 = vpop.f32.mrb[49].mxu1  ;;  %v6926_v63 = vpop.f32.mrb[50].mxu0 }
 0x279   :  { %v6947_v0 = vadd.f32 %v6946_v62, %v6945_v59  ;;  %v6948_v1 = vpop.f32.mrb[50].mxu1  ;;  %v6927_v2 = vpop.f32.mrb[51].mxu0 }
 0x27a   :  { %v5375_v3 = vadd.f32 %v6925_v61, %v5335_v55  ;;  %v6949_v4 = vpop.f32.mrb[51].mxu1 }
 0x27c   :  { %v5415_v5 = vadd.f32 %v6947_v0, %v5375_v3 }
 0x296   :  { %v6967_v6 = vpop.f32.mrb[52].mxu0 }
 0x297   :  { %v6989_v7 = vpop.f32.mrb[52].mxu1  ;;  %v6968_v8 = vpop.f32.mrb[53].mxu0 }
 0x298   :  { %v6990_v9 = vpop.f32.mrb[53].mxu1  ;;  %v6969_v10 = vadd.f32 %v6968_v8, %v6967_v6  ;;  %v6970_v12 = vpop.f32.mrb[54].mxu0 }
 0x299   :  { %v6991_v11 = vadd.f32 %v6990_v9, %v6989_v7  ;;  %v6992_v13 = vpop.f32.mrb[54].mxu1  ;;  %v6971_v14 = vpop.f32.mrb[55].mxu0 }
 0x29a   :  { %v6993_v15 = vpop.f32.mrb[55].mxu1  ;;  %v5455_v16 = vadd.f32 %v6969_v10, %v5415_v5 }
 0x29c   :  { %v5495_v17 = vadd.f32 %v6991_v11, %v5455_v16 }
 0x2b6   :  { %v7011_v18 = vpop.f32.mrb[56].mxu0 }
 0x2b7   :  { %v7033_v19 = vpop.f32.mrb[56].mxu1  ;;  %v7012_v20 = vpop.f32.mrb[57].mxu0 }
 0x2b8   :  { %v7013_v21 = vadd.f32 %v7012_v20, %v7011_v18  ;;  %v7034_v22 = vpop.f32.mrb[57].mxu1  ;;  %v7014_v23 = vpop.f32.mrb[58].mxu0 }
 0x2b9   :  { %v7035_v24 = vadd.f32 %v7034_v22, %v7033_v19  ;;  %v7036_v25 = vpop.f32.mrb[58].mxu1  ;;  %v7015_v26 = vpop.f32.mrb[59].mxu0 }
 0x2ba   :  { %v5535_v27 = vadd.f32 %v7013_v21, %v5495_v17  ;;  %v7037_v28 = vpop.f32.mrb[59].mxu1 }
 0x2bc   :  { %v5575_v29 = vadd.f32 %v7035_v24, %v5535_v27 }
 0x2d6   :  { %v7055_v30 = vpop.f32.mrb[60].mxu0 }
 0x2d7   :  { %v7077_v31 = vpop.f32.mrb[60].mxu1  ;;  %v7056_v32 = vpop.f32.mrb[61].mxu0 }
 0x2d8   :  { %v7057_v33 = vadd.f32 %v7056_v32, %v7055_v30  ;;  %v7078_v34 = vpop.f32.mrb[61].mxu1  ;;  %v7058_v35 = vpop.f32.mrb[62].mxu0 }
 0x2d9   :  { %v7079_v36 = vadd.f32 %v7078_v34, %v7077_v31  ;;  %v7080_v37 = vpop.f32.mrb[62].mxu1  ;;  %v7059_v38 = vpop.f32.mrb[63].mxu0 }
 0x2da   :  { %v5615_v39 = vadd.f32 %v7057_v33, %v5575_v29  ;;  %v7081_v40 = vpop.f32.mrb[63].mxu1 }
 0x2dc   :  { %v5655_v41 = vadd.f32 %v7079_v36, %v5615_v39 }
 0x2de   :  { %v5660_v42 = vmax.f32 %v5655_v41, 0.0 }
 0x2e0   :  { %v5661_v43 = vpack.c.bf16 %v5660_v42, %v5660_v42 }
 0x2e2   :  { %7109 = vmatmul.mubr.bf16.vlgmr.msra.gmra.mrb[64].mxu0 %v5661_v43 }
 0x3b5   :  { %v5767_v47 = vpop.f32.mrb[64].mxu0 }
 0x3b6   :  { %v5768_v48 = vadd.f32 %v6370_v45, %v5767_v47  ;;  %v7110_v49 = vpop.f32.mrb[65].mxu0 }
 0x3b7   :  { %v5770_v50 = vpop.f32.mrb[66].mxu0 }
 0x3b8   :  { %v5773_v51 = vmax.f32 %v5768_v48, 0.0  ;;  %v7111_v52 = vpop.f32.mrb[67].mxu0 }
 0x3ba   :  { %v5777_v53 = vsel %vm5776_vm1, %v5773_v51, -1e+30 }
 0x3bb   :  { %5778 = vmax.xlane.f32.xlu0 %v5777_v53 }
 0x448   :  { %v5779_v54 = vpop.xlane.xlu0 %5778 }
 0x449   :  { %v5780_v55 = vsub.f32 %v5777_v53, %v5779_v54 }
 0x44b   :  { %v5781_v56 = vmul.f32 1.442695, %v5780_v55 }
 0x44d   :  { %7698 = vpow2.f32 %v5781_v56 }
 0x457   :  { %v7699_v57 = vpop.eup %7698 }
 0x458   :  { %5783 = vadd.xlane.f32.xlu0 %v7699_v57 }
 0x4e5   :  { %v5784_v58 = vpop.xlane.xlu0 %5783 }
 0x4e6   :  { %7700 = vlog2.f32 %v5784_v58 }
 0x4f0   :  { %v7701_v59 = vpop.eup %7700 }
 0x4f1   :  { %v5786_v60 = vmul.f32 0.6931472, %v7701_v59 }
 0x4f3   :  { %v5787_v61 = vsub.f32 %v5780_v55, %v5786_v60 }
 0x4f5   :  { %5788 = vst [vmem:[%s9428_s5] sm:$0xff] %v5787_v61 }

// kernel: cnn_forward.2
= control target key start
LH: loop header
LB: loop body
LE: loop exit
PB: predicated region body
PF: predicated region fallthrough
CT: control target
= control target key end

     0   :  { %s18275_s18 = smov 0   ;;  %s21226_s0 = inlined_call_operand.vmem [shape: bf16[2,36,32,40], index: 0, kind: input, shape index: {}]   ;;  %s21227_s1 = inlined_call_operand.vmem [shape: bf16[5,40,128], index: 1, kind: input, shape index: {}]   ;;  %s21228_s2 = inlined_call_operand.vmem [shape: f32[1,128], index: 2, kind: input, shape index: {}]   ;;  %s21229_s3 = inlined_call_operand.vmem [shape: bf16[3,384,128], index: 3, kind: input, shape index: {}]   ;;  %s21230_s4 = inlined_call_operand.vmem [shape: f32[1,128], index: 4, kind: input, shape index: {}]   ;;  %s21231_s5 = inlined_call_operand.vmem [shape: bf16[2,8,8,128], index: 5, kind: output, shape index: {}]  }
   0x1 LB: > { %s13407_s19 = sadd.s32 4294967295, %s18242_s18   ;;  %p13411_p0 = scmp.ge.s32.totalorder %s18242_s18, 1  ;;  %s18242_s18 = sphi %s18275_s18, %s15_s18  }
   0x2   : > { %p187_p1 = scmp.lt.s32.totalorder %s18242_s18, 3 }
   0x4   : > { %p188_p2 = pnand %p13411_p0, %p187_p1 }
   0x6   : > { %191 = sbr.rel (%p188_p2) target bundleno = 1879 (0x757), region = 40 }
   0xd   : > { %v17753_v0 = vld [vmem:[%s21227_s1 + $0x14] sm:$0xff]   ;;  %v17754_v1 = vld [vmem:[%s21227_s1 + $0x1c] sm:$0xff]   ;;  %p215_p3 = scmp.lt.s32.totalorder %s13407_s19, 1  ;;  %v17755_v2 = vld [vmem:[%s21227_s1 + $0x24] ss:$0 sps:$4 sm:$0xff]   ;;  %vm887_vm0 = vcmask 1043456  }
   0xe   : > { %15931 = vmatprep.subr.bf16.mxu0 %v17753_v0  ;;  %vm694_vm1 = vcmask 326656   ;;  %v17758_v3 = vld [vmem:[%s21227_s1 + $0x28] sm:$0xff]   ;;  %v18305_v4 = vsel %vm887_vm0, %v17755_v2, 0  ;;  %v17771_v8 = vld [vmem:[%s21227_s1 + $0x30] sm:$0xff]   ;;  %v17786_v9 = vld [vmem:[%s21227_s1 + $0x38] ss:$0 sps:$4 sm:$0xff]  }
   0xf   : > { %15932 = vmatpush3.bf16.msra.mxu0 %v17753_v0  ;;  %s21351_s19 = smov (!%p215_p3, %s13407_s19), 1  ;;  %v3821_v12 = vsel %vm887_vm0, %v17786_v9, 0  ;;  %v18342_v20 = vld [vmem:[%s21227_s1 + $0x3c] sm:$0xff]   ;;  %v17822_v52 = vld [vmem:[%s21227_s1 + $0x44] sm:$0xff]   ;;  %v17845_v63 = vld [vmem:[%s21227_s1 + $0x4c] ss:$0 sps:$4 sm:$0xff]  }
  0x10   : > { %15933 = vmatprep.subr.bf16.mxu0 %v17754_v1  ;;  %s17743_s26 = smul.u32 576, %s21351_s19  ;;  %vm8437_vm2 = vsmask.f32 7938  ;;  %vm8386_vm3 = vcmask 1040384   ;;  %vm8387_vm4 = vsmask.f32 256 }
  0x11   : > { %vm19013_vm5 = vmand %vm8386_vm3, %vm8437_vm2  ;;  %vm9051_vm7 = vsmask.f32 3328  ;;  %vm9052_vm8 = vsmask.f32 7440  ;;  %vm8567_vm10 = vsmask.f32 4368 }
  0x12   : > { %s18298_s29 = scalar_lea.vmem %s21226_s0, %s17743_s26  ;;  %vm19018_vm6 = vmand %vm8386_vm3, %vm8387_vm4  ;;  %vm9502_vm13 = vcmask 1042432   ;;  %vm9503_vm14 = vcmask 1046532   ;;  %s14998_s7 = sshll.u32 %s21351_s19, 5 }
  0x13   : > { %15934 = vmatpush3.bf16.msra.mxu0 %v17754_v1  ;;  %v17756_v5 = vld [vmem:[%s18298_s29 + $0x10] sm:$0xff]   ;;  %v17757_v6 = vld [vmem:[%s18298_s29 + $0x18] sm:$0xff]   ;;  %v17759_v7 = vld [vmem:[%s18298_s29 + $0x20] sm:$0xff]   ;;  %v5415_v1 = vsel %vm887_vm0, %v17845_v63, 0  ;;  %s21195_s10 = scalar_lea.vmem %s21231_s5, %s14998_s7 }
  0x14   : > { %17738 = vmatprep.subr.msk.bf16.mxu0 %vm887_vm0, %v17755_v2  ;;  %15937 = vmatprep.mubr.msk.bf16.mxu0 %vm694_vm1, %v17756_v5  ;;  %v17760_v10 = vld [vmem:[%s18298_s29 + $0x28] sm:$0xff]   ;;  %v17761_v11 = vld [vmem:[%s18298_s29 + $0x30] sm:$0xff]   ;;  %v17762_v13 = vld [vmem:[%s18298_s29 + $0x38] sm:$0xff]  }
  0x15   : > { %v17763_v14 = vld [vmem:[%s18298_s29 + $0x40] sm:$0xff]   ;;  %v17764_v15 = vld [vmem:[%s18298_s29 + $0x48] sm:$0xff]   ;;  %v17765_v16 = vld [vmem:[%s18298_s29 + $0x50] sm:$0xff]  }
  0x16   : > { %v17766_v17 = vld [vmem:[%s18298_s29 + $0x58] sm:$0xff]   ;;  %v17767_v18 = vld [vmem:[%s18298_s29 + $0x60] sm:$0xff]   ;;  %v17768_v19 = vld [vmem:[%s18298_s29 + $0x68] sm:$0xff]  }
  0x17   : > { %15936 = vmatpush3.bf16.msra.mxu0 %v18305_v4  ;;  %v17769_v21 = vld [vmem:[%s18298_s29 + $0x70] sm:$0xff]   ;;  %v17770_v22 = vld [vmem:[%s18298_s29 + $0x78] sm:$0xff]   ;;  %v17772_v23 = vld [vmem:[%s18298_s29 + $0x80] sm:$0xff]  }
  0x18   : > { %16065 = vmatprep.subr.bf16.mxu0 %v17758_v3  ;;  %v17773_v24 = vld [vmem:[%s18298_s29 + $0x88] sm:$0xff]   ;;  %v17774_v25 = vld [vmem:[%s18298_s29 + $0x90] sm:$0xff]   ;;  %v17775_v26 = vld [vmem:[%s18298_s29 + $0x98] sm:$0xff]  }
  0x19   : > { %v17776_v27 = vld [vmem:[%s18298_s29 + $0xa0] sm:$0xff]   ;;  %v17777_v28 = vld [vmem:[%s18298_s29 + $0xa8] sm:$0xff]   ;;  %v17778_v29 = vld [vmem:[%s18298_s29 + $0xb0] sm:$0xff]  }
  0x1a   : > { %15938 = vmatmul.mubr.msk.bf16.vlgmr.msra.gmra.mrb[0].mxu0 %vm694_vm1, %v17757_v6  ;;  %v17779_v30 = vld [vmem:[%s18298_s29 + $0xb8] sm:$0xff]   ;;  %v17780_v31 = vld [vmem:[%s18298_s29 + $0xc0] sm:$0xff]   ;;  %v17781_v32 = vld [vmem:[%s18298_s29 + $0xc8] sm:$0xff]  }
  0x1b   : > { %16066 = vmatpush3.bf16.msra.mxu0 %v17758_v3  ;;  %15941 = vmatprep.mubr.msk.bf16.mxu0 %vm694_vm1, %v17759_v7  ;;  %v17782_v33 = vld [vmem:[%s18298_s29 + $0xd0] sm:$0xff]   ;;  %v17783_v34 = vld [vmem:[%s18298_s29 + $0xd8] sm:$0xff]   ;;  %v17784_v35 = vld [vmem:[%s18298_s29 + $0xe0] sm:$0xff]  }
  0x1c   : > { %16067 = vmatprep.subr.bf16.mxu0 %v17771_v8  ;;  %v17785_v36 = vld [vmem:[%s18298_s29 + $0xe8] sm:$0xff]   ;;  %v17787_v37 = vld [vmem:[%s18298_s29 + $0xf0] sm:$0xff]   ;;  %v17788_v38 = vld [vmem:[%s18298_s29 + $0xf8] sm:$0xff]  }
  0x1d   : > { %v17789_v39 = vld [vmem:[%s18298_s29 + $0x100] sm:$0xff]   ;;  %v17790_v40 = vld [vmem:[%s18298_s29 + $0x108] sm:$0xff]   ;;  %v17791_v41 = vld [vmem:[%s18298_s29 + $0x110] sm:$0xff]  }
  0x1e   : > { %v17792_v42 = vld [vmem:[%s18298_s29 + $0x118] sm:$0xff]   ;;  %v17793_v43 = vld [vmem:[%s18298_s29 + $0x120] sm:$0xff]   ;;  %v17794_v44 = vld [vmem:[%s18298_s29 + $0x128] sm:$0xff]  }
  0x1f   : > { %16068 = vmatpush3.bf16.msra.mxu0 %v17771_v8  ;;  %v17795_v45 = vld [vmem:[%s18298_s29 + $0x130] sm:$0xff]   ;;  %v17796_v46 = vld [vmem:[%s18298_s29 + $0x138] sm:$0xff]   ;;  %v17797_v47 = vld [vmem:[%s18298_s29 + $0x140] sm:$0xff]  }
  0x20   : > { %17740 = vmatprep.subr.msk.bf16.mxu0 %vm887_vm0, %v17786_v9  ;;  %v17798_v48 = vld [vmem:[%s18298_s29 + $0x148] sm:$0xff]   ;;  %v17799_v49 = vld [vmem:[%s18298_s29 + $0x20] sm:$0xff]   ;;  %v17802_v51 = vld [vmem:[%s18298_s29 + $0x30] sm:$0xff]  }
  0x21   : > { %v17800_v50 = vld [vmem:[%s18298_s29 + $0x28] sm:$0xff]   ;;  %v17803_v53 = vld [vmem:[%s18298_s29 + $0x38] sm:$0xff]   ;;  %v17804_v54 = vld [vmem:[%s18298_s29 + $0x40] sm:$0xff]  }
  0x22   : > { %15942 = vmatmul.mubr.msk.bf16.gmra.mrb[4].mxu0 %vm694_vm1, %v17760_v10  ;;  %v17805_v55 = vld [vmem:[%s18298_s29 + $0x48] sm:$0xff]   ;;  %v17806_v56 = vld [vmem:[%s18298_s29 + $0x50] sm:$0xff]   ;;  %v17807_v57 = vld [vmem:[%s18298_s29 + $0x58] sm:$0xff]  }
  0x23   : > { %15945 = vmatprep.mubr.msk.bf16.mxu0 %vm694_vm1, %v17761_v11  ;;  %16070 = vmatpush3.bf16.msra.mxu0 %v3821_v12  ;;  %v17808_v58 = vld [vmem:[%s18298_s29 + $0x60] sm:$0xff]   ;;  %v17809_v59 = vld [vmem:[%s18298_s29 + $0x68] sm:$0xff]   ;;  %v17810_v60 = vld [vmem:[%s18298_s29 + $0x70] sm:$0xff]  }
  0x24   : > { %16199 = vmatprep.subr.bf16.mxu0 %v18342_v20  ;;  %v17811_v61 = vld [vmem:[%s18298_s29 + $0x78] sm:$0xff]   ;;  %v17812_v62 = vld [vmem:[%s18298_s29 + $0x80] sm:$0xff]   ;;  %v17813_v0 = vld [vmem:[%s18298_s29 + $0x88] sm:$0xff]  }
  0x25   : > { %v17814_v2 = vld [vmem:[%s18298_s29 + $0x90] sm:$0xff]   ;;  %v17815_v3 = vld [vmem:[%s18298_s29 + $0x98] sm:$0xff]   ;;  %v17816_v5 = vld [vmem:[%s18298_s29 + $0xa0] sm:$0xff]  }
  0x26   : > { %v17817_v6 = vld [vmem:[%s18298_s29 + $0xa8] sm:$0xff]   ;;  %v17818_v7 = vld [vmem:[%s18298_s29 + $0xb0] sm:$0xff]   ;;  %v17819_v8 = vld [vmem:[%s18298_s29 + $0xb8] sm:$0xff]  }
  0x27   : > { %v17820_v9 = vld [vmem:[%s18298_s29 + $0xc0] sm:$0xff]   ;;  %v17821_v10 = vld [vmem:[%s18298_s29 + $0xc8] sm:$0xff]   ;;  %v17823_v11 = vld [vmem:[%s18298_s29 + $0xd0] sm:$0xff]  }
  0x28   : > { %v17824_v12 = vld [vmem:[%s18298_s29 + $0xd8] sm:$0xff]   ;;  %vm19068_vm9 = vmor %vm9051_vm7, %vm9052_vm8 }
  0x29   : > { %vm19185_vm11 = vmand %vm887_vm0, %vm8437_vm2 }
  0x2a   : > { %15946 = vmatmul.mubr.msk.bf16.gmra.mrb[8].mxu0 %vm694_vm1, %v17762_v13  ;;  %v17825_v13 = vld [vmem:[%s18298_s29 + $0xe0] sm:$0xff]   ;;  %vm19193_vm12 = vmor %vm8387_vm4, %vm8567_vm10 }
  0x2b   : > { %15949 = vmatprep.mubr.msk.bf16.mxu0 %vm694_vm1, %v17763_v14  ;;  %v17826_v14 = vld [vmem:[%s18298_s29 + $0xe8] sm:$0xff]   ;;  %vm19262_vm15 = vmor %vm9502_vm13, %vm9503_vm14 }
  0x32   : > { %15950 = vmatmul.mubr.msk.bf16.gmra.mrb[12].mxu0 %vm694_vm1, %v17764_v15  ;;  %v17827_v15 = vld [vmem:[%s18298_s29 + $0xf0] sm:$0xff]  }
  0x33   : > { %15953 = vmatprep.mubr.msk.bf16.mxu0 %vm694_vm1, %v17765_v16  ;;  %v17828_v16 = vld [vmem:[%s18298_s29 + $0xf8] sm:$0xff]  }
  0x3a   : > { %15954 = vmatmul.mubr.msk.bf16.gmra.mrb[16].mxu0 %vm694_vm1, %v17766_v17  ;;  %v17829_v17 = vld [vmem:[%s18298_s29 + $0x100] sm:$0xff]  }
  0x3b   : > { %15957 = vmatprep.mubr.msk.bf16.mxu0 %vm694_vm1, %v17767_v18  ;;  %v17830_v18 = vld [vmem:[%s18298_s29 + $0x108] sm:$0xff]  }
  0x42   : > { %15958 = vmatmul.mubr.msk.bf16.gmra.mrb[20].mxu0 %vm694_vm1, %v17768_v19  ;;  %v17831_v19 = vld [vmem:[%s18298_s29 + $0x110] sm:$0xff]  }
  0x43   : > { %15961 = vmatprep.mubr.msk.bf16.mxu0 %vm694_vm1, %v17769_v21  ;;  %v17833_v21 = vld [vmem:[%s18298_s29 + $0x120] sm:$0xff]  }
  0x4a   : > { %15962 = vmatmul.mubr.msk.bf16.gmra.mrb[24].mxu0 %vm694_vm1, %v17770_v22  ;;  %v17834_v22 = vld [vmem:[%s18298_s29 + $0x128] sm:$0xff]  }
  0x4b   : > { %15965 = vmatprep.mubr.msk.bf16.mxu0 %vm694_vm1, %v17772_v23  ;;  %v17835_v23 = vld [vmem:[%s18298_s29 + $0x130] sm:$0xff]  }
  0x52   : > { %15966 = vmatmul.mubr.msk.bf16.gmra.mrb[28].mxu0 %vm694_vm1, %v17773_v24  ;;  %v18483_v24 = vld [vmem:[%s21227_s1 + $0x50] sm:$0xff]  }
  0x53   : > { %15969 = vmatprep.mubr.msk.bf16.mxu0 %vm694_vm1, %v17774_v25  ;;  %v17836_v25 = vld [vmem:[%s18298_s29 + $0x138] sm:$0xff]  }
  0x5a   : > { %15970 = vmatmul.mubr.msk.bf16.gmra.mrb[32].mxu0 %vm694_vm1, %v17775_v26  ;;  %v17837_v26 = vld [vmem:[%s18298_s29 + $0x140] sm:$0xff]  }
  0x5b   : > { %15973 = vmatprep.mubr.msk.bf16.mxu0 %vm694_vm1, %v17776_v27  ;;  %v17838_v27 = vld [vmem:[%s18298_s29 + $0x148] sm:$0xff]  }
  0x62   : > { %15974 = vmatmul.mubr.msk.bf16.gmra.mrb[36].mxu0 %vm694_vm1, %v17777_v28  ;;  %v17839_v28 = vld [vmem:[%s18298_s29 + $0x150] sm:$0xff]  }
  0x63   : > { %15977 = vmatprep.mubr.msk.bf16.mxu0 %vm694_vm1, %v17778_v29  ;;  %v17840_v29 = vld [vmem:[%s18298_s29 + $0x158] sm:$0xff]  }
  0x6a   : > { %15978 = vmatmul.mubr.msk.bf16.gmra.mrb[40].mxu0 %vm694_vm1, %v17779_v30  ;;  %v17841_v30 = vld [vmem:[%s18298_s29 + $0x160] sm:$0xff]  }
  0x6b   : > { %15981 = vmatprep.mubr.msk.bf16.mxu0 %vm694_vm1, %v17780_v31  ;;  %v17842_v31 = vld [vmem:[%s18298_s29 + $0x168] sm:$0xff]  }
  0x72   : > { %15982 = vmatmul.mubr.msk.bf16.gmra.mrb[44].mxu0 %vm694_vm1, %v17781_v32  ;;  %v17843_v32 = vld [vmem:[%s18298_s29 + $0x170] sm:$0xff]  }
  0x73   : > { %15985 = vmatprep.mubr.msk.bf16.mxu0 %vm694_vm1, %v17782_v33  ;;  %v17844_v33 = vld [vmem:[%s18298_s29 + $0x178] sm:$0xff]  }
  0x7a   : > { %15986 = vmatmul.mubr.msk.bf16.gmra.mrb[48].mxu0 %vm694_vm1, %v17783_v34  ;;  %v17846_v34 = vld [vmem:[%s18298_s29 + $0x180] sm:$0xff]  }
  0x7b   : > { %15989 = vmatprep.mubr.msk.bf16.mxu0 %vm694_vm1, %v17784_v35  ;;  %v17879_v35 = vld [vmem:[%s21227_s1] sm:$0xff]  }
  0x7c   : > { %15797 = vmatprep.subr.bf16.mxu1 %v17879_v35 }
  0x7d   : > { %15798 = vmatpush3.bf16.msra.mxu1 %v17879_v35  ;;  %v17876_v35 = vld [vmem:[%s18298_s29 + $0x78] sm:$0xff]  }
  0x82   : > { %15990 = vmatmul.mubr.msk.bf16.gmra.mrb[52].mxu0 %vm694_vm1, %v17785_v36  ;;  %v17880_v36 = vld [vmem:[%s21227_s1 + $0x8] sm:$0xff]  }
  0x83   : > { %15993 = vmatprep.mubr.msk.bf16.mxu0 %vm694_vm1, %v17787_v37  ;;  %15799 = vmatprep.subr.bf16.mxu1 %v17880_v36  ;;  %v17847_v37 = vld [vmem:[%s18298_s29 + $0x188] sm:$0xff]  }
  0x84   : > { %15800 = vmatpush3.bf16.msra.mxu1 %v17880_v36  ;;  %v17877_v36 = vld [vmem:[%s18298_s29 + $0x80] sm:$0xff]  }
  0x8a   : > { %15994 = vmatmul.mubr.msk.bf16.gmra.mrb[56].mxu0 %vm694_vm1, %v17788_v38  ;;  %v17848_v38 = vld [vmem:[%s18298_s29 + $0x190] sm:$0xff]  }
  0x8b   : > { %15997 = vmatprep.mubr.msk.bf16.mxu0 %vm694_vm1, %v17789_v39  ;;  %v17883_v39 = vld [vmem:[%s21227_s1 + $0x10] ss:$0 sps:$4 sm:$0xff]  }
  0x8c   : > { %17737 = vmatprep.subr.msk.bf16.mxu1 %vm887_vm0, %v17883_v39 }
  0x92   : > { %15998 = vmatmul.mubr.msk.bf16.gmra.mrb[60].mxu0 %vm694_vm1, %v17790_v40  ;;  %v17884_v40 = vld [vmem:[%s18298_s29] sm:$0xff]  }
  0x93   : > { %16001 = vmatprep.mubr.msk.bf16.mxu0 %vm694_vm1, %v17791_v41  ;;  %v889_v41 = vsel %vm887_vm0, %v17883_v39, 0  ;;  %15803 = vmatprep.mubr.msk.bf16.mxu1 %vm694_vm1, %v17884_v40  ;;  %v17878_v39 = vld [vmem:[%s18298_s29 + $0x88] sm:$0xff]   ;;  %v17881_v40 = vld [vmem:[%s18298_s29 + $0x90] sm:$0xff]  }
  0x94   : > { %15802 = vmatpush3.bf16.msra.mxu1 %v889_v41  ;;  %v17945_v41 = vld [vmem:[%s21227_s1 + $0x60] ss:$0 sps:$4 sm:$0xff]  }
  0x9a   : > { %16002 = vmatmul.mubr.msk.bf16.gmra.mrb[64].mxu0 %vm694_vm1, %v17792_v42  ;;  %v17885_v42 = vld [vmem:[%s18298_s29 + $0x8] sm:$0xff]  }
  0x9b   : > { %16005 = vmatprep.mubr.msk.bf16.mxu0 %vm694_vm1, %v17793_v43  ;;  %v18208_v43 = vld [vmem:[%s21227_s1 + $0x14] sm:$0xff]   ;;  %15804 = vmatmul.mubr.msk.bf16.vlgmr.msra.gmra.mrb[0].mxu1 %vm694_vm1, %v17885_v42 }
  0x9c   : > { %16611 = vmatprep.subr.bf16.mxu1 %v18208_v43  ;;  %v17946_v42 = vld [vmem:[%s18298_s29 + $0xf0] sm:$0xff]  }
  0x9d   : > { %16614 = vmatpush3.bf16.msra.mxu1 %v18208_v43  ;;  %v17947_v43 = vld [vmem:[%s18298_s29 + $0xf8] sm:$0xff]  }
  0xa2   : > { %16006 = vmatmul.mubr.msk.bf16.gmra.mrb[68].mxu0 %vm694_vm1, %v17794_v44  ;;  %v17849_v44 = vld [vmem:[%s18298_s29 + $0x198] sm:$0xff]  }
  0xa3   : > { %16009 = vmatprep.mubr.msk.bf16.mxu0 %vm694_vm1, %v17795_v45  ;;  %v17850_v45 = vld [vmem:[%s18298_s29 + $0x1a0] sm:$0xff]  }
  0xaa   : > { %16010 = vmatmul.mubr.msk.bf16.gmra.mrb[72].mxu0 %vm694_vm1, %v17796_v46  ;;  %v18209_v46 = vld [vmem:[%s21227_s1 + $0x1c] sm:$0xff]  }
  0xab   : > { %16013 = vmatprep.mubr.msk.bf16.mxu0 %vm694_vm1, %v17797_v47  ;;  %16612 = vmatprep.subr.bf16.mxu1 %v18209_v46  ;;  %v17888_v47 = vld [vmem:[%s18298_s29 + $0x10] sm:$0xff]  }
  0xac   : > { %15807 = vmatprep.mubr.msk.bf16.mxu1 %vm694_vm1, %v17888_v47  ;;  %16615 = vmatpush3.bf16.msra.mxu1 %v18209_v46  ;;  %v17886_v46 = vld [vmem:[%s18298_s29 + $0xa0] sm:$0xff]  }
  0xad   : > { %v17950_v47 = vld [vmem:[%s18298_s29 + $0x100] sm:$0xff]  }
  0xb2   : > { %16014 = vmatmul.mubr.msk.bf16.gmra.mrb[76].mxu0 %vm694_vm1, %v17798_v48  ;;  %v17889_v48 = vld [vmem:[%s18298_s29 + $0x18] sm:$0xff]  }
  0xb3   : > { %16071 = vmatprep.mubr.msk.bf16.mxu0 %vm694_vm1, %v17799_v49  ;;  %v18210_v49 = vld [vmem:[%s21227_s1 + $0x24] ss:$0 sps:$4 sm:$0xff]   ;;  %15808 = vmatmul.mubr.msk.bf16.gmra.mrb[4].mxu1 %vm694_vm1, %v17889_v48  ;;  %v17951_v48 = vld [vmem:[%s18298_s29 + $0x108] sm:$0xff]  }
  0xb4   : > { %17739 = vmatprep.subr.msk.bf16.mxu1 %vm887_vm0, %v18210_v49  ;;  %v17887_v49 = vld [vmem:[%s18298_s29 + $0xa8] sm:$0xff]  }
  0xb5   : > { %16616 = vmatpush3.bf16.msra.mxu1 %v18305_v4  ;;  %v17897_v4 = vld [vmem:[%s18298_s29 + $0x38] sm:$0xff]  }
  0xba   : > { %16072 = vmatmul.mubr.msk.bf16.vlgmr.msra.gmra.mrb[0].mxu0 %vm694_vm1, %v17800_v50  ;;  %v17851_v50 = vld [vmem:[%s18298_s29 + $0x1a8] sm:$0xff]  }
  0xbb   : > { %16200 = vmatpush3.bf16.msra.mxu0 %v18342_v20  ;;  %16075 = vmatprep.mubr.msk.bf16.mxu0 %vm694_vm1, %v17802_v51  ;;  %v17832_v20 = vld [vmem:[%s18298_s29 + $0x118] sm:$0xff]   ;;  %v17852_v51 = vld [vmem:[%s18298_s29 + $0x1b0] sm:$0xff]  }
  0xbc   : > { %16201 = vmatprep.subr.bf16.mxu0 %v17822_v52 }
  0xbf   : > { %16202 = vmatpush3.bf16.msra.mxu0 %v17822_v52  ;;  %v17892_v52 = vld [vmem:[%s18298_s29 + $0x20] sm:$0xff]  }
  0xc0   : > { %17741 = vmatprep.subr.msk.bf16.mxu0 %vm887_vm0, %v17845_v63  ;;  %15811 = vmatprep.mubr.msk.bf16.mxu1 %vm694_vm1, %v17892_v52  ;;  %v17905_v63 = vld [vmem:[%s18298_s29 + $0x50] sm:$0xff]   ;;  %v17955_v52 = vld [vmem:[%s18298_s29 + $0x118] sm:$0xff]  }
  0xc2   : > { %16076 = vmatmul.mubr.msk.bf16.gmra.mrb[4].mxu0 %vm694_vm1, %v17803_v53  ;;  %v17893_v53 = vld [vmem:[%s18298_s29 + $0x28] sm:$0xff]  }
  0xc3   : > { %16079 = vmatprep.mubr.msk.bf16.mxu0 %vm694_vm1, %v17804_v54  ;;  %16204 = vmatpush3.bf16.msra.mxu0 %v5415_v1  ;;  %v17853_v54 = vld [vmem:[%s18298_s29 + $0x1b8] sm:$0xff]   ;;  %v17859_v1 = vld [vmem:[%s18298_s29 + $0x1e8] sm:$0xff]  }
  0xc4   : > { %16333 = vmatprep.subr.bf16.mxu0 %v18483_v24  ;;  %15812 = vmatmul.mubr.msk.bf16.gmra.mrb[8].mxu1 %vm694_vm1, %v17893_v53  ;;  %v17891_v53 = vld [vmem:[%s18298_s29 + $0xb8] sm:$0xff]  }
  0xca   : > { %16080 = vmatmul.mubr.msk.bf16.gmra.mrb[8].mxu0 %vm694_vm1, %v17805_v55  ;;  %v17854_v55 = vld [vmem:[%s18298_s29 + $0x1c0] sm:$0xff]  }
  0xcb   : > { %16083 = vmatprep.mubr.msk.bf16.mxu0 %vm694_vm1, %v17806_v56  ;;  %v17896_v56 = vld [vmem:[%s18298_s29 + $0x30] sm:$0xff]  }
  0xcc   : > { %15815 = vmatprep.mubr.msk.bf16.mxu1 %vm694_vm1, %v17896_v56  ;;  %v17959_v56 = vld [vmem:[%s18298_s29 + $0x128] sm:$0xff]  }
  0xcd   : > { %15816 = vmatmul.mubr.msk.bf16.gmra.mrb[12].mxu1 %vm694_vm1, %v17897_v4  ;;  %v17895_v4 = vld [vmem:[%s18298_s29 + $0xc8] sm:$0xff]  }
  0xd2   : > { %16084 = vmatmul.mubr.msk.bf16.gmra.mrb[12].mxu0 %vm694_vm1, %v17807_v57  ;;  %v17855_v57 = vld [vmem:[%s18298_s29 + $0x1c8] sm:$0xff]  }
  0xd3   : > { %16087 = vmatprep.mubr.msk.bf16.mxu0 %vm694_vm1, %v17808_v58  ;;  %v17856_v58 = vld [vmem:[%s18298_s29 + $0x1d0] sm:$0xff]  }
  0xda   : > { %16088 = vmatmul.mubr.msk.bf16.gmra.mrb[16].mxu0 %vm694_vm1, %v17809_v59  ;;  %v17900_v59 = vld [vmem:[%s18298_s29 + $0x40] sm:$0xff]  }
  0xdb   : > { %16091 = vmatprep.mubr.msk.bf16.mxu0 %vm694_vm1, %v17810_v60  ;;  %v17901_v60 = vld [vmem:[%s18298_s29 + $0x48] sm:$0xff]   ;;  %15819 = vmatprep.mubr.msk.bf16.mxu1 %vm694_vm1, %v17900_v59  ;;  %v17963_v59 = vld [vmem:[%s18298_s29 + $0x138] sm:$0xff]  }
  0xdc   : > { %15820 = vmatmul.mubr.msk.bf16.gmra.mrb[16].mxu1 %vm694_vm1, %v17901_v60  ;;  %v17899_v60 = vld [vmem:[%s18298_s29 + $0xd8] sm:$0xff]  }
  0xdd   : > { %15823 = vmatprep.mubr.msk.bf16.mxu1 %vm694_vm1, %v17905_v63  ;;  %v17967_v63 = vld [vmem:[%s18298_s29 + $0x148] sm:$0xff]  }
  0xe2   : > { %16092 = vmatmul.mubr.msk.bf16.gmra.mrb[20].mxu0 %vm694_vm1, %v17811_v61  ;;  %v17857_v61 = vld [vmem:[%s18298_s29 + $0x1d8] sm:$0xff]  }
  0xe3   : > { %16095 = vmatprep.mubr.msk.bf16.mxu0 %vm694_vm1, %v17812_v62  ;;  %v17858_v62 = vld [vmem:[%s18298_s29 + $0x1e0] sm:$0xff]  }
  0xea   : > { %16096 = vmatmul.mubr.msk.bf16.gmra.mrb[24].mxu0 %vm694_vm1, %v17813_v0  ;;  %v17906_v0 = vld [vmem:[%s18298_s29 + $0x58] sm:$0xff]  }
  0xeb   : > { %16099 = vmatprep.mubr.msk.bf16.mxu0 %vm694_vm1, %v17814_v2  ;;  %v17860_v2 = vld [vmem:[%s18298_s29 + $0x1f0] sm:$0xff]   ;;  %15824 = vmatmul.mubr.msk.bf16.gmra.mrb[20].mxu1 %vm694_vm1, %v17906_v0  ;;  %v17904_v0 = vld [vmem:[%s18298_s29 + $0xe8] sm:$0xff]  }
  0xf2   : > { %16100 = vmatmul.mubr.msk.bf16.gmra.mrb[28].mxu0 %vm694_vm1, %v17815_v3  ;;  %v17909_v3 = vld [vmem:[%s18298_s29 + $0x60] sm:$0xff]  }
  0xf3   : > { %16103 = vmatprep.mubr.msk.bf16.mxu0 %vm694_vm1, %v17816_v5  ;;  %v17910_v5 = vld [vmem:[%s18298_s29 + $0x68] sm:$0xff]   ;;  %15827 = vmatprep.mubr.msk.bf16.mxu1 %vm694_vm1, %v17909_v3  ;;  %v17971_v3 = vld [vmem:[%s18298_s29 + $0x158] sm:$0xff]  }
  0xf4   : > { %15828 = vmatmul.mubr.msk.bf16.gmra.mrb[24].mxu1 %vm694_vm1, %v17910_v5  ;;  %v17908_v5 = vld [vmem:[%s18298_s29 + $0xf8] sm:$0xff]  }
  0xfa   : > { %16104 = vmatmul.mubr.msk.bf16.gmra.mrb[32].mxu0 %vm694_vm1, %v17817_v6  ;;  %v17861_v6 = vld [vmem:[%s18298_s29 + $0x1f8] sm:$0xff]  }
  0xfb   : > { %16107 = vmatprep.mubr.msk.bf16.mxu0 %vm694_vm1, %v17818_v7  ;;  %v17862_v7 = vld [vmem:[%s18298_s29 + $0x200] sm:$0xff]  }
 0x102   : > { %16108 = vmatmul.mubr.msk.bf16.gmra.mrb[36].mxu0 %vm694_vm1, %v17819_v8  ;;  %v17913_v8 = vld [vmem:[%s18298_s29 + $0x70] sm:$0xff]  }
 0x103   : > { %16111 = vmatprep.mubr.msk.bf16.mxu0 %vm694_vm1, %v17820_v9  ;;  %v17914_v9 = vld [vmem:[%s18298_s29 + $0x78] sm:$0xff]   ;;  %15831 = vmatprep.mubr.msk.bf16.mxu1 %vm694_vm1, %v17913_v8  ;;  %v17975_v8 = vld [vmem:[%s18298_s29 + $0x168] sm:$0xff]  }
 0x104   : > { %15832 = vmatmul.mubr.msk.bf16.gmra.mrb[28].mxu1 %vm694_vm1, %v17914_v9  ;;  %v17912_v9 = vld [vmem:[%s18298_s29 + $0x108] sm:$0xff]  }
 0x10a   : > { %16112 = vmatmul.mubr.msk.bf16.gmra.mrb[40].mxu0 %vm694_vm1, %v17821_v10  ;;  %v17863_v10 = vld [vmem:[%s18298_s29 + $0x208] sm:$0xff]  }
 0x10b   : > { %16115 = vmatprep.mubr.msk.bf16.mxu0 %vm694_vm1, %v17823_v11  ;;  %v17864_v11 = vld [vmem:[%s18298_s29 + $0x210] sm:$0xff]  }
 0x112   : > { %16116 = vmatmul.mubr.msk.bf16.gmra.mrb[44].mxu0 %vm694_vm1, %v17824_v12  ;;  %v17917_v12 = vld [vmem:[%s18298_s29 + $0x80] sm:$0xff]  }
 0x113   : > { %16119 = vmatprep.mubr.msk.bf16.mxu0 %vm694_vm1, %v17825_v13  ;;  %v17918_v13 = vld [vmem:[%s18298_s29 + $0x88] sm:$0xff]   ;;  %15835 = vmatprep.mubr.msk.bf16.mxu1 %vm694_vm1, %v17917_v12  ;;  %v17979_v12 = vld [vmem:[%s18298_s29 + $0x178] sm:$0xff]  }
 0x114   : > { %15836 = vmatmul.mubr.msk.bf16.gmra.mrb[32].mxu1 %vm694_vm1, %v17918_v13  ;;  %v17916_v13 = vld [vmem:[%s18298_s29 + $0x118] sm:$0xff]  }
 0x11a   : > { %16120 = vmatmul.mubr.msk.bf16.gmra.mrb[48].mxu0 %vm694_vm1, %v17826_v14  ;;  %v17865_v14 = vld [vmem:[%s18298_s29 + $0x218] sm:$0xff]  }
 0x11b   : > { %16123 = vmatprep.mubr.msk.bf16.mxu0 %vm694_vm1, %v17827_v15  ;;  %v17866_v15 = vld [vmem:[%s18298_s29 + $0x30] sm:$0xff]  }
 0x122   : > { %16124 = vmatmul.mubr.msk.bf16.gmra.mrb[52].mxu0 %vm694_vm1, %v17828_v16  ;;  %v17921_v16 = vld [vmem:[%s18298_s29 + $0x90] sm:$0xff]  }
 0x123   : > { %16127 = vmatprep.mubr.msk.bf16.mxu0 %vm694_vm1, %v17829_v17  ;;  %v17922_v17 = vld [vmem:[%s18298_s29 + $0x98] sm:$0xff]   ;;  %15839 = vmatprep.mubr.msk.bf16.mxu1 %vm694_vm1, %v17921_v16  ;;  %v17983_v16 = vld [vmem:[%s18298_s29 + $0x188] sm:$0xff]  }
 0x124   : > { %15840 = vmatmul.mubr.msk.bf16.gmra.mrb[36].mxu1 %vm694_vm1, %v17922_v17  ;;  %v17920_v17 = vld [vmem:[%s18298_s29 + $0x128] sm:$0xff]  }
 0x12a   : > { %16128 = vmatmul.mubr.msk.bf16.gmra.mrb[56].mxu0 %vm694_vm1, %v17830_v18  ;;  %v17867_v18 = vld [vmem:[%s18298_s29 + $0x38] sm:$0xff]  }
 0x12b   : > { %16131 = vmatprep.mubr.msk.bf16.mxu0 %vm694_vm1, %v17831_v19  ;;  %v17869_v19 = vld [vmem:[%s18298_s29 + $0x40] sm:$0xff]  }
 0x132   : > { %16132 = vmatmul.mubr.msk.bf16.gmra.mrb[60].mxu0 %vm694_vm1, %v17832_v20  ;;  %v17902_v20 = vld [vmem:[%s21227_s1 + $0x58] sm:$0xff]  }
 0x133   : > { %16135 = vmatprep.mubr.msk.bf16.mxu0 %vm694_vm1, %v17833_v21  ;;  %v17925_v21 = vld [vmem:[%s18298_s29 + $0xa0] sm:$0xff]  }
 0x134   : > { %15843 = vmatprep.mubr.msk.bf16.mxu1 %vm694_vm1, %v17925_v21  ;;  %v17924_v21 = vld [vmem:[%s18298_s29 + $0x138] sm:$0xff]  }
 0x13a   : > { %16136 = vmatmul.mubr.msk.bf16.gmra.mrb[64].mxu0 %vm694_vm1, %v17834_v22  ;;  %v17926_v22 = vld [vmem:[%s18298_s29 + $0xa8] sm:$0xff]  }
 0x13b   : > { %16139 = vmatprep.mubr.msk.bf16.mxu0 %vm694_vm1, %v17835_v23  ;;  %v17870_v23 = vld [vmem:[%s18298_s29 + $0x48] sm:$0xff]   ;;  %15844 = vmatmul.mubr.msk.bf16.gmra.mrb[40].mxu1 %vm694_vm1, %v17926_v22  ;;  %v17927_v22 = vld [vmem:[%s18298_s29 + $0x140] sm:$0xff]  }
 0x142   : > { %16140 = vmatmul.mubr.msk.bf16.gmra.mrb[68].mxu0 %vm694_vm1, %v17836_v25  ;;  %v17871_v25 = vld [vmem:[%s18298_s29 + $0x50] sm:$0xff]  }
 0x143   : > { %16143 = vmatprep.mubr.msk.bf16.mxu0 %vm694_vm1, %v17837_v26  ;;  %v17929_v26 = vld [vmem:[%s18298_s29 + $0xb0] sm:$0xff]  }
 0x144   : > { %15847 = vmatprep.mubr.msk.bf16.mxu1 %vm694_vm1, %v17929_v26  ;;  %v17928_v26 = vld [vmem:[%s18298_s29 + $0x148] sm:$0xff]  }
 0x14a   : > { %16144 = vmatmul.mubr.msk.bf16.gmra.mrb[72].mxu0 %vm694_vm1, %v17838_v27  ;;  %v17872_v27 = vld [vmem:[%s18298_s29 + $0x58] sm:$0xff]  }
 0x14b   : > { %16147 = vmatprep.mubr.msk.bf16.mxu0 %vm694_vm1, %v17839_v28  ;;  %v17873_v28 = vld [vmem:[%s18298_s29 + $0x60] sm:$0xff]  }
 0x152   : > { %16148 = vmatmul.mubr.msk.bf16.gmra.mrb[76].mxu0 %vm694_vm1, %v17840_v29  ;;  %v17933_v29 = vld [vmem:[%s18298_s29 + $0xc0] sm:$0xff]  }
 0x153   : > { %16151 = vmatprep.mubr.msk.bf16.mxu0 %vm694_vm1, %v17841_v30  ;;  %v17934_v30 = vld [vmem:[%s18298_s29 + $0xc8] sm:$0xff]  }
 0x15a   : > { %16152 = vmatmul.mubr.msk.bf16.gmra.mrb[80].mxu0 %vm694_vm1, %v17842_v31  ;;  %v17874_v31 = vld [vmem:[%s18298_s29 + $0x68] sm:$0xff]  }
 0x15b   : > { %16155 = vmatprep.mubr.msk.bf16.mxu0 %vm694_vm1, %v17843_v32  ;;  %v17875_v32 = vld [vmem:[%s18298_s29 + $0x70] sm:$0xff]  }
 0x162   : > { %16156 = vmatmul.mubr.msk.bf16.gmra.mrb[84].mxu0 %vm694_vm1, %v17844_v33  ;;  %v17937_v33 = vld [vmem:[%s18298_s29 + $0xd0] sm:$0xff]  }
 0x163   : > { %16159 = vmatprep.mubr.msk.bf16.mxu0 %vm694_vm1, %v17846_v34  ;;  %v17938_v34 = vld [vmem:[%s18298_s29 + $0xd8] sm:$0xff]  }
 0x16a   : > { %16160 = vmatmul.mubr.msk.bf16.gmra.mrb[88].mxu0 %vm694_vm1, %v17847_v37  ;;  %v17941_v37 = vld [vmem:[%s18298_s29 + $0xe0] sm:$0xff]  }
 0x16b   : > { %16163 = vmatprep.mubr.msk.bf16.mxu0 %vm694_vm1, %v17848_v38  ;;  %v17942_v38 = vld [vmem:[%s18298_s29 + $0xe8] sm:$0xff]  }
 0x172   : > { %16164 = vmatmul.mubr.msk.bf16.gmra.mrb[92].mxu0 %vm694_vm1, %v17849_v44  ;;  %v7009_v44 = vsel %vm887_vm0, %v17945_v41, 0 }
 0x173   : > { %16167 = vmatprep.mubr.msk.bf16.mxu0 %vm694_vm1, %v17850_v45  ;;  %v17882_v45 = vld [vmem:[%s18298_s29 + $0x98] sm:$0xff]  }
 0x17a   : > { %16168 = vmatmul.mubr.msk.bf16.gmra.mrb[96].mxu0 %vm694_vm1, %v17851_v50  ;;  %v17890_v50 = vld [vmem:[%s18298_s29 + $0xb0] sm:$0xff]  }
 0x17b   : > { %16171 = vmatprep.mubr.msk.bf16.mxu0 %vm694_vm1, %v17852_v51  ;;  %v17954_v51 = vld [vmem:[%s18298_s29 + $0x110] sm:$0xff]  }
 0x182   : > { %16172 = vmatmul.mubr.msk.bf16.gmra.mrb[100].mxu0 %vm694_vm1, %v17853_v54  ;;  %v17894_v54 = vld [vmem:[%s18298_s29 + $0xc0] sm:$0xff]  }
 0x183   : > { %16175 = vmatprep.mubr.msk.bf16.mxu0 %vm694_vm1, %v17854_v55  ;;  %v17958_v55 = vld [vmem:[%s18298_s29 + $0x120] sm:$0xff]  }
 0x18a   : > { %16176 = vmatmul.mubr.msk.bf16.gmra.mrb[104].mxu0 %vm694_vm1, %v17855_v57  ;;  %v17898_v57 = vld [vmem:[%s18298_s29 + $0xd0] sm:$0xff]  }
 0x18b   : > { %16179 = vmatprep.mubr.msk.bf16.mxu0 %vm694_vm1, %v17856_v58  ;;  %v17962_v58 = vld [vmem:[%s18298_s29 + $0x130] sm:$0xff]  }
 0x192   : > { %16180 = vmatmul.mubr.msk.bf16.gmra.mrb[108].mxu0 %vm694_vm1, %v17857_v61  ;;  %v17903_v61 = vld [vmem:[%s18298_s29 + $0xe0] sm:$0xff]  }
 0x193   : > { %16183 = vmatprep.mubr.msk.bf16.mxu0 %vm694_vm1, %v17858_v62  ;;  %v17966_v62 = vld [vmem:[%s18298_s29 + $0x140] sm:$0xff]  }
 0x19a   : > { %16184 = vmatmul.mubr.msk.bf16.gmra.mrb[112].mxu0 %vm694_vm1, %v17859_v1  ;;  %v17907_v1 = vld [vmem:[%s18298_s29 + $0xf0] sm:$0xff]  }
 0x19b   : > { %16187 = vmatprep.mubr.msk.bf16.mxu0 %vm694_vm1, %v17860_v2  ;;  %v17970_v2 = vld [vmem:[%s18298_s29 + $0x150] sm:$0xff]  }
 0x1a2   : > { %16188 = vmatmul.mubr.msk.bf16.gmra.mrb[116].mxu0 %vm694_vm1, %v17861_v6  ;;  %v17911_v6 = vld [vmem:[%s18298_s29 + $0x100] sm:$0xff]  }
 0x1a3   : > { %16191 = vmatprep.mubr.msk.bf16.mxu0 %vm694_vm1, %v17862_v7  ;;  %v17974_v7 = vld [vmem:[%s18298_s29 + $0x160] sm:$0xff]  }
 0x1aa   : > { %16192 = vmatmul.mubr.msk.bf16.gmra.mrb[120].mxu0 %vm694_vm1, %v17863_v10  ;;  %v17915_v10 = vld [vmem:[%s18298_s29 + $0x110] sm:$0xff]  }
 0x1ab   : > { %16195 = vmatprep.mubr.msk.bf16.mxu0 %vm694_vm1, %v17864_v11  ;;  %v17978_v11 = vld [vmem:[%s18298_s29 + $0x170] sm:$0xff]  }
 0x1b2   : > { %16196 = vmatmul.mubr.msk.bf16.gmra.mrb[124].mxu0 %vm694_vm1, %v17865_v14  ;;  %v17919_v14 = vld [vmem:[%s18298_s29 + $0x120] sm:$0xff]  }
 0x1b3   : > { %16205 = vmatprep.mubr.msk.bf16.mxu0 %vm694_vm1, %v17866_v15  ;;  %v17982_v15 = vld [vmem:[%s18298_s29 + $0x180] sm:$0xff]  }
 0x1ba   : > { %16206 = vmatmul.mubr.msk.bf16.vlgmr.msra.gmra.mrb[0].mxu0 %vm694_vm1, %v17867_v18  ;;  %v17923_v18 = vld [vmem:[%s18298_s29 + $0x130] sm:$0xff]  }
 0x1bb   : > { %16334 = vmatpush3.bf16.msra.mxu0 %v18483_v24  ;;  %16209 = vmatprep.mubr.msk.bf16.mxu0 %vm694_vm1, %v17869_v19  ;;  %v17930_v24 = vld [vmem:[%s18298_s29 + $0xb8] sm:$0xff]   ;;  %v17986_v19 = vld [vmem:[%s18298_s29 + $0x190] sm:$0xff]  }
 0x1bc   : > { %16335 = vmatprep.subr.bf16.mxu0 %v17902_v20  ;;  %15848 = vmatmul.mubr.msk.bf16.gmra.mrb[44].mxu1 %vm694_vm1, %v17930_v24  ;;  %v17931_v24 = vld [vmem:[%s18298_s29 + $0x150] sm:$0xff]  }
 0x1bd   : > { %15851 = vmatprep.mubr.msk.bf16.mxu1 %vm694_vm1, %v17933_v29  ;;  %v17932_v29 = vld [vmem:[%s18298_s29 + $0x158] sm:$0xff]  }
 0x1bf   : > { %16336 = vmatpush3.bf16.msra.mxu0 %v17902_v20  ;;  %v17987_v20 = vld [vmem:[%s18298_s29 + $0x198] sm:$0xff]  }
 0x1c0   : > { %17742 = vmatprep.subr.msk.bf16.mxu0 %vm887_vm0, %v17945_v41  ;;  %v17944_v41 = vld [vmem:[%s18298_s29 + $0x188] sm:$0xff]  }
 0x1c2   : > { %16210 = vmatmul.mubr.msk.bf16.gmra.mrb[4].mxu0 %vm694_vm1, %v17870_v23  ;;  %v17990_v23 = vld [vmem:[%s18298_s29 + $0x1a0] sm:$0xff]  }
 0x1c3   : > { %16213 = vmatprep.mubr.msk.bf16.mxu0 %vm694_vm1, %v17871_v25  ;;  %16338 = vmatpush3.bf16.msra.mxu0 %v7009_v44  ;;  %v17991_v25 = vld [vmem:[%s18298_s29 + $0x1a8] sm:$0xff]   ;;  %v18011_v44 = vld [vmem:[%s18298_s29 + $0x1f8] sm:$0xff]  }
 0x1c4   : > { %15852 = vmatmul.mubr.msk.bf16.gmra.mrb[48].mxu1 %vm694_vm1, %v17934_v30  ;;  %v17935_v30 = vld [vmem:[%s18298_s29 + $0x160] sm:$0xff]  }
 0x1c5   : > { %15855 = vmatprep.mubr.msk.bf16.mxu1 %vm694_vm1, %v17937_v33  ;;  %v17936_v33 = vld [vmem:[%s18298_s29 + $0x168] sm:$0xff]  }
 0x1ca   : > { %16214 = vmatmul.mubr.msk.bf16.gmra.mrb[8].mxu0 %vm694_vm1, %v17872_v27  ;;  %v17994_v27 = vld [vmem:[%s18298_s29 + $0x1b0] sm:$0xff]  }
 0x1cb   : > { %16217 = vmatprep.mubr.msk.bf16.mxu0 %vm694_vm1, %v17873_v28  ;;  %v17995_v28 = vld [vmem:[%s18298_s29 + $0x1b8] sm:$0xff]  }
 0x1cc   : > { %15856 = vmatmul.mubr.msk.bf16.gmra.mrb[52].mxu1 %vm694_vm1, %v17938_v34  ;;  %v17939_v34 = vld [vmem:[%s18298_s29 + $0x170] sm:$0xff]  }
 0x1cd   : > { %15859 = vmatprep.mubr.msk.bf16.mxu1 %vm694_vm1, %v17941_v37  ;;  %v17940_v37 = vld [vmem:[%s18298_s29 + $0x178] sm:$0xff]  }
 0x1d2   : > { %16218 = vmatmul.mubr.msk.bf16.gmra.mrb[12].mxu0 %vm694_vm1, %v17874_v31  ;;  %v17998_v31 = vld [vmem:[%s18298_s29 + $0x1c0] sm:$0xff]  }
 0x1d3   : > { %16221 = vmatprep.mubr.msk.bf16.mxu0 %vm694_vm1, %v17875_v32  ;;  %v17999_v32 = vld [vmem:[%s18298_s29 + $0x1c8] sm:$0xff]  }
 0x1d4   : > { %15860 = vmatmul.mubr.msk.bf16.gmra.mrb[56].mxu1 %vm694_vm1, %v17942_v38  ;;  %v17943_v38 = vld [vmem:[%s18298_s29 + $0x180] sm:$0xff]  }
 0x1d5   : > { %15863 = vmatprep.mubr.msk.bf16.mxu1 %vm694_vm1, %v17946_v42  ;;  %v17948_v42 = vld [vmem:[%s18298_s29 + $0x190] sm:$0xff]  }
 0x1da   : > { %16222 = vmatmul.mubr.msk.bf16.gmra.mrb[16].mxu0 %vm694_vm1, %v17876_v35  ;;  %v18002_v35 = vld [vmem:[%s18298_s29 + $0x1d0] sm:$0xff]  }
 0x1db   : > { %16225 = vmatprep.mubr.msk.bf16.mxu0 %vm694_vm1, %v17877_v36  ;;  %v18003_v36 = vld [vmem:[%s18298_s29 + $0x1d8] sm:$0xff]  }
 0x1dc   : > { %15864 = vmatmul.mubr.msk.bf16.gmra.mrb[60].mxu1 %vm694_vm1, %v17947_v43  ;;  %v18010_v43 = vld [vmem:[%s18298_s29 + $0x1f0] sm:$0xff]  }
 0x1dd   : > { %15867 = vmatprep.mubr.msk.bf16.mxu1 %vm694_vm1, %v17950_v47  ;;  %v18014_v47 = vld [vmem:[%s18298_s29 + $0x150] sm:$0xff]  }
 0x1e2   : > { %16226 = vmatmul.mubr.msk.bf16.gmra.mrb[20].mxu0 %vm694_vm1, %v17878_v39  ;;  %v18006_v39 = vld [vmem:[%s18298_s29 + $0x1e0] sm:$0xff]  }
 0x1e3   : > { %16229 = vmatprep.mubr.msk.bf16.mxu0 %vm694_vm1, %v17881_v40  ;;  %v18007_v40 = vld [vmem:[%s18298_s29 + $0x1e8] sm:$0xff]  }
 0x1e4   : > { %15868 = vmatmul.mubr.msk.bf16.gmra.mrb[64].mxu1 %vm694_vm1, %v17951_v48  ;;  %v18015_v48 = vld [vmem:[%s18298_s29 + $0x158] sm:$0xff]  }
 0x1e5   : > { %15871 = vmatprep.mubr.msk.bf16.mxu1 %vm694_vm1, %v17954_v51  ;;  %v18018_v51 = vld [vmem:[%s18298_s29 + $0x160] sm:$0xff]  }
 0x1ea   : > { %16230 = vmatmul.mubr.msk.bf16.gmra.mrb[24].mxu0 %vm694_vm1, %v17882_v45  ;;  %v17949_v45 = vld [vmem:[%s18298_s29 + $0x198] sm:$0xff]  }
 0x1eb   : > { %16233 = vmatprep.mubr.msk.bf16.mxu0 %vm694_vm1, %v17886_v46  ;;  %v17952_v46 = vld [vmem:[%s18298_s29 + $0x1a0] sm:$0xff]  }
 0x1ec   : > { %15872 = vmatmul.mubr.msk.bf16.gmra.mrb[68].mxu1 %vm694_vm1, %v17955_v52  ;;  %v18019_v52 = vld [vmem:[%s18298_s29 + $0x168] sm:$0xff]  }
 0x1ed   : > { %15875 = vmatprep.mubr.msk.bf16.mxu1 %vm694_vm1, %v17958_v55  ;;  %v18022_v55 = vld [vmem:[%s18298_s29 + $0x170] sm:$0xff]  }
 0x1f2   : > { %16234 = vmatmul.mubr.msk.bf16.gmra.mrb[28].mxu0 %vm694_vm1, %v17887_v49  ;;  %v17953_v49 = vld [vmem:[%s18298_s29 + $0x1a8] sm:$0xff]  }
 0x1f3   : > { %16237 = vmatprep.mubr.msk.bf16.mxu0 %vm694_vm1, %v17890_v50  ;;  %v17956_v50 = vld [vmem:[%s18298_s29 + $0x1b0] sm:$0xff]  }
 0x1f4   : > { %15876 = vmatmul.mubr.msk.bf16.gmra.mrb[72].mxu1 %vm694_vm1, %v17959_v56  ;;  %v18023_v56 = vld [vmem:[%s18298_s29 + $0x178] sm:$0xff]  }
 0x1f5   : > { %15879 = vmatprep.mubr.msk.bf16.mxu1 %vm694_vm1, %v17962_v58  ;;  %v18026_v58 = vld [vmem:[%s18298_s29 + $0x180] sm:$0xff]  }
 0x1fa   : > { %16238 = vmatmul.mubr.msk.bf16.gmra.mrb[32].mxu0 %vm694_vm1, %v17891_v53  ;;  %v17957_v53 = vld [vmem:[%s18298_s29 + $0x1b8] sm:$0xff]  }
 0x1fb   : > { %16241 = vmatprep.mubr.msk.bf16.mxu0 %vm694_vm1, %v17894_v54  ;;  %v17960_v54 = vld [vmem:[%s18298_s29 + $0x1c0] sm:$0xff]  }
 0x1fc   : > { %15880 = vmatmul.mubr.msk.bf16.gmra.mrb[76].mxu1 %vm694_vm1, %v17963_v59  ;;  %v18027_v59 = vld [vmem:[%s18298_s29 + $0x188] sm:$0xff]  }
 0x1fd   : > { %15883 = vmatprep.mubr.msk.bf16.mxu1 %vm694_vm1, %v17966_v62  ;;  %v18030_v62 = vld [vmem:[%s18298_s29 + $0x190] sm:$0xff]  }
 0x202   : > { %16242 = vmatmul.mubr.msk.bf16.gmra.mrb[36].mxu0 %vm694_vm1, %v17895_v4  ;;  %v17961_v4 = vld [vmem:[%s18298_s29 + $0x1c8] sm:$0xff]  }
 0x203   : > { %16245 = vmatprep.mubr.msk.bf16.mxu0 %vm694_vm1, %v17898_v57  ;;  %v17964_v57 = vld [vmem:[%s18298_s29 + $0x1d0] sm:$0xff]  }
 0x204   : > { %15884 = vmatmul.mubr.msk.bf16.gmra.mrb[80].mxu1 %vm694_vm1, %v17967_v63  ;;  %v18031_v63 = vld [vmem:[%s18298_s29 + $0x198] sm:$0xff]  }
 0x205   : > { %15887 = vmatprep.mubr.msk.bf16.mxu1 %vm694_vm1, %v17970_v2  ;;  %v18034_v2 = vld [vmem:[%s18298_s29 + $0x1a0] sm:$0xff]  }
 0x20a   : > { %16246 = vmatmul.mubr.msk.bf16.gmra.mrb[40].mxu0 %vm694_vm1, %v17899_v60  ;;  %v17965_v60 = vld [vmem:[%s18298_s29 + $0x1d8] sm:$0xff]  }
 0x20b   : > { %16249 = vmatprep.mubr.msk.bf16.mxu0 %vm694_vm1, %v17903_v61  ;;  %v17968_v61 = vld [vmem:[%s18298_s29 + $0x1e0] sm:$0xff]  }
 0x20c   : > { %15888 = vmatmul.mubr.msk.bf16.gmra.mrb[84].mxu1 %vm694_vm1, %v17971_v3  ;;  %v18035_v3 = vld [vmem:[%s18298_s29 + $0x1a8] sm:$0xff]  }
 0x20d   : > { %15891 = vmatprep.mubr.msk.bf16.mxu1 %vm694_vm1, %v17974_v7  ;;  %v18038_v7 = vld [vmem:[%s18298_s29 + $0x1b0] sm:$0xff]  }
 0x212   : > { %16250 = vmatmul.mubr.msk.bf16.gmra.mrb[44].mxu0 %vm694_vm1, %v17904_v0  ;;  %v17969_v0 = vld [vmem:[%s18298_s29 + $0x1e8] sm:$0xff]  }
 0x213   : > { %16253 = vmatprep.mubr.msk.bf16.mxu0 %vm694_vm1, %v17907_v1  ;;  %v17972_v1 = vld [vmem:[%s18298_s29 + $0x1f0] sm:$0xff]  }
 0x214   : > { %15892 = vmatmul.mubr.msk.bf16.gmra.mrb[88].mxu1 %vm694_vm1, %v17975_v8  ;;  %v18039_v8 = vld [vmem:[%s18298_s29 + $0x1b8] sm:$0xff]  }
 0x215   : > { %15895 = vmatprep.mubr.msk.bf16.mxu1 %vm694_vm1, %v17978_v11  ;;  %v18853_v11 = vpop.f32.mrb[0].mxu1 }
 0x21a   : > { %16254 = vmatmul.mubr.msk.bf16.gmra.mrb[48].mxu0 %vm694_vm1, %v17908_v5  ;;  %v17973_v5 = vld [vmem:[%s18298_s29 + $0x1f8] sm:$0xff]  }
 0x21b   : > { %16257 = vmatprep.mubr.msk.bf16.mxu0 %vm694_vm1, %v17911_v6  ;;  %v17976_v6 = vld [vmem:[%s18298_s29 + $0x200] sm:$0xff]  }
 0x21c   : > { %15896 = vmatmul.mubr.msk.bf16.gmra.mrb[92].mxu1 %vm694_vm1, %v17979_v12  ;;  %v18042_v12 = vld [vmem:[%s18298_s29 + $0x1c0] sm:$0xff]  }
 0x21d   : > { %15899 = vmatprep.mubr.msk.bf16.mxu1 %vm694_vm1, %v17982_v15 }
 0x222   : > { %16258 = vmatmul.mubr.msk.bf16.gmra.mrb[52].mxu0 %vm694_vm1, %v17912_v9  ;;  %v17977_v9 = vld [vmem:[%s18298_s29 + $0x208] sm:$0xff]  }
 0x223   : > { %16261 = vmatprep.mubr.msk.bf16.mxu0 %vm694_vm1, %v17915_v10  ;;  %v17980_v10 = vld [vmem:[%s18298_s29 + $0x210] sm:$0xff]  }
 0x224   : > { %15900 = vmatmul.mubr.msk.bf16.gmra.mrb[96].mxu1 %vm694_vm1, %v17983_v16 }
 0x225   : > { %15903 = vmatprep.mubr.msk.bf16.mxu1 %vm694_vm1, %v17986_v19 }
 0x22a   : > { %16262 = vmatmul.mubr.msk.bf16.gmra.mrb[56].mxu0 %vm694_vm1, %v17916_v13  ;;  %v18857_v13 = vpop.f32.mrb[1].mxu1 }
 0x22b   : > { %16265 = vmatprep.mubr.msk.bf16.mxu0 %vm694_vm1, %v17919_v14  ;;  %v18043_v14 = vld [vmem:[%s18298_s29 + $0x1c8] sm:$0xff]   ;;  %v18860_v15 = vpop.f32.mrb[2].mxu1 }
 0x22c   : > { %15904 = vmatmul.mubr.msk.bf16.gmra.mrb[100].mxu1 %vm694_vm1, %v17987_v20  ;;  %v18863_v16 = vpop.f32.mrb[3].mxu1  ;;  %v18046_v20 = vld [vmem:[%s18298_s29 + $0x1d0] sm:$0xff]  }
 0x22d   : > { %15907 = vmatprep.mubr.msk.bf16.mxu1 %vm694_vm1, %v17990_v23  ;;  %v18869_v19 = vpop.f32.mrb[4].mxu1 }
 0x232   : > { %16266 = vmatmul.mubr.msk.bf16.gmra.mrb[60].mxu0 %vm694_vm1, %v17920_v17  ;;  %v17981_v17 = vld [vmem:[%s18298_s29 + $0x218] sm:$0xff]  }
 0x233   : > { %16269 = vmatprep.mubr.msk.bf16.mxu0 %vm694_vm1, %v17923_v18  ;;  %v17984_v18 = vld [vmem:[%s18298_s29 + $0x220] sm:$0xff]  }
 0x234   : > { %15908 = vmatmul.mubr.msk.bf16.gmra.mrb[104].mxu1 %vm694_vm1, %v17991_v25 }
 0x235   : > { %15911 = vmatprep.mubr.msk.bf16.mxu1 %vm694_vm1, %v17994_v27 }
 0x23a   : > { %16270 = vmatmul.mubr.msk.bf16.gmra.mrb[64].mxu0 %vm694_vm1, %v17924_v21  ;;  %v18873_v21 = vpop.f32.mrb[5].mxu1 }
 0x23b   : > { %16273 = vmatprep.mubr.msk.bf16.mxu0 %vm694_vm1, %v17927_v22  ;;  %v18047_v22 = vld [vmem:[%s18298_s29 + $0x1d8] sm:$0xff]   ;;  %v18876_v23 = vpop.f32.mrb[6].mxu1 }
 0x23c   : > { %15912 = vmatmul.mubr.msk.bf16.gmra.mrb[108].mxu1 %vm694_vm1, %v17995_v28  ;;  %v18879_v25 = vpop.f32.mrb[7].mxu1  ;;  %v18050_v28 = vld [vmem:[%s18298_s29 + $0x1e0] sm:$0xff]  }
 0x23d   : > { %15915 = vmatprep.mubr.msk.bf16.mxu1 %vm694_vm1, %v17998_v31  ;;  %v18885_v27 = vpop.f32.mrb[8].mxu1 }
 0x242   : > { %16274 = vmatmul.mubr.msk.bf16.gmra.mrb[68].mxu0 %vm694_vm1, %v17928_v26  ;;  %v17985_v26 = vld [vmem:[%s18298_s29 + $0x228] sm:$0xff]  }
 0x243   : > { %16277 = vmatprep.mubr.msk.bf16.mxu0 %vm694_vm1, %v17931_v24  ;;  %v17988_v24 = vld [vmem:[%s18298_s29 + $0x40] sm:$0xff]  }
 0x244   : > { %15916 = vmatmul.mubr.msk.bf16.gmra.mrb[112].mxu1 %vm694_vm1, %v17999_v32 }
 0x245   : > { %15919 = vmatprep.mubr.msk.bf16.mxu1 %vm694_vm1, %v18002_v35 }
 0x24a   : > { %16278 = vmatmul.mubr.msk.bf16.gmra.mrb[72].mxu0 %vm694_vm1, %v17932_v29  ;;  %v18889_v29 = vpop.f32.mrb[9].mxu1 }
 0x24b   : > { %16281 = vmatprep.mubr.msk.bf16.mxu0 %vm694_vm1, %v17935_v30  ;;  %v18051_v30 = vld [vmem:[%s18298_s29 + $0x1e8] sm:$0xff]   ;;  %v18892_v31 = vpop.f32.mrb[10].mxu1 }
 0x24c   : > { %15920 = vmatmul.mubr.msk.bf16.gmra.mrb[116].mxu1 %vm694_vm1, %v18003_v36  ;;  %v18895_v32 = vpop.f32.mrb[11].mxu1  ;;  %v18054_v36 = vld [vmem:[%s18298_s29 + $0x1f0] sm:$0xff]  }
 0x24d   : > { %15923 = vmatprep.mubr.msk.bf16.mxu1 %vm694_vm1, %v18006_v39  ;;  %v18901_v35 = vpop.f32.mrb[12].mxu1 }
 0x252   : > { %16282 = vmatmul.mubr.msk.bf16.gmra.mrb[76].mxu0 %vm694_vm1, %v17936_v33  ;;  %v17989_v33 = vld [vmem:[%s18298_s29 + $0x48] sm:$0xff]  }
 0x253   : > { %16285 = vmatprep.mubr.msk.bf16.mxu0 %vm694_vm1, %v17939_v34  ;;  %v17992_v34 = vld [vmem:[%s18298_s29 + $0x50] sm:$0xff]  }
 0x254   : > { %15924 = vmatmul.mubr.msk.bf16.gmra.mrb[120].mxu1 %vm694_vm1, %v18007_v40 }
 0x255   : > { %15927 = vmatprep.mubr.msk.bf16.mxu1 %vm694_vm1, %v18010_v43 }
 0x25a   : > { %16286 = vmatmul.mubr.msk.bf16.gmra.mrb[80].mxu0 %vm694_vm1, %v17940_v37  ;;  %v18905_v37 = vpop.f32.mrb[13].mxu1 }
 0x25b   : > { %16289 = vmatprep.mubr.msk.bf16.mxu0 %vm694_vm1, %v17943_v38  ;;  %v18055_v38 = vld [vmem:[%s18298_s29 + $0x1f8] sm:$0xff]   ;;  %v18908_v39 = vpop.f32.mrb[14].mxu1 }
 0x25c   : > { %15928 = vmatmul.mubr.msk.bf16.gmra.mrb[124].mxu1 %vm694_vm1, %v18011_v44  ;;  %v18911_v40 = vpop.f32.mrb[15].mxu1  ;;  %v18058_v44 = vld [vmem:[%s18298_s29 + $0x200] sm:$0xff]  }
 0x25d   : > { %16017 = vmatprep.mubr.msk.bf16.mxu1 %vm694_vm1, %v18014_v47  ;;  %v18917_v43 = vpop.f32.mrb[16].mxu1 }
 0x262   : > { %16290 = vmatmul.mubr.msk.bf16.gmra.mrb[84].mxu0 %vm694_vm1, %v17944_v41  ;;  %v17993_v41 = vld [vmem:[%s18298_s29 + $0x58] sm:$0xff]  }
 0x263   : > { %16293 = vmatprep.mubr.msk.bf16.mxu0 %vm694_vm1, %v17948_v42  ;;  %v17996_v42 = vld [vmem:[%s18298_s29 + $0x60] sm:$0xff]  }
 0x264   : > { %16018 = vmatmul.mubr.msk.bf16.vlgmr.msra.gmra.mrb[80].mxu1 %vm694_vm1, %v18015_v48 }
 0x265   : > { %16021 = vmatprep.mubr.msk.bf16.mxu1 %vm694_vm1, %v18018_v51 }
 0x26a   : > { %16294 = vmatmul.mubr.msk.bf16.gmra.mrb[88].mxu0 %vm694_vm1, %v17949_v45  ;;  %v18921_v45 = vpop.f32.mrb[17].mxu1 }
 0x26b   : > { %16297 = vmatprep.mubr.msk.bf16.mxu0 %vm694_vm1, %v17952_v46  ;;  %v18059_v46 = vld [vmem:[%s18298_s29 + $0x208] sm:$0xff]   ;;  %v18924_v47 = vpop.f32.mrb[18].mxu1 }
 0x26c   : > { %16022 = vmatmul.mubr.msk.bf16.gmra.mrb[84].mxu1 %vm694_vm1, %v18019_v52  ;;  %v18927_v48 = vpop.f32.mrb[19].mxu1 }
 0x26d   : > { %16025 = vmatprep.mubr.msk.bf16.mxu1 %vm694_vm1, %v18022_v55  ;;  %v18933_v51 = vpop.f32.mrb[20].mxu1  ;;  %v18001_v55 = vld [vmem:[%s18298_s29 + $0x78] sm:$0xff]  }
 0x26e   : > { %v18936_v52 = vpop.f32.mrb[21].mxu1 }
 0x272   : > { %16298 = vmatmul.mubr.msk.bf16.gmra.mrb[92].mxu0 %vm694_vm1, %v17953_v49  ;;  %v17997_v49 = vld [vmem:[%s18298_s29 + $0x68] sm:$0xff]  }
 0x273   : > { %16301 = vmatprep.mubr.msk.bf16.mxu0 %vm694_vm1, %v17956_v50  ;;  %v18000_v50 = vld [vmem:[%s18298_s29 + $0x70] sm:$0xff]  }
 0x274   : > { %16026 = vmatmul.mubr.msk.bf16.gmra.mrb[88].mxu1 %vm694_vm1, %v18023_v56  ;;  %v18004_v56 = vld [vmem:[%s18298_s29 + $0x80] sm:$0xff]  }
 0x275   : > { %16029 = vmatprep.mubr.msk.bf16.mxu1 %vm694_vm1, %v18026_v58 }
 0x27a   : > { %16302 = vmatmul.mubr.msk.bf16.gmra.mrb[96].mxu0 %vm694_vm1, %v17957_v53  ;;  %v18938_v53 = vpop.f32.mrb[22].mxu1 }
 0x27b   : > { %16305 = vmatprep.mubr.msk.bf16.mxu0 %vm694_vm1, %v17960_v54  ;;  %v18940_v54 = vpop.f32.mrb[23].mxu1 }
 0x27c   : > { %16030 = vmatmul.mubr.msk.bf16.gmra.mrb[92].mxu1 %vm694_vm1, %v18027_v59 }
 0x27d   : > { %16033 = vmatprep.mubr.msk.bf16.mxu1 %vm694_vm1, %v18030_v62 }
 0x282   : > { %16306 = vmatmul.mubr.msk.bf16.gmra.mrb[100].mxu0 %vm694_vm1, %v17961_v4  ;;  %v18945_v4 = vpop.f32.mrb[24].mxu1 }
 0x283   : > { %16309 = vmatprep.mubr.msk.bf16.mxu0 %vm694_vm1, %v17964_v57  ;;  %v18948_v57 = vpop.f32.mrb[25].mxu1 }
 0x284   : > { %16034 = vmatmul.mubr.msk.bf16.gmra.mrb[96].mxu1 %vm694_vm1, %v18031_v63  ;;  %v18950_v58 = vpop.f32.mrb[26].mxu1 }
 0x285   : > { %16037 = vmatprep.mubr.msk.bf16.mxu1 %vm694_vm1, %v18034_v2  ;;  %v1024_v59 = vpop.f32.mrb[27].mxu1  ;;  %v18009_v2 = vld [vmem:[%s18298_s29 + $0x98] sm:$0xff]  }
 0x286   : > { %16698 = vst [vmem:[#allocation2 + $0xc8] sm:$0xff] %v1024_v59  ;;  %v15833_v62 = vpop.f32.mrb[28].mxu1  ;;  %v18029_v59 = vld [vmem:[%s18298_s29 + $0xe8] sm:$0xff]  }
 0x287   : > { %16701 = vst [vmem:[#allocation2 + $0xf0] sm:$0xff] %v15833_v62  ;;  %v1037_v63 = vpop.f32.mrb[29].mxu1 }
 0x288   : > { %16704 = vst [vmem:[#allocation2 + $0xe0] sm:$0xff] %v1037_v63 }
 0x28a   : > { %16310 = vmatmul.mubr.msk.bf16.gmra.mrb[104].mxu0 %vm694_vm1, %v17965_v60  ;;  %v18005_v60 = vld [vmem:[%s18298_s29 + $0x88] sm:$0xff]  }
 0x28b   : > { %16313 = vmatprep.mubr.msk.bf16.mxu0 %vm694_vm1, %v17968_v61  ;;  %v18008_v61 = vld [vmem:[%s18298_s29 + $0x90] sm:$0xff]  }
 0x28c   : > { %16038 = vmatmul.mubr.msk.bf16.gmra.mrb[100].mxu1 %vm694_vm1, %v18035_v3  ;;  %v18012_v3 = vld [vmem:[%s18298_s29 + $0xa0] sm:$0xff]  }
 0x28d   : > { %16041 = vmatprep.mubr.msk.bf16.mxu1 %vm694_vm1, %v18038_v7 }
 0x292   : > { %16314 = vmatmul.mubr.msk.bf16.gmra.mrb[108].mxu0 %vm694_vm1, %v17969_v0  ;;  %v15834_v0 = vpop.f32.mrb[30].mxu1 }
 0x293   : > { %16317 = vmatprep.mubr.msk.bf16.mxu0 %vm694_vm1, %v17972_v1  ;;  %16707 = vst [vmem:[#allocation2 + $0xf8] sm:$0xff] %v15834_v0  ;;  %v1040_v1 = vpop.f32.mrb[31].mxu1 }
 0x294   : > { %16042 = vmatmul.mubr.msk.bf16.gmra.mrb[104].mxu1 %vm694_vm1, %v18039_v8  ;;  %16710 = vst [vmem:[#allocation2 + $0xe8] sm:$0xff] %v1040_v1  ;;  %v18033_v1 = vld [vmem:[%s18298_s29 + $0xf8] sm:$0xff]  }
 0x295   : > { %16045 = vmatprep.mubr.msk.bf16.mxu1 %vm694_vm1, %v18042_v12 }
 0x29a   : > { %16318 = vmatmul.mubr.msk.bf16.gmra.mrb[112].mxu0 %vm694_vm1, %v17973_v5  ;;  %v15837_v5 = vpop.f32.mrb[32].mxu1 }
 0x29b   : > { %16321 = vmatprep.mubr.msk.bf16.mxu0 %vm694_vm1, %v17976_v6  ;;  %16713 = vst [vmem:[#allocation2 + $0x110] sm:$0xff] %v15837_v5  ;;  %v1053_v6 = vpop.f32.mrb[33].mxu1 }
 0x29c   : > { %16046 = vmatmul.mubr.msk.bf16.gmra.mrb[108].mxu1 %vm694_vm1, %v18043_v14  ;;  %16716 = vst [vmem:[#allocation2 + $0x100] sm:$0xff] %v1053_v6  ;;  %v15838_v7 = vpop.f32.mrb[34].mxu1 }
 0x29d   : > { %16049 = vmatprep.mubr.msk.bf16.mxu1 %vm694_vm1, %v18046_v20  ;;  %16719 = vst [vmem:[#allocation2 + $0x118] sm:$0xff] %v15838_v7  ;;  %v1056_v8 = vpop.f32.mrb[35].mxu1  ;;  %v18017_v20 = vld [vmem:[%s18298_s29 + $0xb8] sm:$0xff]  }
 0x29e   : > { %16722 = vst [vmem:[#allocation2 + $0x108] sm:$0xff] %v1056_v8  ;;  %v15841_v12 = vpop.f32.mrb[36].mxu1  ;;  %v18037_v8 = vld [vmem:[%s18298_s29 + $0x108] sm:$0xff]  }
 0x29f   : > { %16725 = vst [vmem:[#allocation2 + $0x130] sm:$0xff] %v15841_v12  ;;  %v1069_v14 = vpop.f32.mrb[37].mxu1 }
 0x2a0   : > { %16728 = vst [vmem:[#allocation2 + $0x120] sm:$0xff] %v1069_v14 }
 0x2a2   : > { %16322 = vmatmul.mubr.msk.bf16.gmra.mrb[116].mxu0 %vm694_vm1, %v17977_v9  ;;  %v18013_v9 = vld [vmem:[%s18298_s29 + $0xa8] sm:$0xff]  }
 0x2a3   : > { %16325 = vmatprep.mubr.msk.bf16.mxu0 %vm694_vm1, %v17980_v10  ;;  %v18016_v10 = vld [vmem:[%s18298_s29 + $0xb0] sm:$0xff]  }
 0x2a4   : > { %16050 = vmatmul.mubr.msk.bf16.gmra.mrb[112].mxu1 %vm694_vm1, %v18047_v22  ;;  %v18020_v22 = vld [vmem:[%s18298_s29 + $0xc0] sm:$0xff]  }
 0x2a5   : > { %16053 = vmatprep.mubr.msk.bf16.mxu1 %vm694_vm1, %v18050_v28 }
 0x2aa   : > { %16326 = vmatmul.mubr.msk.bf16.gmra.mrb[120].mxu0 %vm694_vm1, %v17981_v17  ;;  %v15842_v17 = vpop.f32.mrb[38].mxu1 }
 0x2ab   : > { %16329 = vmatprep.mubr.msk.bf16.mxu0 %vm694_vm1, %v17984_v18  ;;  %16731 = vst [vmem:[#allocation2 + $0x138] sm:$0xff] %v15842_v17  ;;  %v1072_v18 = vpop.f32.mrb[39].mxu1 }
 0x2ac   : > { %16054 = vmatmul.mubr.msk.bf16.gmra.mrb[116].mxu1 %vm694_vm1, %v18051_v30  ;;  %16734 = vst [vmem:[#allocation2 + $0x128] sm:$0xff] %v1072_v18  ;;  %v18041_v18 = vld [vmem:[%s18298_s29 + $0x118] sm:$0xff]  }
 0x2ad   : > { %16057 = vmatprep.mubr.msk.bf16.mxu1 %vm694_vm1, %v18054_v36 }
 0x2b2   : > { %16330 = vmatmul.mubr.msk.bf16.gmra.mrb[124].mxu0 %vm694_vm1, %v17985_v26  ;;  %v15845_v26 = vpop.f32.mrb[40].mxu1 }
 0x2b3   : > { %16339 = vmatprep.mubr.msk.bf16.mxu0 %vm694_vm1, %v17988_v24  ;;  %16737 = vst [vmem:[#allocation2 + $0x150] sm:$0xff] %v15845_v26  ;;  %v1085_v24 = vpop.f32.mrb[41].mxu1  ;;  %v18084_v26 = vld [vmem:[%s21229_s3] sm:$0xff]  }
 0x2b4   : > { %16058 = vmatmul.mubr.msk.bf16.gmra.mrb[120].mxu1 %vm694_vm1, %v18055_v38  ;;  %16740 = vst [vmem:[#allocation2 + $0x140] sm:$0xff] %v1085_v24  ;;  %v15846_v28 = vpop.f32.mrb[42].mxu1 }
 0x2b5   : > { %16061 = vmatprep.mubr.msk.bf16.mxu1 %vm694_vm1, %v18058_v44  ;;  %16743 = vst [vmem:[#allocation2 + $0x158] sm:$0xff] %v15846_v28  ;;  %v1088_v30 = vpop.f32.mrb[43].mxu1  ;;  %v18025_v44 = vld [vmem:[%s18298_s29 + $0xd8] sm:$0xff]   ;;  %v18086_v28 = vld [vmem:[%s21229_s3 + $0x48] sm:$0xff]  }
 0x2b6   : > { %16746 = vst [vmem:[#allocation2 + $0x148] sm:$0xff] %v1088_v30  ;;  %v15849_v36 = vpop.f32.mrb[44].mxu1 }
 0x2b7   : > { %16749 = vst [vmem:[#allocation2 + $0x170] sm:$0xff] %v15849_v36  ;;  %v1101_v38 = vpop.f32.mrb[45].mxu1 }
 0x2b8   : > { %16752 = vst [vmem:[#allocation2 + $0x160] sm:$0xff] %v1101_v38  ;;  %v18045_v38 = vld [vmem:[%s18298_s29 + $0x128] sm:$0xff]  }
 0x2ba   : > { %16340 = vmatmul.mubr.msk.bf16.vlgmr.msra.gmra.mrb[0].mxu0 %vm694_vm1, %v17989_v33  ;;  %v18021_v33 = vld [vmem:[%s18298_s29 + $0xc8] sm:$0xff]  }
 0x2bb   : > { %16343 = vmatprep.mubr.msk.bf16.mxu0 %vm694_vm1, %v17992_v34  ;;  %v18024_v34 = vld [vmem:[%s18298_s29 + $0xd0] sm:$0xff]  }
 0x2bc   : > { %16062 = vmatmul.mubr.msk.bf16.gmra.mrb[124].mxu1 %vm694_vm1, %v18059_v46  ;;  %v18028_v46 = vld [vmem:[%s18298_s29 + $0xe0] sm:$0xff]  }
 0x2c2   : > { %16344 = vmatmul.mubr.msk.bf16.gmra.mrb[4].mxu0 %vm694_vm1, %v17993_v41  ;;  %v15850_v41 = vpop.f32.mrb[46].mxu1 }
 0x2c3   : > { %16347 = vmatprep.mubr.msk.bf16.mxu0 %vm694_vm1, %v17996_v42  ;;  %16755 = vst [vmem:[#allocation2 + $0x178] sm:$0xff] %v15850_v41  ;;  %v1104_v42 = vpop.f32.mrb[47].mxu1  ;;  %v18088_v41 = vld [vmem:[%s21229_s3 + $0x50] sm:$0xff]  }
 0x2c4   : > { %16758 = vst [vmem:[#allocation2 + $0x168] sm:$0xff] %v1104_v42  ;;  %v18048_v42 = vld [vmem:[%s18298_s29 + $0x130] sm:$0xff]  }
 0x2ca   : > { %16348 = vmatmul.mubr.msk.bf16.gmra.mrb[8].mxu0 %vm694_vm1, %v17997_v49  ;;  %v15853_v49 = vpop.f32.mrb[48].mxu1 }
 0x2cb   : > { %16351 = vmatprep.mubr.msk.bf16.mxu0 %vm694_vm1, %v18000_v50  ;;  %16761 = vst [vmem:[#allocation2 + $0x190] sm:$0xff] %v15853_v49  ;;  %v1117_v50 = vpop.f32.mrb[49].mxu1  ;;  %v8439_v49 = vld [vmem:[#allocation3 + $0x14] sm:$0x1] }
 0x2cc   : > { %16764 = vst [vmem:[#allocation2 + $0x180] sm:$0xff] %v1117_v50 }
 0x2d2   : > { %16352 = vmatmul.mubr.msk.bf16.gmra.mrb[12].mxu0 %vm694_vm1, %v18001_v55  ;;  %v15854_v55 = vpop.f32.mrb[50].mxu1 }
 0x2d3   : > { %16355 = vmatprep.mubr.msk.bf16.mxu0 %vm694_vm1, %v18004_v56  ;;  %16767 = vst [vmem:[#allocation2 + $0x198] sm:$0xff] %v15854_v55  ;;  %v1120_v56 = vpop.f32.mrb[51].mxu1  ;;  %v8389_v55 = vld [vmem:[#allocation3 + $0xc] sm:$0x1] }
 0x2d4   : > { %16770 = vst [vmem:[#allocation2 + $0x188] sm:$0xff] %v1120_v56  ;;  %v8440_v56 = vsel %vm19013_vm5, 0, %v8439_v49 }
 0x2d5   : > { %8441 = vst [vmem:[#allocation3 + $0x14] sm:$0x1] %v8440_v56 }
 0x2da   : > { %16356 = vmatmul.mubr.msk.bf16.gmra.mrb[16].mxu0 %vm694_vm1, %v18005_v60  ;;  %v18032_v60 = vld [vmem:[%s18298_s29 + $0xf0] sm:$0xff]  }
 0x2db   : > { %16359 = vmatprep.mubr.msk.bf16.mxu0 %vm694_vm1, %v18008_v61  ;;  %v15857_v61 = vpop.f32.mrb[52].mxu1 }
 0x2dc   : > { %16773 = vst [vmem:[#allocation2 + $0x1b0] sm:$0xff] %v15857_v61  ;;  %v1133_v62 = vpop.f32.mrb[53].mxu1  ;;  %v18092_v61 = vld [vmem:[%s21229_s3 + $0x58] sm:$0xff]  }
 0x2dd   : > { %16776 = vst [vmem:[#allocation2 + $0x1a0] sm:$0xff] %v1133_v62  ;;  %v15858_v63 = vpop.f32.mrb[54].mxu1 }
 0x2de   : > { %16779 = vst [vmem:[#allocation2 + $0x1b8] sm:$0xff] %v15858_v63  ;;  %v1136_v0 = vpop.f32.mrb[55].mxu1  ;;  %v18093_v63 = vld [vmem:[%s21229_s3 + $0x18] sm:$0xff]  }
 0x2df   : > { %16782 = vst [vmem:[#allocation2 + $0x1a8] sm:$0xff] %v1136_v0 }
 0x2e2   : > { %16360 = vmatmul.mubr.msk.bf16.gmra.mrb[20].mxu0 %vm694_vm1, %v18009_v2  ;;  %v18036_v2 = vld [vmem:[%s18298_s29 + $0x100] sm:$0xff]  }
 0x2e3   : > { %16363 = vmatprep.mubr.msk.bf16.mxu0 %vm694_vm1, %v18012_v3  ;;  %v15861_v3 = vpop.f32.mrb[56].mxu1 }
 0x2e4   : > { %16785 = vst [vmem:[#allocation2 + $0x1d0] sm:$0xff] %v15861_v3  ;;  %v1149_v5 = vpop.f32.mrb[57].mxu1  ;;  %v18049_v3 = vld [vmem:[%s18298_s29 + $0x138] sm:$0xff]  }
 0x2e5   : > { %16788 = vst [vmem:[#allocation2 + $0x1c0] sm:$0xff] %v1149_v5  ;;  %v15862_v6 = vpop.f32.mrb[58].mxu1  ;;  %v18094_v5 = vld [vmem:[%s21229_s3 + $0x60] sm:$0xff]  }
 0x2e6   : > { %16791 = vst [vmem:[#allocation2 + $0x1d8] sm:$0xff] %v15862_v6  ;;  %v1152_v7 = vpop.f32.mrb[59].mxu1  ;;  %v18052_v6 = vld [vmem:[%s18298_s29 + $0x140] sm:$0xff]  }
 0x2e7   : > { %16794 = vst [vmem:[#allocation2 + $0x1c8] sm:$0xff] %v1152_v7  ;;  %v18096_v7 = vld [vmem:[%s21229_s3 + $0x20] sm:$0xff]  }
 0x2ea   : > { %16364 = vmatmul.mubr.msk.bf16.gmra.mrb[24].mxu0 %vm694_vm1, %v18013_v9  ;;  %v18040_v9 = vld [vmem:[%s18298_s29 + $0x110] sm:$0xff]  }
 0x2eb   : > { %16367 = vmatprep.mubr.msk.bf16.mxu0 %vm694_vm1, %v18016_v10  ;;  %v15865_v10 = vpop.f32.mrb[60].mxu1 }
 0x2ec   : > { %16797 = vst [vmem:[#allocation2 + $0x1f0] sm:$0xff] %v15865_v10  ;;  %v1165_v12 = vpop.f32.mrb[61].mxu1 }
 0x2ed   : > { %16800 = vst [vmem:[#allocation2 + $0x1e0] sm:$0xff] %v1165_v12  ;;  %v15866_v14 = vpop.f32.mrb[62].mxu1  ;;  %v18099_v12 = vld [vmem:[%s21229_s3 + $0x28] sm:$0xff]  }
 0x2ee   : > { %16803 = vst [vmem:[#allocation2 + $0x1f8] sm:$0xff] %v15866_v14  ;;  %v1168_v17 = vpop.f32.mrb[63].mxu1 }
 0x2ef   : > { %16806 = vst [vmem:[#allocation2 + $0x1e8] sm:$0xff] %v1168_v17  ;;  %v15869_v24 = vpop.f32.mrb[64].mxu1 }
 0x2f0   : > { %16809 = vst [vmem:[#allocation2 + $0x210] sm:$0xff] %v15869_v24  ;;  %v1181_v30 = vpop.f32.mrb[65].mxu1 }
 0x2f1   : > { %16812 = vst [vmem:[#allocation2 + $0x200] sm:$0xff] %v1181_v30  ;;  %v18053_v30 = vld [vmem:[%s18298_s29 + $0x148] sm:$0xff]  }
 0x2f2   : > { %16368 = vmatmul.mubr.msk.bf16.gmra.mrb[28].mxu0 %vm694_vm1, %v18017_v20  ;;  %v18082_v20 = vld [vmem:[%s21229_s3 + $0x40] sm:$0xff]  }
 0x2f3   : > { %16371 = vmatprep.mubr.msk.bf16.mxu0 %vm694_vm1, %v18020_v22  ;;  %v18044_v22 = vld [vmem:[%s18298_s29 + $0x120] sm:$0xff]   ;;  %15389 = vmatprep.subr.bf16.mxu1 %v18082_v20 }
 0x2f4   : > { %15390 = vmatpush3.bf16.msra.mxu1 %v18084_v26 }
 0x2f5   : > { %15391 = vmatprep.subr.bf16.mxu1 %v18086_v28 }
 0x2fa   : > { %16372 = vmatmul.mubr.msk.bf16.gmra.mrb[32].mxu0 %vm694_vm1, %v18021_v33  ;;  %v18087_v33 = vld [vmem:[%s21229_s3 + $0x8] sm:$0xff]  }
 0x2fb   : > { %16375 = vmatprep.mubr.msk.bf16.mxu0 %vm694_vm1, %v18024_v34  ;;  %v15870_v34 = vpop.f32.mrb[66].mxu1  ;;  %15392 = vmatpush3.bf16.msra.mxu1 %v18087_v33  ;;  %v18100_v33 = vld [vmem:[%s21229_s3 + $0x70] sm:$0xff]  }
 0x2fc   : > { %16815 = vst [vmem:[#allocation2 + $0x218] sm:$0xff] %v15870_v34  ;;  %v1184_v36 = vpop.f32.mrb[67].mxu1  ;;  %15393 = vmatprep.subr.bf16.mxu1 %v18088_v41 }
 0x2fd   : > { %16818 = vst [vmem:[#allocation2 + $0x208] sm:$0xff] %v1184_v36 }
 0x302   : > { %16376 = vmatmul.mubr.msk.bf16.gmra.mrb[36].mxu0 %vm694_vm1, %v18025_v44  ;;  %v18090_v44 = vld [vmem:[%s21229_s3 + $0x10] sm:$0xff]  }
 0x303   : > { %16379 = vmatprep.mubr.msk.bf16.mxu0 %vm694_vm1, %v18028_v46  ;;  %v21260_v46 = vmov 0  ;;  %15394 = vmatpush3.bf16.msra.mxu1 %v18090_v44  ;;  %v18101_v44 = vld [vmem:[%s21229_s3 + $0x30] sm:$0xff]  }
 0x304   : > { %v21261_v46 = vsel %vm19013_vm5, 4294967295, %v21260_v46  ;;  %15395 = vmatprep.subr.bf16.mxu1 %v18092_v61 }
 0x305   : > { %21262 = vst [vmem:[#allocation5_spill] sm:$0xff] %v21261_v46 }
 0x307   : > { %15396 = vmatpush3.bf16.msra.mxu1 %v18093_v63  ;;  %v18102_v63 = vld [vmem:[%s21229_s3 + $0x78] sm:$0xff]  }
 0x308   : > { %15397 = vmatprep.subr.bf16.mxu1 %v18094_v5 }
 0x30a   : > { %16380 = vmatmul.mubr.msk.bf16.gmra.mrb[40].mxu0 %vm694_vm1, %v18029_v59  ;;  %v8390_v59 = vsel %vm19018_vm6, 0, %v8389_v55 }
 0x30b   : > { %16383 = vmatprep.mubr.msk.bf16.mxu0 %vm694_vm1, %v18032_v60  ;;  %v15873_v60 = vpop.f32.mrb[68].mxu1  ;;  %8391 = vst [vmem:[#allocation3 + $0xc] sm:$0x1] %v8390_v59  ;;  %15398 = vmatpush3.bf16.msra.mxu1 %v18096_v7 }
 0x30c   : > { %16821 = vst [vmem:[#allocation2 + $0x230] sm:$0xff] %v15873_v60  ;;  %v1197_v62 = vpop.f32.mrb[69].mxu1  ;;  %v8392_v60 = vld [vmem:[#allocation3 + $0x18] sm:$0x1] }
 0x30d   : > { %16824 = vst [vmem:[#allocation2 + $0x220] sm:$0xff] %v1197_v62  ;;  %v15874_v0 = vpop.f32.mrb[70].mxu1  ;;  %v8393_v61 = vsel %vm19018_vm6, 0, %v8392_v60 }
 0x30e   : > { %16827 = vst [vmem:[#allocation2 + $0x238] sm:$0xff] %v15874_v0  ;;  %8394 = vst [vmem:[#allocation3 + $0x18] sm:$0x1] %v8393_v61  ;;  %v18065_v61 = vld [vmem:[%s18298_s29 + $0x188] sm:$0xff]  }
 0x312   : > { %16384 = vmatmul.mubr.msk.bf16.gmra.mrb[44].mxu0 %vm694_vm1, %v18033_v1  ;;  %v18244_v1 = vmov 0  }
 0x313   : > { %16387 = vmatprep.mubr.msk.bf16.mxu0 %vm694_vm1, %v18036_v2  ;;  %8378 = vst [vmem:[#allocation3] sm:$0xf] %v18244_v1  ;;  %8379 = vst [vmem:[#allocation3 + $0x4] sm:$0xf] %v18244_v1  ;;  %v1200_v2 = vpop.f32.mrb[71].mxu1 }
 0x314   : > { %8380 = vst [vmem:[#allocation3 + $0x8] sm:$0x1] %v18244_v1  ;;  %8382 = vst [vmem:[#allocation3 + $0xcc] sm:$0xf] %v18244_v1 }
 0x315   : > { %8383 = vst [vmem:[#allocation3 + $0xd0] sm:$0xf] %v18244_v1  ;;  %8384 = vst [vmem:[#allocation3 + $0xd4] sm:$0x1] %v18244_v1 }
 0x316   : > { %16830 = vst [vmem:[#allocation2 + $0x228] sm:$0xff] %v1200_v2  ;;  %v18103_v2 = vld [vmem:[%s21229_s3 + $0x38] sm:$0xff]  }
 0x31a   : > { %16388 = vmatmul.mubr.msk.bf16.gmra.mrb[48].mxu0 %vm694_vm1, %v18037_v8  ;;  %v15877_v8 = vpop.f32.mrb[72].mxu1  ;;  %v9003_v14 = vld [vmem:[#allocation3] sm:$0xf]  ;;  %v9004_v17 = vld [vmem:[#allocation3 + $0x4] sm:$0xf] }
 0x31b   : > { %16391 = vmatprep.mubr.msk.bf16.mxu0 %vm694_vm1, %v18040_v9  ;;  %v18098_v9 = vld [vmem:[%s21229_s3 + $0x68] sm:$0xff]   ;;  %16833 = vst [vmem:[#allocation2 + $0x250] sm:$0xff] %v15877_v8  ;;  %v1213_v10 = vpop.f32.mrb[73].mxu1  ;;  %v9055_v20 = vshrl.u32 %v9003_v14, 16  ;;  %v9064_v26 = vshll.u32 %v9004_v17, 16  ;;  %v9068_v24 = vshrl.u32 %v9004_v17, 16 }
 0x31c   : > { %16836 = vst [vmem:[#allocation2 + $0x240] sm:$0xff] %v1213_v10  ;;  %15399 = vmatprep.subr.bf16.mxu1 %v18098_v9  ;;  %v9035_v49 = vld [vmem:[#allocation3 + $0x8] sm:$0x1] }
 0x31d   : > { %15400 = vmatpush3.bf16.msra.mxu1 %v18099_v12  ;;  %v9057_v34 = vrot.slane %v9055_v20, 4  ;;  %v9070_v41 = vrot.slane %v9068_v24, 4  ;;  %v9074_v59 = vshll.u32 %v9035_v49, 16  ;;  %v18057_v12 = vld [vmem:[%s18298_s29 + $0x158] sm:$0xff]   ;;  %v14651_v20 = vcombine.low %v9003_v14, %v9004_v17 }
 0x31e   : > { %15401 = vmatprep.subr.bf16.mxu1 %v18100_v33  ;;  %v18061_v33 = vld [vmem:[%s18298_s29 + $0x168] sm:$0xff]  }
 0x31f   : > { %v9076_v5 = vrot.slane %v9074_v59, 5 }
 0x321   : > { %15402 = vmatpush3.bf16.msra.mxu1 %v18101_v44  ;;  %v8445_v44 = vld [vmem:[#allocation3 + $0x2c] sm:$0x1] }
 0x322   : > { %16392 = vmatmul.mubr.msk.bf16.gmra.mrb[52].mxu0 %vm694_vm1, %v18041_v18  ;;  %v15878_v18 = vpop.f32.mrb[74].mxu1  ;;  %15403 = vmatprep.subr.bf16.mxu1 %v18102_v63 }
 0x323   : > { %16395 = vmatprep.mubr.msk.bf16.mxu0 %vm694_vm1, %v18044_v22  ;;  %v9058_v22 = vshll.u32 %v9003_v14, 16  ;;  %16839 = vst [vmem:[#allocation2 + $0x258] sm:$0xff] %v15878_v18  ;;  %v1216_v28 = vpop.f32.mrb[75].mxu1 }
 0x324   : > { %16842 = vst [vmem:[#allocation2 + $0x248] sm:$0xff] %v1216_v28  ;;  %v15881_v62 = vpop.f32.mrb[76].mxu1 }
 0x325   : > { %v9060_v36 = vrot.slane %v9058_v22, 5  ;;  %16845 = vst [vmem:[#allocation2 + $0x270] sm:$0xff] %v15881_v62  ;;  %v1229_v1 = vpop.f32.mrb[77].mxu1  ;;  %15404 = vmatpush3.bf16.msra.mxu1 %v18103_v2  ;;  %v8442_v22 = vld [vmem:[#allocation3 + $0x20] sm:$0x1]  ;;  %v18066_v62 = vld [vmem:[%s18298_s29 + $0x190] sm:$0xff]  }
 0x326   : > { %16848 = vst [vmem:[#allocation2 + $0x260] sm:$0xff] %v1229_v1  ;;  %v8443_v24 = vsel %vm19013_vm5, 0, %v8442_v22 }
 0x327   : > { %v9061_v55 = vor.u32 %v9060_v36, %v9057_v34  ;;  %8444 = vst [vmem:[#allocation3 + $0x20] sm:$0x1] %v8443_v24  ;;  %v18062_v34 = vld [vmem:[%s18298_s29 + $0x170] sm:$0xff]   ;;  %v8395_v36 = vld [vmem:[#allocation3 + $0x24] sm:$0x1] }
 0x328   : > { %v18070_v24 = vld [vmem:[%s18298_s29 + $0x1b0] sm:$0xff]  }
 0x329   : > { %v9062_v0 = vrot.slane %v9061_v55, 4  ;;  %v8446_v55 = vsel %vm19013_vm5, 0, %v8445_v44 }
 0x32a   : > { %16396 = vmatmul.mubr.msk.bf16.gmra.mrb[56].mxu0 %vm694_vm1, %v18045_v38  ;;  %v9066_v38 = vrot.slane %v9064_v26, 5  ;;  %v18060_v26 = vld [vmem:[%s18298_s29 + $0x160] sm:$0xff]   ;;  %8447 = vst [vmem:[#allocation3 + $0x2c] sm:$0x1] %v8446_v55 }
 0x32b   : > { %16399 = vmatprep.mubr.msk.bf16.mxu0 %vm694_vm1, %v18048_v42  ;;  %v18056_v42 = vld [vmem:[%s18298_s29 + $0x150] sm:$0xff]  }
 0x32c   : > { %v9071_v56 = vor.u32 %v9070_v41, %v9066_v38  ;;  %v9067_v9 = vsel %vm19068_vm9, %v9062_v0, %v9066_v38  ;;  %v8396_v38 = vsel %vm19018_vm6, 0, %v8395_v36  ;;  %v18063_v41 = vld [vmem:[%s18298_s29 + $0x178] sm:$0xff]   ;;  %v8451_v36 = vld [vmem:[#allocation3 + $0x44] sm:$0x1] }
 0x32d   : > { %8397 = vst [vmem:[#allocation3 + $0x24] sm:$0x1] %v8396_v38  ;;  %v8401_v38 = vld [vmem:[#allocation3 + $0x3c] sm:$0x1] }
 0x332   : > { %16400 = vmatmul.mubr.msk.bf16.gmra.mrb[60].mxu0 %vm694_vm1, %v18049_v3  ;;  %v9072_v3 = vrot.slane %v9071_v56, 4 }
 0x333   : > { %16403 = vmatprep.mubr.msk.bf16.mxu0 %vm694_vm1, %v18052_v6  ;;  %v15882_v6 = vpop.f32.mrb[78].mxu1 }
 0x334   : > { %16851 = vst [vmem:[#allocation2 + $0x278] sm:$0xff] %v15882_v6  ;;  %v1232_v8 = vpop.f32.mrb[79].mxu1  ;;  %v9077_v10 = vsel %vm19068_vm9, %v9072_v3, %v9076_v5  ;;  %v18067_v3 = vld [vmem:[%s18298_s29 + $0x198] sm:$0xff]   ;;  %v8398_v5 = vld [vmem:[#allocation3 + $0x30] sm:$0x1]  ;;  %v18068_v6 = vld [vmem:[%s18298_s29 + $0x1a0] sm:$0xff]  }
 0x335   : > { %16854 = vst [vmem:[#allocation2 + $0x268] sm:$0xff] %v1232_v8  ;;  %v14667_v18 = vcombine.low %v9067_v9, %v9077_v10  ;;  %v8399_v8 = vsel %vm19018_vm6, 0, %v8398_v5  ;;  %v8448_v9 = vld [vmem:[#allocation3 + $0x38] sm:$0x1]  ;;  %v8404_v5 = vld [vmem:[#allocation3 + $0x48] sm:$0x1] }
 0x336   : > { %8400 = vst [vmem:[#allocation3 + $0x30] sm:$0x1] %v8399_v8  ;;  %v8449_v10 = vsel %vm19013_vm5, 0, %v8448_v9  ;;  %v8405_v8 = vsel %vm19018_vm6, 0, %v8404_v5 }
 0x337   : > { %10049 = vmatprep.mubr.bf16.mxu1 %v14667_v18  ;;  %v16019_v28 = vpop.f32.mrb[80].mxu1  ;;  %8450 = vst [vmem:[#allocation3 + $0x38] sm:$0x1] %v8449_v10  ;;  %8406 = vst [vmem:[#allocation3 + $0x48] sm:$0x1] %v8405_v8 }
 0x338   : > { %10050 = vmatmul.mubr.bf16.vlgmr.msra.gmra.mrb[128].mxu1 %v14651_v20  ;;  %16857 = vst [vmem:[#allocation2 + $0x290] sm:$0xff] %v16019_v28 }
 0x33a   : > { %16404 = vmatmul.mubr.msk.bf16.gmra.mrb[64].mxu0 %vm694_vm1, %v18053_v30  ;;  %v2583_v30 = vpop.f32.mrb[81].mxu1 }
 0x33b   : > { %16407 = vmatprep.mubr.msk.bf16.mxu0 %vm694_vm1, %v18056_v42  ;;  %16860 = vst [vmem:[#allocation2 + $0x280] sm:$0xff] %v2583_v30  ;;  %v16020_v14 = vpop.f32.mrb[82].mxu1  ;;  %v18064_v42 = vld [vmem:[%s18298_s29 + $0x180] sm:$0xff]  }
 0x33c   : > { %16863 = vst [vmem:[#allocation2 + $0x298] sm:$0xff] %v16020_v14  ;;  %v2586_v17 = vpop.f32.mrb[83].mxu1 }
 0x33d   : > { %16866 = vst [vmem:[#allocation2 + $0x288] sm:$0xff] %v2586_v17 }
 0x33f   : > { %v16023_v49 = vpop.f32.mrb[84].mxu1 }
 0x340   : > { %16869 = vst [vmem:[#allocation2 + $0x2b0] sm:$0xff] %v16023_v49  ;;  %v2599_v56 = vpop.f32.mrb[85].mxu1 }
 0x341   : > { %16872 = vst [vmem:[#allocation2 + $0x2a0] sm:$0xff] %v2599_v56  ;;  %v16024_v59 = vpop.f32.mrb[86].mxu1 }
 0x342   : > { %16408 = vmatmul.mubr.msk.bf16.gmra.mrb[68].mxu0 %vm694_vm1, %v18057_v12  ;;  %16875 = vst [vmem:[#allocation2 + $0x2b8] sm:$0xff] %v16024_v59  ;;  %v2602_v60 = vpop.f32.mrb[87].mxu1  ;;  %v18073_v59 = vld [vmem:[%s18298_s29 + $0x1c8] sm:$0xff]  }
 0x343   : > { %16411 = vmatprep.mubr.msk.bf16.mxu0 %vm694_vm1, %v18060_v26  ;;  %16878 = vst [vmem:[#allocation2 + $0x2a8] sm:$0xff] %v2602_v60  ;;  %v18069_v26 = vld [vmem:[%s18298_s29 + $0x1a8] sm:$0xff]   ;;  %v18074_v60 = vld [vmem:[%s18298_s29 + $0x1d0] sm:$0xff]  }
 0x347   : > { %v16027_v63 = vpop.f32.mrb[88].mxu1 }
 0x348   : > { %16881 = vst [vmem:[#allocation2 + $0x2d0] sm:$0xff] %v16027_v63  ;;  %v2615_v0 = vpop.f32.mrb[89].mxu1 }
 0x349   : > { %16884 = vst [vmem:[#allocation2 + $0x2c0] sm:$0xff] %v2615_v0  ;;  %v16028_v1 = vpop.f32.mrb[90].mxu1 }
 0x34a   : > { %16412 = vmatmul.mubr.msk.bf16.gmra.mrb[72].mxu0 %vm694_vm1, %v18061_v33  ;;  %16887 = vst [vmem:[#allocation2 + $0x2d8] sm:$0xff] %v16028_v1  ;;  %v2618_v2 = vpop.f32.mrb[91].mxu1  ;;  %v18071_v33 = vld [vmem:[%s18298_s29 + $0x1b8] sm:$0xff]  }
 0x34b   : > { %16415 = vmatprep.mubr.msk.bf16.mxu0 %vm694_vm1, %v18062_v34  ;;  %16890 = vst [vmem:[#allocation2 + $0x2c8] sm:$0xff] %v2618_v2  ;;  %v18072_v34 = vld [vmem:[%s18298_s29 + $0x1c0] sm:$0xff]   ;;  %v18075_v1 = vld [vmem:[%s18298_s29 + $0x1d8] sm:$0xff]  }
 0x34c   : > { %v18076_v2 = vld [vmem:[%s18298_s29 + $0x1e0] sm:$0xff]  }
 0x34f   : > { %v16031_v12 = vpop.f32.mrb[92].mxu1 }
 0x350   : > { %16893 = vst [vmem:[#allocation2 + $0x2f0] sm:$0xff] %v16031_v12  ;;  %v2631_v18 = vpop.f32.mrb[93].mxu1 }
 0x351   : > { %16896 = vst [vmem:[#allocation2 + $0x2e0] sm:$0xff] %v2631_v18  ;;  %v16032_v20 = vpop.f32.mrb[94].mxu1 }
 0x352   : > { %16416 = vmatmul.mubr.msk.bf16.gmra.mrb[76].mxu0 %vm694_vm1, %v18063_v41  ;;  %16899 = vst [vmem:[#allocation2 + $0x2f8] sm:$0xff] %v16032_v20  ;;  %v2634_v22 = vpop.f32.mrb[95].mxu1  ;;  %v8452_v41 = vsel %vm19013_vm5, 0, %v8451_v36  ;;  %v18077_v20 = vld [vmem:[%s18298_s29 + $0x1e8] sm:$0xff]  }
 0x353   : > { %16419 = vmatprep.mubr.msk.bf16.mxu0 %vm694_vm1, %v18064_v42  ;;  %16902 = vst [vmem:[#allocation2 + $0x2e8] sm:$0xff] %v2634_v22  ;;  %v8402_v42 = vsel %vm19018_vm6, 0, %v8401_v38  ;;  %8453 = vst [vmem:[#allocation3 + $0x44] sm:$0x1] %v8452_v41  ;;  %v18078_v22 = vld [vmem:[%s18298_s29 + $0x1f0] sm:$0xff]   ;;  %v18080_v41 = vld [vmem:[%s18298_s29 + $0x200] sm:$0xff]  }
 0x354   : > { %8403 = vst [vmem:[#allocation3 + $0x3c] sm:$0x1] %v8402_v42  ;;  %v8457_v42 = vld [vmem:[#allocation3 + $0x5c] sm:$0x1] }
 0x357   : > { %v16035_v28 = vpop.f32.mrb[96].mxu1 }
 0x358   : > { %16905 = vst [vmem:[#allocation2 + $0x310] sm:$0xff] %v16035_v28  ;;  %v2647_v30 = vpop.f32.mrb[97].mxu1 }
 0x359   : > { %16908 = vst [vmem:[#allocation2 + $0x300] sm:$0xff] %v2647_v30  ;;  %v16036_v14 = vpop.f32.mrb[98].mxu1 }
 0x35a   : > { %16420 = vmatmul.mubr.msk.bf16.gmra.mrb[80].mxu0 %vm694_vm1, %v18065_v61  ;;  %16911 = vst [vmem:[#allocation2 + $0x318] sm:$0xff] %v16036_v14  ;;  %v2650_v17 = vpop.f32.mrb[99].mxu1 }
 0x35b   : > { %16423 = vmatprep.mubr.msk.bf16.mxu0 %vm694_vm1, %v18066_v62  ;;  %16914 = vst [vmem:[#allocation2 + $0x308] sm:$0xff] %v2650_v17 }
 0x35f   : > { %v16039_v44 = vpop.f32.mrb[100].mxu1 }
 0x360   : > { %16917 = vst [vmem:[#allocation2 + $0x330] sm:$0xff] %v16039_v44  ;;  %v2663_v49 = vpop.f32.mrb[101].mxu1 }
 0x361   : > { %16920 = vst [vmem:[#allocation2 + $0x320] sm:$0xff] %v2663_v49  ;;  %v16040_v55 = vpop.f32.mrb[102].mxu1 }
 0x362   : > { %16424 = vmatmul.mubr.msk.bf16.gmra.mrb[84].mxu0 %vm694_vm1, %v18067_v3  ;;  %16923 = vst [vmem:[#allocation2 + $0x338] sm:$0xff] %v16040_v55  ;;  %v2666_v56 = vpop.f32.mrb[103].mxu1  ;;  %v8454_v3 = vld [vmem:[#allocation3 + $0x50] sm:$0x1]  ;;  %v8407_v55 = vld [vmem:[#allocation3 + $0x54] sm:$0x1] }
 0x363   : > { %16427 = vmatprep.mubr.msk.bf16.mxu0 %vm694_vm1, %v18068_v6  ;;  %16926 = vst [vmem:[#allocation2 + $0x328] sm:$0xff] %v2666_v56  ;;  %v8455_v6 = vsel %vm19013_vm5, 0, %v8454_v3  ;;  %v8458_v56 = vsel %vm19013_vm5, 0, %v8457_v42  ;;  %v18083_v3 = vld [vmem:[%s18298_s29 + $0x210] sm:$0xff]  }
 0x364   : > { %8456 = vst [vmem:[#allocation3 + $0x50] sm:$0x1] %v8455_v6  ;;  %8459 = vst [vmem:[#allocation3 + $0x5c] sm:$0x1] %v8458_v56 }
 0x367   : > { %v16043_v61 = vpop.f32.mrb[104].mxu1 }
 0x368   : > { %16929 = vst [vmem:[#allocation2 + $0x350] sm:$0xff] %v16043_v61  ;;  %v2679_v62 = vpop.f32.mrb[105].mxu1 }
 0x369   : > { %16932 = vst [vmem:[#allocation2 + $0x340] sm:$0xff] %v2679_v62  ;;  %v16044_v63 = vpop.f32.mrb[106].mxu1 }
 0x36a   : > { %16428 = vmatmul.mubr.msk.bf16.gmra.mrb[88].mxu0 %vm694_vm1, %v18069_v26  ;;  %16935 = vst [vmem:[#allocation2 + $0x358] sm:$0xff] %v16044_v63  ;;  %v2682_v0 = vpop.f32.mrb[107].mxu1 }
 0x36b   : > { %16431 = vmatprep.mubr.msk.bf16.mxu0 %vm694_vm1, %v18070_v24  ;;  %16938 = vst [vmem:[#allocation2 + $0x348] sm:$0xff] %v2682_v0  ;;  %v18081_v0 = vld [vmem:[%s18298_s29 + $0x208] sm:$0xff]  }
 0x36f   : > { %v16047_v9 = vpop.f32.mrb[108].mxu1 }
 0x370   : > { %16941 = vst [vmem:[#allocation2 + $0x370] sm:$0xff] %v16047_v9  ;;  %v2695_v10 = vpop.f32.mrb[109].mxu1 }
 0x371   : > { %16944 = vst [vmem:[#allocation2 + $0x360] sm:$0xff] %v2695_v10  ;;  %v16048_v12 = vpop.f32.mrb[110].mxu1 }
 0x372   : > { %16432 = vmatmul.mubr.msk.bf16.gmra.mrb[92].mxu0 %vm694_vm1, %v18071_v33  ;;  %16947 = vst [vmem:[#allocation2 + $0x378] sm:$0xff] %v16048_v12  ;;  %v2698_v18 = vpop.f32.mrb[111].mxu1 }
 0x373   : > { %16435 = vmatprep.mubr.msk.bf16.mxu0 %vm694_vm1, %v18072_v34  ;;  %16950 = vst [vmem:[#allocation2 + $0x368] sm:$0xff] %v2698_v18  ;;  %v18079_v34 = vld [vmem:[%s18298_s29 + $0x1f8] sm:$0xff]  }
 0x377   : > { %v16051_v26 = vpop.f32.mrb[112].mxu1 }
 0x378   : > { %16953 = vst [vmem:[#allocation2 + $0x390] sm:$0xff] %v16051_v26  ;;  %v2711_v24 = vpop.f32.mrb[113].mxu1 }
 0x379   : > { %16956 = vst [vmem:[#allocation2 + $0x380] sm:$0xff] %v2711_v24  ;;  %v16052_v28 = vpop.f32.mrb[114].mxu1 }
 0x37a   : > { %16436 = vmatmul.mubr.msk.bf16.gmra.mrb[96].mxu0 %vm694_vm1, %v18073_v59  ;;  %16959 = vst [vmem:[#allocation2 + $0x398] sm:$0xff] %v16052_v28  ;;  %v2714_v30 = vpop.f32.mrb[115].mxu1 }
 0x37b   : > { %16439 = vmatprep.mubr.msk.bf16.mxu0 %vm694_vm1, %v18074_v60  ;;  %16962 = vst [vmem:[#allocation2 + $0x388] sm:$0xff] %v2714_v30  ;;  %v18089_v30 = vld [vmem:[%s18298_s29 + $0x220] sm:$0xff]  }
 0x37f   : > { %v16055_v60 = vpop.f32.mrb[116].mxu1 }
 0x380   : > { %16965 = vst [vmem:[#allocation2 + $0x3b0] sm:$0xff] %v16055_v60 }
 0x382   : > { %16440 = vmatmul.mubr.msk.bf16.gmra.mrb[100].mxu0 %vm694_vm1, %v18075_v1 }
 0x383   : > { %16443 = vmatprep.mubr.msk.bf16.mxu0 %vm694_vm1, %v18076_v2 }
 0x38a   : > { %16444 = vmatmul.mubr.msk.bf16.gmra.mrb[104].mxu0 %vm694_vm1, %v18077_v20 }
 0x38b   : > { %16447 = vmatprep.mubr.msk.bf16.mxu0 %vm694_vm1, %v18078_v22  ;;  %v18085_v22 = vld [vmem:[%s18298_s29 + $0x218] sm:$0xff]  }
 0x38d   : > { %v16341_v14 = vpop.f32.mrb[0].mxu0 }
 0x38e   : > { %v16619_v17 = vadd.f32 %v16341_v14, %v18853_v11  ;;  %v7045_v33 = vpop.f32.mrb[1].mxu0  ;;  %v8408_v11 = vsel %vm19018_vm6, 0, %v8407_v55  ;;  %v8460_v14 = vld [vmem:[#allocation3 + $0x68] sm:$0x1] }
 0x38f   : > { %v16622_v36 = vadd.f32 %v7045_v33, %v18857_v13  ;;  %v16342_v38 = vpop.f32.mrb[2].mxu0  ;;  %8409 = vst [vmem:[#allocation3 + $0x54] sm:$0x1] %v8408_v11  ;;  %v2727_v13 = vpop.f32.mrb[117].mxu1 }
 0x390   : > { %7814 = vst [vmem:[#allocation2 + $0x10] sm:$0xff] %v16619_v17  ;;  %v16625_v44 = vadd.f32 %v16342_v38, %v18860_v15  ;;  %v7048_v49 = vpop.f32.mrb[3].mxu0  ;;  %16968 = vst [vmem:[#allocation2 + $0x3a0] sm:$0xff] %v2727_v13  ;;  %v16056_v15 = vpop.f32.mrb[118].mxu1  ;;  %v8461_v38 = vsel %vm19013_vm5, 0, %v8460_v14 }
 0x391   : > { %7812 = vst [vmem:[#allocation2] sm:$0xff] %v16622_v36  ;;  %v16628_v59 = vadd.f32 %v7048_v49, %v18863_v16  ;;  %16971 = vst [vmem:[#allocation2 + $0x3b8] sm:$0xff] %v16056_v15  ;;  %v2730_v16 = vpop.f32.mrb[119].mxu1  ;;  %v8410_v36 = vld [vmem:[#allocation3 + $0x60] sm:$0x1] }
 0x392   : > { %7815 = vst [vmem:[#allocation2 + $0x18] sm:$0xff] %v16625_v44  ;;  %16448 = vmatmul.mubr.msk.bf16.gmra.mrb[108].mxu0 %vm694_vm1, %v18079_v34  ;;  %16974 = vst [vmem:[#allocation2 + $0x3a8] sm:$0xff] %v2730_v16  ;;  %v16059_v9 = vpop.f32.mrb[120].mxu1 }
 0x393   : > { %7813 = vst [vmem:[#allocation2 + $0x8] sm:$0xff] %v16628_v59  ;;  %16451 = vmatprep.mubr.msk.bf16.mxu0 %vm694_vm1, %v18080_v41  ;;  %16977 = vst [vmem:[#allocation2 + $0x3d0] sm:$0xff] %v16059_v9 }
 0x394   : > { %8462 = vst [vmem:[#allocation3 + $0x68] sm:$0x1] %v8461_v38 }
 0x395   : > { %v16345_v61 = vpop.f32.mrb[4].mxu0 }
 0x396   : > { %v16631_v62 = vadd.f32 %v16345_v61, %v18869_v19  ;;  %v7061_v63 = vpop.f32.mrb[5].mxu0  ;;  %v2743_v19 = vpop.f32.mrb[121].mxu1 }
 0x397   : > { %v16634_v1 = vadd.f32 %v7061_v63, %v18873_v21  ;;  %v16346_v2 = vpop.f32.mrb[6].mxu0  ;;  %16980 = vst [vmem:[#allocation2 + $0x3c0] sm:$0xff] %v2743_v19  ;;  %v16060_v21 = vpop.f32.mrb[122].mxu1 }
 0x398   : > { %7818 = vst [vmem:[#allocation2 + $0x30] sm:$0xff] %v16631_v62  ;;  %v16637_v5 = vadd.f32 %v16346_v2, %v18876_v23  ;;  %v7064_v6 = vpop.f32.mrb[7].mxu0  ;;  %16983 = vst [vmem:[#allocation2 + $0x3d8] sm:$0xff] %v16060_v21  ;;  %v2746_v23 = vpop.f32.mrb[123].mxu1  ;;  %v18091_v2 = vld [vmem:[%s18298_s29 + $0x228] sm:$0xff]  }
 0x399   : > { %7816 = vst [vmem:[#allocation2 + $0x20] sm:$0xff] %v16634_v1  ;;  %v16640_v8 = vadd.f32 %v7064_v6, %v18879_v25  ;;  %v7942_v12 = vld [vmem:[#allocation2 + $0x10] ss:$2 sm:$0xff]  ;;  %v8070_v18 = vld [vmem:[#allocation2 + $0x11] ss:$2 sm:$0xff]  ;;  %16986 = vst [vmem:[#allocation2 + $0x3c8] sm:$0xff] %v2746_v23 }
 0x39a   : > { %7819 = vst [vmem:[#allocation2 + $0x38] sm:$0xff] %v16637_v5  ;;  %16452 = vmatmul.mubr.msk.bf16.gmra.mrb[112].mxu0 %vm694_vm1, %v18081_v0  ;;  %v7940_v26 = vld [vmem:[#allocation2] ss:$2 sm:$0xff]  ;;  %v8068_v17 = vld [vmem:[#allocation2 + $0x1] ss:$2 sm:$0xff]  ;;  %v16063_v44 = vpop.f32.mrb[124].mxu1  ;;  %v8196_v49 = vmax.f32 %v7942_v12, %v8070_v18 }
 0x39b   : > { %7817 = vst [vmem:[#allocation2 + $0x28] sm:$0xff] %v16640_v8  ;;  %16455 = vmatprep.mubr.msk.bf16.mxu0 %vm694_vm1, %v18083_v3  ;;  %16989 = vst [vmem:[#allocation2 + $0x3f0] sm:$0xff] %v16063_v44  ;;  %v8195_v11 = vmax.f32 %v7940_v26, %v8068_v17  ;;  %v18095_v8 = vld [vmem:[%s18298_s29 + $0x230] sm:$0xff]  }
 0x39d   : > { %v16349_v10 = vpop.f32.mrb[8].mxu0 }
 0x39e   : > { %v16643_v25 = vadd.f32 %v16349_v10, %v18885_v27  ;;  %v7077_v20 = vpop.f32.mrb[9].mxu0 }
 0x39f   : > { %v16646_v24 = vadd.f32 %v7077_v20, %v18889_v29  ;;  %v16350_v28 = vpop.f32.mrb[10].mxu0  ;;  %v8411_v29 = vsel %vm19018_vm6, 0, %v8410_v36 }
 0x3a0   : > { %7822 = vst [vmem:[#allocation2 + $0x50] sm:$0xff] %v16643_v25  ;;  %v16649_v33 = vadd.f32 %v16350_v28, %v18892_v31  ;;  %v7080_v34 = vpop.f32.mrb[11].mxu0  ;;  %8412 = vst [vmem:[#allocation3 + $0x60] sm:$0x1] %v8411_v29  ;;  %v2759_v31 = vpop.f32.mrb[125].mxu1 }
 0x3a1   : > { %v7946_v41 = vld [vmem:[#allocation2 + $0x30] ss:$2 sm:$0xff]  ;;  %v8074_v27 = vld [vmem:[#allocation2 + $0x31] ss:$2 sm:$0xff]  ;;  %7820 = vst [vmem:[#allocation2 + $0x40] sm:$0xff] %v16646_v24  ;;  %v16652_v42 = vadd.f32 %v7080_v34, %v18895_v32  ;;  %16992 = vst [vmem:[#allocation2 + $0x3e0] sm:$0xff] %v2759_v31 }
 0x3a2   : > { %v8198_v55 = vmax.f32 %v7946_v41, %v8074_v27  ;;  %v7944_v56 = vld [vmem:[#allocation2 + $0x20] ss:$2 sm:$0xff]  ;;  %v8072_v59 = vld [vmem:[#allocation2 + $0x21] ss:$2 sm:$0xff]  ;;  %7823 = vst [vmem:[#allocation2 + $0x58] sm:$0xff] %v16649_v33  ;;  %16456 = vmatmul.mubr.msk.bf16.gmra.mrb[116].mxu0 %vm694_vm1, %v18085_v22  ;;  %v16064_v13 = vpop.f32.mrb[126].mxu1 }
 0x3a3   : > { %v19168_v32 = vld [vmem:[%s21228_s2] ss:$0 sm:$0xff]  ;;  %v8197_v60 = vmax.f32 %v7944_v56, %v8072_v59  ;;  %7821 = vst [vmem:[#allocation2 + $0x48] sm:$0xff] %v16652_v42  ;;  %16459 = vmatprep.mubr.msk.bf16.mxu0 %vm694_vm1, %v18089_v30  ;;  %16995 = vst [vmem:[#allocation2 + $0x3f8] sm:$0xff] %v16064_v13  ;;  %v2762_v16 = vpop.f32.mrb[127].mxu1  ;;  %v18097_v33 = vld [vmem:[%s18298_s29 + $0x238] sm:$0xff]  }
 0x3a4   : > { %v8260_v15 = vmax.f32 %v8196_v49, %v8198_v55  ;;  %16998 = vst [vmem:[#allocation2 + $0x3e8] sm:$0xff] %v2762_v16  ;;  %v8895_v22 = vld [vmem:[#allocation3 + $0x14] sm:$0x1]  ;;  %v8891_v28 = vld [vmem:[#allocation3 + $0xc] sm:$0xf] }
 0x3a5   : > { %v8259_v61 = vmax.f32 %v8195_v11, %v8197_v60  ;;  %v16353_v62 = vpop.f32.mrb[12].mxu0  ;;  %v8463_v42 = vld [vmem:[#allocation3 + $0x74] sm:$0x1]  ;;  %v8413_v56 = vld [vmem:[#allocation3 + $0x6c] sm:$0x1] }
 0x3a6   : > { %v8299_v63 = vadd.f32 %v19168_v32, %v8260_v15  ;;  %v16655_v0 = vadd.f32 %v16353_v62, %v18901_v35  ;;  %v7093_v1 = vpop.f32.mrb[13].mxu0  ;;  %v8464_v59 = vsel %vm19013_vm5, 0, %v8463_v42  ;;  %v8898_v42 = vld [vmem:[#allocation3 + $0x18] sm:$0xf] }
 0x3a7   : > { %v8298_v3 = vadd.f32 %v19168_v32, %v8259_v61  ;;  %v16658_v5 = vadd.f32 %v7093_v1, %v18905_v37  ;;  %v16354_v6 = vpop.f32.mrb[14].mxu0  ;;  %8465 = vst [vmem:[#allocation3 + $0x74] sm:$0x1] %v8464_v59 }
 0x3a8   : > { %v8331_v9 = vmax.f32 %v8299_v63, 0.0  ;;  %7826 = vst [vmem:[#allocation2 + $0x70] sm:$0xff] %v16655_v0  ;;  %v16661_v19 = vadd.f32 %v16354_v6, %v18908_v39  ;;  %v7096_v21 = vpop.f32.mrb[15].mxu0 }
 0x3a9   : > { %v8330_v10 = vmax.f32 %v8298_v3, 0.0  ;;  %7824 = vst [vmem:[#allocation2 + $0x60] sm:$0xff] %v16658_v5  ;;  %v16664_v23 = vadd.f32 %v7096_v21, %v18911_v40  ;;  %v7950_v25 = vld [vmem:[#allocation2 + $0x50] ss:$2 sm:$0xff]  ;;  %v8078_v20 = vld [vmem:[#allocation2 + $0x51] ss:$2 sm:$0xff] }
 0x3aa   : > { %v15000_v12 = vpack.c.bf16 %v8331_v9, %v8331_v9  ;;  %7827 = vst [vmem:[#allocation2 + $0x78] sm:$0xff] %v16661_v19  ;;  %16460 = vmatmul.mubr.msk.bf16.gmra.mrb[120].mxu0 %vm694_vm1, %v18091_v2  ;;  %v7948_v40 = vld [vmem:[#allocation2 + $0x40] ss:$2 sm:$0xff]  ;;  %v8076_v30 = vld [vmem:[#allocation2 + $0x41] ss:$2 sm:$0xff]  ;;  %v8200_v15 = vmax.f32 %v7950_v25, %v8078_v20 }
 0x3ab   : > { %v14999_v35 = vpack.c.bf16 %v8330_v10, %v8330_v10  ;;  %7825 = vst [vmem:[#allocation2 + $0x68] sm:$0xff] %v16664_v23  ;;  %16463 = vmatprep.mubr.msk.bf16.mxu0 %vm694_vm1, %v18095_v8  ;;  %v8199_v1 = vmax.f32 %v7948_v40, %v8076_v30 }
 0x3ac   : > { %v8578_v37 = vshrl.u32 %v15000_v12, 16  ;;  %v8581_v24 = vshll.u32 %v15000_v12, 16 }
 0x3ad   : > { %v8570_v18 = vshrl.u32 %v14999_v35, 16  ;;  %v16357_v39 = vpop.f32.mrb[16].mxu0  ;;  %v8573_v38 = vshll.u32 %v14999_v35, 16 }
 0x3ae   : > { %v8580_v26 = vrot.slane %v8578_v37, 7  ;;  %v16667_v14 = vadd.f32 %v16357_v39, %v18917_v43  ;;  %v7109_v17 = vpop.f32.mrb[17].mxu0 }
 0x3af   : > { %v8572_v36 = vrot.slane %v8570_v18, 7  ;;  %v16670_v41 = vadd.f32 %v7109_v17, %v18921_v45  ;;  %v16358_v27 = vpop.f32.mrb[18].mxu0 }
 0x3b0   : > { %v8583_v29 = vor.u32 %v8581_v24, %v8580_v26  ;;  %v8585_v44 = vrot.slane %v8580_v26, 4  ;;  %7830 = vst [vmem:[#allocation2 + $0x90] sm:$0xff] %v16667_v14  ;;  %v16673_v49 = vadd.f32 %v16358_v27, %v18924_v47  ;;  %v7112_v43 = vpop.f32.mrb[19].mxu0  ;;  %v8414_v47 = vsel %vm19018_vm6, 0, %v8413_v56 }
 0x3b1   : > { %v8575_v31 = vor.u32 %v8573_v38, %v8572_v36  ;;  %v8576_v45 = vrot.slane %v8572_v36, 4  ;;  %v7954_v11 = vld [vmem:[#allocation2 + $0x70] ss:$2 sm:$0xff]  ;;  %v8082_v60 = vld [vmem:[#allocation2 + $0x71] ss:$2 sm:$0xff]  ;;  %7828 = vst [vmem:[#allocation2 + $0x80] sm:$0xff] %v16670_v41  ;;  %v16676_v13 = vadd.f32 %v7112_v43, %v18927_v48 }
 0x3b2   : > { %v8202_v16 = vmax.f32 %v7954_v11, %v8082_v60  ;;  %v7952_v61 = vld [vmem:[#allocation2 + $0x60] ss:$2 sm:$0xff]  ;;  %v8080_v62 = vld [vmem:[#allocation2 + $0x61] ss:$2 sm:$0xff]  ;;  %7831 = vst [vmem:[#allocation2 + $0x98] sm:$0xff] %v16673_v49  ;;  %16464 = vmatmul.mubr.msk.bf16.gmra.mrb[124].mxu0 %vm694_vm1, %v18097_v33  ;;  %v8896_v63 = vsel %vm19018_vm6, %v8585_v44, %v8895_v22 }
 0x3b3   : > { %8415 = vst [vmem:[#allocation3 + $0x6c] sm:$0x1] %v8414_v47  ;;  %v8892_v0 = vsel %vm19185_vm11, %v8575_v31, %v8891_v28  ;;  %v8201_v48 = vmax.f32 %v7952_v61, %v8080_v62  ;;  %7829 = vst [vmem:[#allocation2 + $0x88] sm:$0xff] %v16676_v13  ;;  %v8584_v2 = vsel %vm19193_vm12, %v8576_v45, %v8583_v29  ;;  %v16699_v43 = vld [vmem:[#allocation2 + $0xc8] sm:$0xff] }
 0x3b4   : > { %8897 = vst [vmem:[#allocation3 + $0x14] sm:$0x1] %v8896_v63  ;;  %8893 = vst [vmem:[#allocation3 + $0xc] sm:$0xf] %v8892_v0  ;;  %v8262_v3 = vmax.f32 %v8200_v15, %v8202_v16  ;;  %v8902_v15 = vld [vmem:[#allocation3 + $0x20] sm:$0x1] }
 0x3b5   : > { %8894 = vst [vmem:[#allocation3 + $0x10] sm:$0xf] %v8584_v2  ;;  %v8261_v5 = vmax.f32 %v8199_v1, %v8201_v48  ;;  %v16361_v6 = vpop.f32.mrb[20].mxu0  ;;  %v8466_v1 = vld [vmem:[#allocation3 + $0x80] sm:$0x1] }
 0x3b6   : > { %v8301_v8 = vadd.f32 %v19168_v32, %v8262_v3  ;;  %v16679_v9 = vadd.f32 %v16361_v6, %v18933_v51  ;;  %v7125_v19 = vpop.f32.mrb[21].mxu0 }
 0x3b7   : > { %v8300_v21 = vadd.f32 %v19168_v32, %v8261_v5  ;;  %v16682_v10 = vadd.f32 %v7125_v19, %v18936_v52  ;;  %v16362_v23 = vpop.f32.mrb[22].mxu0 }
 0x3b8   : > { %v8333_v12 = vmax.f32 %v8301_v8, 0.0  ;;  %7834 = vst [vmem:[#allocation2 + $0xb0] sm:$0xff] %v16679_v9  ;;  %v16685_v35 = vadd.f32 %v16362_v23, %v18938_v53  ;;  %v7128_v37 = vpop.f32.mrb[23].mxu0 }
 0x3b9   : > { %v8332_v18 = vmax.f32 %v8300_v21, 0.0  ;;  %v19214_v25 = vld [vmem:[#allocation2 + $0x90] ss:$2 sm:$0xff]  ;;  %v19216_v20 = vld [vmem:[#allocation2 + $0x91] ss:$2 sm:$0xff]  ;;  %7832 = vst [vmem:[#allocation2 + $0xa0] sm:$0xff] %v16682_v10  ;;  %v16688_v39 = vadd.f32 %v7128_v37, %v18940_v54 }
 0x3ba   : > { %v15002_v51 = vpack.c.bf16 %v8333_v12, %v8333_v12  ;;  %7835 = vst [vmem:[#allocation2 + $0xb8] sm:$0xff] %v16685_v35  ;;  %v8204_v52 = vmax.f32 %v19214_v25, %v19216_v20  ;;  %v7956_v29 = vld [vmem:[#allocation2 + $0x80] ss:$2 sm:$0xff]  ;;  %v8084_v45 = vld [vmem:[#allocation2 + $0x81] ss:$2 sm:$0xff] }
 0x3bb   : > { %v19219_v22 = vld [vmem:[#allocation3 + $0x14] sm:$0x1]  ;;  %v15001_v26 = vpack.c.bf16 %v8332_v18, %v8332_v18  ;;  %7833 = vst [vmem:[#allocation2 + $0xa8] sm:$0xff] %v16688_v39  ;;  %v19223_v24 = vld [vmem:[#allocation3 + $0xc] sm:$0xf]  ;;  %v8203_v9 = vmax.f32 %v7956_v29, %v8084_v45 }
 0x3bc   : > { %v19225_v53 = vld [vmem:[#allocation3 + $0x10] sm:$0xf]  ;;  %v9098_v28 = vshll.u32 %v19219_v22, 16  ;;  %v8595_v40 = vshrl.u32 %v15002_v51, 16  ;;  %v8598_v30 = vshll.u32 %v15002_v51, 16  ;;  %v9079_v14 = vshrl.u32 %v19223_v24, 16 }
 0x3bd   : > { %v9082_v54 = vshll.u32 %v19223_v24, 16  ;;  %v8587_v17 = vshrl.u32 %v15001_v26, 16  ;;  %v8590_v33 = vshll.u32 %v15001_v26, 16  ;;  %v16365_v36 = vpop.f32.mrb[24].mxu0  ;;  %v9088_v38 = vshll.u32 %v19225_v53, 16  ;;  %v18112_v26 = vld [vmem:[%s21229_s3 + $0x80] sm:$0xff]  }
 0x3be   : > { %v9092_v41 = vshrl.u32 %v19225_v53, 16  ;;  %v8597_v27 = vrot.slane %v8595_v40, 7  ;;  %v16691_v44 = vadd.f32 %v16365_v36, %v18945_v4  ;;  %v7141_v49 = vpop.f32.mrb[25].mxu0  ;;  %v9081_v56 = vrot.slane %v9079_v14, 4  ;;  %v8416_v4 = vld [vmem:[#allocation3 + $0x78] sm:$0x1]  ;;  %16467 = vmatprep.subr.bf16.mxu1 %v18112_v26 }
 0x3bf   : > { %v9084_v59 = vrot.slane %v9082_v54, 5  ;;  %v8589_v31 = vrot.slane %v8587_v17, 7  ;;  %v16694_v11 = vadd.f32 %v7141_v49, %v18948_v57  ;;  %v16366_v60 = vpop.f32.mrb[26].mxu0  ;;  %v9090_v13 = vrot.slane %v9088_v38, 5  ;;  %v19235_v48 = vld [vmem:[#allocation3 + $0xc] sm:$0xe]  ;;  %16468 = vmatpush3.bf16.msra.mxu1 %v18112_v26 }
 0x3c0   : > { %v9094_v47 = vrot.slane %v9092_v41, 4  ;;  %v8600_v16 = vor.u32 %v8598_v30, %v8597_v27  ;;  %v8602_v61 = vrot.slane %v8597_v27, 4  ;;  %7838 = vst [vmem:[#allocation2 + $0xd0] sm:$0xff] %v16691_v44  ;;  %v16697_v62 = vadd.f32 %v16366_v60, %v18950_v58  ;;  %v7144_v63 = vpop.f32.mrb[27].mxu0  ;;  %v16702_v30 = vld [vmem:[#allocation2 + $0xf0] sm:$0xff]  ;;  %v16705_v38 = vld [vmem:[#allocation2 + $0xe0] sm:$0xff] }
 0x3c1   : > { %v9085_v0 = vor.u32 %v9084_v59, %v9081_v56  ;;  %v8592_v2 = vor.u32 %v8590_v33, %v8589_v31  ;;  %v8593_v3 = vrot.slane %v8589_v31, 4  ;;  %v7962_v5 = vld [vmem:[#allocation2 + $0xb0] ss:$2 sm:$0xff]  ;;  %v8090_v6 = vld [vmem:[#allocation2 + $0xb1] ss:$2 sm:$0xff]  ;;  %7836 = vst [vmem:[#allocation2 + $0xc0] sm:$0xff] %v16694_v11  ;;  %v16700_v57 = vadd.f32 %v16699_v43, %v7144_v63 }
 0x3c2   : > { %v9095_v8 = vor.u32 %v9094_v47, %v9090_v13  ;;  %v8206_v19 = vmax.f32 %v7962_v5, %v8090_v6  ;;  %v7960_v21 = vld [vmem:[#allocation2 + $0xa0] ss:$2 sm:$0xff]  ;;  %v8088_v10 = vld [vmem:[#allocation2 + $0xa1] ss:$2 sm:$0xff]  ;;  %7839 = vst [vmem:[#allocation2 + $0xd8] sm:$0xff] %v16697_v62  ;;  %v9100_v58 = vrot.slane %v9098_v28, 5  ;;  %v8903_v39 = vsel %vm19018_vm6, %v8602_v61, %v8902_v15 }
 0x3c3   : > { %v9086_v23 = vrot.slane %v9085_v0, 4  ;;  %v8899_v12 = vsel %vm19185_vm11, %v8592_v2, %v8898_v42  ;;  %v8205_v35 = vmax.f32 %v7960_v21, %v8088_v10  ;;  %7837 = vst [vmem:[#allocation2 + $0xc8] sm:$0xff] %v16700_v57  ;;  %v8601_v18 = vsel %vm19193_vm12, %v8593_v3, %v8600_v16  ;;  %8904 = vst [vmem:[#allocation3 + $0x20] sm:$0x1] %v8903_v39  ;;  %v16708_v49 = vld [vmem:[#allocation2 + $0xf8] sm:$0xff]  ;;  %v16711_v60 = vld [vmem:[#allocation2 + $0xe8] sm:$0xff] }
 0x3c4   : > { %v9096_v37 = vrot.slane %v9095_v8, 4  ;;  %8900 = vst [vmem:[#allocation3 + $0x18] sm:$0xf] %v8899_v12  ;;  %v8264_v25 = vmax.f32 %v8204_v52, %v8206_v19  ;;  %8901 = vst [vmem:[#allocation3 + $0x1c] sm:$0xf] %v8601_v18  ;;  %v8417_v51 = vsel %vm19018_vm6, 0, %v8416_v4  ;;  %v14652_v43 = vcombine.low %v19223_v24, %v19225_v53 }
 0x3c5   : > { %v9091_v20 = vsel %vm19068_vm9, %v9086_v23, %v9090_v13  ;;  %v8263_v28 = vmax.f32 %v8203_v9, %v8205_v35  ;;  %v16369_v40 = vpop.f32.mrb[28].mxu0  ;;  %8418 = vst [vmem:[#allocation3 + $0x78] sm:$0x1] %v8417_v51  ;;  %v8467_v14 = vsel %vm19013_vm5, 0, %v8466_v1  ;;  %v14636_v54 = vrot.slane %v19235_v48, 9  ;;  %v16714_v3 = vld [vmem:[#allocation2 + $0x110] sm:$0xff] }
 0x3c6   : > { %v9101_v52 = vsel %vm19068_vm9, %v9096_v37, %v9100_v58  ;;  %v8303_v17 = vadd.f32 %v19168_v32, %v8264_v25  ;;  %v16703_v33 = vadd.f32 %v16702_v30, %v16369_v40  ;;  %v7157_v36 = vpop.f32.mrb[29].mxu0  ;;  %8468 = vst [vmem:[#allocation3 + $0x80] sm:$0x1] %v8467_v14  ;;  %v9514_v27 = vrot.slane %v19225_v53, 5  ;;  %v16717_v5 = vld [vmem:[#allocation2 + $0x100] sm:$0xff]  ;;  %v16720_v10 = vld [vmem:[#allocation2 + $0x118] sm:$0xff] }
 0x3c7   : > { %v14668_v41 = vcombine.low %v9091_v20, %v9101_v52  ;;  %v8302_v42 = vadd.f32 %v19168_v32, %v8263_v28  ;;  %v16706_v29 = vadd.f32 %v16705_v38, %v7157_v36  ;;  %v16370_v44 = vpop.f32.mrb[30].mxu0  ;;  %v9517_v45 = vrot.slane %v19219_v22, 5  ;;  %v8905_v35 = vld [vmem:[#allocation3 + $0x24] sm:$0xf]  ;;  %v16723_v20 = vld [vmem:[#allocation2 + $0x108] sm:$0xff] }
 0x3c8   : > { %v8335_v59 = vmax.f32 %v8303_v17, 0.0  ;;  %7842 = vst [vmem:[#allocation2 + $0xf0] sm:$0xff] %v16703_v33  ;;  %v16709_v31 = vadd.f32 %v16708_v49, %v16370_v44  ;;  %v7160_v11 = vpop.f32.mrb[31].mxu0  ;;  %v9516_v13 = vrot.slane %v9514_v27, 4  ;;  %v19273_v61 = vsel %vm19262_vm15, %v14636_v54, %v9514_v27  ;;  %v8909_v54 = vld [vmem:[#allocation3 + $0x2c] sm:$0x1] }
 0x3c9   : > { %10057 = vmatprep.mubr.bf16.mxu1 %v14668_v41  ;;  %v8334_v47 = vmax.f32 %v8302_v42, 0.0  ;;  %v19267_v15 = vld [vmem:[#allocation2 + $0xd0] ss:$2 sm:$0xff]  ;;  %v19269_v24 = vld [vmem:[#allocation2 + $0xd1] ss:$2 sm:$0xff]  ;;  %7840 = vst [vmem:[#allocation2 + $0xe0] sm:$0xff] %v16706_v29  ;;  %v16712_v53 = vadd.f32 %v16711_v60, %v7160_v11 }
 0x3ca   : > { %10058 = vmatmul.mubr.bf16.gmra.mrb[132].mxu1 %v14652_v43  ;;  %v15004_v16 = vpack.c.bf16 %v8335_v59, %v8335_v59  ;;  %7843 = vst [vmem:[#allocation2 + $0xf8] sm:$0xff] %v16709_v31  ;;  %v19277_v22 = vsel %vm19262_vm15, %v9516_v13, %v9517_v45  ;;  %v8208_v63 = vmax.f32 %v19267_v15, %v19269_v24  ;;  %v7964_v19 = vld [vmem:[#allocation2 + $0xc0] ss:$2 sm:$0xff]  ;;  %v8092_v37 = vld [vmem:[#allocation2 + $0xc1] ss:$2 sm:$0xff] }
 0x3cb   : > { %v15003_v62 = vpack.c.bf16 %v8334_v47, %v8334_v47  ;;  %7841 = vst [vmem:[#allocation2 + $0xe8] sm:$0xff] %v16712_v53  ;;  %v19281_v0 = vld [vmem:[#allocation3 + $0x18] sm:$0xf]  ;;  %v19283_v4 = vld [vmem:[#allocation3 + $0x1c] sm:$0xf]  ;;  %v8207_v11 = vmax.f32 %v7964_v19, %v8092_v37  ;;  %v16726_v19 = vld [vmem:[#allocation2 + $0x130] sm:$0xff] }
 0x3cc   : > { %v8612_v48 = vshrl.u32 %v15004_v16, 16  ;;  %v8615_v2 = vshll.u32 %v15004_v16, 16  ;;  %v9103_v6 = vshrl.u32 %v19281_v0, 16  ;;  %v9106_v57 = vshll.u32 %v19281_v0, 16  ;;  %v19291_v30 = vld [vmem:[#allocation3 + $0x20] sm:$0x1] }
 0x3cd   : > { %v8604_v8 = vshrl.u32 %v15003_v62, 16  ;;  %v8607_v9 = vshll.u32 %v15003_v62, 16  ;;  %v16373_v21 = vpop.f32.mrb[32].mxu0  ;;  %v9112_v23 = vshll.u32 %v19283_v4, 16  ;;  %v9116_v58 = vshrl.u32 %v19283_v4, 16 }
 0x3ce   : > { %v8614_v12 = vrot.slane %v8612_v48, 7  ;;  %v16715_v18 = vadd.f32 %v16714_v3, %v16373_v21  ;;  %v7173_v25 = vpop.f32.mrb[33].mxu0  ;;  %v9105_v39 = vrot.slane %v9103_v6, 4  ;;  %v9108_v51 = vrot.slane %v9106_v57, 5  ;;  %v8419_v27 = vld [vmem:[#allocation3 + $0x84] sm:$0x1] }
 0x3cf   : > { %v8606_v26 = vrot.slane %v8604_v8, 7  ;;  %v16718_v28 = vadd.f32 %v16717_v5, %v7173_v25  ;;  %v16374_v40 = vpop.f32.mrb[34].mxu0  ;;  %v9114_v52 = vrot.slane %v9112_v23, 5  ;;  %v9118_v14 = vrot.slane %v9116_v58, 4  ;;  %v8469_v42 = vld [vmem:[#allocation3 + $0x8c] sm:$0x1] }
 0x3d0   : > { %v8617_v17 = vor.u32 %v8615_v2, %v8614_v12  ;;  %v8619_v33 = vrot.slane %v8614_v12, 4  ;;  %7846 = vst [vmem:[#allocation2 + $0x110] sm:$0xff] %v16715_v18  ;;  %v16721_v36 = vadd.f32 %v16720_v10, %v16374_v40  ;;  %v7176_v38 = vpop.f32.mrb[35].mxu0  ;;  %v9109_v41 = vor.u32 %v9108_v51, %v9105_v39  ;;  %v19293_v29 = vld [vmem:[#allocation3 + $0x18] sm:$0xe]  ;;  %v18114_v57 = vld [vmem:[%s21229_s3 + $0x88] sm:$0xff]  }
 0x3d1   : > { %v8609_v44 = vor.u32 %v8607_v9, %v8606_v26  ;;  %v8610_v49 = vrot.slane %v8606_v26, 4  ;;  %v7970_v43 = vld [vmem:[#allocation2 + $0xf0] ss:$2 sm:$0xff]  ;;  %v8098_v59 = vld [vmem:[#allocation2 + $0xf1] ss:$2 sm:$0xff]  ;;  %7844 = vst [vmem:[#allocation2 + $0x100] sm:$0xff] %v16718_v28  ;;  %v16724_v31 = vadd.f32 %v16723_v20, %v7176_v38  ;;  %v9119_v45 = vor.u32 %v9118_v14, %v9114_v52  ;;  %16469 = vmatprep.subr.bf16.mxu1 %v18114_v57 }
 0x3d2   : > { %v8210_v60 = vmax.f32 %v7970_v43, %v8098_v59  ;;  %v7968_v13 = vld [vmem:[#allocation2 + $0xe0] ss:$2 sm:$0xff]  ;;  %v8096_v47 = vld [vmem:[#allocation2 + $0xe1] ss:$2 sm:$0xff]  ;;  %7847 = vst [vmem:[#allocation2 + $0x118] sm:$0xff] %v16721_v36  ;;  %v9110_v15 = vrot.slane %v9109_v41, 4  ;;  %v8910_v6 = vsel %vm19018_vm6, %v8619_v33, %v8909_v54  ;;  %v14653_v28 = vcombine.low %v19281_v0, %v19283_v4  ;;  %16470 = vmatpush3.bf16.msra.mxu1 %v18114_v57 }
 0x3d3   : > { %v9122_v24 = vshll.u32 %v19291_v30, 16  ;;  %v8906_v53 = vsel %vm19185_vm11, %v8609_v44, %v8905_v35  ;;  %v8209_v16 = vmax.f32 %v7968_v13, %v8096_v47  ;;  %7845 = vst [vmem:[#allocation2 + $0x108] sm:$0xff] %v16724_v31  ;;  %v9120_v62 = vrot.slane %v9119_v45, 4  ;;  %8911 = vst [vmem:[#allocation3 + $0x2c] sm:$0x1] %v8910_v6  ;;  %v16729_v35 = vld [vmem:[#allocation2 + $0x120] sm:$0xff] }
 0x3d4   : > { %v8618_v48 = vsel %vm19193_vm12, %v8610_v49, %v8617_v17  ;;  %8907 = vst [vmem:[#allocation3 + $0x24] sm:$0xf] %v8906_v53  ;;  %v8266_v2 = vmax.f32 %v8208_v63, %v8210_v60  ;;  %v9115_v3 = vsel %vm19068_vm9, %v9110_v15, %v9114_v52  ;;  %v8420_v21 = vsel %vm19018_vm6, 0, %v8419_v27  ;;  %v16732_v51 = vld [vmem:[#allocation2 + $0x138] sm:$0xff]  ;;  %v16735_v54 = vld [vmem:[#allocation2 + $0x128] sm:$0xff]  ;;  %v16738_v45 = vld [vmem:[#allocation2 + $0x150] sm:$0xff] }
 0x3d5   : > { %v9124_v5 = vrot.slane %v9122_v24, 5  ;;  %8908 = vst [vmem:[#allocation3 + $0x28] sm:$0xf] %v8618_v48  ;;  %v8265_v8 = vmax.f32 %v8207_v11, %v8209_v16  ;;  %v16377_v9 = vpop.f32.mrb[36].mxu0  ;;  %v8470_v63 = vsel %vm19013_vm5, 0, %v8469_v42  ;;  %v14637_v10 = vrot.slane %v19293_v29, 9 }
 0x3d6   : > { %v8305_v23 = vadd.f32 %v19168_v32, %v8266_v2  ;;  %v16727_v58 = vadd.f32 %v16726_v19, %v16377_v9  ;;  %v7189_v12 = vpop.f32.mrb[37].mxu0  ;;  %8421 = vst [vmem:[#allocation3 + $0x84] sm:$0x1] %v8420_v21  ;;  %8471 = vst [vmem:[#allocation3 + $0x8c] sm:$0x1] %v8470_v63  ;;  %v9521_v18 = vrot.slane %v19283_v4, 5 }
 0x3d7   : > { %v9125_v37 = vsel %vm19068_vm9, %v9120_v62, %v9124_v5  ;;  %v8304_v25 = vadd.f32 %v19168_v32, %v8265_v8  ;;  %v16730_v20 = vadd.f32 %v16729_v35, %v7189_v12  ;;  %v16378_v39 = vpop.f32.mrb[38].mxu0  ;;  %v9524_v33 = vrot.slane %v19291_v30, 5  ;;  %v16741_v11 = vld [vmem:[#allocation2 + $0x140] sm:$0xff]  ;;  %v16744_v16 = vld [vmem:[#allocation2 + $0x158] sm:$0xff]  ;;  %v16747_v8 = vld [vmem:[#allocation2 + $0x148] sm:$0xff] }
 0x3d8   : > { %v14669_v26 = vcombine.low %v9115_v3, %v9125_v37  ;;  %v8337_v40 = vmax.f32 %v8305_v23, 0.0  ;;  %7850 = vst [vmem:[#allocation2 + $0x130] sm:$0xff] %v16727_v58  ;;  %v16733_v52 = vadd.f32 %v16732_v51, %v16378_v39  ;;  %v7192_v14 = vpop.f32.mrb[39].mxu0  ;;  %v9523_v17 = vrot.slane %v9521_v18, 4  ;;  %v8912_v3 = vld [vmem:[#allocation3 + $0x30] sm:$0xf] }
 0x3d9   : > { %v8336_v36 = vmax.f32 %v8304_v25, 0.0  ;;  %v19320_v38 = vld [vmem:[#allocation2 + $0x110] ss:$2 sm:$0xff]  ;;  %v19322_v41 = vld [vmem:[#allocation2 + $0x111] ss:$2 sm:$0xff]  ;;  %7848 = vst [vmem:[#allocation2 + $0x120] sm:$0xff] %v16730_v20  ;;  %v16736_v27 = vadd.f32 %v16735_v54, %v7192_v14  ;;  %v19326_v0 = vsel %vm19262_vm15, %v14637_v10, %v9521_v18 }
 0x3da   : > { %10065 = vmatprep.mubr.bf16.mxu1 %v14669_v26  ;;  %v15006_v42 = vpack.c.bf16 %v8337_v40, %v8337_v40  ;;  %7851 = vst [vmem:[#allocation2 + $0x138] sm:$0xff] %v16733_v52  ;;  %v19330_v4 = vsel %vm19262_vm15, %v9523_v17, %v9524_v33  ;;  %v8212_v29 = vmax.f32 %v19320_v38, %v19322_v41  ;;  %v7972_v24 = vld [vmem:[#allocation2 + $0x100] ss:$2 sm:$0xff]  ;;  %v8100_v5 = vld [vmem:[#allocation2 + $0x101] ss:$2 sm:$0xff] }
 0x3db   : > { %10066 = vmatmul.mubr.bf16.gmra.mrb[136].mxu1 %v14653_v28  ;;  %v15005_v30 = vpack.c.bf16 %v8336_v36, %v8336_v36  ;;  %7849 = vst [vmem:[#allocation2 + $0x128] sm:$0xff] %v16736_v27  ;;  %v19334_v44 = vld [vmem:[#allocation3 + $0x24] sm:$0xf]  ;;  %v19344_v23 = vld [vmem:[#allocation3 + $0x2c] sm:$0x1]  ;;  %v8211_v36 = vmax.f32 %v7972_v24, %v8100_v5  ;;  %v18116_v24 = vld [vmem:[%s21229_s3 + $0x90] sm:$0xff]  }
 0x3dc   : > { %v19336_v49 = vld [vmem:[#allocation3 + $0x28] sm:$0xf]  ;;  %v8629_v59 = vshrl.u32 %v15006_v42, 16  ;;  %v8632_v31 = vshll.u32 %v15006_v42, 16  ;;  %v9127_v60 = vshrl.u32 %v19334_v44, 16  ;;  %v9130_v13 = vshll.u32 %v19334_v44, 16  ;;  %16471 = vmatprep.subr.bf16.mxu1 %v18116_v24 }
 0x3dd   : > { %v8621_v47 = vshrl.u32 %v15005_v30, 16  ;;  %v8624_v15 = vshll.u32 %v15005_v30, 16  ;;  %v16381_v53 = vpop.f32.mrb[40].mxu0  ;;  %v9136_v62 = vshll.u32 %v19336_v49, 16  ;;  %v9140_v48 = vshrl.u32 %v19336_v49, 16  ;;  %16472 = vmatpush3.bf16.msra.mxu1 %v18116_v24 }
 0x3de   : > { %v8631_v2 = vrot.slane %v8629_v59, 7  ;;  %v16739_v6 = vadd.f32 %v16738_v45, %v16381_v53  ;;  %v7205_v57 = vpop.f32.mrb[41].mxu0  ;;  %v9129_v9 = vrot.slane %v9127_v60, 4  ;;  %v9132_v19 = vrot.slane %v9130_v13, 5  ;;  %v8916_v35 = vld [vmem:[#allocation3 + $0x38] sm:$0x1] }
 0x3df   : > { %v8623_v21 = vrot.slane %v8621_v47, 7  ;;  %v16742_v63 = vadd.f32 %v16741_v11, %v7205_v57  ;;  %v16382_v10 = vpop.f32.mrb[42].mxu0  ;;  %v9138_v58 = vrot.slane %v9136_v62, 5  ;;  %v9142_v12 = vrot.slane %v9140_v48, 4  ;;  %v8422_v51 = vld [vmem:[#allocation3 + $0x90] sm:$0x1] }
 0x3e0   : > { %v8634_v37 = vor.u32 %v8632_v31, %v8631_v2  ;;  %v8636_v18 = vrot.slane %v8631_v2, 4  ;;  %7854 = vst [vmem:[#allocation2 + $0x150] sm:$0xff] %v16739_v6  ;;  %v16745_v25 = vadd.f32 %v16744_v16, %v16382_v10  ;;  %v7208_v20 = vpop.f32.mrb[43].mxu0  ;;  %v9133_v39 = vor.u32 %v9132_v19, %v9129_v9  ;;  %v8472_v26 = vld [vmem:[#allocation3 + $0x98] sm:$0x1]  ;;  %v16750_v62 = vld [vmem:[#allocation2 + $0x170] sm:$0xff] }
 0x3e1   : > { %v19346_v28 = vld [vmem:[#allocation3 + $0x24] sm:$0xe]  ;;  %v8626_v40 = vor.u32 %v8624_v15, %v8623_v21  ;;  %v8627_v52 = vrot.slane %v8623_v21, 4  ;;  %v7978_v14 = vld [vmem:[#allocation2 + $0x130] ss:$2 sm:$0xff]  ;;  %7852 = vst [vmem:[#allocation2 + $0x140] sm:$0xff] %v16742_v63  ;;  %v16748_v17 = vadd.f32 %v16747_v8, %v7208_v20  ;;  %v9143_v33 = vor.u32 %v9142_v12, %v9138_v58 }
 0x3e2   : > { %v8106_v54 = vld [vmem:[#allocation2 + $0x131] ss:$2 sm:$0xff]  ;;  %v7976_v41 = vld [vmem:[#allocation2 + $0x120] ss:$2 sm:$0xff]  ;;  %v8104_v27 = vld [vmem:[#allocation2 + $0x121] ss:$2 sm:$0xff]  ;;  %v8917_v15 = vsel %vm19018_vm6, %v8636_v18, %v8916_v35  ;;  %v14654_v12 = vcombine.low %v19334_v44, %v19336_v49 }
 0x3e3   : > { %v8214_v38 = vmax.f32 %v7978_v14, %v8106_v54  ;;  %7855 = vst [vmem:[#allocation2 + $0x158] sm:$0xff] %v16745_v25  ;;  %v9134_v42 = vrot.slane %v9133_v39, 4  ;;  %v9146_v30 = vshll.u32 %v19344_v23, 16  ;;  %v8913_v59 = vsel %vm19185_vm11, %v8626_v40, %v8912_v3  ;;  %7853 = vst [vmem:[#allocation2 + $0x148] sm:$0xff] %v16748_v17  ;;  %v16753_v57 = vld [vmem:[#allocation2 + $0x160] sm:$0xff]  ;;  %v16756_v10 = vld [vmem:[#allocation2 + $0x178] sm:$0xff] }
 0x3e4   : > { %v8213_v31 = vmax.f32 %v7976_v41, %v8104_v27  ;;  %v9144_v45 = vrot.slane %v9143_v33, 4  ;;  %v8635_v11 = vsel %vm19193_vm12, %v8627_v52, %v8634_v37  ;;  %8914 = vst [vmem:[#allocation3 + $0x30] sm:$0xf] %v8913_v59  ;;  %8918 = vst [vmem:[#allocation3 + $0x38] sm:$0x1] %v8917_v15  ;;  %v8423_v48 = vsel %vm19018_vm6, 0, %v8422_v51 }
 0x3e5   : > { %v8268_v60 = vmax.f32 %v8212_v29, %v8214_v38  ;;  %v9139_v13 = vsel %vm19068_vm9, %v9134_v42, %v9138_v58  ;;  %v9148_v47 = vrot.slane %v9146_v30, 5  ;;  %8915 = vst [vmem:[#allocation3 + $0x34] sm:$0xf] %v8635_v11  ;;  %v16385_v16 = vpop.f32.mrb[44].mxu0  ;;  %v8473_v29 = vsel %vm19013_vm5, 0, %v8472_v26  ;;  %v16759_v25 = vld [vmem:[#allocation2 + $0x168] sm:$0xff] }
 0x3e6   : > { %v8267_v53 = vmax.f32 %v8211_v36, %v8213_v31  ;;  %v14638_v2 = vrot.slane %v19346_v28, 9  ;;  %v16751_v5 = vadd.f32 %v16750_v62, %v16385_v16  ;;  %v7221_v6 = vpop.f32.mrb[45].mxu0  ;;  %8424 = vst [vmem:[#allocation3 + $0x90] sm:$0x1] %v8423_v48  ;;  %8474 = vst [vmem:[#allocation3 + $0x98] sm:$0x1] %v8473_v29 }
 0x3e7   : > { %v8307_v3 = vadd.f32 %v19168_v32, %v8268_v60  ;;  %v9149_v8 = vsel %vm19068_vm9, %v9144_v45, %v9148_v47  ;;  %v9528_v9 = vrot.slane %v19336_v49, 5  ;;  %v16754_v21 = vadd.f32 %v16753_v57, %v7221_v6  ;;  %v16386_v63 = vpop.f32.mrb[46].mxu0  ;;  %v16762_v41 = vld [vmem:[#allocation2 + $0x190] sm:$0xff]  ;;  %v16765_v27 = vld [vmem:[#allocation2 + $0x180] sm:$0xff]  ;;  %v16768_v60 = vld [vmem:[#allocation2 + $0x198] sm:$0xff] }
 0x3e8   : > { %v8306_v19 = vadd.f32 %v19168_v32, %v8267_v53  ;;  %v14670_v58 = vcombine.low %v9139_v13, %v9149_v8  ;;  %7858 = vst [vmem:[#allocation2 + $0x170] sm:$0xff] %v16751_v5  ;;  %v16757_v37 = vadd.f32 %v16756_v10, %v16386_v63  ;;  %v7224_v18 = vpop.f32.mrb[47].mxu0  ;;  %v9531_v39 = vrot.slane %v19344_v23, 5  ;;  %v8919_v24 = vld [vmem:[#allocation3 + $0x3c] sm:$0xf]  ;;  %v16771_v48 = vld [vmem:[#allocation2 + $0x188] sm:$0xff] }
 0x3e9   : > { %v8339_v35 = vmax.f32 %v8307_v3, 0.0  ;;  %v9530_v20 = vrot.slane %v9528_v9, 4  ;;  %7856 = vst [vmem:[#allocation2 + $0x160] sm:$0xff] %v16754_v21  ;;  %v16760_v40 = vadd.f32 %v16759_v25, %v7224_v18  ;;  %v19379_v44 = vsel %vm19262_vm15, %v14638_v2, %v9528_v9 }
 0x3ea   : > { %v8338_v51 = vmax.f32 %v8306_v19, 0.0  ;;  %v19373_v26 = vld [vmem:[#allocation2 + $0x150] ss:$2 sm:$0xff]  ;;  %v19375_v28 = vld [vmem:[#allocation2 + $0x151] ss:$2 sm:$0xff]  ;;  %10073 = vmatprep.mubr.bf16.mxu1 %v14670_v58  ;;  %7859 = vst [vmem:[#allocation2 + $0x178] sm:$0xff] %v16757_v37 }
 0x3eb   : > { %v15008_v52 = vpack.c.bf16 %v8339_v35, %v8339_v35  ;;  %10074 = vmatmul.mubr.bf16.gmra.mrb[140].mxu1 %v14654_v12  ;;  %v19383_v49 = vsel %vm19262_vm15, %v9530_v20, %v9531_v39  ;;  %v8216_v14 = vmax.f32 %v19373_v26, %v19375_v28  ;;  %7857 = vst [vmem:[#allocation2 + $0x168] sm:$0xff] %v16760_v40  ;;  %v19387_v54 = vld [vmem:[#allocation3 + $0x30] sm:$0xf]  ;;  %v7980_v45 = vld [vmem:[#allocation2 + $0x140] ss:$2 sm:$0xff] }
 0x3ec   : > { %v15007_v23 = vpack.c.bf16 %v8338_v51, %v8338_v51  ;;  %v19389_v17 = vld [vmem:[#allocation3 + $0x34] sm:$0xf]  ;;  %v9151_v42 = vshrl.u32 %v19387_v54, 16  ;;  %v9154_v30 = vshll.u32 %v19387_v54, 16  ;;  %v8108_v53 = vld [vmem:[#allocation2 + $0x141] ss:$2 sm:$0xff] }
 0x3ed   : > { %v8646_v36 = vshrl.u32 %v15008_v52, 16  ;;  %v8649_v38 = vshll.u32 %v15008_v52, 16  ;;  %v16389_v11 = vpop.f32.mrb[48].mxu0  ;;  %v9160_v13 = vshll.u32 %v19389_v17, 16  ;;  %v9164_v47 = vshrl.u32 %v19389_v17, 16 }
 0x3ee   : > { %v8638_v59 = vshrl.u32 %v15007_v23, 16  ;;  %v8641_v31 = vshll.u32 %v15007_v23, 16  ;;  %v16763_v16 = vadd.f32 %v16762_v41, %v16389_v11  ;;  %v7237_v62 = vpop.f32.mrb[49].mxu0  ;;  %v9153_v29 = vrot.slane %v9151_v42, 4  ;;  %v19397_v57 = vld [vmem:[#allocation3 + $0x38] sm:$0x1] }
 0x3ef   : > { %v8648_v15 = vrot.slane %v8646_v36, 7  ;;  %v9156_v2 = vrot.slane %v9154_v30, 5  ;;  %v16766_v5 = vadd.f32 %v16765_v27, %v7237_v62  ;;  %v16390_v6 = vpop.f32.mrb[50].mxu0  ;;  %v9162_v8 = vrot.slane %v9160_v13, 5  ;;  %v8923_v19 = vld [vmem:[#allocation3 + $0x44] sm:$0x1] }
 0x3f0   : > { %v8640_v3 = vrot.slane %v8638_v59, 7  ;;  %v9166_v9 = vrot.slane %v9164_v47, 4  ;;  %7862 = vst [vmem:[#allocation2 + $0x190] sm:$0xff] %v16763_v16  ;;  %v16769_v10 = vadd.f32 %v16768_v60, %v16390_v6  ;;  %v7240_v58 = vpop.f32.mrb[51].mxu0  ;;  %v8425_v35 = vld [vmem:[#allocation3 + $0x9c] sm:$0x1]  ;;  %v8215_v40 = vmax.f32 %v7980_v45, %v8108_v53 }
 0x3f1   : > { %v8651_v21 = vor.u32 %v8649_v38, %v8648_v15  ;;  %v8653_v63 = vrot.slane %v8648_v15, 4  ;;  %v9157_v12 = vor.u32 %v9156_v2, %v9153_v29  ;;  %v8475_v37 = vld [vmem:[#allocation3 + $0xa4] sm:$0x1]  ;;  %v19399_v18 = vld [vmem:[#allocation3 + $0x30] sm:$0xe]  ;;  %7860 = vst [vmem:[#allocation2 + $0x180] sm:$0xff] %v16766_v5  ;;  %v16772_v26 = vadd.f32 %v16771_v48, %v7240_v58 }
 0x3f2   : > { %v8643_v25 = vor.u32 %v8641_v31, %v8640_v3  ;;  %v8644_v20 = vrot.slane %v8640_v3, 4  ;;  %v7986_v39 = vld [vmem:[#allocation2 + $0x170] ss:$2 sm:$0xff]  ;;  %v8114_v51 = vld [vmem:[#allocation2 + $0x171] ss:$2 sm:$0xff]  ;;  %v9167_v28 = vor.u32 %v9166_v9, %v9162_v8  ;;  %7863 = vst [vmem:[#allocation2 + $0x198] sm:$0xff] %v16769_v10 }
 0x3f3   : > { %v8218_v52 = vmax.f32 %v7986_v39, %v8114_v51  ;;  %v7984_v23 = vld [vmem:[#allocation2 + $0x160] ss:$2 sm:$0xff]  ;;  %v8112_v36 = vld [vmem:[#allocation2 + $0x161] ss:$2 sm:$0xff]  ;;  %v9158_v38 = vrot.slane %v9157_v12, 4  ;;  %v9170_v41 = vshll.u32 %v19397_v57, 16  ;;  %v8924_v60 = vsel %vm19018_vm6, %v8653_v63, %v8923_v19 }
 0x3f4   : > { %v8920_v27 = vsel %vm19185_vm11, %v8643_v25, %v8919_v24  ;;  %v8217_v42 = vmax.f32 %v7984_v23, %v8112_v36  ;;  %7861 = vst [vmem:[#allocation2 + $0x188] sm:$0xff] %v16772_v26  ;;  %v9168_v30 = vrot.slane %v9167_v28, 4  ;;  %v8652_v59 = vsel %vm19193_vm12, %v8644_v20, %v8651_v21  ;;  %v18118_v13 = vld [vmem:[%s21229_s3 + $0x98] sm:$0xff]   ;;  %v16774_v24 = vld [vmem:[#allocation2 + $0x1b0] sm:$0xff]  ;;  %8925 = vst [vmem:[#allocation3 + $0x44] sm:$0x1] %v8924_v60 }
 0x3f5   : > { %8921 = vst [vmem:[#allocation3 + $0x3c] sm:$0xf] %v8920_v27  ;;  %v8270_v31 = vmax.f32 %v8216_v14, %v8218_v52  ;;  %v9163_v45 = vsel %vm19068_vm9, %v9158_v38, %v9162_v8  ;;  %v9172_v11 = vrot.slane %v9170_v41, 5  ;;  %8922 = vst [vmem:[#allocation3 + $0x40] sm:$0xf] %v8652_v59  ;;  %v16393_v15 = vpop.f32.mrb[52].mxu0  ;;  %16473 = vmatprep.subr.bf16.mxu1 %v18118_v13 }
 0x3f6   : > { %v8269_v47 = vmax.f32 %v8215_v40, %v8217_v42  ;;  %v8426_v53 = vsel %vm19018_vm6, 0, %v8425_v35  ;;  %v8476_v14 = vsel %vm19013_vm5, 0, %v8475_v37  ;;  %v14639_v16 = vrot.slane %v19399_v18, 9  ;;  %v7253_v29 = vpop.f32.mrb[53].mxu0  ;;  %v16777_v2 = vld [vmem:[#allocation2 + $0x1a0] sm:$0xff]  ;;  %v16780_v19 = vld [vmem:[#allocation2 + $0x1b8] sm:$0xff]  ;;  %16474 = vmatpush3.bf16.msra.mxu1 %v18118_v13 }
 0x3f7   : > { %v8309_v62 = vadd.f32 %v19168_v32, %v8270_v31  ;;  %v16775_v48 = vadd.f32 %v16774_v24, %v16393_v15  ;;  %v9173_v3 = vsel %vm19068_vm9, %v9168_v30, %v9172_v11  ;;  %8427 = vst [vmem:[#allocation3 + $0x9c] sm:$0x1] %v8426_v53  ;;  %8477 = vst [vmem:[#allocation3 + $0xa4] sm:$0x1] %v8476_v14  ;;  %v9535_v5 = vrot.slane %v19389_v17, 5  ;;  %v16394_v32 = vpop.f32.mrb[54].mxu0 }
 0x3f8   : > { %v19425_v6 = vld [vmem:[%s21228_s2] ss:$0 sm:$0xff]  ;;  %v16778_v9 = vadd.f32 %v16777_v2, %v7253_v29  ;;  %v14671_v21 = vcombine.low %v9163_v45, %v9173_v3  ;;  %v14655_v63 = vcombine.low %v19387_v54, %v19389_v17  ;;  %v16781_v58 = vadd.f32 %v16780_v19, %v16394_v32  ;;  %v7256_v12 = vpop.f32.mrb[55].mxu0  ;;  %v16783_v35 = vld [vmem:[#allocation2 + $0x1a8] sm:$0xff]  ;;  %v16786_v41 = vld [vmem:[#allocation2 + $0x1d0] sm:$0xff] }
 0x3f9   : > { %v8308_v8 = vadd.f32 %v19425_v6, %v8269_v47  ;;  %v8341_v10 = vmax.f32 %v8309_v62, 0.0  ;;  %7866 = vst [vmem:[#allocation2 + $0x1b0] sm:$0xff] %v16775_v48  ;;  %v9537_v37 = vrot.slane %v9535_v5, 4  ;;  %v9538_v18 = vrot.slane %v19397_v57, 5  ;;  %v19431_v20 = vld [vmem:[#allocation2 + $0x190] ss:$2 sm:$0xff] }
 0x3fa   : > { %v19433_v39 = vld [vmem:[#allocation2 + $0x191] ss:$2 sm:$0xff]  ;;  %7864 = vst [vmem:[#allocation2 + $0x1a0] sm:$0xff] %v16778_v9  ;;  %10081 = vmatprep.mubr.bf16.mxu1 %v14671_v21  ;;  %v16784_v51 = vadd.f32 %v16783_v35, %v7256_v12  ;;  %7867 = vst [vmem:[#allocation2 + $0x1b8] sm:$0xff] %v16781_v58  ;;  %v19437_v54 = vsel %vm19262_vm15, %v14639_v16, %v9535_v5  ;;  %v16789_v27 = vld [vmem:[#allocation2 + $0x1c0] sm:$0xff] }
 0x3fb   : > { %v8340_v25 = vmax.f32 %v8308_v8, 0.0  ;;  %v15010_v26 = vpack.c.bf16 %v8341_v10, %v8341_v10  ;;  %10082 = vmatmul.mubr.bf16.gmra.mrb[144].mxu1 %v14655_v63  ;;  %v19441_v17 = vsel %vm19262_vm15, %v9537_v37, %v9538_v18  ;;  %v8220_v28 = vmax.f32 %v19431_v20, %v19433_v39  ;;  %v7988_v45 = vld [vmem:[#allocation2 + $0x180] ss:$2 sm:$0xff]  ;;  %v16792_v60 = vld [vmem:[#allocation2 + $0x1d8] sm:$0xff]  ;;  %v8116_v53 = vld [vmem:[#allocation2 + $0x181] ss:$2 sm:$0xff] }
 0x3fc   : > { %7865 = vst [vmem:[#allocation2 + $0x1a8] sm:$0xff] %v16784_v51  ;;  %v19445_v40 = vld [vmem:[#allocation3 + $0x3c] sm:$0xf]  ;;  %v19447_v52 = vld [vmem:[#allocation3 + $0x40] sm:$0xf]  ;;  %v16795_v62 = vld [vmem:[#allocation2 + $0x1c8] sm:$0xff] }
 0x3fd   : > { %v15009_v57 = vpack.c.bf16 %v8340_v25, %v8340_v25  ;;  %v8663_v36 = vshrl.u32 %v15010_v26, 16  ;;  %v8666_v38 = vshll.u32 %v15010_v26, 16  ;;  %v9175_v42 = vshrl.u32 %v19445_v40, 16  ;;  %v16397_v11 = vpop.f32.mrb[56].mxu0  ;;  %v8926_v24 = vld [vmem:[#allocation3 + $0x48] sm:$0xf] }
 0x3fe   : > { %v9178_v30 = vshll.u32 %v19445_v40, 16  ;;  %v9184_v13 = vshll.u32 %v19447_v52, 16  ;;  %v9188_v47 = vshrl.u32 %v19447_v52, 16  ;;  %v16787_v14 = vadd.f32 %v16786_v41, %v16397_v11  ;;  %v7269_v16 = vpop.f32.mrb[57].mxu0  ;;  %v19455_v8 = vld [vmem:[#allocation3 + $0x44] sm:$0x1] }
 0x3ff   : > { %v8655_v59 = vshrl.u32 %v15009_v57, 16  ;;  %v8658_v31 = vshll.u32 %v15009_v57, 16  ;;  %v8665_v15 = vrot.slane %v8663_v36, 7  ;;  %v9177_v48 = vrot.slane %v9175_v42, 4  ;;  %v16398_v5 = vpop.f32.mrb[58].mxu0 }
 0x400   : > { %v9180_v29 = vrot.slane %v9178_v30, 5  ;;  %v16790_v3 = vadd.f32 %v16789_v27, %v7269_v16  ;;  %v9186_v9 = vrot.slane %v9184_v13, 5  ;;  %v9190_v32 = vrot.slane %v9188_v47, 4  ;;  %v8930_v19 = vld [vmem:[#allocation3 + $0x50] sm:$0x1]  ;;  %7870 = vst [vmem:[#allocation2 + $0x1d0] sm:$0xff] %v16787_v14 }
 0x401   : > { %v8657_v2 = vrot.slane %v8655_v59, 7  ;;  %v8668_v21 = vor.u32 %v8666_v38, %v8665_v15  ;;  %v8670_v63 = vrot.slane %v8665_v15, 4  ;;  %v16793_v10 = vadd.f32 %v16792_v60, %v16398_v5  ;;  %v7272_v58 = vpop.f32.mrb[59].mxu0  ;;  %v8428_v35 = vld [vmem:[#allocation3 + $0xa8] sm:$0x1]  ;;  %v16798_v16 = vld [vmem:[#allocation2 + $0x1f0] sm:$0xff] }
 0x402   : > { %v9181_v12 = vor.u32 %v9180_v29, %v9177_v48  ;;  %v8478_v37 = vld [vmem:[#allocation3 + $0xb0] sm:$0x1]  ;;  %v19457_v18 = vld [vmem:[#allocation3 + $0x3c] sm:$0xe]  ;;  %7868 = vst [vmem:[#allocation2 + $0x1c0] sm:$0xff] %v16790_v3  ;;  %v16796_v26 = vadd.f32 %v16795_v62, %v7272_v58  ;;  %v9191_v57 = vor.u32 %v9190_v32, %v9186_v9  ;;  %v8219_v36 = vmax.f32 %v7988_v45, %v8116_v53  ;;  %v16801_v5 = vld [vmem:[#allocation2 + $0x1e0] sm:$0xff] }
 0x403   : > { %v8660_v25 = vor.u32 %v8658_v31, %v8657_v2  ;;  %v8661_v20 = vrot.slane %v8657_v2, 4  ;;  %v7994_v39 = vld [vmem:[#allocation2 + $0x1b0] ss:$2 sm:$0xff]  ;;  %v8122_v51 = vld [vmem:[#allocation2 + $0x1b1] ss:$2 sm:$0xff]  ;;  %7871 = vst [vmem:[#allocation2 + $0x1d8] sm:$0xff] %v16793_v10  ;;  %v8931_v15 = vsel %vm19018_vm6, %v8670_v63, %v8930_v19 }
 0x404   : > { %v8222_v41 = vmax.f32 %v7994_v39, %v8122_v51  ;;  %v7992_v27 = vld [vmem:[#allocation2 + $0x1a0] ss:$2 sm:$0xff]  ;;  %v8120_v38 = vld [vmem:[#allocation2 + $0x1a1] ss:$2 sm:$0xff]  ;;  %v9182_v42 = vrot.slane %v9181_v12, 4  ;;  %v9194_v30 = vshll.u32 %v19455_v8, 16  ;;  %v14656_v12 = vcombine.low %v19445_v40, %v19447_v52 }
 0x405   : > { %v8927_v59 = vsel %vm19185_vm11, %v8660_v25, %v8926_v24  ;;  %v8221_v11 = vmax.f32 %v7992_v27, %v8120_v38  ;;  %7869 = vst [vmem:[#allocation2 + $0x1c8] sm:$0xff] %v16796_v26  ;;  %v9192_v31 = vrot.slane %v9191_v57, 4  ;;  %v8669_v60 = vsel %vm19193_vm12, %v8661_v20, %v8668_v21  ;;  %v18120_v24 = vld [vmem:[%s21229_s3 + $0xa0] sm:$0xff]   ;;  %v16401_v14 = vpop.f32.mrb[60].mxu0  ;;  %8932 = vst [vmem:[#allocation3 + $0x50] sm:$0x1] %v8931_v15 }
 0x406   : > { %8928 = vst [vmem:[#allocation3 + $0x48] sm:$0xf] %v8927_v59  ;;  %v8272_v13 = vmax.f32 %v8220_v28, %v8222_v41  ;;  %v9187_v45 = vsel %vm19068_vm9, %v9182_v42, %v9186_v9  ;;  %v9196_v47 = vrot.slane %v9194_v30, 5  ;;  %8929 = vst [vmem:[#allocation3 + $0x4c] sm:$0xf] %v8669_v60  ;;  %v8429_v62 = vsel %vm19018_vm6, 0, %v8428_v35  ;;  %16475 = vmatprep.subr.bf16.mxu1 %v18120_v24 }
 0x407   : > { %v8271_v53 = vmax.f32 %v8219_v36, %v8221_v11  ;;  %v8479_v28 = vsel %vm19013_vm5, 0, %v8478_v37  ;;  %v14640_v48 = vrot.slane %v19457_v18, 9  ;;  %v16799_v2 = vadd.f32 %v16798_v16, %v16401_v14  ;;  %v7285_v3 = vpop.f32.mrb[61].mxu0  ;;  %8430 = vst [vmem:[#allocation3 + $0xa8] sm:$0x1] %v8429_v62  ;;  %v16804_v10 = vld [vmem:[#allocation2 + $0x1f8] sm:$0xff]  ;;  %16476 = vmatpush3.bf16.msra.mxu1 %v18120_v24 }
 0x408   : > { %v8311_v29 = vadd.f32 %v19425_v6, %v8272_v13  ;;  %v9197_v9 = vsel %vm19068_vm9, %v9192_v31, %v9196_v47  ;;  %8480 = vst [vmem:[#allocation3 + $0xb0] sm:$0x1] %v8479_v28  ;;  %v9542_v32 = vrot.slane %v19447_v52, 5  ;;  %v16802_v21 = vadd.f32 %v16801_v5, %v7285_v3  ;;  %v16402_v63 = vpop.f32.mrb[62].mxu0  ;;  %v16807_v25 = vld [vmem:[#allocation2 + $0x1e8] sm:$0xff]  ;;  %v16810_v31 = vld [vmem:[#allocation2 + $0x210] sm:$0xff] }
 0x409   : > { %v8310_v19 = vadd.f32 %v19425_v6, %v8271_v53  ;;  %v14672_v58 = vcombine.low %v9187_v45, %v9197_v9  ;;  %7874 = vst [vmem:[#allocation2 + $0x1f0] sm:$0xff] %v16799_v2  ;;  %v16805_v37 = vadd.f32 %v16804_v10, %v16402_v63  ;;  %v7288_v18 = vpop.f32.mrb[63].mxu0  ;;  %v9545_v39 = vrot.slane %v19455_v8, 5  ;;  %v16813_v60 = vld [vmem:[#allocation2 + $0x200] sm:$0xff]  ;;  %v16816_v14 = vld [vmem:[#allocation2 + $0x218] sm:$0xff]  ;;  %v16819_v5 = vld [vmem:[#allocation2 + $0x208] sm:$0xff] }
 0x40a   : > { %v8343_v35 = vmax.f32 %v8311_v29, 0.0  ;;  %v9544_v20 = vrot.slane %v9542_v32, 4  ;;  %v19484_v26 = vld [vmem:[#allocation2 + $0x1d0] ss:$2 sm:$0xff]  ;;  %v19486_v57 = vld [vmem:[#allocation2 + $0x1d1] ss:$2 sm:$0xff]  ;;  %v16808_v36 = vadd.f32 %v16807_v25, %v7288_v18  ;;  %v19490_v40 = vsel %vm19262_vm15, %v14640_v48, %v9542_v32 }
 0x40b   : > { %v8342_v51 = vmax.f32 %v8310_v19, 0.0  ;;  %7872 = vst [vmem:[#allocation2 + $0x1e0] sm:$0xff] %v16802_v21  ;;  %10089 = vmatprep.mubr.bf16.mxu1 %v14672_v58  ;;  %7875 = vst [vmem:[#allocation2 + $0x1f8] sm:$0xff] %v16805_v37  ;;  %v8224_v27 = vmax.f32 %v19484_v26, %v19486_v57  ;;  %v8933_v48 = vld [vmem:[#allocation3 + $0x54] sm:$0xf] }
 0x40c   : > { %v15012_v41 = vpack.c.bf16 %v8343_v35, %v8343_v35  ;;  %10090 = vmatmul.mubr.bf16.gmra.mrb[148].mxu1 %v14656_v12  ;;  %v19494_v52 = vsel %vm19262_vm15, %v9544_v20, %v9545_v39  ;;  %7873 = vst [vmem:[#allocation2 + $0x1e8] sm:$0xff] %v16808_v36  ;;  %v7996_v24 = vld [vmem:[#allocation2 + $0x1c0] ss:$2 sm:$0xff]  ;;  %v8124_v29 = vld [vmem:[#allocation2 + $0x1c1] ss:$2 sm:$0xff] }
 0x40d   : > { %v15011_v8 = vpack.c.bf16 %v8342_v51, %v8342_v51  ;;  %v19498_v38 = vld [vmem:[#allocation3 + $0x48] sm:$0xf]  ;;  %v19500_v42 = vld [vmem:[#allocation3 + $0x4c] sm:$0xf]  ;;  %v16405_v53 = vpop.f32.mrb[64].mxu0 }
 0x40e   : > { %v8680_v59 = vshrl.u32 %v15012_v41, 16  ;;  %v8683_v11 = vshll.u32 %v15012_v41, 16  ;;  %v9199_v13 = vshrl.u32 %v19498_v38, 16  ;;  %v9202_v45 = vshll.u32 %v19498_v38, 16  ;;  %v7301_v3 = vpop.f32.mrb[65].mxu0 }
 0x40f   : > { %v8672_v47 = vshrl.u32 %v15011_v8, 16  ;;  %v8675_v15 = vshll.u32 %v15011_v8, 16  ;;  %v9208_v16 = vshll.u32 %v19500_v42, 16  ;;  %v9212_v62 = vshrl.u32 %v19500_v42, 16  ;;  %v16406_v63 = vpop.f32.mrb[66].mxu0 }
 0x410   : > { %v8682_v28 = vrot.slane %v8680_v59, 7  ;;  %v16811_v2 = vadd.f32 %v16810_v31, %v16405_v53  ;;  %v9201_v9 = vrot.slane %v9199_v13, 4  ;;  %v9204_v32 = vrot.slane %v9202_v45, 5  ;;  %v19508_v10 = vld [vmem:[#allocation3 + $0x50] sm:$0x1]  ;;  %v7304_v20 = vpop.f32.mrb[67].mxu0 }
 0x411   : > { %v8674_v19 = vrot.slane %v8672_v47, 7  ;;  %v16814_v21 = vadd.f32 %v16813_v60, %v7301_v3  ;;  %v9210_v58 = vrot.slane %v9208_v16, 5  ;;  %v9214_v12 = vrot.slane %v9212_v62, 4  ;;  %v8937_v35 = vld [vmem:[#allocation3 + $0x5c] sm:$0x1] }
 0x412   : > { %v8685_v37 = vor.u32 %v8683_v11, %v8682_v28  ;;  %v8687_v18 = vrot.slane %v8682_v28, 4  ;;  %7878 = vst [vmem:[#allocation2 + $0x210] sm:$0xff] %v16811_v2  ;;  %v16817_v25 = vadd.f32 %v16816_v14, %v16406_v63  ;;  %v9205_v39 = vor.u32 %v9204_v32, %v9201_v9  ;;  %v8431_v51 = vld [vmem:[#allocation3 + $0xb4] sm:$0x1]  ;;  %v8481_v26 = vld [vmem:[#allocation3 + $0xbc] sm:$0x1] }
 0x413   : > { %v19510_v57 = vld [vmem:[#allocation3 + $0x48] sm:$0xe]  ;;  %v8677_v36 = vor.u32 %v8675_v15, %v8674_v19  ;;  %v8678_v41 = vrot.slane %v8674_v19, 4  ;;  %v8002_v8 = vld [vmem:[#allocation2 + $0x1f0] ss:$2 sm:$0xff]  ;;  %7876 = vst [vmem:[#allocation2 + $0x200] sm:$0xff] %v16814_v21  ;;  %v16820_v31 = vadd.f32 %v16819_v5, %v7304_v20  ;;  %v9215_v60 = vor.u32 %v9214_v12, %v9210_v58 }
 0x414   : > { %v8130_v59 = vld [vmem:[#allocation2 + $0x1f1] ss:$2 sm:$0xff]  ;;  %v8223_v13 = vmax.f32 %v7996_v24, %v8124_v29  ;;  %v8000_v47 = vld [vmem:[#allocation2 + $0x1e0] ss:$2 sm:$0xff]  ;;  %v8128_v11 = vld [vmem:[#allocation2 + $0x1e1] ss:$2 sm:$0xff]  ;;  %v8938_v3 = vsel %vm19018_vm6, %v8687_v18, %v8937_v35 }
 0x415   : > { %v8226_v45 = vmax.f32 %v8002_v8, %v8130_v59  ;;  %7879 = vst [vmem:[#allocation2 + $0x218] sm:$0xff] %v16817_v25  ;;  %v9206_v53 = vrot.slane %v9205_v39, 4  ;;  %v9218_v14 = vshll.u32 %v19508_v10, 16  ;;  %v8934_v16 = vsel %vm19185_vm11, %v8677_v36, %v8933_v48  ;;  %7877 = vst [vmem:[#allocation2 + $0x208] sm:$0xff] %v16820_v31  ;;  %v18122_v48 = vld [vmem:[%s21229_s3 + $0xa8] sm:$0xff]   ;;  %v16409_v9 = vpop.f32.mrb[68].mxu0 }
 0x416   : > { %v8225_v62 = vmax.f32 %v8000_v47, %v8128_v11  ;;  %v9216_v15 = vrot.slane %v9215_v60, 4  ;;  %v8686_v28 = vsel %vm19193_vm12, %v8678_v41, %v8685_v37  ;;  %8935 = vst [vmem:[#allocation3 + $0x54] sm:$0xf] %v8934_v16  ;;  %v16822_v32 = vld [vmem:[#allocation2 + $0x230] sm:$0xff]  ;;  %8939 = vst [vmem:[#allocation3 + $0x5c] sm:$0x1] %v8938_v3  ;;  %16477 = vmatprep.subr.bf16.mxu1 %v18122_v48 }
 0x417   : > { %v8274_v2 = vmax.f32 %v8224_v27, %v8226_v45  ;;  %v9211_v24 = vsel %vm19068_vm9, %v9206_v53, %v9210_v58  ;;  %v9220_v29 = vrot.slane %v9218_v14, 5  ;;  %8936 = vst [vmem:[#allocation3 + $0x58] sm:$0xf] %v8686_v28  ;;  %v8432_v19 = vsel %vm19018_vm6, 0, %v8431_v51  ;;  %v7317_v12 = vpop.f32.mrb[69].mxu0  ;;  %v16825_v35 = vld [vmem:[#allocation2 + $0x220] sm:$0xff]  ;;  %16478 = vmatpush3.bf16.msra.mxu1 %v18122_v48 }
 0x418   : > { %v8273_v5 = vmax.f32 %v8223_v13, %v8225_v62  ;;  %v8482_v27 = vsel %vm19013_vm5, 0, %v8481_v26  ;;  %v14641_v21 = vrot.slane %v19510_v57, 9  ;;  %v16823_v58 = vadd.f32 %v16822_v32, %v16409_v9  ;;  %8433 = vst [vmem:[#allocation3 + $0xb4] sm:$0x1] %v8432_v19  ;;  %v16410_v39 = vpop.f32.mrb[70].mxu0  ;;  %v16828_v51 = vld [vmem:[#allocation2 + $0x238] sm:$0xff] }
 0x419   : > { %v8313_v63 = vadd.f32 %v19425_v6, %v8274_v2  ;;  %v9221_v37 = vsel %vm19068_vm9, %v9216_v15, %v9220_v29  ;;  %8483 = vst [vmem:[#allocation3 + $0xbc] sm:$0x1] %v8482_v27  ;;  %v9549_v18 = vrot.slane %v19500_v42, 5  ;;  %v16826_v20 = vadd.f32 %v16825_v35, %v7317_v12  ;;  %v7320_v8 = vpop.f32.mrb[71].mxu0  ;;  %v16831_v59 = vld [vmem:[#allocation2 + $0x228] sm:$0xff]  ;;  %v16837_v27 = vld [vmem:[#allocation2 + $0x240] sm:$0xff] }
 0x41a   : > { %v8312_v25 = vadd.f32 %v19425_v6, %v8273_v5  ;;  %v14673_v26 = vcombine.low %v9211_v24, %v9221_v37  ;;  %v14657_v57 = vcombine.low %v19498_v38, %v19500_v42  ;;  %7882 = vst [vmem:[#allocation2 + $0x230] sm:$0xff] %v16823_v58  ;;  %v16829_v41 = vadd.f32 %v16828_v51, %v16410_v39  ;;  %v16834_v24 = vld [vmem:[#allocation2 + $0x250] sm:$0xff]  ;;  %v8940_v12 = vld [vmem:[#allocation3 + $0x60] sm:$0xf] }
 0x41b   : > { %v8345_v36 = vmax.f32 %v8313_v63, 0.0  ;;  %v9551_v31 = vrot.slane %v9549_v18, 4  ;;  %v9552_v60 = vrot.slane %v19508_v10, 5  ;;  %7880 = vst [vmem:[#allocation2 + $0x220] sm:$0xff] %v16826_v20  ;;  %v16832_v11 = vadd.f32 %v16831_v59, %v7320_v8  ;;  %v8944_v8 = vld [vmem:[#allocation3 + $0x68] sm:$0x1] }
 0x41c   : > { %v8344_v13 = vmax.f32 %v8312_v25, 0.0  ;;  %v19537_v45 = vld [vmem:[#allocation2 + $0x210] ss:$2 sm:$0xff]  ;;  %v19539_v47 = vld [vmem:[#allocation2 + $0x211] ss:$2 sm:$0xff]  ;;  %10097 = vmatprep.mubr.bf16.mxu1 %v14673_v26  ;;  %7883 = vst [vmem:[#allocation2 + $0x238] sm:$0xff] %v16829_v41  ;;  %v19543_v38 = vsel %vm19262_vm15, %v14641_v21, %v9549_v18 }
 0x41d   : > { %v15014_v53 = vpack.c.bf16 %v8345_v36, %v8345_v36  ;;  %10098 = vmatmul.mubr.bf16.gmra.mrb[152].mxu1 %v14657_v57  ;;  %v19547_v42 = vsel %vm19262_vm15, %v9551_v31, %v9552_v60  ;;  %v8228_v14 = vmax.f32 %v19537_v45, %v19539_v47  ;;  %7881 = vst [vmem:[#allocation2 + $0x228] sm:$0xff] %v16832_v11  ;;  %v19551_v16 = vld [vmem:[#allocation3 + $0x54] sm:$0xf]  ;;  %v8004_v9 = vld [vmem:[#allocation2 + $0x200] ss:$2 sm:$0xff]  ;;  %v16413_v19 = vpop.f32.mrb[72].mxu0 }
 0x41e   : > { %v15013_v10 = vpack.c.bf16 %v8344_v13, %v8344_v13  ;;  %v19553_v62 = vld [vmem:[#allocation3 + $0x58] sm:$0xf]  ;;  %v9223_v29 = vshrl.u32 %v19551_v16, 16  ;;  %v9226_v3 = vshll.u32 %v19551_v16, 16  ;;  %v8132_v32 = vld [vmem:[#allocation2 + $0x201] ss:$2 sm:$0xff]  ;;  %v16835_v35 = vadd.f32 %v16834_v24, %v16413_v19 }
 0x41f   : > { %v8697_v28 = vshrl.u32 %v15014_v53, 16  ;;  %v8700_v2 = vshll.u32 %v15014_v53, 16  ;;  %v9232_v21 = vshll.u32 %v19553_v62, 16  ;;  %v9236_v63 = vshrl.u32 %v19553_v62, 16  ;;  %v7333_v37 = vpop.f32.mrb[73].mxu0  ;;  %v16840_v57 = vld [vmem:[#allocation2 + $0x258] sm:$0xff] }
 0x420   : > { %v8689_v48 = vshrl.u32 %v15013_v10, 16  ;;  %v8692_v5 = vshll.u32 %v15013_v10, 16  ;;  %v19561_v18 = vld [vmem:[#allocation3 + $0x5c] sm:$0x1]  ;;  %v9225_v25 = vrot.slane %v9223_v29, 4  ;;  %v9228_v20 = vrot.slane %v9226_v3, 5 }
 0x421   : > { %v8699_v58 = vrot.slane %v8697_v28, 7  ;;  %v16838_v51 = vadd.f32 %v16837_v27, %v7333_v37  ;;  %v16414_v26 = vpop.f32.mrb[74].mxu0  ;;  %v9234_v36 = vrot.slane %v9232_v21, 5  ;;  %v9238_v41 = vrot.slane %v9236_v63, 4  ;;  %v15405_v59 = vpop.f32.mrb[128].mxu1  ;;  %7886 = vst [vmem:[#allocation2 + $0x250] sm:$0xff] %v16835_v35 }
 0x422   : > { %v8691_v39 = vrot.slane %v8689_v48, 7  ;;  %v16841_v13 = vadd.f32 %v16840_v57, %v16414_v26  ;;  %v7336_v11 = vpop.f32.mrb[75].mxu0  ;;  %v16843_v53 = vld [vmem:[#allocation2 + $0x248] sm:$0xff]  ;;  %v9229_v10 = vor.u32 %v9228_v20, %v9225_v25  ;;  %v8434_v28 = vld [vmem:[#allocation3 + $0xc0] sm:$0x1]  ;;  %v15406_v24 = vpop.f32.mrb[129].mxu1  ;;  %v8227_v63 = vmax.f32 %v8004_v9, %v8132_v32 }
 0x423   : > { %v8702_v31 = vor.u32 %v8700_v2, %v8699_v58  ;;  %v8704_v60 = vrot.slane %v8699_v58, 4  ;;  %v8010_v3 = vld [vmem:[#allocation2 + $0x230] ss:$2 sm:$0xff]  ;;  %v8138_v48 = vld [vmem:[#allocation2 + $0x231] ss:$2 sm:$0xff]  ;;  %7884 = vst [vmem:[#allocation2 + $0x240] sm:$0xff] %v16838_v51  ;;  %v16844_v27 = vadd.f32 %v16843_v53, %v7336_v11  ;;  %v9239_v37 = vor.u32 %v9238_v41, %v9234_v36 }
 0x424   : > { %v8694_v19 = vor.u32 %v8692_v5, %v8691_v39  ;;  %v8695_v29 = vrot.slane %v8691_v39, 4  ;;  %v15408_v21 = vpop.f32.mrb[130].mxu1  ;;  %v8230_v15 = vmax.f32 %v8010_v3, %v8138_v48  ;;  %v8008_v30 = vld [vmem:[#allocation2 + $0x220] ss:$2 sm:$0xff]  ;;  %v8136_v2 = vld [vmem:[#allocation2 + $0x221] ss:$2 sm:$0xff] }
 0x425   : > { %7887 = vst [vmem:[#allocation2 + $0x258] sm:$0xff] %v16841_v13  ;;  %v9230_v58 = vrot.slane %v9229_v10, 4  ;;  %v9242_v35 = vshll.u32 %v19561_v18, 16  ;;  %v8229_v20 = vmax.f32 %v8008_v30, %v8136_v2  ;;  %7885 = vst [vmem:[#allocation2 + $0x248] sm:$0xff] %v16844_v27  ;;  %v9240_v5 = vrot.slane %v9239_v37, 4  ;;  %v15409_v51 = vpop.f32.mrb[131].mxu1 }
 0x426   : > { %v8941_v25 = vsel %vm19185_vm11, %v8694_v19, %v8940_v12  ;;  %v8703_v39 = vsel %vm19193_vm12, %v8695_v29, %v8702_v31  ;;  %v8276_v9 = vmax.f32 %v8228_v14, %v8230_v15  ;;  %v8945_v12 = vsel %vm19018_vm6, %v8704_v60, %v8944_v8  ;;  %v18124_v30 = vld [vmem:[%s21229_s3 + $0xb0] sm:$0xff]   ;;  %v18126_v57 = vld [vmem:[%s21229_s3 + $0xb8] sm:$0xff]   ;;  %v16417_v31 = vpop.f32.mrb[76].mxu0  ;;  %v16849_v13 = vld [vmem:[#allocation2 + $0x260] sm:$0xff] }
 0x427   : > { %8942 = vst [vmem:[#allocation3 + $0x60] sm:$0xf] %v8941_v25  ;;  %v9235_v32 = vsel %vm19068_vm9, %v9230_v58, %v9234_v36  ;;  %v9244_v26 = vrot.slane %v9242_v35, 5  ;;  %8943 = vst [vmem:[#allocation3 + $0x64] sm:$0xf] %v8703_v39  ;;  %v8275_v41 = vmax.f32 %v8227_v63, %v8229_v20  ;;  %v16846_v45 = vld [vmem:[#allocation2 + $0x270] sm:$0xff]  ;;  %v15407_v14 = vadd.f32 %v15406_v24, %v15405_v59 }
 0x428   : > { %8946 = vst [vmem:[#allocation3 + $0x68] sm:$0x1] %v8945_v12  ;;  %v8435_v47 = vsel %vm19018_vm6, 0, %v8434_v28  ;;  %v15410_v15 = vadd.f32 %v15409_v51, %v15408_v21  ;;  %v8315_v36 = vadd.f32 %v19425_v6, %v8276_v9  ;;  %v16847_v8 = vadd.f32 %v16846_v45, %v16417_v31  ;;  %v7349_v60 = vpop.f32.mrb[77].mxu0  ;;  %16479 = vmatprep.subr.bf16.mxu1 %v18124_v30  ;;  %v16852_v29 = vld [vmem:[#allocation2 + $0x278] sm:$0xff]  ;;  %v16855_v27 = vld [vmem:[#allocation2 + $0x268] sm:$0xff] }
 0x429   : > { %v9245_v11 = vsel %vm19068_vm9, %v9240_v5, %v9244_v26  ;;  %8436 = vst [vmem:[#allocation3 + $0xc0] sm:$0x1] %v8435_v47  ;;  %v8314_v53 = vadd.f32 %v19425_v6, %v8275_v41  ;;  %v16850_v10 = vadd.f32 %v16849_v13, %v7349_v60  ;;  %v16418_v19 = vpop.f32.mrb[78].mxu0  ;;  %16480 = vmatpush3.bf16.msra.mxu1 %v18124_v30  ;;  %17010 = vst [vmem:[#allocation4] sm:$0xff] %v15407_v14  ;;  %v19590_v21 = vld [vmem:[#allocation3 + $0x54] sm:$0xe] }
 0x42a   : > { %v14674_v3 = vcombine.low %v9235_v32, %v9245_v11  ;;  %17028 = vst [vmem:[#allocation4 + $0x8] sm:$0xff] %v15410_v15  ;;  %v9556_v59 = vrot.slane %v19553_v62, 5  ;;  %v8347_v28 = vmax.f32 %v8315_v36, 0.0  ;;  %7890 = vst [vmem:[#allocation2 + $0x270] sm:$0xff] %v16847_v8  ;;  %v16853_v24 = vadd.f32 %v16852_v29, %v16418_v19  ;;  %v7352_v48 = vpop.f32.mrb[79].mxu0  ;;  %16481 = vmatprep.subr.bf16.mxu1 %v18126_v57  ;;  %v16858_v30 = vld [vmem:[#allocation2 + $0x290] sm:$0xff] }
 0x42b   : > { %v14658_v37 = vcombine.low %v19551_v16, %v19553_v62  ;;  %v9559_v63 = vrot.slane %v19561_v18, 5  ;;  %v8346_v2 = vmax.f32 %v8314_v53, 0.0  ;;  %7888 = vst [vmem:[#allocation2 + $0x260] sm:$0xff] %v16850_v10  ;;  %v16856_v25 = vadd.f32 %v16855_v27, %v7352_v48  ;;  %v16861_v41 = vld [vmem:[#allocation2 + $0x280] sm:$0xff]  ;;  %v16864_v8 = vld [vmem:[#allocation2 + $0x298] sm:$0xff]  ;;  %v16867_v19 = vld [vmem:[#allocation2 + $0x288] sm:$0xff] }
 0x42c   : > { %v19593_v58 = vld [vmem:[#allocation2 + $0x250] ss:$2 sm:$0xff]  ;;  %v19595_v35 = vld [vmem:[#allocation2 + $0x251] ss:$2 sm:$0xff]  ;;  %10105 = vmatprep.mubr.bf16.mxu1 %v14674_v3  ;;  %v9558_v20 = vrot.slane %v9556_v59, 4  ;;  %v15016_v5 = vpack.c.bf16 %v8347_v28, %v8347_v28  ;;  %7891 = vst [vmem:[#allocation2 + $0x278] sm:$0xff] %v16853_v24 }
 0x42d   : > { %10106 = vmatmul.mubr.bf16.gmra.mrb[156].mxu1 %v14658_v37  ;;  %v15015_v16 = vpack.c.bf16 %v8346_v2, %v8346_v2  ;;  %v8232_v39 = vmax.f32 %v19593_v58, %v19595_v35  ;;  %7889 = vst [vmem:[#allocation2 + $0x268] sm:$0xff] %v16856_v25  ;;  %v14642_v9 = vrot.slane %v19590_v21, 9  ;;  %v8012_v15 = vld [vmem:[#allocation2 + $0x240] ss:$2 sm:$0xff]  ;;  %v16421_v36 = vpop.f32.mrb[80].mxu0  ;;  %v16876_v21 = vld [vmem:[#allocation2 + $0x2b8] sm:$0xff] }
 0x42e   : > { %v19601_v18 = vld [vmem:[#allocation3 + $0x60] sm:$0xf]  ;;  %v19603_v51 = vld [vmem:[#allocation3 + $0x64] sm:$0xf]  ;;  %16482 = vmatpush3.bf16.msra.mxu1 %v18126_v57  ;;  %v19608_v32 = vsel %vm19262_vm15, %v9558_v20, %v9559_v63  ;;  %v8714_v26 = vshrl.u32 %v15016_v5, 16  ;;  %v8717_v12 = vshll.u32 %v15016_v5, 16  ;;  %v16859_v53 = vadd.f32 %v16858_v30, %v16421_v36 }
 0x42f   : > { %v9247_v31 = vshrl.u32 %v19601_v18, 16  ;;  %v9250_v45 = vshll.u32 %v19601_v18, 16  ;;  %v8706_v47 = vshrl.u32 %v15015_v16, 16  ;;  %v8709_v14 = vshll.u32 %v15015_v16, 16  ;;  %v8140_v11 = vld [vmem:[#allocation2 + $0x241] ss:$2 sm:$0xff] }
 0x430   : > { %v9256_v57 = vshll.u32 %v19603_v51, 16  ;;  %v9260_v60 = vshrl.u32 %v19603_v51, 16  ;;  %v8716_v13 = vrot.slane %v8714_v26, 7  ;;  %v7365_v10 = vpop.f32.mrb[81].mxu0  ;;  %v19614_v27 = vld [vmem:[#allocation3 + $0x68] sm:$0x1] }
 0x431   : > { %v9249_v29 = vrot.slane %v9247_v31, 4  ;;  %v9252_v3 = vrot.slane %v9250_v45, 5  ;;  %v8708_v28 = vrot.slane %v8706_v47, 7  ;;  %v16862_v24 = vadd.f32 %v16861_v41, %v7365_v10  ;;  %v16422_v48 = vpop.f32.mrb[82].mxu0  ;;  %v8947_v35 = vld [vmem:[#allocation3 + $0x6c] sm:$0xf] }
 0x432   : > { %v9258_v37 = vrot.slane %v9256_v57, 5  ;;  %v9262_v63 = vrot.slane %v9260_v60, 4  ;;  %v8719_v2 = vor.u32 %v8717_v12, %v8716_v13  ;;  %v8721_v58 = vrot.slane %v8716_v13, 4  ;;  %7894 = vst [vmem:[#allocation2 + $0x290] sm:$0xff] %v16859_v53  ;;  %v7368_v20 = vpop.f32.mrb[83].mxu0 }
 0x433   : > { %v16865_v25 = vadd.f32 %v16864_v8, %v16422_v48  ;;  %v9253_v5 = vor.u32 %v9252_v3, %v9249_v29  ;;  %v8951_v16 = vld [vmem:[#allocation3 + $0x74] sm:$0x1]  ;;  %v8711_v26 = vor.u32 %v8709_v14, %v8708_v28  ;;  %v8712_v30 = vrot.slane %v8708_v28, 4  ;;  %v8146_v31 = vld [vmem:[#allocation2 + $0x271] ss:$2 sm:$0xff]  ;;  %7892 = vst [vmem:[#allocation2 + $0x280] sm:$0xff] %v16862_v24 }
 0x434   : > { %v8018_v36 = vld [vmem:[#allocation2 + $0x270] ss:$2 sm:$0xff]  ;;  %v16868_v45 = vadd.f32 %v16867_v19, %v7368_v20  ;;  %v9263_v41 = vor.u32 %v9262_v63, %v9258_v37  ;;  %v8231_v47 = vmax.f32 %v8012_v15, %v8140_v11  ;;  %v8016_v23 = vld [vmem:[#allocation2 + $0x260] ss:$2 sm:$0xff]  ;;  %v8144_v57 = vld [vmem:[#allocation2 + $0x261] ss:$2 sm:$0xff]  ;;  %v8952_v3 = vsel %vm19018_vm6, %v8721_v58, %v8951_v16 }
 0x435   : > { %v8234_v10 = vmax.f32 %v8018_v36, %v8146_v31  ;;  %7895 = vst [vmem:[#allocation2 + $0x298] sm:$0xff] %v16865_v25  ;;  %v9254_v12 = vrot.slane %v9253_v5, 4  ;;  %v9266_v60 = vshll.u32 %v19614_v27, 16  ;;  %v8948_v8 = vsel %vm19185_vm11, %v8711_v26, %v8947_v35  ;;  %v18128_v15 = vld [vmem:[%s21229_s3 + $0x100] sm:$0xff]   ;;  %v16425_v28 = vpop.f32.mrb[84].mxu0  ;;  %v16870_v24 = vld [vmem:[#allocation2 + $0x2b0] sm:$0xff] }
 0x436   : > { %v8233_v13 = vmax.f32 %v8016_v23, %v8144_v57  ;;  %7893 = vst [vmem:[#allocation2 + $0x288] sm:$0xff] %v16868_v45  ;;  %v9264_v14 = vrot.slane %v9263_v41, 4  ;;  %v8720_v53 = vsel %vm19193_vm12, %v8712_v30, %v8719_v2  ;;  %8949 = vst [vmem:[#allocation3 + $0x6c] sm:$0xf] %v8948_v8  ;;  %15525 = vmatprep.subr.bf16.mxu1 %v18128_v15  ;;  %v7381_v63 = vpop.f32.mrb[85].mxu0  ;;  %v16873_v2 = vld [vmem:[#allocation2 + $0x2a0] sm:$0xff] }
 0x437   : > { %v8278_v11 = vmax.f32 %v8232_v39, %v8234_v10  ;;  %v9259_v19 = vsel %vm19068_vm9, %v9254_v12, %v9258_v37  ;;  %v9268_v29 = vrot.slane %v9266_v60, 5  ;;  %8950 = vst [vmem:[#allocation3 + $0x70] sm:$0xf] %v8720_v53  ;;  %8953 = vst [vmem:[#allocation3 + $0x74] sm:$0x1] %v8952_v3  ;;  %v19634_v39 = vsel %vm19262_vm15, %v14642_v9, %v9556_v59  ;;  %v16426_v20 = vpop.f32.mrb[86].mxu0 }
 0x438   : > { %v8277_v23 = vmax.f32 %v8231_v47, %v8233_v13  ;;  %v16871_v37 = vadd.f32 %v16870_v24, %v16425_v28  ;;  %v16874_v62 = vadd.f32 %v16873_v2, %v7381_v63  ;;  %v19642_v16 = vld [vmem:[#allocation3 + $0x60] sm:$0xe]  ;;  %v16877_v9 = vadd.f32 %v16876_v21, %v16426_v20  ;;  %v7384_v26 = vpop.f32.mrb[87].mxu0  ;;  %v16879_v30 = vld [vmem:[#allocation2 + $0x2a8] sm:$0xff]  ;;  %v16882_v15 = vld [vmem:[#allocation2 + $0x2d0] sm:$0xff] }
 0x439   : > { %v8317_v48 = vadd.f32 %v19425_v6, %v8278_v11  ;;  %v9269_v58 = vsel %vm19068_vm9, %v9264_v14, %v9268_v29  ;;  %v14659_v36 = vcombine.low %v19601_v18, %v19603_v51  ;;  %v14643_v10 = vrot.slane %v19642_v16, 9  ;;  %v16885_v11 = vld [vmem:[#allocation2 + $0x2c0] sm:$0xff]  ;;  %v16891_v21 = vld [vmem:[#allocation2 + $0x2c8] sm:$0xff] }
 0x43a   : > { %v8316_v25 = vadd.f32 %v19425_v6, %v8277_v23  ;;  %v14675_v5 = vcombine.low %v9259_v19, %v9269_v58  ;;  %7898 = vst [vmem:[#allocation2 + $0x2b0] sm:$0xff] %v16871_v37  ;;  %7896 = vst [vmem:[#allocation2 + $0x2a0] sm:$0xff] %v16874_v62  ;;  %v16880_v6 = vadd.f32 %v16879_v30, %v7384_v26  ;;  %v9563_v8 = vrot.slane %v19603_v51, 5  ;;  %v8954_v58 = vld [vmem:[#allocation3 + $0x78] sm:$0xf] }
 0x43b   : > { %v8349_v59 = vmax.f32 %v8317_v48, 0.0  ;;  %7899 = vst [vmem:[#allocation2 + $0x2b8] sm:$0xff] %v16877_v9  ;;  %v9566_v13 = vrot.slane %v19614_v27, 5  ;;  %v16888_v48 = vld [vmem:[#allocation2 + $0x2d8] sm:$0xff]  ;;  %v8958_v35 = vld [vmem:[#allocation3 + $0x80] sm:$0x1] }
 0x43c   : > { %v8348_v31 = vmax.f32 %v8316_v25, 0.0  ;;  %v19646_v45 = vld [vmem:[#allocation2 + $0x290] ss:$2 sm:$0xff]  ;;  %v19648_v41 = vld [vmem:[#allocation2 + $0x291] ss:$2 sm:$0xff]  ;;  %10113 = vmatprep.mubr.bf16.mxu1 %v14675_v5  ;;  %7897 = vst [vmem:[#allocation2 + $0x2a8] sm:$0xff] %v16880_v6 }
 0x43d   : > { %v15018_v47 = vpack.c.bf16 %v8349_v59, %v8349_v59  ;;  %10114 = vmatmul.mubr.bf16.gmra.mrb[160].mxu1 %v14659_v36  ;;  %v8236_v12 = vmax.f32 %v19646_v45, %v19648_v41  ;;  %v19653_v60 = vld [vmem:[#allocation3 + $0x6c] sm:$0xf]  ;;  %v16429_v24 = vpop.f32.mrb[88].mxu0 }
 0x43e   : > { %v15017_v57 = vpack.c.bf16 %v8348_v31, %v8348_v31  ;;  %v19655_v18 = vld [vmem:[#allocation3 + $0x70] sm:$0xf]  ;;  %v9271_v19 = vshrl.u32 %v19653_v60, 16  ;;  %v9274_v29 = vshll.u32 %v19653_v60, 16  ;;  %v8020_v28 = vld [vmem:[#allocation2 + $0x280] ss:$2 sm:$0xff]  ;;  %v16883_v62 = vadd.f32 %v16882_v15, %v16429_v24 }
 0x43f   : > { %v8731_v14 = vshrl.u32 %v15018_v47, 16  ;;  %v8734_v53 = vshll.u32 %v15018_v47, 16  ;;  %v9280_v37 = vshll.u32 %v19655_v18, 16  ;;  %v9284_v63 = vshrl.u32 %v19655_v18, 16  ;;  %v8148_v25 = vld [vmem:[#allocation2 + $0x281] ss:$2 sm:$0xff] }
 0x440   : > { %v8723_v3 = vshrl.u32 %v15017_v57, 16  ;;  %v8726_v23 = vshll.u32 %v15017_v57, 16  ;;  %v7397_v20 = vpop.f32.mrb[89].mxu0  ;;  %v9273_v5 = vrot.slane %v9271_v19, 4  ;;  %v9276_v59 = vrot.slane %v9274_v29, 5  ;;  %7902 = vst [vmem:[#allocation2 + $0x2d0] sm:$0xff] %v16883_v62 }
 0x441   : > { %v8733_v2 = vrot.slane %v8731_v14, 7  ;;  %v16886_v26 = vadd.f32 %v16885_v11, %v7397_v20  ;;  %v16430_v30 = vpop.f32.mrb[90].mxu0  ;;  %v19663_v36 = vld [vmem:[#allocation3 + $0x74] sm:$0x1]  ;;  %v9282_v31 = vrot.slane %v9280_v37, 5  ;;  %v9286_v45 = vrot.slane %v9284_v63, 4 }
 0x442   : > { %v8725_v9 = vrot.slane %v8723_v3, 7  ;;  %v16889_v47 = vadd.f32 %v16888_v48, %v16430_v30  ;;  %v7400_v57 = vpop.f32.mrb[91].mxu0  ;;  %v9277_v14 = vor.u32 %v9276_v59, %v9273_v5  ;;  %v19665_v33 = vld [vmem:[#allocation3 + $0x6c] sm:$0xe]  ;;  %v8026_v19 = vld [vmem:[#allocation2 + $0x2b0] ss:$2 sm:$0xff]  ;;  %v8235_v20 = vmax.f32 %v8020_v28, %v8148_v25 }
 0x443   : > { %v8736_v41 = vor.u32 %v8734_v53, %v8733_v2  ;;  %v8738_v6 = vrot.slane %v8733_v2, 4  ;;  %v8154_v29 = vld [vmem:[#allocation2 + $0x2b1] ss:$2 sm:$0xff]  ;;  %7900 = vst [vmem:[#allocation2 + $0x2c0] sm:$0xff] %v16886_v26  ;;  %v16892_v11 = vadd.f32 %v16891_v21, %v7400_v57  ;;  %v9287_v3 = vor.u32 %v9286_v45, %v9282_v31  ;;  %v8024_v37 = vld [vmem:[#allocation2 + $0x2a0] ss:$2 sm:$0xff] }
 0x444   : > { %v8728_v15 = vor.u32 %v8726_v23, %v8725_v9  ;;  %v8729_v24 = vrot.slane %v8725_v9, 4  ;;  %v8238_v43 = vmax.f32 %v8026_v19, %v8154_v29  ;;  %v8152_v63 = vld [vmem:[#allocation2 + $0x2a1] ss:$2 sm:$0xff]  ;;  %7903 = vst [vmem:[#allocation2 + $0x2d8] sm:$0xff] %v16889_v47  ;;  %v9278_v53 = vrot.slane %v9277_v14, 4  ;;  %v16894_v30 = vld [vmem:[#allocation2 + $0x2f0] sm:$0xff] }
 0x445   : > { %v9290_v48 = vshll.u32 %v19663_v36, 16  ;;  %v8237_v62 = vmax.f32 %v8024_v37, %v8152_v63  ;;  %7901 = vst [vmem:[#allocation2 + $0x2c8] sm:$0xff] %v16892_v11  ;;  %v9288_v23 = vrot.slane %v9287_v3, 4  ;;  %v8959_v59 = vsel %vm19018_vm6, %v8738_v6, %v8958_v35  ;;  %v16433_v26 = vpop.f32.mrb[92].mxu0  ;;  %v19690_v35 = vld [vmem:[%s21228_s2] ss:$0 sm:$0xff] }
 0x446   : > { %v8955_v2 = vsel %vm19185_vm11, %v8728_v15, %v8954_v58  ;;  %v8737_v5 = vsel %vm19193_vm12, %v8729_v24, %v8736_v41  ;;  %v8280_v21 = vmax.f32 %v8236_v12, %v8238_v43  ;;  %v9283_v28 = vsel %vm19068_vm9, %v9278_v53, %v9282_v31  ;;  %8960 = vst [vmem:[#allocation3 + $0x80] sm:$0x1] %v8959_v59  ;;  %v7413_v41 = vpop.f32.mrb[93].mxu0  ;;  %v16897_v6 = vld [vmem:[#allocation2 + $0x2e0] sm:$0xff]  ;;  %v16903_v29 = vld [vmem:[#allocation2 + $0x2e8] sm:$0xff] }
 0x447   : > { %8956 = vst [vmem:[#allocation3 + $0x78] sm:$0xf] %v8955_v2  ;;  %v9292_v25 = vrot.slane %v9290_v48, 5  ;;  %8957 = vst [vmem:[#allocation3 + $0x7c] sm:$0xf] %v8737_v5  ;;  %v8279_v9 = vmax.f32 %v8235_v20, %v8237_v62  ;;  %v19682_v58 = vsel %vm19262_vm15, %v14643_v10, %v9563_v8  ;;  %v9565_v43 = vrot.slane %v9563_v8, 4 }
 0x448   : > { %v14644_v12 = vrot.slane %v19665_v33, 9  ;;  %v8319_v31 = vadd.f32 %v19690_v35, %v8280_v21  ;;  %v16895_v45 = vadd.f32 %v16894_v30, %v16433_v26  ;;  %v9570_v10 = vrot.slane %v19655_v18, 5  ;;  %v16434_v47 = vpop.f32.mrb[94].mxu0  ;;  %v16900_v33 = vld [vmem:[#allocation2 + $0x2f8] sm:$0xff] }
 0x449   : > { %v9293_v16 = vsel %vm19068_vm9, %v9288_v23, %v9292_v25  ;;  %v8318_v51 = vadd.f32 %v19690_v35, %v8279_v9  ;;  %v16898_v8 = vadd.f32 %v16897_v6, %v7413_v41  ;;  %v19701_v14 = vsel %vm19262_vm15, %v9565_v43, %v9566_v13  ;;  %v7416_v19 = vpop.f32.mrb[95].mxu0  ;;  %v16909_v25 = vld [vmem:[#allocation2 + $0x300] sm:$0xff] }
 0x44a   : > { %v14676_v57 = vcombine.low %v9283_v28, %v9293_v16  ;;  %v8351_v15 = vmax.f32 %v8319_v31, 0.0  ;;  %7906 = vst [vmem:[#allocation2 + $0x2f0] sm:$0xff] %v16895_v45  ;;  %v16901_v24 = vadd.f32 %v16900_v33, %v16434_v47  ;;  %v14660_v11 = vcombine.low %v19653_v60, %v19655_v18  ;;  %v16906_v28 = vld [vmem:[#allocation2 + $0x310] sm:$0xff]  ;;  %v16912_v31 = vld [vmem:[#allocation2 + $0x318] sm:$0xff]  ;;  %v8961_v16 = vld [vmem:[#allocation3 + $0x84] sm:$0xf] }
 0x44b   : > { %v8350_v20 = vmax.f32 %v8318_v51, 0.0  ;;  %v19707_v37 = vld [vmem:[#allocation2 + $0x2d0] ss:$2 sm:$0xff]  ;;  %v19709_v63 = vld [vmem:[#allocation2 + $0x2d1] ss:$2 sm:$0xff]  ;;  %7904 = vst [vmem:[#allocation2 + $0x2e0] sm:$0xff] %v16898_v8  ;;  %v16904_v27 = vadd.f32 %v16903_v29, %v7416_v19  ;;  %v19713_v53 = vsel %vm19262_vm15, %v14644_v12, %v9570_v10 }
 0x44c   : > { %10121 = vmatprep.mubr.bf16.mxu1 %v14676_v57  ;;  %v15020_v13 = vpack.c.bf16 %v8351_v15, %v8351_v15  ;;  %7907 = vst [vmem:[#allocation2 + $0x2f8] sm:$0xff] %v16901_v24  ;;  %v8240_v60 = vmax.f32 %v19707_v37, %v19709_v63  ;;  %v19721_v62 = vrot.slane %v9570_v10, 4  ;;  %v9573_v23 = vrot.slane %v19663_v36, 5  ;;  %v8028_v43 = vld [vmem:[#allocation2 + $0x2c0] ss:$2 sm:$0xff] }
 0x44d   : > { %10122 = vmatmul.mubr.bf16.gmra.mrb[164].mxu1 %v14660_v11  ;;  %v15019_v48 = vpack.c.bf16 %v8350_v20, %v8350_v20  ;;  %7905 = vst [vmem:[#allocation2 + $0x2e8] sm:$0xff] %v16904_v27  ;;  %v16437_v12 = vpop.f32.mrb[96].mxu0  ;;  %v8156_v10 = vld [vmem:[#allocation2 + $0x2c1] ss:$2 sm:$0xff]  ;;  %v19728_v29 = vld [vmem:[#allocation3 + $0x80] sm:$0x1] }
 0x44e   : > { %v19717_v18 = vld [vmem:[#allocation3 + $0x78] sm:$0xf]  ;;  %v19719_v2 = vld [vmem:[#allocation3 + $0x7c] sm:$0xf]  ;;  %v8748_v5 = vshrl.u32 %v15020_v13, 16  ;;  %v8751_v21 = vshll.u32 %v15020_v13, 16  ;;  %v16907_v51 = vadd.f32 %v16906_v28, %v16437_v12 }
 0x44f   : > { %v9295_v59 = vshrl.u32 %v19717_v18, 16  ;;  %v9298_v9 = vshll.u32 %v19717_v18, 16  ;;  %v8740_v26 = vshrl.u32 %v15019_v48, 16  ;;  %v8743_v30 = vshll.u32 %v15019_v48, 16  ;;  %v7429_v8 = vpop.f32.mrb[97].mxu0  ;;  %v16915_v47 = vld [vmem:[#allocation2 + $0x308] sm:$0xff] }
 0x450   : > { %v9304_v45 = vshll.u32 %v19719_v2, 16  ;;  %v9308_v41 = vshrl.u32 %v19719_v2, 16  ;;  %v8750_v6 = vrot.slane %v8748_v5, 7  ;;  %v16910_v24 = vadd.f32 %v16909_v25, %v7429_v8  ;;  %v16438_v19 = vpop.f32.mrb[98].mxu0  ;;  %7910 = vst [vmem:[#allocation2 + $0x310] sm:$0xff] %v16907_v51 }
 0x451   : > { %v9297_v33 = vrot.slane %v9295_v59, 4  ;;  %v9300_v57 = vrot.slane %v9298_v9, 5  ;;  %v8742_v15 = vrot.slane %v8740_v26, 7  ;;  %v16913_v27 = vadd.f32 %v16912_v31, %v16438_v19  ;;  %v7432_v13 = vpop.f32.mrb[99].mxu0  ;;  %v8965_v5 = vld [vmem:[#allocation3 + $0x8c] sm:$0x1] }
 0x452   : > { %v9306_v11 = vrot.slane %v9304_v45, 5  ;;  %v9310_v20 = vrot.slane %v9308_v41, 4  ;;  %v8753_v37 = vor.u32 %v8751_v21, %v8750_v6  ;;  %v8755_v63 = vrot.slane %v8750_v6, 4  ;;  %v19730_v3 = vld [vmem:[#allocation3 + $0x78] sm:$0xe]  ;;  %7908 = vst [vmem:[#allocation2 + $0x300] sm:$0xff] %v16910_v24 }
 0x453   : > { %v9301_v48 = vor.u32 %v9300_v57, %v9297_v33  ;;  %v8745_v28 = vor.u32 %v8743_v30, %v8742_v15  ;;  %v8746_v12 = vrot.slane %v8742_v15, 4  ;;  %v8034_v59 = vld [vmem:[#allocation2 + $0x2f0] ss:$2 sm:$0xff]  ;;  %v8162_v9 = vld [vmem:[#allocation2 + $0x2f1] ss:$2 sm:$0xff]  ;;  %v16916_v25 = vadd.f32 %v16915_v47, %v7432_v13  ;;  %7911 = vst [vmem:[#allocation2 + $0x318] sm:$0xff] %v16913_v27 }
 0x454   : > { %v9311_v26 = vor.u32 %v9310_v20, %v9306_v11  ;;  %v8239_v8 = vmax.f32 %v8028_v43, %v8156_v10  ;;  %v8242_v1 = vmax.f32 %v8034_v59, %v8162_v9  ;;  %v8032_v45 = vld [vmem:[#allocation2 + $0x2e0] ss:$2 sm:$0xff]  ;;  %v8160_v41 = vld [vmem:[#allocation2 + $0x2e1] ss:$2 sm:$0xff]  ;;  %v9314_v31 = vshll.u32 %v19728_v29, 16  ;;  %v16918_v19 = vld [vmem:[#allocation2 + $0x330] sm:$0xff] }
 0x455   : > { %v9302_v21 = vrot.slane %v9301_v48, 4  ;;  %v8962_v6 = vsel %vm19185_vm11, %v8745_v28, %v8961_v16  ;;  %v8241_v51 = vmax.f32 %v8032_v45, %v8160_v41  ;;  %7909 = vst [vmem:[#allocation2 + $0x308] sm:$0xff] %v16916_v25  ;;  %v8754_v33 = vsel %vm19193_vm12, %v8746_v12, %v8753_v37  ;;  %v16441_v24 = vpop.f32.mrb[100].mxu0  ;;  %v16927_v9 = vld [vmem:[#allocation2 + $0x328] sm:$0xff] }
 0x456   : > { %v9312_v30 = vrot.slane %v9311_v26, 4  ;;  %8963 = vst [vmem:[#allocation3 + $0x84] sm:$0xf] %v8962_v6  ;;  %v8282_v47 = vmax.f32 %v8240_v60, %v8242_v1  ;;  %v9316_v10 = vrot.slane %v9314_v31, 5  ;;  %8964 = vst [vmem:[#allocation3 + $0x88] sm:$0xf] %v8754_v33  ;;  %v8966_v57 = vsel %vm19018_vm6, %v8755_v63, %v8965_v5 }
 0x457   : > { %v9307_v43 = vsel %vm19068_vm9, %v9302_v21, %v9306_v11  ;;  %v8281_v15 = vmax.f32 %v8239_v8, %v8241_v51  ;;  %8967 = vst [vmem:[#allocation3 + $0x8c] sm:$0x1] %v8966_v57  ;;  %v19746_v16 = vsel %vm19262_vm15, %v19721_v62, %v9573_v23  ;;  %v14645_v1 = vrot.slane %v19730_v3, 9  ;;  %v7445_v37 = vpop.f32.mrb[101].mxu0  ;;  %v16921_v63 = vld [vmem:[#allocation2 + $0x320] sm:$0xff]  ;;  %v16924_v23 = vld [vmem:[#allocation2 + $0x338] sm:$0xff] }
 0x458   : > { %v9577_v60 = vrot.slane %v19719_v2, 5  ;;  %v8321_v11 = vadd.f32 %v19690_v35, %v8282_v47  ;;  %v16919_v20 = vadd.f32 %v16918_v19, %v16441_v24  ;;  %v9317_v27 = vsel %vm19068_vm9, %v9312_v30, %v9316_v10  ;;  %v16442_v62 = vpop.f32.mrb[102].mxu0  ;;  %v16930_v10 = vld [vmem:[#allocation2 + $0x350] sm:$0xff]  ;;  %v16933_v57 = vld [vmem:[#allocation2 + $0x340] sm:$0xff] }
 0x459   : > { %v8320_v13 = vadd.f32 %v19690_v35, %v8281_v15  ;;  %v16922_v48 = vadd.f32 %v16921_v63, %v7445_v37  ;;  %v14677_v5 = vcombine.low %v9307_v43, %v9317_v27  ;;  %v14661_v3 = vcombine.low %v19717_v18, %v19719_v2  ;;  %v7448_v59 = vpop.f32.mrb[103].mxu0 }
 0x45a   : > { %v8353_v28 = vmax.f32 %v8321_v11, 0.0  ;;  %7914 = vst [vmem:[#allocation2 + $0x330] sm:$0xff] %v16919_v20  ;;  %v16925_v12 = vadd.f32 %v16924_v23, %v16442_v62  ;;  %v9579_v25 = vrot.slane %v9577_v60, 4  ;;  %v9580_v26 = vrot.slane %v19728_v29, 5  ;;  %v19759_v45 = vld [vmem:[#allocation2 + $0x310] ss:$2 sm:$0xff] }
 0x45b   : > { %v8352_v8 = vmax.f32 %v8320_v13, 0.0  ;;  %v19761_v41 = vld [vmem:[#allocation2 + $0x311] ss:$2 sm:$0xff]  ;;  %7912 = vst [vmem:[#allocation2 + $0x320] sm:$0xff] %v16922_v48  ;;  %10129 = vmatprep.mubr.bf16.mxu1 %v14677_v5  ;;  %v16928_v21 = vadd.f32 %v16927_v9, %v7448_v59  ;;  %v19765_v18 = vsel %vm19262_vm15, %v14645_v1, %v9577_v60  ;;  %v16939_v23 = vld [vmem:[#allocation2 + $0x348] sm:$0xff] }
 0x45c   : > { %v15022_v31 = vpack.c.bf16 %v8353_v28, %v8353_v28  ;;  %7915 = vst [vmem:[#allocation2 + $0x338] sm:$0xff] %v16925_v12  ;;  %10130 = vmatmul.mubr.bf16.gmra.mrb[168].mxu1 %v14661_v3  ;;  %v19769_v2 = vsel %vm19262_vm15, %v9579_v25, %v9580_v26  ;;  %v8244_v6 = vmax.f32 %v19759_v45, %v19761_v41  ;;  %v8036_v60 = vld [vmem:[#allocation2 + $0x300] ss:$2 sm:$0xff]  ;;  %v16936_v20 = vld [vmem:[#allocation2 + $0x358] sm:$0xff]  ;;  %v8164_v13 = vld [vmem:[#allocation2 + $0x301] ss:$2 sm:$0xff] }
 0x45d   : > { %v15021_v29 = vpack.c.bf16 %v8352_v8, %v8352_v8  ;;  %7913 = vst [vmem:[#allocation2 + $0x328] sm:$0xff] %v16928_v21  ;;  %v19773_v51 = vld [vmem:[#allocation3 + $0x84] sm:$0xf]  ;;  %v19775_v30 = vld [vmem:[#allocation3 + $0x88] sm:$0xf]  ;;  %v16445_v11 = vpop.f32.mrb[104].mxu0 }
 0x45e   : > { %v8765_v47 = vshrl.u32 %v15022_v31, 16  ;;  %v8768_v43 = vshll.u32 %v15022_v31, 16  ;;  %v9319_v15 = vshrl.u32 %v19773_v51, 16  ;;  %v9322_v24 = vshll.u32 %v19773_v51, 16  ;;  %v7461_v62 = vpop.f32.mrb[105].mxu0 }
 0x45f   : > { %v8757_v19 = vshrl.u32 %v15021_v29, 16  ;;  %v8760_v1 = vshll.u32 %v15021_v29, 16  ;;  %v9328_v37 = vshll.u32 %v19775_v30, 16  ;;  %v9332_v63 = vshrl.u32 %v19775_v30, 16  ;;  %v16446_v59 = vpop.f32.mrb[106].mxu0 }
 0x460   : > { %v8767_v27 = vrot.slane %v8765_v47, 7  ;;  %v16931_v48 = vadd.f32 %v16930_v10, %v16445_v11  ;;  %v9321_v5 = vrot.slane %v9319_v15, 4  ;;  %v9324_v3 = vrot.slane %v9322_v24, 5  ;;  %v19783_v9 = vld [vmem:[#allocation3 + $0x8c] sm:$0x1]  ;;  %v7464_v31 = vpop.f32.mrb[107].mxu0 }
 0x461   : > { %v8759_v28 = vrot.slane %v8757_v19, 7  ;;  %v16934_v12 = vadd.f32 %v16933_v57, %v7461_v62  ;;  %v9330_v25 = vrot.slane %v9328_v37, 5  ;;  %v9334_v26 = vrot.slane %v9332_v63, 4  ;;  %v8968_v41 = vld [vmem:[#allocation3 + $0x90] sm:$0xf] }
 0x462   : > { %v8770_v8 = vor.u32 %v8768_v43, %v8767_v27  ;;  %v8772_v45 = vrot.slane %v8767_v27, 4  ;;  %7918 = vst [vmem:[#allocation2 + $0x350] sm:$0xff] %v16931_v48  ;;  %v16937_v21 = vadd.f32 %v16936_v20, %v16446_v59  ;;  %v9325_v29 = vor.u32 %v9324_v3, %v9321_v5  ;;  %v8972_v47 = vld [vmem:[#allocation3 + $0x98] sm:$0x1]  ;;  %v9449_v5 = vld [vmem:[#allocation3 + $0x84] sm:$0xe] }
 0x463   : > { %v8762_v10 = vor.u32 %v8760_v1, %v8759_v28  ;;  %v8763_v11 = vrot.slane %v8759_v28, 4  ;;  %v8042_v33 = vld [vmem:[#allocation2 + $0x330] ss:$2 sm:$0xff]  ;;  %v8170_v15 = vld [vmem:[#allocation2 + $0x331] ss:$2 sm:$0xff]  ;;  %7916 = vst [vmem:[#allocation2 + $0x340] sm:$0xff] %v16934_v12  ;;  %v16940_v24 = vadd.f32 %v16939_v23, %v7464_v31  ;;  %v9335_v57 = vor.u32 %v9334_v26, %v9330_v25 }
 0x464   : > { %v8243_v19 = vmax.f32 %v8036_v60, %v8164_v13  ;;  %v8246_v62 = vmax.f32 %v8042_v33, %v8170_v15  ;;  %v8040_v36 = vld [vmem:[#allocation2 + $0x320] ss:$2 sm:$0xff]  ;;  %v8168_v37 = vld [vmem:[#allocation2 + $0x321] ss:$2 sm:$0xff]  ;;  %7919 = vst [vmem:[#allocation2 + $0x358] sm:$0xff] %v16937_v21  ;;  %v9326_v43 = vrot.slane %v9325_v29, 4  ;;  %v8973_v13 = vsel %vm19018_vm6, %v8772_v45, %v8972_v47 }
 0x465   : > { %v9338_v63 = vshll.u32 %v19783_v9, 16  ;;  %v8969_v20 = vsel %vm19185_vm11, %v8762_v10, %v8968_v41  ;;  %v8245_v27 = vmax.f32 %v8040_v36, %v8168_v37  ;;  %7917 = vst [vmem:[#allocation2 + $0x348] sm:$0xff] %v16940_v24  ;;  %v9336_v1 = vrot.slane %v9335_v57, 4  ;;  %v16449_v28 = vpop.f32.mrb[108].mxu0  ;;  %v16942_v12 = vld [vmem:[#allocation2 + $0x370] sm:$0xff]  ;;  %v16945_v41 = vld [vmem:[#allocation2 + $0x360] sm:$0xff] }
 0x466   : > { %v8771_v48 = vsel %vm19193_vm12, %v8763_v11, %v8770_v8  ;;  %8970 = vst [vmem:[#allocation3 + $0x90] sm:$0xf] %v8969_v20  ;;  %v8284_v23 = vmax.f32 %v8244_v6, %v8246_v62  ;;  %v9331_v33 = vsel %vm19068_vm9, %v9326_v43, %v9330_v25  ;;  %8974 = vst [vmem:[#allocation3 + $0x98] sm:$0x1] %v8973_v13  ;;  %v9584_v36 = vrot.slane %v19775_v30, 5  ;;  %v7477_v8 = vpop.f32.mrb[109].mxu0 }
 0x467   : > { %v9340_v60 = vrot.slane %v9338_v63, 5  ;;  %8971 = vst [vmem:[#allocation3 + $0x94] sm:$0xf] %v8771_v48  ;;  %v8283_v3 = vmax.f32 %v8243_v19, %v8245_v27  ;;  %v16943_v26 = vadd.f32 %v16942_v12, %v16449_v28  ;;  %v14646_v25 = vrot.slane %v9449_v5, 9  ;;  %v16450_v29 = vpop.f32.mrb[110].mxu0  ;;  %v16948_v45 = vld [vmem:[#allocation2 + $0x378] sm:$0xff] }
 0x468   : > { %v8323_v59 = vadd.f32 %v19690_v35, %v8284_v23  ;;  %v16946_v31 = vadd.f32 %v16945_v41, %v7477_v8  ;;  %v14662_v10 = vcombine.low %v19773_v51, %v19775_v30  ;;  %v16949_v15 = vadd.f32 %v16948_v45, %v16450_v29  ;;  %v7480_v24 = vpop.f32.mrb[111].mxu0  ;;  %v16951_v57 = vld [vmem:[#allocation2 + $0x368] sm:$0xff]  ;;  %v16954_v13 = vld [vmem:[#allocation2 + $0x390] sm:$0xff]  ;;  %v16960_v41 = vld [vmem:[#allocation2 + $0x398] sm:$0xff] }
 0x469   : > { %v9341_v6 = vsel %vm19068_vm9, %v9336_v1, %v9340_v60  ;;  %v8322_v21 = vadd.f32 %v19690_v35, %v8283_v3  ;;  %7922 = vst [vmem:[#allocation2 + $0x370] sm:$0xff] %v16943_v26  ;;  %v9586_v19 = vrot.slane %v9584_v36, 4  ;;  %v9587_v62 = vrot.slane %v19783_v9, 5  ;;  %v16957_v3 = vld [vmem:[#allocation2 + $0x380] sm:$0xff] }
 0x46a   : > { %v14678_v47 = vcombine.low %v9331_v33, %v9341_v6  ;;  %v8355_v11 = vmax.f32 %v8323_v59, 0.0  ;;  %7920 = vst [vmem:[#allocation2 + $0x360] sm:$0xff] %v16946_v31  ;;  %v16952_v20 = vadd.f32 %v16951_v57, %v7480_v24  ;;  %7923 = vst [vmem:[#allocation2 + $0x378] sm:$0xff] %v16949_v15  ;;  %v19808_v51 = vsel %vm19262_vm15, %v14646_v25, %v9584_v36  ;;  %v8979_v23 = vld [vmem:[#allocation3 + $0xa4] sm:$0x1] }
 0x46b   : > { %v8354_v37 = vmax.f32 %v8322_v21, 0.0  ;;  %v19802_v43 = vld [vmem:[#allocation2 + $0x350] ss:$2 sm:$0xff]  ;;  %v19804_v63 = vld [vmem:[#allocation2 + $0x351] ss:$2 sm:$0xff]  ;;  %v19812_v30 = vsel %vm19262_vm15, %v9586_v19, %v9587_v62 }
 0x46c   : > { %10137 = vmatprep.mubr.bf16.mxu1 %v14678_v47  ;;  %v15024_v27 = vpack.c.bf16 %v8355_v11, %v8355_v11  ;;  %21273 = vst [vmem:[#allocation6_spill] sm:$0xff] %v19812_v30  ;;  %v8248_v1 = vmax.f32 %v19802_v43, %v19804_v63  ;;  %7921 = vst [vmem:[#allocation2 + $0x368] sm:$0xff] %v16952_v20  ;;  %v8044_v26 = vld [vmem:[#allocation2 + $0x340] ss:$2 sm:$0xff]  ;;  %v8172_v31 = vld [vmem:[#allocation2 + $0x341] ss:$2 sm:$0xff] }
 0x46d   : > { %10138 = vmatmul.mubr.bf16.gmra.mrb[172].mxu1 %v14662_v10  ;;  %v15023_v9 = vpack.c.bf16 %v8354_v37, %v8354_v37  ;;  %v19816_v48 = vld [vmem:[#allocation3 + $0x90] sm:$0xf]  ;;  %v16453_v8 = vpop.f32.mrb[112].mxu0  ;;  %v16963_v47 = vld [vmem:[#allocation2 + $0x388] sm:$0xff]  ;;  %v19826_v19 = vld [vmem:[#allocation3 + $0x98] sm:$0x1] }
 0x46e   : > { %v19818_v5 = vld [vmem:[#allocation3 + $0x94] sm:$0xf]  ;;  %v8782_v33 = vshrl.u32 %v15024_v27, 16  ;;  %v8785_v60 = vshll.u32 %v15024_v27, 16  ;;  %v9343_v28 = vshrl.u32 %v19816_v48, 16  ;;  %v9346_v12 = vshll.u32 %v19816_v48, 16 }
 0x46f   : > { %v8774_v36 = vshrl.u32 %v15023_v9, 16  ;;  %v8777_v59 = vshll.u32 %v15023_v9, 16  ;;  %v9352_v6 = vshll.u32 %v19818_v5, 16  ;;  %v9356_v25 = vshrl.u32 %v19818_v5, 16  ;;  %v7493_v45 = vpop.f32.mrb[113].mxu0 }
 0x470   : > { %v8784_v21 = vrot.slane %v8782_v33, 7  ;;  %v16955_v29 = vadd.f32 %v16954_v13, %v16453_v8  ;;  %v9345_v10 = vrot.slane %v9343_v28, 4  ;;  %v9348_v11 = vrot.slane %v9346_v12, 5  ;;  %v16454_v57 = vpop.f32.mrb[114].mxu0  ;;  %v8975_v20 = vld [vmem:[#allocation3 + $0x9c] sm:$0xf] }
 0x471   : > { %v8776_v15 = vrot.slane %v8774_v36, 7  ;;  %v16958_v24 = vadd.f32 %v16957_v3, %v7493_v45  ;;  %v9354_v62 = vrot.slane %v9352_v6, 5  ;;  %v9358_v37 = vrot.slane %v9356_v25, 4  ;;  %v7496_v9 = vpop.f32.mrb[115].mxu0  ;;  %v8050_v46 = vld [vmem:[#allocation2 + $0x370] ss:$2 sm:$0xff] }
 0x472   : > { %v8787_v43 = vor.u32 %v8785_v60, %v8784_v21  ;;  %v8789_v63 = vrot.slane %v8784_v21, 4  ;;  %7926 = vst [vmem:[#allocation2 + $0x390] sm:$0xff] %v16955_v29  ;;  %v16961_v27 = vadd.f32 %v16960_v41, %v16454_v57  ;;  %v9349_v33 = vor.u32 %v9348_v11, %v9345_v10  ;;  %v8178_v28 = vld [vmem:[#allocation2 + $0x371] ss:$2 sm:$0xff] }
 0x473   : > { %v8779_v13 = vor.u32 %v8777_v59, %v8776_v15  ;;  %v8780_v8 = vrot.slane %v8776_v15, 4  ;;  %7924 = vst [vmem:[#allocation2 + $0x380] sm:$0xff] %v16958_v24  ;;  %v16964_v12 = vadd.f32 %v16963_v47, %v7496_v9  ;;  %v9359_v3 = vor.u32 %v9358_v37, %v9354_v62  ;;  %v8048_v30 = vld [vmem:[#allocation2 + $0x360] ss:$2 sm:$0xff]  ;;  %v8176_v6 = vld [vmem:[#allocation2 + $0x361] ss:$2 sm:$0xff] }
 0x474   : > { %v8247_v36 = vmax.f32 %v8044_v26, %v8172_v31  ;;  %v8250_v45 = vmax.f32 %v8050_v46, %v8178_v28  ;;  %7927 = vst [vmem:[#allocation2 + $0x398] sm:$0xff] %v16961_v27  ;;  %v9350_v60 = vrot.slane %v9349_v33, 4  ;;  %v9362_v25 = vshll.u32 %v19826_v19, 16  ;;  %v9450_v10 = vld [vmem:[#allocation3 + $0x90] sm:$0xe] }
 0x475   : > { %v8976_v41 = vsel %vm19185_vm11, %v8779_v13, %v8975_v20  ;;  %v8249_v21 = vmax.f32 %v8048_v30, %v8176_v6  ;;  %7925 = vst [vmem:[#allocation2 + $0x388] sm:$0xff] %v16964_v12  ;;  %v9360_v59 = vrot.slane %v9359_v3, 4  ;;  %v8788_v29 = vsel %vm19193_vm12, %v8780_v8, %v8787_v43  ;;  %v16457_v15 = vpop.f32.mrb[116].mxu0  ;;  %v16966_v24 = vld [vmem:[#allocation2 + $0x3b0] sm:$0xff]  ;;  %v16969_v20 = vld [vmem:[#allocation2 + $0x3a0] sm:$0xff]  ;;  %v16975_v3 = vld [vmem:[#allocation2 + $0x3a8] sm:$0xff] }
 0x476   : > { %8977 = vst [vmem:[#allocation3 + $0x9c] sm:$0xf] %v8976_v41  ;;  %v8286_v47 = vmax.f32 %v8248_v1, %v8250_v45  ;;  %v9355_v46 = vsel %vm19068_vm9, %v9350_v60, %v9354_v62  ;;  %v9364_v26 = vrot.slane %v9362_v25, 5  ;;  %8978 = vst [vmem:[#allocation3 + $0xa0] sm:$0xf] %v8788_v29  ;;  %v8980_v31 = vsel %vm19018_vm6, %v8789_v63, %v8979_v23  ;;  %v7509_v43 = vpop.f32.mrb[117].mxu0 }
 0x477   : > { %v8285_v11 = vmax.f32 %v8247_v36, %v8249_v21  ;;  %8981 = vst [vmem:[#allocation3 + $0xa4] sm:$0x1] %v8980_v31  ;;  %v9591_v30 = vrot.slane %v19818_v5, 5  ;;  %v16967_v37 = vadd.f32 %v16966_v24, %v16457_v15  ;;  %v14647_v62 = vrot.slane %v9450_v10, 9  ;;  %v16458_v33 = vpop.f32.mrb[118].mxu0  ;;  %v16972_v23 = vld [vmem:[#allocation2 + $0x3b8] sm:$0xff] }
 0x478   : > { %v8325_v57 = vadd.f32 %v19690_v35, %v8286_v47  ;;  %v9365_v1 = vsel %vm19068_vm9, %v9360_v59, %v9364_v26  ;;  %v16970_v9 = vadd.f32 %v16969_v20, %v7509_v43  ;;  %v14663_v13 = vcombine.low %v19816_v48, %v19818_v5  ;;  %v7512_v12 = vpop.f32.mrb[119].mxu0  ;;  %v16978_v31 = vld [vmem:[#allocation2 + $0x3d0] sm:$0xff]  ;;  %v16984_v20 = vld [vmem:[#allocation2 + $0x3d8] sm:$0xff] }
 0x479   : > { %v8324_v27 = vadd.f32 %v19690_v35, %v8285_v11  ;;  %v14679_v63 = vcombine.low %v9355_v46, %v9365_v1  ;;  %7930 = vst [vmem:[#allocation2 + $0x3b0] sm:$0xff] %v16967_v37  ;;  %v16973_v28 = vadd.f32 %v16972_v23, %v16458_v33  ;;  %v9593_v36 = vrot.slane %v9591_v30, 4  ;;  %v16981_v11 = vld [vmem:[#allocation2 + $0x3c0] sm:$0xff]  ;;  %v8986_v47 = vld [vmem:[#allocation3 + $0xb0] sm:$0x1] }
 0x47a   : > { %v8357_v8 = vmax.f32 %v8325_v57, 0.0  ;;  %v9594_v45 = vrot.slane %v19826_v19, 5  ;;  %7928 = vst [vmem:[#allocation2 + $0x3a0] sm:$0xff] %v16970_v9  ;;  %v16976_v41 = vadd.f32 %v16975_v3, %v7512_v12  ;;  %v19851_v48 = vsel %vm19262_vm15, %v14647_v62, %v9591_v30 }
 0x47b   : > { %v8356_v6 = vmax.f32 %v8324_v27, 0.0  ;;  %v19845_v60 = vld [vmem:[#allocation2 + $0x390] ss:$2 sm:$0xff]  ;;  %v19847_v25 = vld [vmem:[#allocation2 + $0x391] ss:$2 sm:$0xff]  ;;  %10145 = vmatprep.mubr.bf16.mxu1 %v14679_v63  ;;  %7931 = vst [vmem:[#allocation2 + $0x3b8] sm:$0xff] %v16973_v28 }
 0x47c   : > { %v15026_v21 = vpack.c.bf16 %v8357_v8, %v8357_v8  ;;  %10146 = vmatmul.mubr.bf16.gmra.mrb[176].mxu1 %v14663_v13  ;;  %21274 = vst [vmem:[#allocation7_spill] sm:$0xff] %v19851_v48  ;;  %v19855_v5 = vsel %vm19262_vm15, %v9593_v36, %v9594_v45  ;;  %v8252_v59 = vmax.f32 %v19845_v60, %v19847_v25  ;;  %7929 = vst [vmem:[#allocation2 + $0x3a8] sm:$0xff] %v16976_v41  ;;  %v8052_v37 = vld [vmem:[#allocation2 + $0x380] ss:$2 sm:$0xff]  ;;  %v8180_v9 = vld [vmem:[#allocation2 + $0x381] ss:$2 sm:$0xff] }
 0x47d   : > { %21275 = vst [vmem:[#allocation8_spill] sm:$0xff] %v19855_v5  ;;  %v15025_v19 = vpack.c.bf16 %v8356_v6, %v8356_v6  ;;  %v19859_v29 = vld [vmem:[#allocation3 + $0x9c] sm:$0xf]  ;;  %v19861_v10 = vld [vmem:[#allocation3 + $0xa0] sm:$0xf]  ;;  %v16461_v43 = vpop.f32.mrb[120].mxu0 }
 0x47e   : > { %v8799_v46 = vshrl.u32 %v15026_v21, 16  ;;  %v8802_v26 = vshll.u32 %v15026_v21, 16  ;;  %v9367_v15 = vshrl.u32 %v19859_v29, 16  ;;  %v9370_v24 = vshll.u32 %v19859_v29, 16  ;;  %v7525_v23 = vpop.f32.mrb[121].mxu0  ;;  %v16987_v63 = vld [vmem:[#allocation2 + $0x3c8] sm:$0xff] }
 0x47f   : > { %v8791_v30 = vshrl.u32 %v15025_v19, 16  ;;  %v8794_v57 = vshll.u32 %v15025_v19, 16  ;;  %v9376_v1 = vshll.u32 %v19861_v10, 16  ;;  %v9380_v62 = vshrl.u32 %v19861_v10, 16  ;;  %v16462_v3 = vpop.f32.mrb[122].mxu0 }
 0x480   : > { %v8801_v27 = vrot.slane %v8799_v46, 7  ;;  %v16979_v33 = vadd.f32 %v16978_v31, %v16461_v43  ;;  %v9369_v13 = vrot.slane %v9367_v15, 4  ;;  %v9372_v8 = vrot.slane %v9370_v24, 5  ;;  %v19869_v36 = vld [vmem:[#allocation3 + $0xa4] sm:$0x1]  ;;  %v7528_v19 = vpop.f32.mrb[123].mxu0 }
 0x481   : > { %v8793_v28 = vrot.slane %v8791_v30, 7  ;;  %v16982_v12 = vadd.f32 %v16981_v11, %v7525_v23  ;;  %v9378_v45 = vrot.slane %v9376_v1, 5  ;;  %v9382_v6 = vrot.slane %v9380_v62, 4  ;;  %v8982_v41 = vld [vmem:[#allocation3 + $0xa8] sm:$0xf] }
 0x482   : > { %v8804_v60 = vor.u32 %v8802_v26, %v8801_v27  ;;  %v8806_v25 = vrot.slane %v8801_v27, 4  ;;  %7934 = vst [vmem:[#allocation2 + $0x3d0] sm:$0xff] %v16979_v33  ;;  %v16985_v21 = vadd.f32 %v16984_v20, %v16462_v3  ;;  %v9373_v46 = vor.u32 %v9372_v8, %v9369_v13  ;;  %v8058_v5 = vld [vmem:[#allocation2 + $0x3b0] ss:$2 sm:$0xff]  ;;  %v8186_v15 = vld [vmem:[#allocation2 + $0x3b1] ss:$2 sm:$0xff] }
 0x483   : > { %v8796_v31 = vor.u32 %v8794_v57, %v8793_v28  ;;  %v8797_v43 = vrot.slane %v8793_v28, 4  ;;  %7932 = vst [vmem:[#allocation2 + $0x3c0] sm:$0xff] %v16982_v12  ;;  %v16988_v24 = vadd.f32 %v16987_v63, %v7528_v19  ;;  %v9383_v11 = vor.u32 %v9382_v6, %v9378_v45  ;;  %v8056_v48 = vld [vmem:[#allocation2 + $0x3a0] ss:$2 sm:$0xff]  ;;  %v8184_v1 = vld [vmem:[#allocation2 + $0x3a1] ss:$2 sm:$0xff] }
 0x484   : > { %v8251_v30 = vmax.f32 %v8052_v37, %v8180_v9  ;;  %v8254_v23 = vmax.f32 %v8058_v5, %v8186_v15  ;;  %7935 = vst [vmem:[#allocation2 + $0x3d8] sm:$0xff] %v16985_v21  ;;  %v9374_v26 = vrot.slane %v9373_v46, 4  ;;  %v9386_v62 = vshll.u32 %v19869_v36, 16  ;;  %v9451_v13 = vld [vmem:[#allocation3 + $0x9c] sm:$0xe]  ;;  %v16990_v12 = vld [vmem:[#allocation2 + $0x3f0] sm:$0xff] }
 0x485   : > { %v8983_v20 = vsel %vm19185_vm11, %v8796_v31, %v8982_v41  ;;  %v8253_v27 = vmax.f32 %v8056_v48, %v8184_v1  ;;  %7933 = vst [vmem:[#allocation2 + $0x3c8] sm:$0xff] %v16988_v24  ;;  %v9384_v57 = vrot.slane %v9383_v11, 4  ;;  %v8805_v33 = vsel %vm19193_vm12, %v8797_v43, %v8804_v60  ;;  %v16465_v28 = vpop.f32.mrb[124].mxu0  ;;  %v16993_v41 = vld [vmem:[#allocation2 + $0x3e0] sm:$0xff]  ;;  %v16999_v11 = vld [vmem:[#allocation2 + $0x3e8] sm:$0xff] }
 0x486   : > { %8984 = vst [vmem:[#allocation3 + $0xa8] sm:$0xf] %v8983_v20  ;;  %v8288_v63 = vmax.f32 %v8252_v59, %v8254_v23  ;;  %v9379_v5 = vsel %vm19068_vm9, %v9374_v26, %v9378_v45  ;;  %v9388_v37 = vrot.slane %v9386_v62, 5  ;;  %8985 = vst [vmem:[#allocation3 + $0xac] sm:$0xf] %v8805_v33  ;;  %v8987_v9 = vsel %vm19018_vm6, %v8806_v25, %v8986_v47  ;;  %v7541_v60 = vpop.f32.mrb[125].mxu0 }
 0x487   : > { %v8287_v8 = vmax.f32 %v8251_v30, %v8253_v27  ;;  %8988 = vst [vmem:[#allocation3 + $0xb0] sm:$0x1] %v8987_v9  ;;  %v9598_v48 = vrot.slane %v19861_v10, 5  ;;  %v16991_v6 = vadd.f32 %v16990_v12, %v16465_v28  ;;  %v14648_v45 = vrot.slane %v9451_v13, 9  ;;  %v16466_v46 = vpop.f32.mrb[126].mxu0  ;;  %v16996_v47 = vld [vmem:[#allocation2 + $0x3f8] sm:$0xff] }
 0x488   : > { %v8327_v3 = vadd.f32 %v19690_v35, %v8288_v63  ;;  %v9389_v59 = vsel %vm19068_vm9, %v9384_v57, %v9388_v37  ;;  %v16994_v19 = vadd.f32 %v16993_v41, %v7541_v60  ;;  %v14664_v31 = vcombine.low %v19859_v29, %v19861_v10  ;;  %v7544_v24 = vpop.f32.mrb[127].mxu0 }
 0x489   : > { %v8326_v21 = vadd.f32 %v19690_v35, %v8287_v8  ;;  %v14680_v25 = vcombine.low %v9379_v5, %v9389_v59  ;;  %7938 = vst [vmem:[#allocation2 + $0x3f0] sm:$0xff] %v16991_v6  ;;  %v16997_v15 = vadd.f32 %v16996_v47, %v16466_v46  ;;  %v9600_v30 = vrot.slane %v9598_v48, 4 }
 0x48a   : > { %v8359_v43 = vmax.f32 %v8327_v3, 0.0  ;;  %v9601_v23 = vrot.slane %v19869_v36, 5  ;;  %7936 = vst [vmem:[#allocation2 + $0x3e0] sm:$0xff] %v16994_v19  ;;  %v17000_v26 = vadd.f32 %v16999_v11, %v7544_v24  ;;  %v19890_v20 = vsel %vm19262_vm15, %v14648_v45, %v9598_v48  ;;  %v8993_v48 = vld [vmem:[#allocation3 + $0xbc] sm:$0x1] }
 0x48b   : > { %v8358_v1 = vmax.f32 %v8326_v21, 0.0  ;;  %10153 = vmatprep.mubr.bf16.mxu1 %v14680_v25  ;;  %7939 = vst [vmem:[#allocation2 + $0x3f8] sm:$0xff] %v16997_v15 }
 0x48c   : > { %v15028_v62 = vpack.c.bf16 %v8359_v43, %v8359_v43  ;;  %10154 = vmatmul.mubr.bf16.gmra.mrb[180].mxu1 %v14664_v31  ;;  %v19894_v29 = vsel %vm19262_vm15, %v9600_v30, %v9601_v23  ;;  %7937 = vst [vmem:[#allocation2 + $0x3e8] sm:$0xff] %v17000_v26  ;;  %v8060_v8 = vld [vmem:[#allocation2 + $0x3c0] ss:$2 sm:$0xff]  ;;  %v8188_v19 = vld [vmem:[#allocation2 + $0x3c1] ss:$2 sm:$0xff] }
 0x48d   : > { %v15027_v10 = vpack.c.bf16 %v8358_v1, %v8358_v1  ;;  %v9031_v27 = vld [vmem:[#allocation3 + $0xa8] sm:$0xf]  ;;  %v9032_v57 = vld [vmem:[#allocation3 + $0xac] sm:$0xf]  ;;  %v14696_v36 = vcombine.low %v19890_v20, %v19894_v29  ;;  %v8989_v43 = vld [vmem:[#allocation3 + $0xb4] sm:$0xf]  ;;  %v8255_v26 = vmax.f32 %v8060_v8, %v8188_v19 }
 0x48e   : > { %v8816_v33 = vshrl.u32 %v15028_v62, 16  ;;  %v9049_v13 = vld [vmem:[#allocation3 + $0xb0] sm:$0x1]  ;;  %v9391_v63 = vshrl.u32 %v9031_v27, 16  ;;  %v9394_v5 = vshll.u32 %v9031_v27, 16  ;;  %v8819_v37 = vshll.u32 %v15028_v62, 16 }
 0x48f   : > { %v8808_v9 = vshrl.u32 %v15027_v10, 16  ;;  %v9400_v28 = vshll.u32 %v9032_v57, 16  ;;  %v9404_v12 = vshrl.u32 %v9032_v57, 16  ;;  %v9410_v41 = vshll.u32 %v9049_v13, 16  ;;  %v9452_v59 = vld [vmem:[#allocation3 + $0xa8] sm:$0xe] }
 0x490   : > { %v8818_v3 = vrot.slane %v8816_v33, 7  ;;  %v9393_v6 = vrot.slane %v9391_v63, 4  ;;  %v9396_v60 = vrot.slane %v9394_v5, 5  ;;  %v8811_v21 = vshll.u32 %v15027_v10, 16 }
 0x491   : > { %v8810_v45 = vrot.slane %v8808_v9, 7  ;;  %v9402_v46 = vrot.slane %v9400_v28, 5  ;;  %v9406_v47 = vrot.slane %v9404_v12, 4  ;;  %v9412_v24 = vrot.slane %v9410_v41, 5 }
 0x492   : > { %v8821_v25 = vor.u32 %v8819_v37, %v8818_v3  ;;  %v8823_v31 = vrot.slane %v8818_v3, 4  ;;  %v9397_v15 = vor.u32 %v9396_v60, %v9393_v6  ;;  %v14649_v1 = vrot.slane %v9452_v59, 9 }
 0x493   : > { %v8813_v11 = vor.u32 %v8811_v21, %v8810_v45  ;;  %v8814_v30 = vrot.slane %v8810_v45, 4  ;;  %v9407_v23 = vor.u32 %v9406_v47, %v9402_v46  ;;  %v8064_v62 = vld [vmem:[#allocation2 + $0x3e0] ss:$2 sm:$0xff]  ;;  %v8192_v33 = vld [vmem:[#allocation2 + $0x3e1] ss:$2 sm:$0xff]  ;;  %v9605_v10 = vrot.slane %v9032_v57, 5 }
 0x494   : > { %v9398_v63 = vrot.slane %v9397_v15, 4  ;;  %v8994_v5 = vsel %vm19018_vm6, %v8823_v31, %v8993_v48  ;;  %v8257_v37 = vmax.f32 %v8064_v62, %v8192_v33  ;;  %v9608_v60 = vrot.slane %v9049_v13, 5  ;;  %v18213_v47 = vld [vmem:[#allocation3 + $0x4] sm:$0xf] }
 0x495   : > { %v8990_v9 = vsel %vm19185_vm11, %v8813_v11, %v8989_v43  ;;  %v9408_v28 = vrot.slane %v9407_v23, 4  ;;  %v8822_v12 = vsel %vm19193_vm12, %v8814_v30, %v8821_v25  ;;  %8995 = vst [vmem:[#allocation3 + $0xbc] sm:$0x1] %v8994_v5  ;;  %v9607_v3 = vrot.slane %v9605_v10, 4 }
 0x496   : > { %8991 = vst [vmem:[#allocation3 + $0xb4] sm:$0xf] %v8990_v9  ;;  %v9403_v8 = vsel %vm19068_vm9, %v9398_v63, %v9402_v46  ;;  %8992 = vst [vmem:[#allocation3 + $0xb8] sm:$0xf] %v8822_v12  ;;  %v8289_v6 = vmax.f32 %v8255_v26, %v8257_v37  ;;  %v14665_v45 = vcombine.low %v9031_v27, %v9032_v57  ;;  %v9438_v46 = vld [vmem:[#allocation3] sm:$0xe] }
 0x497   : > { %v9413_v48 = vsel %vm19068_vm9, %v9408_v28, %v9412_v24  ;;  %v19911_v21 = vsel %vm19262_vm15, %v14649_v1, %v9605_v10  ;;  %v19915_v19 = vsel %vm19262_vm15, %v9607_v3, %v9608_v60  ;;  %v9507_v25 = vrot.slane %v18213_v47, 5  ;;  %v18214_v1 = vld [vmem:[#allocation3 + $0x8] sm:$0x1] }
 0x498   : > { %v14681_v41 = vcombine.low %v9403_v8, %v9413_v48  ;;  %v8328_v59 = vadd.f32 %v19690_v35, %v8289_v6  ;;  %v14697_v31 = vcombine.low %v19911_v21, %v19915_v19  ;;  %v14635_v15 = vrot.slane %v9438_v46, 9 }
 0x499   : > { %v9509_v23 = vrot.slane %v9507_v25, 4  ;;  %v9510_v26 = vrot.slane %v18214_v1, 5 }
 0x49a   : > { %10161 = vmatprep.mubr.bf16.mxu1 %v14681_v41  ;;  %v8360_v13 = vmax.f32 %v8328_v59, 0.0  ;;  %v8996_v59 = vld [vmem:[#allocation3 + $0xc0] sm:$0xf] }
 0x49b   : > { %10162 = vmatmul.mubr.bf16.gmra.mrb[184].mxu1 %v14665_v45 }
 0x49c   : > { %v9050_v43 = vld [vmem:[#allocation3 + $0xbc] sm:$0x1]  ;;  %v15029_v35 = vpack.c.bf16 %v8360_v13, %v8360_v13 }
 0x49d   : > { %v9033_v27 = vld [vmem:[#allocation3 + $0xb4] sm:$0xf]  ;;  %v9034_v57 = vld [vmem:[#allocation3 + $0xb8] sm:$0xf]  ;;  %v15411_v24 = vpop.f32.mrb[132].mxu1  ;;  %v9434_v10 = vshll.u32 %v9050_v43, 16 }
 0x49e   : > { %v9415_v11 = vshrl.u32 %v9033_v27, 16  ;;  %v9418_v30 = vshll.u32 %v9033_v27, 16  ;;  %v8825_v62 = vshrl.u32 %v15029_v35, 16  ;;  %v15412_v33 = vpop.f32.mrb[133].mxu1  ;;  %v9424_v63 = vshll.u32 %v9034_v57, 16 }
 0x49f   : > { %v9428_v5 = vshrl.u32 %v9034_v57, 16  ;;  %v8828_v9 = vshll.u32 %v15029_v35, 16  ;;  %v15413_v37 = vadd.f32 %v15412_v33, %v15411_v24  ;;  %v15414_v28 = vpop.f32.mrb[134].mxu1  ;;  %v9453_v41 = vld [vmem:[#allocation3 + $0xb4] sm:$0xe]  ;;  %v9508_v35 = vsel %vm19262_vm15, %v14635_v15, %v9507_v25 }
 0x4a0   : > { %v9417_v12 = vrot.slane %v9415_v11, 4  ;;  %v9420_v8 = vrot.slane %v9418_v30, 5  ;;  %v19919_v3 = vrot.slane %v8825_v62, 7  ;;  %v15415_v6 = vpop.f32.mrb[135].mxu1  ;;  %v9426_v48 = vrot.slane %v9424_v63, 5 }
 0x4a1   : > { %v9430_v60 = vrot.slane %v9428_v5, 4  ;;  %17001 = vst [vmem:[#allocation4 + $0x10] sm:$0xff] %v15413_v37  ;;  %v15416_v45 = vadd.f32 %v15415_v6, %v15414_v28  ;;  %v14650_v24 = vrot.slane %v9453_v41, 9  ;;  %v9612_v11 = vrot.slane %v9034_v57, 5 }
 0x4a2   : > { %v9421_v46 = vor.u32 %v9420_v8, %v9417_v12  ;;  %v8830_v47 = vor.u32 %v8828_v9, %v19919_v3  ;;  %v9436_v33 = vrot.slane %v9434_v10, 5  ;;  %v9511_v63 = vsel %vm19262_vm15, %v9509_v23, %v9510_v26  ;;  %v18129_v8 = vld [vmem:[%s21229_s3 + $0xc0] sm:$0xff]  }
 0x4a3   : > { %v9431_v13 = vor.u32 %v9430_v60, %v9426_v48  ;;  %17019 = vst [vmem:[#allocation4 + $0x18] sm:$0xff] %v15416_v45  ;;  %v9614_v9 = vrot.slane %v9612_v11, 4  ;;  %v9615_v37 = vrot.slane %v9050_v43, 5  ;;  %v14683_v15 = vcombine.low %v9508_v35, %v9511_v63  ;;  %v18130_v60 = vld [vmem:[%s21229_s3 + $0x108] sm:$0xff]   ;;  %v8062_v63 = vld [vmem:[#allocation2 + $0x3d0] ss:$2 sm:$0xff] }
 0x4a4   : > { %v9422_v1 = vrot.slane %v9421_v46, 4  ;;  %v8997_v30 = vsel %vm19185_vm11, %v8830_v47, %v8996_v59  ;;  %v19934_v34 = vsel %vm19262_vm15, %v14650_v24, %v9612_v11  ;;  %v14666_v23 = vcombine.low %v9033_v27, %v9034_v57  ;;  %v18131_v45 = vld [vmem:[%s21229_s3 + $0xc8] sm:$0xff]   ;;  %v18132_v46 = vld [vmem:[%s21229_s3 + $0x110] sm:$0xff]   ;;  %v18135_v47 = vld [vmem:[%s21229_s3 + $0xd8] sm:$0xff]  }
 0x4a5   : > { %v9432_v62 = vrot.slane %v9431_v13, 4  ;;  %8998 = vst [vmem:[#allocation3 + $0xc0] sm:$0xf] %v8997_v30  ;;  %v19938_v10 = vsel %vm19262_vm15, %v9614_v9, %v9615_v37  ;;  %v21276_v57 = vcombine.low %v19273_v61, %v19277_v22  ;;  %v21277_v59 = vcombine.low %v19326_v0, %v19330_v4  ;;  %v18133_v61 = vld [vmem:[%s21229_s3 + $0xd0] sm:$0xff]   ;;  %v18134_v22 = vld [vmem:[%s21229_s3 + $0x118] sm:$0xff]   ;;  %v18136_v13 = vld [vmem:[%s21229_s3 + $0x120] sm:$0xff]  }
 0x4a6   : > { %v9427_v5 = vsel %vm19068_vm9, %v9422_v1, %v9426_v48  ;;  %v14698_v26 = vcombine.low %v19934_v34, %v19938_v10  ;;  %v21278_v0 = vcombine.low %v19379_v44, %v19383_v49  ;;  %v21279_v4 = vcombine.low %v19437_v54, %v19441_v17  ;;  %v18137_v44 = vld [vmem:[%s21229_s3 + $0xe0] sm:$0xff]   ;;  %v18138_v17 = vld [vmem:[%s21229_s3 + $0x128] sm:$0xff]   ;;  %v8066_v24 = vld [vmem:[#allocation2 + $0x3f0] ss:$2 sm:$0xff] }
 0x4a7   : > { %v9437_v28 = vsel %vm19068_vm9, %v9432_v62, %v9436_v33  ;;  %v8194_v11 = vld [vmem:[#allocation2 + $0x3f1] ss:$2 sm:$0xff]  ;;  %v21280_v33 = vcombine.low %v19490_v40, %v19494_v52  ;;  %v21281_v9 = vcombine.low %v19543_v38, %v19547_v42  ;;  %v18139_v37 = vld [vmem:[%s21229_s3 + $0xe8] sm:$0xff]  }
 0x4a8   : > { %v14682_v25 = vcombine.low %v9427_v5, %v9437_v28  ;;  %v8190_v5 = vld [vmem:[#allocation2 + $0x3d1] ss:$2 sm:$0xff]  ;;  %v8258_v28 = vmax.f32 %v8066_v24, %v8194_v11 }
 0x4a9   : > { %v8256_v40 = vmax.f32 %v8062_v63, %v8190_v5  ;;  %v18141_v52 = vld [vmem:[%s21229_s3 + $0xf0] sm:$0xff]   ;;  %v18142_v42 = vld [vmem:[%s21229_s3 + $0x138] sm:$0xff]  }
 0x4aa   : > { %10169 = vmatprep.mubr.bf16.mxu1 %v14682_v25  ;;  %v18140_v25 = vld [vmem:[%s21229_s3 + $0x130] sm:$0xff]  }
 0x4ab   : > { %10170 = vmatmul.mubr.bf16.gmra.mrb[188].mxu1 %v14666_v23  ;;  %v8290_v38 = vmax.f32 %v8256_v40, %v8258_v28  ;;  %v21283_v23 = vcombine.low %v19682_v58, %v19701_v14  ;;  %v10403_v63 = vld [vmem:[#allocation3 + $0x14] sm:$0x1] }
 0x4ac   : > { %16483 = vmatprep.mubr.bf16.mxu1 %v14683_v15  ;;  %v21282_v15 = vcombine.low %v19634_v39, %v19608_v32  ;;  %v20017_v32 = vld [vmem:[%s21229_s3 + $0x140] sm:$0xff]  }
 0x4ae   : > { %v15417_v43 = vpop.f32.mrb[136].mxu1 }
 0x4af   : > { %v15418_v12 = vpop.f32.mrb[137].mxu1 }
 0x4b0   : > { %v15419_v6 = vadd.f32 %v15418_v12, %v15417_v43  ;;  %v15420_v48 = vpop.f32.mrb[138].mxu1  ;;  %v18143_v43 = vld [vmem:[%s21229_s3 + $0xf8] sm:$0xff]   ;;  %v18215_v12 = vld [vmem:[%s21228_s2] ss:$0 sm:$0xff] }
 0x4b1   : > { %v15421_v41 = vpop.f32.mrb[139].mxu1 }
 0x4b2   : > { %17046 = vst [vmem:[#allocation4 + $0x20] sm:$0xff] %v15419_v6  ;;  %v15422_v27 = vadd.f32 %v15421_v41, %v15420_v48 }
 0x4b3   : > { %16484 = vmatmul.mubr.bf16.vlgmr.msra.gmra.mrb[192].mxu1 %v21276_v57  ;;  %v21285_v57 = vcombine.low %v19765_v18, %v19769_v2  ;;  %v21286_v18 = vld [vmem:[#allocation6_spill] sm:$0xff] }
 0x4b4   : > { %16487 = vmatprep.mubr.bf16.mxu1 %v21277_v59  ;;  %15526 = vmatpush3.bf16.msra.mxu1 %v18129_v8  ;;  %17064 = vst [vmem:[#allocation4 + $0x28] sm:$0xff] %v15422_v27  ;;  %v8329_v8 = vadd.f32 %v18215_v12, %v8290_v38  ;;  %v21284_v27 = vcombine.low %v19713_v53, %v19746_v16  ;;  %v20026_v59 = vld [vmem:[#allocation3 + $0xc] sm:$0xf]  ;;  %v20034_v16 = vld [vmem:[#allocation3 + $0x18] sm:$0xf]  ;;  %v10439_v38 = vshll.u32 %v10403_v63, 16 }
 0x4b5   : > { %15527 = vmatprep.subr.bf16.mxu1 %v18130_v60  ;;  %v21287_v2 = vcombine.low %v19808_v51, %v21286_v18  ;;  %v10444_v24 = vshrl.u32 %v20034_v16, 16  ;;  %v10447_v11 = vshll.u32 %v20034_v16, 16  ;;  %v8831_v12 = vrot.slane %v19919_v3, 4 }
 0x4b6   : > { %v8361_v58 = vmax.f32 %v8329_v8, 0.0  ;;  %v10441_v3 = vrot.slane %v10439_v38, 5  ;;  %v20097_v38 = vld [vmem:[#allocation3 + $0x40] sm:$0xf] }
 0x4b8   : > { %15528 = vmatpush3.bf16.msra.mxu1 %v18131_v45  ;;  %v20028_v45 = vld [vmem:[#allocation3 + $0x10] sm:$0xf] }
 0x4b9   : > { %15529 = vmatprep.subr.bf16.mxu1 %v18132_v46  ;;  %v15030_v46 = vpack.c.bf16 %v8361_v58, %v8361_v58 }
 0x4bb   : > { %16488 = vmatmul.mubr.bf16.gmra.mrb[196].mxu1 %v21278_v0  ;;  %v10429_v0 = vshll.u32 %v20028_v45, 16  ;;  %v8833_v53 = vshrl.u32 %v15030_v46, 16 }
 0x4bc   : > { %16491 = vmatprep.mubr.bf16.mxu1 %v21279_v4  ;;  %15530 = vmatpush3.bf16.msra.mxu1 %v18133_v61  ;;  %v10420_v61 = vshrl.u32 %v20026_v59, 16  ;;  %v10433_v4 = vshrl.u32 %v20028_v45, 16 }
 0x4bd   : > { %15531 = vmatprep.subr.bf16.mxu1 %v18134_v22  ;;  %v10423_v22 = vshll.u32 %v20026_v59, 16 }
 0x4be   : > { %v15423_v1 = vpop.f32.mrb[140].mxu1 }
 0x4bf   : > { %v15424_v35 = vpop.f32.mrb[141].mxu1 }
 0x4c0   : > { %15532 = vmatpush3.bf16.msra.mxu1 %v18135_v47  ;;  %v15425_v49 = vadd.f32 %v15424_v35, %v15423_v1  ;;  %v15426_v54 = vpop.f32.mrb[142].mxu1  ;;  %v20036_v47 = vld [vmem:[#allocation3 + $0x1c] sm:$0xf]  ;;  %v10425_v1 = vrot.slane %v10423_v22, 5  ;;  %v10431_v35 = vrot.slane %v10429_v0, 5 }
 0x4c1   : > { %15533 = vmatprep.subr.bf16.mxu1 %v18136_v13  ;;  %v15427_v30 = vpop.f32.mrb[143].mxu1  ;;  %v10422_v13 = vrot.slane %v10420_v61, 4  ;;  %v10457_v51 = vshrl.u32 %v20036_v47, 16 }
 0x4c2   : > { %17037 = vst [vmem:[#allocation4 + $0x30] sm:$0xff] %v15425_v49  ;;  %v15428_v62 = vadd.f32 %v15427_v30, %v15426_v54  ;;  %v21288_v49 = vld [vmem:[#allocation7_spill] sm:$0xff]  ;;  %v21289_v54 = vld [vmem:[#allocation8_spill] sm:$0xff]  ;;  %v10453_v30 = vshll.u32 %v20036_v47, 16 }
 0x4c3   : > { %16492 = vmatmul.mubr.bf16.gmra.mrb[200].mxu1 %v21280_v33  ;;  %v8835_v33 = vrot.slane %v8833_v53, 7 }
 0x4c4   : > { %16495 = vmatprep.mubr.bf16.mxu1 %v21281_v9  ;;  %15534 = vmatpush3.bf16.msra.mxu1 %v18137_v44  ;;  %17055 = vst [vmem:[#allocation4 + $0x38] sm:$0xff] %v15428_v62  ;;  %v10435_v44 = vrot.slane %v10433_v4, 4  ;;  %v8484_v62 = vld [vmem:[#allocation3 + $0xc8] sm:$0x1] }
 0x4c5   : > { %15535 = vmatprep.subr.bf16.mxu1 %v18138_v17  ;;  %v21290_v17 = vcombine.low %v21288_v49, %v21289_v54  ;;  %v8485_v9 = vsel %vm19013_vm5, 0, %v8484_v62 }
 0x4c6   : > { %v10436_v40 = vor.u32 %v10435_v44, %v10431_v35  ;;  %8486 = vst [vmem:[#allocation3 + $0xc8] sm:$0x1] %v8485_v9 }
 0x4c8   : > { %15536 = vmatpush3.bf16.msra.mxu1 %v18139_v37  ;;  %v8836_v37 = vshll.u32 %v15030_v46, 16  ;;  %v10404_v46 = vld [vmem:[#allocation3 + $0x20] sm:$0x1] }
 0x4c9   : > { %15537 = vmatprep.subr.bf16.mxu1 %v18140_v25  ;;  %v10426_v25 = vor.u32 %v10425_v1, %v10422_v13 }
 0x4cb   : > { %16496 = vmatmul.mubr.bf16.gmra.mrb[204].mxu1 %v21282_v15  ;;  %v10449_v15 = vrot.slane %v10447_v11, 5 }
 0x4cc   : > { %16499 = vmatprep.mubr.bf16.mxu1 %v21283_v23  ;;  %15538 = vmatpush3.bf16.msra.mxu1 %v18141_v52  ;;  %v10455_v23 = vrot.slane %v10453_v30, 5  ;;  %v10405_v30 = vld [vmem:[#allocation3 + $0x2c] sm:$0x1] }
 0x4cd   : > { %15539 = vmatprep.subr.bf16.mxu1 %v18142_v42  ;;  %v10446_v42 = vrot.slane %v10444_v24, 4  ;;  %v9000_v53 = vld [vmem:[#allocation3 + $0xc8] sm:$0x1]  ;;  %v20080_v24 = vld [vmem:[#allocation3 + $0x34] sm:$0xf] }
 0x4ce   : > { %v15429_v39 = vpop.f32.mrb[144].mxu1  ;;  %v10505_v9 = vshrl.u32 %v20080_v24, 16 }
 0x4cf   : > { %v15430_v6 = vpop.f32.mrb[145].mxu1  ;;  %v10450_v61 = vor.u32 %v10449_v15, %v10446_v42  ;;  %v20099_v42 = vld [vmem:[#allocation3 + $0x80] sm:$0x1] }
 0x4d0   : > { %15540 = vmatpush3.bf16.msra.mxu1 %v18143_v43  ;;  %v15431_v14 = vadd.f32 %v15430_v6, %v15429_v39  ;;  %v15432_v48 = vpop.f32.mrb[146].mxu1  ;;  %v8838_v43 = vor.u32 %v8836_v37, %v8835_v33  ;;  %v10459_v6 = vrot.slane %v10457_v51, 4  ;;  %v10812_v51 = vld [vmem:[#allocation3 + $0x78] sm:$0xe]  ;;  %v20093_v37 = vld [vmem:[#allocation3 + $0x3c] sm:$0xf] }
 0x4d1   : > { %16515 = vmatprep.subr.bf16.mxu1 %v20017_v32  ;;  %v15433_v60 = vpop.f32.mrb[147].mxu1 }
 0x4d2   : > { %17082 = vst [vmem:[#allocation4 + $0x40] sm:$0xff] %v15431_v14  ;;  %v15434_v41 = vadd.f32 %v15433_v60, %v15432_v48  ;;  %v20051_v14 = vld [vmem:[#allocation3 + $0x24] sm:$0xf]  ;;  %v8840_v48 = vrot.slane %v8835_v33, 4  ;;  %v10460_v22 = vor.u32 %v10459_v6, %v10455_v23  ;;  %v8839_v20 = vsel %vm19193_vm12, %v8831_v12, %v8838_v43  ;;  %v20086_v33 = vld [vmem:[#allocation3 + $0x7c] sm:$0xf] }
 0x4d3   : > { %16500 = vmatmul.mubr.bf16.gmra.mrb[208].mxu1 %v21284_v27  ;;  %v10437_v27 = vrot.slane %v10436_v40, 4  ;;  %v10468_v0 = vshrl.u32 %v20051_v14, 16  ;;  %v10471_v4 = vshll.u32 %v20051_v14, 16  ;;  %8999 = vst [vmem:[#allocation3 + $0xc4] sm:$0xf] %v8839_v20  ;;  %v18148_v12 = vld [vmem:[%s21229_s3 + $0x148] sm:$0xff]  }
 0x4d4   : > { %16503 = vmatprep.mubr.bf16.mxu1 %v21285_v57  ;;  %17100 = vst [vmem:[#allocation4 + $0x48] sm:$0xff] %v15434_v41  ;;  %v10427_v41 = vrot.slane %v10426_v25, 4  ;;  %v20056_v57 = vld [vmem:[#allocation3 + $0x28] sm:$0xf]  ;;  %v9001_v18 = vsel %vm19018_vm6, %v8840_v48, %v9000_v53  ;;  %v10461_v55 = vrot.slane %v10460_v22, 4  ;;  %v14739_v25 = vcombine.low %v20026_v59, %v20028_v45 }
 0x4d5   : > { %v10477_v29 = vshll.u32 %v20056_v57, 16  ;;  %v10442_v19 = vsel %vm19068_vm9, %v10437_v27, %v10441_v3  ;;  %9002 = vst [vmem:[#allocation3 + $0xc8] sm:$0x1] %v9001_v18  ;;  %v10470_v13 = vrot.slane %v10468_v0, 4  ;;  %v10473_v1 = vrot.slane %v10471_v4, 5 }
 0x4d6   : > { %v10432_v21 = vsel %vm19068_vm9, %v10427_v41, %v10431_v35  ;;  %v10507_v41 = vrot.slane %v10505_v9, 4  ;;  %v10935_v3 = vrot.slane %v20099_v42, 5  ;;  %v10519_v22 = vshll.u32 %v20093_v37, 16  ;;  %v10406_v0 = vld [vmem:[#allocation3 + $0x38] sm:$0x1] }
 0x4d7   : > { %v14755_v44 = vcombine.low %v10432_v21, %v10442_v19  ;;  %v20073_v49 = vrot.slane %v10477_v29, 5  ;;  %v10474_v62 = vor.u32 %v10473_v1, %v10470_v13  ;;  %v10525_v4 = vshll.u32 %v20097_v38, 16  ;;  %v18151_v29 = vld [vmem:[%s21229_s3 + $0x150] sm:$0xff]   ;;  %v18154_v1 = vld [vmem:[%s21229_s3 + $0x158] sm:$0xff]   ;;  %v20149_v9 = vld [vmem:[#allocation3 + $0x44] sm:$0x1] }
 0x4d8   : > { %v10529_v20 = vshrl.u32 %v20097_v38, 16  ;;  %v10511_v13 = vshll.u32 %v10406_v0, 16 }
 0x4d9   : > { %v10475_v43 = vrot.slane %v10474_v62, 4  ;;  %v20143_v62 = vld [vmem:[#allocation3 + $0x48] sm:$0xf] }
 0x4db   : > { %16504 = vmatmul.mubr.bf16.gmra.mrb[212].mxu1 %v21287_v2  ;;  %v10451_v2 = vrot.slane %v10450_v61, 4  ;;  %v10516_v61 = vshrl.u32 %v20093_v37, 16  ;;  %v10480_v21 = vsel %vm19068_vm9, %v10475_v43, %v20073_v49 }
 0x4dc   : > { %16507 = vmatprep.mubr.bf16.mxu1 %v21290_v17  ;;  %v20078_v17 = vld [vmem:[#allocation3 + $0x30] sm:$0xf] }
 0x4dd   : > { %v10456_v50 = vsel %vm19068_vm9, %v10451_v2, %v10455_v23  ;;  %v10492_v34 = vshrl.u32 %v20078_v17, 16  ;;  %v10495_v10 = vshll.u32 %v20078_v17, 16  ;;  %v20132_v2 = vld [vmem:[#allocation3 + $0x88] sm:$0xf] }
 0x4df   : > { %v15435_v28 = vpop.f32.mrb[148].mxu1  ;;  %v10494_v48 = vrot.slane %v10492_v34, 4  ;;  %v10497_v59 = vrot.slane %v10495_v10, 5  ;;  %v20146_v10 = vld [vmem:[#allocation3 + $0x4c] sm:$0xf] }
 0x4e0   : > { %v15436_v52 = vpop.f32.mrb[149].mxu1  ;;  %v10553_v43 = vshrl.u32 %v20146_v10, 16 }
 0x4e1   : > { %v15437_v8 = vadd.f32 %v15436_v52, %v15435_v28  ;;  %v15438_v39 = vpop.f32.mrb[150].mxu1  ;;  %v10487_v52 = vshll.u32 %v10405_v30, 16 }
 0x4e2   : > { %v15439_v58 = vpop.f32.mrb[151].mxu1 }
 0x4e3   : > { %17073 = vst [vmem:[#allocation4 + $0x50] sm:$0xff] %v15437_v8  ;;  %v15440_v60 = vadd.f32 %v15439_v58, %v15438_v39  ;;  %16508 = vmatmul.mubr.bf16.gmra.mrb[216].mxu1 %v14696_v36  ;;  %v10481_v36 = vshrl.u32 %v20056_v57, 16  ;;  %v14732_v8 = vrot.slane %v10812_v51, 9  ;;  %v10932_v39 = vrot.slane %v20086_v33, 5 }
 0x4e4   : > { %16511 = vmatprep.mubr.bf16.mxu1 %v14697_v31  ;;  %v10463_v31 = vshll.u32 %v10404_v46, 16  ;;  %v10489_v46 = vrot.slane %v10487_v52, 5  ;;  %v10543_v52 = vshll.u32 %v20143_v62, 16 }
 0x4e5   : > { %17091 = vst [vmem:[#allocation4 + $0x58] sm:$0xff] %v15440_v60  ;;  %v10483_v54 = vrot.slane %v10481_v36, 4  ;;  %v10934_v27 = vrot.slane %v10932_v39, 4  ;;  %v20118_v36 = vsel %vm19262_vm15, %v14732_v8, %v10932_v39 }
 0x4e6   : > { %v10465_v35 = vrot.slane %v10463_v31, 5  ;;  %v10498_v31 = vor.u32 %v10497_v59, %v10494_v48 }
 0x4e7   : > { %v10484_v63 = vor.u32 %v10483_v54, %v20073_v49  ;;  %v10518_v49 = vrot.slane %v10516_v61, 4  ;;  %v10521_v54 = vrot.slane %v10519_v22, 5  ;;  %v10545_v22 = vrot.slane %v10543_v52, 5 }
 0x4e8   : > { %v10466_v11 = vsel %vm19068_vm9, %v10461_v55, %v10465_v35  ;;  %v14740_v55 = vcombine.low %v20034_v16, %v20036_v47  ;;  %v20141_v35 = vrot.slane %v10525_v4, 5  ;;  %v10939_v16 = vrot.slane %v20132_v2, 5 }
 0x4e9   : > { %v14756_v40 = vcombine.low %v10456_v50, %v10466_v11  ;;  %v10485_v58 = vrot.slane %v10484_v63, 4  ;;  %v10531_v50 = vrot.slane %v10529_v20, 4  ;;  %v10813_v11 = vld [vmem:[#allocation3 + $0x84] sm:$0xe]  ;;  %v10499_v47 = vrot.slane %v10498_v31, 4 }
 0x4ea   : > { %v14733_v63 = vrot.slane %v10813_v11, 9  ;;  %v10941_v51 = vrot.slane %v10939_v16, 4  ;;  %v20184_v31 = vld [vmem:[#allocation3 + $0x58] sm:$0xf] }
 0x4eb   : > { %16512 = vmatmul.mubr.bf16.gmra.mrb[220].mxu1 %v14698_v26  ;;  %v10501_v26 = vshll.u32 %v20080_v24, 16  ;;  %v10490_v19 = vsel %vm19068_vm9, %v10485_v58, %v10489_v46 }
 0x4ec   : > { %11412 = vmatprep.mubr.bf16.mxu1 %v14755_v44  ;;  %v20139_v44 = vld [vmem:[#allocation3 + $0x8c] sm:$0x1]  ;;  %v14757_v30 = vcombine.low %v10480_v21, %v10490_v19  ;;  %v10555_v21 = vrot.slane %v10553_v43, 4  ;;  %v20182_v19 = vld [vmem:[#allocation3 + $0x54] sm:$0xf] }
 0x4ed   : > { %v20105_v45 = vrot.slane %v10501_v26, 5  ;;  %v10513_v26 = vrot.slane %v10511_v13, 5  ;;  %v18163_v13 = vld [vmem:[%s21229_s3 + $0x170] sm:$0xff]   ;;  %v10567_v11 = vshll.u32 %v20182_v19, 16 }
 0x4ef   : > { %v10508_v18 = vor.u32 %v10507_v41, %v20105_v45  ;;  %v10535_v41 = vshll.u32 %v20149_v9, 16  ;;  %v10569_v43 = vrot.slane %v10567_v11, 5 }
 0x4f0   : > { %v15441_v5 = vpop.f32.mrb[152].mxu1 }
 0x4f1   : > { %v15442_v28 = vpop.f32.mrb[153].mxu1  ;;  %v10509_v34 = vrot.slane %v10508_v18, 4  ;;  %v20186_v18 = vld [vmem:[#allocation3 + $0x50] sm:$0x1] }
 0x4f2   : > { %v15443_v15 = vadd.f32 %v15442_v28, %v15441_v5  ;;  %v15444_v23 = vpop.f32.mrb[154].mxu1  ;;  %v10942_v5 = vrot.slane %v20139_v44, 5  ;;  %v10522_v28 = vor.u32 %v10521_v54, %v10518_v49 }
 0x4f3   : > { %v15445_v6 = vpop.f32.mrb[155].mxu1  ;;  %11413 = vmatmul.mubr.bf16.vlgmr.msra.gmra.mrb[224].mxu1 %v14739_v25  ;;  %v10532_v25 = vor.u32 %v10531_v50, %v20141_v35  ;;  %v10514_v58 = vsel %vm19068_vm9, %v10509_v34, %v10513_v26  ;;  %v10564_v50 = vshrl.u32 %v20182_v19, 16  ;;  %v20206_v26 = vld [vmem:[#allocation3 + $0x98] sm:$0x1] }
 0x4f4   : > { %17118 = vst [vmem:[#allocation4 + $0x60] sm:$0xff] %v15443_v15  ;;  %v15446_v60 = vadd.f32 %v15445_v6, %v15444_v23  ;;  %11420 = vmatprep.mubr.bf16.mxu1 %v14756_v40  ;;  %16516 = vmatpush3.bf16.msra.mxu1 %v20017_v32  ;;  %v20122_v32 = vsel %vm19262_vm15, %v10934_v27, %v10935_v3  ;;  %v10540_v40 = vshrl.u32 %v20143_v62, 16  ;;  %v18157_v15 = vld [vmem:[%s21229_s3 + $0x160] sm:$0xff]   ;;  %v10549_v23 = vshll.u32 %v20146_v10, 16 }
 0x4f5   : > { %16517 = vmatprep.subr.bf16.mxu1 %v18148_v12  ;;  %v20165_v8 = vsel %vm19262_vm15, %v10941_v51, %v10942_v5  ;;  %v10504_v6 = vsel %vm19068_vm9, %v10499_v47, %v20105_v45  ;;  %v10523_v46 = vrot.slane %v10522_v28, 4  ;;  %v18160_v45 = vld [vmem:[%s21229_s3 + $0x168] sm:$0xff]   ;;  %v10533_v20 = vrot.slane %v10532_v25, 4  ;;  %v18166_v51 = vld [vmem:[%s21229_s3 + $0x178] sm:$0xff]   ;;  %v10814_v5 = vld [vmem:[#allocation3 + $0x90] sm:$0xe] }
 0x4f6   : > { %17136 = vst [vmem:[#allocation4 + $0x68] sm:$0xff] %v15446_v60  ;;  %v14741_v60 = vcombine.low %v20051_v14, %v20056_v57  ;;  %v10542_v61 = vrot.slane %v10540_v40, 4  ;;  %v14758_v4 = vcombine.low %v10504_v6, %v10514_v58  ;;  %v10537_v57 = vrot.slane %v10535_v41, 5  ;;  %v20211_v40 = vld [vmem:[#allocation3 + $0x60] sm:$0xf] }
 0x4f7   : > { %v10559_v47 = vshll.u32 %v20186_v18, 16  ;;  %v14734_v52 = vrot.slane %v10814_v5, 9  ;;  %v10588_v41 = vshrl.u32 %v20211_v40, 16 }
 0x4f8   : > { %16518 = vmatpush3.bf16.msra.mxu1 %v18148_v12  ;;  %v20161_v12 = vsel %vm19262_vm15, %v14733_v63, %v10939_v16  ;;  %v10538_v49 = vsel %vm19068_vm9, %v10533_v20, %v10537_v57  ;;  %v10577_v63 = vshrl.u32 %v20184_v31, 16  ;;  %v20201_v16 = vld [vmem:[#allocation3 + $0x94] sm:$0xf] }
 0x4f9   : > { %16519 = vmatprep.subr.bf16.mxu1 %v18151_v29  ;;  %v10561_v6 = vrot.slane %v10559_v47, 5 }
 0x4fb   : > { %11421 = vmatmul.mubr.bf16.gmra.mrb[228].mxu1 %v14740_v55  ;;  %v10546_v55 = vor.u32 %v10545_v22, %v10542_v61  ;;  %v20229_v61 = vld [vmem:[#allocation3 + $0x5c] sm:$0x1] }
 0x4fc   : > { %11428 = vmatprep.mubr.bf16.mxu1 %v14757_v30  ;;  %16520 = vmatpush3.bf16.msra.mxu1 %v18151_v29  ;;  %v20180_v29 = vrot.slane %v10549_v23, 5  ;;  %v10573_v30 = vshll.u32 %v20184_v31, 16  ;;  %v10566_v23 = vrot.slane %v10564_v50, 4 }
 0x4fd   : > { %16521 = vmatprep.subr.bf16.mxu1 %v18154_v1  ;;  %v10547_v34 = vrot.slane %v10546_v55, 4 }
 0x4fe   : > { %v10556_v54 = vor.u32 %v10555_v21, %v20180_v29  ;;  %v10570_v20 = vor.u32 %v10569_v43, %v10566_v23  ;;  %v20255_v23 = vld [vmem:[#allocation3 + $0x68] sm:$0x1] }
 0x500   : > { %v15447_v39 = vpop.f32.mrb[156].mxu1  ;;  %16522 = vmatpush3.bf16.msra.mxu1 %v18154_v1  ;;  %v10528_v1 = vsel %vm19068_vm9, %v10523_v46, %v20141_v35  ;;  %v14742_v35 = vcombine.low %v20078_v17, %v20080_v24  ;;  %v10557_v25 = vrot.slane %v10556_v54, 4  ;;  %v20214_v17 = vrot.slane %v10573_v30, 5  ;;  %v20247_v54 = vld [vmem:[#allocation3 + $0x6c] sm:$0xf] }
 0x501   : > { %v15448_v59 = vpop.f32.mrb[157].mxu1  ;;  %16523 = vmatprep.subr.bf16.mxu1 %v18157_v15  ;;  %v14759_v28 = vcombine.low %v10528_v1, %v10538_v49  ;;  %v10579_v24 = vrot.slane %v10577_v63, 4  ;;  %v14743_v1 = vcombine.low %v20093_v37, %v20097_v38  ;;  %v10583_v49 = vshll.u32 %v20229_v61, 16 }
 0x502   : > { %v15449_v27 = vadd.f32 %v15448_v59, %v15447_v39  ;;  %v15450_v3 = vpop.f32.mrb[158].mxu1  ;;  %v20216_v39 = vld [vmem:[#allocation3 + $0x64] sm:$0xf]  ;;  %v10949_v59 = vrot.slane %v20206_v26, 5  ;;  %v10562_v46 = vsel %vm19068_vm9, %v10557_v25, %v10561_v6  ;;  %v10590_v30 = vrot.slane %v10588_v41, 4 }
 0x503   : > { %v15451_v0 = vpop.f32.mrb[159].mxu1  ;;  %11429 = vmatmul.mubr.bf16.gmra.mrb[232].mxu1 %v14741_v60  ;;  %v10552_v60 = vsel %vm19068_vm9, %v10547_v34, %v20180_v29  ;;  %v10597_v22 = vshll.u32 %v20216_v39, 16  ;;  %v10580_v29 = vor.u32 %v10579_v24, %v20214_v17  ;;  %v10601_v21 = vshrl.u32 %v20216_v39, 16 }
 0x504   : > { %17109 = vst [vmem:[#allocation4 + $0x70] sm:$0xff] %v15449_v27  ;;  %v15452_v14 = vadd.f32 %v15451_v0, %v15450_v3  ;;  %11436 = vmatprep.mubr.bf16.mxu1 %v14758_v4  ;;  %16524 = vmatpush3.bf16.msra.mxu1 %v18157_v15  ;;  %v10946_v15 = vrot.slane %v20201_v16, 5  ;;  %v10591_v27 = vshll.u32 %v20211_v40, 16  ;;  %v18168_v3 = vld [vmem:[%s21229_s3 + $0x1c0] sm:$0xff]   ;;  %v14760_v11 = vcombine.low %v10552_v60, %v10562_v46 }
 0x505   : > { %16525 = vmatprep.subr.bf16.mxu1 %v18160_v45  ;;  %v10599_v47 = vrot.slane %v10597_v22, 5  ;;  %v10581_v5 = vrot.slane %v10580_v29, 4  ;;  %v10612_v37 = vshrl.u32 %v20247_v54, 16  ;;  %v10615_v38 = vshll.u32 %v20247_v54, 16  ;;  %v20265_v22 = vld [vmem:[#allocation3 + $0x78] sm:$0xf] }
 0x506   : > { %17127 = vst [vmem:[#allocation4 + $0x78] sm:$0xff] %v15452_v14  ;;  %v10948_v58 = vrot.slane %v10946_v15, 4  ;;  %v10593_v63 = vrot.slane %v10591_v27, 5  ;;  %v10585_v25 = vrot.slane %v10583_v49, 5  ;;  %v14744_v41 = vcombine.low %v20143_v62, %v20146_v10 }
 0x507   : > { %v10617_v60 = vrot.slane %v10615_v38, 5  ;;  %v10607_v27 = vshll.u32 %v20255_v23, 16 }
 0x508   : > { %16526 = vmatpush3.bf16.msra.mxu1 %v18160_v45  ;;  %v20234_v45 = vsel %vm19262_vm15, %v14734_v52, %v10946_v15  ;;  %v20238_v0 = vsel %vm19262_vm15, %v10948_v58, %v10949_v59  ;;  %v10594_v43 = vor.u32 %v10593_v63, %v10590_v30  ;;  %v10586_v6 = vsel %vm19068_vm9, %v10581_v5, %v10585_v25 }
 0x509   : > { %16527 = vmatprep.subr.bf16.mxu1 %v18163_v13  ;;  %v10614_v59 = vrot.slane %v10612_v37, 4  ;;  %v10645_v30 = vshll.u32 %v20086_v33, 16  ;;  %v10649_v63 = vshrl.u32 %v20086_v33, 16  ;;  %v14745_v25 = vcombine.low %v20182_v19, %v20184_v31 }
 0x50b   : > { %11437 = vmatmul.mubr.bf16.gmra.mrb[236].mxu1 %v14742_v35  ;;  %v20249_v35 = vld [vmem:[#allocation3 + $0x70] sm:$0xf] }
 0x50c   : > { %11444 = vmatprep.mubr.bf16.mxu1 %v14759_v28  ;;  %16528 = vmatpush3.bf16.msra.mxu1 %v18163_v13  ;;  %v10603_v28 = vrot.slane %v10601_v21, 4  ;;  %v10621_v52 = vshll.u32 %v20249_v35, 16  ;;  %v10625_v15 = vshrl.u32 %v20249_v35, 16  ;;  %v10618_v21 = vor.u32 %v10617_v60, %v10614_v59 }
 0x50d   : > { %16529 = vmatprep.subr.bf16.mxu1 %v18166_v51  ;;  %v10647_v59 = vrot.slane %v10645_v30, 5  ;;  %v10651_v60 = vrot.slane %v10649_v63, 4  ;;  %v10655_v30 = vshll.u32 %v20099_v42, 16 }
 0x50e   : > { %v10604_v58 = vor.u32 %v10603_v28, %v10599_v47  ;;  %v10627_v46 = vrot.slane %v10625_v15, 4 }
 0x510   : > { %v15453_v4 = vpop.f32.mrb[160].mxu1  ;;  %16530 = vmatpush3.bf16.msra.mxu1 %v18166_v51  ;;  %v10571_v51 = vrot.slane %v10570_v20, 4  ;;  %v10595_v20 = vrot.slane %v10594_v43, 4  ;;  %v10605_v29 = vrot.slane %v10604_v58, 4 }
 0x511   : > { %v15454_v57 = vpop.f32.mrb[161].mxu1  ;;  %15661 = vmatprep.subr.bf16.mxu1 %v18168_v3  ;;  %v10623_v3 = vrot.slane %v10621_v52, 5  ;;  %v20280_v52 = vld [vmem:[#allocation3 + $0xc4] sm:$0xf] }
 0x512   : > { %v15455_v55 = vadd.f32 %v15454_v57, %v15453_v4  ;;  %v15456_v13 = vpop.f32.mrb[162].mxu1  ;;  %v10576_v24 = vsel %vm19068_vm9, %v10571_v51, %v20214_v17  ;;  %v20267_v17 = vld [vmem:[#allocation3 + $0x74] sm:$0x1]  ;;  %v10636_v57 = vshrl.u32 %v20265_v22, 16  ;;  %v10619_v51 = vrot.slane %v10618_v21, 4 }
 0x513   : > { %v15457_v50 = vpop.f32.mrb[163].mxu1  ;;  %11445 = vmatmul.mubr.bf16.gmra.mrb[240].mxu1 %v14743_v1  ;;  %v14761_v4 = vcombine.low %v10576_v24, %v10586_v6  ;;  %v10628_v62 = vor.u32 %v10627_v46, %v10623_v3  ;;  %v10600_v1 = vsel %vm19068_vm9, %v10595_v20, %v10599_v47  ;;  %v20282_v24 = vld [vmem:[#allocation3 + $0x84] sm:$0xf]  ;;  %v10818_v46 = vld [vmem:[#allocation3 + $0xc0] sm:$0xe] }
 0x514   : > { %17154 = vst [vmem:[#allocation4 + $0x80] sm:$0xff] %v15455_v55  ;;  %v15458_v34 = vadd.f32 %v15457_v50, %v15456_v13  ;;  %11452 = vmatprep.mubr.bf16.mxu1 %v14760_v11  ;;  %v10639_v55 = vshll.u32 %v20265_v22, 16  ;;  %v10609_v13 = vrot.slane %v10607_v27, 5  ;;  %v10631_v11 = vshll.u32 %v20267_v17, 16 }
 0x515   : > { %v10638_v5 = vrot.slane %v10636_v57, 4  ;;  %v10629_v47 = vrot.slane %v10628_v62, 4  ;;  %v10624_v27 = vsel %vm19068_vm9, %v10619_v51, %v10623_v3  ;;  %v10663_v21 = vshll.u32 %v20282_v24, 16 }
 0x516   : > { %17172 = vst [vmem:[#allocation4 + $0x88] sm:$0xff] %v15458_v34  ;;  %v10610_v50 = vsel %vm19068_vm9, %v10605_v29, %v10609_v13  ;;  %v10641_v28 = vrot.slane %v10639_v55, 5  ;;  %v10633_v58 = vrot.slane %v10631_v11, 5  ;;  %v10660_v29 = vshrl.u32 %v20282_v24, 16 }
 0x517   : > { %v14762_v43 = vcombine.low %v10600_v1, %v10610_v50  ;;  %v14738_v57 = vrot.slane %v10818_v46, 9  ;;  %v10669_v55 = vshll.u32 %v20132_v2, 16  ;;  %v10673_v13 = vshrl.u32 %v20132_v2, 16  ;;  %v20298_v50 = vld [vmem:[#allocation3 + $0x90] sm:$0xf] }
 0x518   : > { %v10642_v19 = vor.u32 %v10641_v28, %v10638_v5  ;;  %v10634_v20 = vsel %vm19068_vm9, %v10629_v47, %v10633_v58  ;;  %v14746_v1 = vcombine.low %v20211_v40, %v20216_v39  ;;  %v10662_v5 = vrot.slane %v10660_v29, 4 }
 0x519   : > { %v14763_v51 = vcombine.low %v10624_v27, %v10634_v20  ;;  %v10665_v28 = vrot.slane %v10663_v21, 5  ;;  %v10687_v42 = vshll.u32 %v20298_v50, 16  ;;  %v20321_v27 = vld [vmem:[#allocation3 + $0xa0] sm:$0xf] }
 0x51a   : > { %v10643_v11 = vrot.slane %v10642_v19, 4 }
 0x51b   : > { %11453 = vmatmul.mubr.bf16.gmra.mrb[244].mxu1 %v14744_v41  ;;  %v20284_v41 = vld [vmem:[#allocation3 + $0xc8] sm:$0x1]  ;;  %v10666_v19 = vor.u32 %v10665_v28, %v10662_v5  ;;  %v10689_v20 = vrot.slane %v10687_v42, 5  ;;  %v10679_v5 = vshll.u32 %v20139_v44, 16 }
 0x51c   : > { %11460 = vmatprep.mubr.bf16.mxu1 %v14761_v4  ;;  %v10974_v4 = vrot.slane %v20280_v52, 5  ;;  %v10977_v3 = vrot.slane %v20284_v41, 5  ;;  %v10648_v58 = vsel %vm19068_vm9, %v10643_v11, %v10647_v59  ;;  %v14747_v11 = vcombine.low %v20247_v54, %v20249_v35 }
 0x51e   : > { %v10976_v62 = vrot.slane %v10974_v4, 4  ;;  %v20303_v63 = vsel %vm19262_vm15, %v14738_v57, %v10974_v4 }
 0x520   : > { %v15459_v49 = vpop.f32.mrb[164].mxu1 }
 0x521   : > { %v15460_v34 = vpop.f32.mrb[165].mxu1 }
 0x522   : > { %v15461_v37 = vadd.f32 %v15460_v34, %v15459_v49  ;;  %v15462_v38 = vpop.f32.mrb[166].mxu1  ;;  %v10652_v49 = vor.u32 %v10651_v60, %v10647_v59  ;;  %v20307_v34 = vsel %vm19262_vm15, %v10976_v62, %v10977_v3  ;;  %v10657_v60 = vrot.slane %v10655_v30, 5 }
 0x523   : > { %v15463_v15 = vpop.f32.mrb[167].mxu1  ;;  %11461 = vmatmul.mubr.bf16.gmra.mrb[248].mxu1 %v14745_v25  ;;  %v10684_v25 = vshrl.u32 %v20298_v50, 16  ;;  %v10717_v3 = vshll.u32 %v20321_v27, 16 }
 0x524   : > { %17145 = vst [vmem:[#allocation4 + $0x90] sm:$0xff] %v15461_v37  ;;  %v15464_v6 = vadd.f32 %v15463_v15, %v15462_v38  ;;  %11468 = vmatprep.mubr.bf16.mxu1 %v14762_v43  ;;  %v20311_v37 = vrot.slane %v10669_v55, 5  ;;  %v10675_v38 = vrot.slane %v10673_v13, 4  ;;  %v10653_v47 = vrot.slane %v10652_v49, 4  ;;  %v20332_v49 = vld [vmem:[#allocation3 + $0xa8] sm:$0xf] }
 0x525   : > { %v10693_v15 = vshll.u32 %v20201_v16, 16  ;;  %v10697_v43 = vshrl.u32 %v20201_v16, 16  ;;  %v10686_v4 = vrot.slane %v10684_v25, 4  ;;  %v10667_v25 = vrot.slane %v10666_v19, 4 }
 0x526   : > { %17163 = vst [vmem:[#allocation4 + $0x98] sm:$0xff] %v15464_v6  ;;  %v20317_v6 = vld [vmem:[#allocation3 + $0x9c] sm:$0xf]  ;;  %v10676_v46 = vor.u32 %v10675_v38, %v20311_v37  ;;  %v10658_v21 = vsel %vm19068_vm9, %v10653_v47, %v10657_v60  ;;  %v10732_v40 = vshrl.u32 %v20332_v49, 16  ;;  %v10735_v54 = vshll.u32 %v20332_v49, 16 }
 0x527   : > { %v20326_v57 = vrot.slane %v10693_v15, 5  ;;  %v10699_v55 = vrot.slane %v10697_v43, 4  ;;  %v10708_v13 = vshrl.u32 %v20317_v6, 16  ;;  %v10711_v59 = vshll.u32 %v20317_v6, 16  ;;  %v20337_v15 = vld [vmem:[#allocation3 + $0xac] sm:$0xf] }
 0x528   : > { %v14764_v38 = vcombine.low %v10648_v58, %v10658_v21  ;;  %v10677_v42 = vrot.slane %v10676_v46, 4  ;;  %v10690_v47 = vor.u32 %v10689_v20, %v10686_v4  ;;  %v20342_v44 = vrot.slane %v10717_v3, 5 }
 0x529   : > { %v10700_v60 = vor.u32 %v10699_v55, %v20326_v57  ;;  %v10681_v19 = vrot.slane %v10679_v5, 5  ;;  %v10741_v46 = vshll.u32 %v20337_v15, 16  ;;  %v10745_v4 = vshrl.u32 %v20337_v15, 16 }
 0x52a   : > { %v10703_v20 = vshll.u32 %v20206_v26, 16  ;;  %v10672_v21 = vsel %vm19068_vm9, %v10667_v25, %v20311_v37  ;;  %v10737_v3 = vrot.slane %v10735_v54, 5  ;;  %v14748_v5 = vcombine.low %v20265_v22, %v20086_v33 }
 0x52b   : > { %11469 = vmatmul.mubr.bf16.gmra.mrb[252].mxu1 %v14746_v1  ;;  %v10721_v1 = vshrl.u32 %v20321_v27, 16  ;;  %v10682_v55 = vsel %vm19068_vm9, %v10677_v42, %v10681_v19  ;;  %v20357_v26 = vrot.slane %v10741_v46, 5  ;;  %v20360_v42 = vld [vmem:[#allocation3 + $0xb0] sm:$0x1]  ;;  %v20373_v19 = vld [vmem:[#allocation3 + $0x44] sm:$0x1] }
 0x52c   : > { %11476 = vmatprep.mubr.bf16.mxu1 %v14763_v51  ;;  %v10705_v37 = vrot.slane %v10703_v20, 5  ;;  %v10751_v54 = vshll.u32 %v20360_v42, 16  ;;  %21293 = vst [vmem:[#allocation7_spill] sm:$0xff] %v20373_v19  ;;  %v20375_v46 = vld [vmem:[#allocation3 + $0x4c] sm:$0xf] }
 0x52d   : > { %v10723_v58 = vrot.slane %v10721_v1, 4  ;;  %v10691_v1 = vrot.slane %v10690_v47, 4 }
 0x52f   : > { %v15465_v29 = vpop.f32.mrb[168].mxu1  ;;  %v10696_v47 = vsel %vm19068_vm9, %v10691_v1, %v20326_v57  ;;  %v14749_v57 = vcombine.low %v20282_v24, %v20132_v2  ;;  %v20390_v24 = vld [vmem:[#allocation3 + $0x50] sm:$0x1] }
 0x530   : > { %v15466_v62 = vpop.f32.mrb[169].mxu1  ;;  %21294 = vst [vmem:[#allocation8_spill] sm:$0xff] %v20390_v24 }
 0x531   : > { %v15467_v30 = vadd.f32 %v15466_v62, %v15465_v29  ;;  %v15468_v51 = vpop.f32.mrb[170].mxu1  ;;  %v10710_v29 = vrot.slane %v10708_v13, 4  ;;  %v10713_v62 = vrot.slane %v10711_v59, 5  ;;  %v20352_v13 = vld [vmem:[#allocation3 + $0xa4] sm:$0x1]  ;;  %v10734_v59 = vrot.slane %v10732_v40, 4 }
 0x532   : > { %v15469_v28 = vpop.f32.mrb[171].mxu1  ;;  %v10727_v25 = vshll.u32 %v20352_v13, 16 }
 0x533   : > { %17190 = vst [vmem:[#allocation4 + $0xa0] sm:$0xff] %v15467_v30  ;;  %v15470_v43 = vadd.f32 %v15469_v28, %v15468_v51  ;;  %11477 = vmatmul.mubr.bf16.gmra.mrb[0].mxu1 %v14747_v11  ;;  %v10701_v11 = vrot.slane %v10700_v60, 4  ;;  %v10714_v30 = vor.u32 %v10713_v62, %v10710_v29  ;;  %v10724_v51 = vor.u32 %v10723_v58, %v20342_v44  ;;  %v20369_v29 = vld [vmem:[#allocation3 + $0xb4] sm:$0xf]  ;;  %v20371_v58 = vld [vmem:[#allocation3 + $0x40] sm:$0xf] }
 0x534   : > { %11484 = vmatprep.mubr.bf16.mxu1 %v14764_v38  ;;  %v10747_v28 = vrot.slane %v10745_v4, 4  ;;  %v14765_v38 = vcombine.low %v10672_v21, %v10682_v55  ;;  %v10738_v40 = vor.u32 %v10737_v3, %v10734_v59  ;;  %v10729_v62 = vrot.slane %v10727_v25, 5  ;;  %21292 = vst [vmem:[#allocation6_spill] sm:$0xff] %v20371_v58  ;;  %v20381_v59 = vld [vmem:[#allocation3 + $0xb8] sm:$0xf] }
 0x535   : > { %17208 = vst [vmem:[#allocation4 + $0xa8] sm:$0xff] %v15470_v43  ;;  %v10706_v43 = vsel %vm19068_vm9, %v10701_v11, %v10705_v37  ;;  %v10715_v33 = vrot.slane %v10714_v30, 4  ;;  %v10725_v22 = vrot.slane %v10724_v51, 4  ;;  %v12234_v3 = vld [vmem:[#allocation3 + $0x3c] sm:$0xe]  ;;  %v10756_v51 = vshrl.u32 %v20369_v29, 16 }
 0x536   : > { %v10748_v60 = vor.u32 %v10747_v28, %v20357_v26  ;;  %v14766_v21 = vcombine.low %v10696_v47, %v10706_v43  ;;  %v10739_v55 = vrot.slane %v10738_v40, 4  ;;  %v10759_v2 = vshll.u32 %v20369_v29, 16  ;;  %v12235_v47 = vld [vmem:[#allocation3 + $0x48] sm:$0xe] }
 0x537   : > { %v10720_v11 = vsel %vm19068_vm9, %v10715_v33, %v20342_v44  ;;  %v10730_v30 = vsel %vm19068_vm9, %v10725_v22, %v10729_v62  ;;  %v10753_v25 = vrot.slane %v10751_v54, 5  ;;  %v12318_v40 = vrot.slane %v20371_v58, 5 }
 0x538   : > { %v10749_v37 = vrot.slane %v10748_v60, 4  ;;  %v10765_v44 = vshll.u32 %v20381_v59, 16  ;;  %v10769_v33 = vshrl.u32 %v20381_v59, 16  ;;  %v14862_v22 = vrot.slane %v12234_v3, 9 }
 0x539   : > { %v12325_v62 = vrot.slane %v20375_v46, 5  ;;  %v12320_v60 = vrot.slane %v12318_v40, 4  ;;  %v12321_v54 = vrot.slane %v20373_v19, 5  ;;  %v10758_v48 = vrot.slane %v10756_v51, 4 }
 0x53a   : > { %v10761_v53 = vrot.slane %v10759_v2, 5  ;;  %v14863_v20 = vrot.slane %v12235_v47, 9  ;;  %v10754_v3 = vsel %vm19068_vm9, %v10749_v37, %v10753_v25  ;;  %v20414_v51 = vrot.slane %v10765_v44, 5  ;;  %v12237_v37 = vld [vmem:[#allocation3 + $0x60] sm:$0xe] }
 0x53b   : > { %11485 = vmatmul.mubr.bf16.gmra.mrb[4].mxu1 %v14748_v5  ;;  %v20392_v5 = vld [vmem:[#allocation3 + $0x58] sm:$0xf]  ;;  %v12327_v58 = vrot.slane %v12325_v62, 4  ;;  %v10771_v2 = vrot.slane %v10769_v33, 4  ;;  %v14767_v47 = vcombine.low %v10720_v11, %v10730_v30  ;;  %v12238_v30 = vld [vmem:[#allocation3 + $0x6c] sm:$0xe] }
 0x53c   : > { %11492 = vmatprep.mubr.bf16.mxu1 %v14765_v38  ;;  %21295 = vst [vmem:[#allocation5_spill] sm:$0xff] %v20392_v5  ;;  %v20441_v25 = vld [vmem:[#allocation3 + $0xc0] sm:$0xf] }
 0x540   : > { %v15471_v4 = vpop.f32.mrb[172].mxu1 }
 0x541   : > { %v15472_v1 = vpop.f32.mrb[173].mxu1 }
 0x542   : > { %v15473_v28 = vadd.f32 %v15472_v1, %v15471_v4  ;;  %v15474_v38 = vpop.f32.mrb[174].mxu1  ;;  %v10744_v4 = vsel %vm19068_vm9, %v10739_v55, %v20357_v26  ;;  %v12236_v1 = vld [vmem:[#allocation3 + $0x54] sm:$0xe]  ;;  %v20410_v26 = vsel %vm19262_vm15, %v12320_v60, %v12321_v54  ;;  %v12328_v55 = vrot.slane %v20390_v24, 5  ;;  %v20424_v60 = vld [vmem:[#allocation3 + $0x68] sm:$0x1] }
 0x543   : > { %v15475_v43 = vpop.f32.mrb[175].mxu1  ;;  %11493 = vmatmul.mubr.bf16.gmra.mrb[8].mxu1 %v14749_v57  ;;  %v20406_v57 = vld [vmem:[#allocation3 + $0x64] sm:$0xf]  ;;  %21298 = vst [vmem:[#allocation11_spill] sm:$0xff] %v20410_v26  ;;  %21300 = vst [vmem:[#allocation13_spill] sm:$0xff] %v20424_v60  ;;  %v20432_v33 = vcombine.low %v10744_v4, %v10754_v3  ;;  %v21307_v54 = vcombine.low %v20298_v50, %v20201_v16 }
 0x544   : > { %17181 = vst [vmem:[#allocation4 + $0xb0] sm:$0xff] %v15473_v28  ;;  %v15476_v14 = vadd.f32 %v15475_v43, %v15474_v38  ;;  %11500 = vmatprep.mubr.bf16.mxu1 %v14766_v21  ;;  %v20404_v28 = vld [vmem:[#allocation3 + $0x5c] sm:$0x1]  ;;  %21297 = vst [vmem:[#allocation10_spill] sm:$0xff] %v20406_v57  ;;  %v12332_v21 = vrot.slane %v20392_v5, 5  ;;  %v14864_v38 = vrot.slane %v12236_v1, 9  ;;  %v20430_v44 = vsel %vm19262_vm15, %v12327_v58, %v12328_v55 }
 0x545   : > { %21296 = vst [vmem:[#allocation9_spill] sm:$0xff] %v20404_v28  ;;  %v20422_v43 = vld [vmem:[#allocation3 + $0xbc] sm:$0x1]  ;;  %21301 = vst [vmem:[#allocation14_spill] sm:$0xff] %v20430_v44  ;;  %v20438_v1 = vsel %vm19262_vm15, %v14863_v20, %v12325_v62  ;;  %v12335_v11 = vrot.slane %v20404_v28, 5  ;;  %v14865_v58 = vrot.slane %v12237_v37, 9 }
 0x546   : > { %17199 = vst [vmem:[#allocation4 + $0xb8] sm:$0xff] %v15476_v14  ;;  %v20418_v14 = vsel %vm19262_vm15, %v14862_v22, %v12318_v40  ;;  %v10762_v40 = vor.u32 %v10761_v53, %v10758_v48  ;;  %v20434_v22 = vld [vmem:[#allocation3 + $0x70] sm:$0xf]  ;;  %21303 = vst [vmem:[#allocation16_spill] sm:$0xff] %v20438_v1  ;;  %v12334_v26 = vrot.slane %v12332_v21, 4  ;;  %v12339_v4 = vrot.slane %v20406_v57, 5 }
 0x547   : > { %21299 = vst [vmem:[#allocation12_spill] sm:$0xff] %v20418_v14  ;;  %21302 = vst [vmem:[#allocation15_spill] sm:$0xff] %v20434_v22  ;;  %v10772_v53 = vor.u32 %v10771_v2, %v20414_v51  ;;  %v10775_v48 = vshll.u32 %v20422_v43, 16  ;;  %v20448_v3 = vld [vmem:[#allocation3 + $0x74] sm:$0x1]  ;;  %v20454_v62 = vsel %vm19262_vm15, %v14864_v38, %v12332_v21  ;;  %v12342_v55 = vrot.slane %v20424_v60, 5 }
 0x548   : > { %21304 = vst [vmem:[#allocation17_spill] sm:$0xff] %v20448_v3  ;;  %v20450_v20 = vld [vmem:[#allocation3 + $0x7c] sm:$0xf]  ;;  %21306 = vst [vmem:[#allocation19_spill] sm:$0xff] %v20454_v62  ;;  %v20462_v37 = vsel %vm19262_vm15, %v12334_v26, %v12335_v11  ;;  %v12341_v2 = vrot.slane %v12339_v4, 4  ;;  %v14866_v44 = vrot.slane %v12238_v30, 9  ;;  %v20475_v26 = vsel %vm19262_vm15, %v14865_v58, %v12339_v4 }
 0x549   : > { %21305 = vst [vmem:[#allocation18_spill] sm:$0xff] %v20450_v20  ;;  %21308 = vst [vmem:[#allocation20_spill] sm:$0xff] %v20462_v37  ;;  %v12346_v1 = vrot.slane %v20434_v22, 5  ;;  %v12239_v14 = vld [vmem:[#allocation3 + $0x78] sm:$0xe]  ;;  %v10763_v28 = vrot.slane %v10762_v40, 4 }
 0x54a   : > { %v10780_v21 = vshrl.u32 %v20441_v25, 16  ;;  %v10783_v38 = vshll.u32 %v20441_v25, 16  ;;  %v20467_v60 = vld [vmem:[#allocation3 + $0x80] sm:$0x1]  ;;  %v20471_v50 = vld [vmem:[#allocation3 + $0x88] sm:$0xf] }
 0x54b   : > { %11501 = vmatmul.mubr.bf16.gmra.mrb[12].mxu1 %v21307_v54  ;;  %21309 = vst [vmem:[#allocation21_spill] sm:$0xff] %v20467_v60  ;;  %21310 = vst [vmem:[#allocation22_spill] sm:$0xff] %v20475_v26  ;;  %v20479_v54 = vsel %vm19262_vm15, %v12341_v2, %v12342_v55  ;;  %v12349_v40 = vrot.slane %v20448_v3, 5  ;;  %v12240_v11 = vld [vmem:[#allocation3 + $0x84] sm:$0xe]  ;;  %v10789_v30 = vshll.u32 %v20280_v52, 16  ;;  %v20489_v55 = vsel %vm19262_vm15, %v14866_v44, %v12346_v1 }
 0x54c   : > { %11508 = vmatprep.mubr.bf16.mxu1 %v14767_v47  ;;  %21311 = vst [vmem:[#allocation23_spill] sm:$0xff] %v20479_v54  ;;  %v12348_v47 = vrot.slane %v12346_v1, 4  ;;  %v14867_v16 = vrot.slane %v12239_v14, 9  ;;  %v12353_v37 = vrot.slane %v20450_v20, 5  ;;  %v10793_v58 = vshrl.u32 %v20280_v52, 16 }
 0x54d   : > { %v11840_v4 = vld [vmem:[#allocation3 + $0x8c] sm:$0x1]  ;;  %v12356_v3 = vrot.slane %v20467_v60, 5  ;;  %v14868_v54 = vrot.slane %v12240_v11, 9  ;;  %v12360_v26 = vrot.slane %v20471_v50, 5  ;;  %v10773_v5 = vrot.slane %v10772_v53, 4 }
 0x54e   : > { %v20493_v2 = vsel %vm19262_vm15, %v12348_v47, %v12349_v40  ;;  %v12355_v22 = vrot.slane %v12353_v37, 4  ;;  %v10782_v19 = vrot.slane %v10780_v21, 4  ;;  %v10785_v44 = vrot.slane %v10783_v38, 5 }
 0x54f   : > { %v15477_v62 = vpop.f32.mrb[176].mxu1  ;;  %v20501_v47 = vsel %vm19262_vm15, %v14867_v16, %v12353_v37  ;;  %v12362_v60 = vrot.slane %v12360_v26, 4  ;;  %v12363_v14 = vrot.slane %v11840_v4, 5  ;;  %v10791_v53 = vrot.slane %v10789_v30, 5  ;;  %v20528_v16 = vld [vmem:[#allocation3 + $0x94] sm:$0xf] }
 0x550   : > { %v15478_v57 = vpop.f32.mrb[177].mxu1  ;;  %v20505_v40 = vsel %vm19262_vm15, %v12355_v22, %v12356_v3  ;;  %v20515_v37 = vsel %vm19262_vm15, %v14868_v54, %v12360_v26  ;;  %v10768_v3 = vsel %vm19068_vm9, %v10763_v28, %v20414_v51  ;;  %v10799_v26 = vshll.u32 %v20284_v41, 16  ;;  %v11841_v54 = vld [vmem:[#allocation3 + $0x98] sm:$0x1]  ;;  %v12241_v30 = vld [vmem:[#allocation3 + $0x90] sm:$0xe] }
 0x551   : > { %v15479_v20 = vadd.f32 %v15478_v57, %v15477_v62  ;;  %v15480_v24 = vpop.f32.mrb[178].mxu1  ;;  %v21312_v57 = vcombine.low %v20317_v6, %v20321_v27  ;;  %v10795_v62 = vrot.slane %v10793_v58, 4  ;;  %v20519_v22 = vsel %vm19262_vm15, %v12362_v60, %v12363_v14 }
 0x552   : > { %v15481_v1 = vpop.f32.mrb[179].mxu1  ;;  %v14752_v60 = vcombine.low %v20332_v49, %v20337_v15  ;;  %v14869_v14 = vrot.slane %v12241_v30, 9  ;;  %v12367_v28 = vrot.slane %v20528_v16, 5  ;;  %v12370_v51 = vrot.slane %v11841_v54, 5 }
 0x553   : > { %17226 = vst [vmem:[#allocation4 + $0xc0] sm:$0xff] %v15479_v20  ;;  %v15482_v11 = vadd.f32 %v15481_v1, %v15480_v24  ;;  %11509 = vmatmul.mubr.bf16.gmra.mrb[16].mxu1 %v21312_v57  ;;  %v10777_v24 = vrot.slane %v10775_v48, 5  ;;  %v10786_v20 = vor.u32 %v10785_v44, %v10782_v19  ;;  %v10796_v38 = vor.u32 %v10795_v62, %v10791_v53  ;;  %v18216_v44 = vld [vmem:[#allocation3 + $0x10] sm:$0xf] }
 0x554   : > { %11516 = vmatprep.mubr.bf16.mxu1 %v20432_v33  ;;  %v12369_v19 = vrot.slane %v12367_v28, 4  ;;  %v10869_v1 = vrot.slane %v18216_v44, 5  ;;  %v20540_v57 = vsel %vm19262_vm15, %v14869_v14, %v12367_v28  ;;  %v18218_v14 = vld [vmem:[#allocation3 + $0x1c] sm:$0xf]  ;;  %v14754_v44 = vcombine.low %v20441_v25, %v20280_v52  ;;  %v18221_v52 = vld [vmem:[#allocation3 + $0x2c] sm:$0x1] }
 0x555   : > { %17244 = vst [vmem:[#allocation4 + $0xc8] sm:$0xff] %v15482_v11  ;;  %v10778_v33 = vsel %vm19068_vm9, %v10773_v5, %v10777_v24  ;;  %v10787_v58 = vrot.slane %v10786_v20, 4  ;;  %v10797_v4 = vrot.slane %v10796_v38, 4  ;;  %v10801_v5 = vrot.slane %v10799_v26, 5  ;;  %v10803_v26 = vld [vmem:[#allocation3 + $0xc] sm:$0xe] }
 0x556   : > { %v14769_v48 = vcombine.low %v10768_v3, %v10778_v33  ;;  %v20544_v62 = vsel %vm19262_vm15, %v12369_v19, %v12370_v51  ;;  %v14753_v33 = vcombine.low %v20369_v29, %v20381_v59  ;;  %v10871_v54 = vrot.slane %v10869_v1, 4  ;;  %v18219_v29 = vld [vmem:[#allocation3 + $0x28] sm:$0xf]  ;;  %v20552_v51 = vld [vmem:[#allocation3 + $0xa0] sm:$0xf] }
 0x557   : > { %v10792_v49 = vsel %vm19068_vm9, %v10787_v58, %v10791_v53  ;;  %v10802_v41 = vsel %vm19068_vm9, %v10797_v4, %v10801_v5  ;;  %v14723_v30 = vrot.slane %v10803_v26, 9  ;;  %v18217_v58 = vld [vmem:[#allocation3 + $0x14] sm:$0x1]  ;;  %v10876_v28 = vrot.slane %v18218_v14, 5  ;;  %v18223_v3 = vld [vmem:[#allocation3 + $0x40] sm:$0xf] }
 0x558   : > { %v10872_v4 = vrot.slane %v18217_v58, 5  ;;  %v10883_v19 = vrot.slane %v18219_v29, 5  ;;  %v12374_v26 = vrot.slane %v20552_v51, 5  ;;  %v10886_v25 = vrot.slane %v18221_v52, 5  ;;  %v18222_v29 = vld [vmem:[#allocation3 + $0x34] sm:$0xf] }
 0x559   : > { %v10897_v6 = vrot.slane %v18223_v3, 5  ;;  %v18170_v52 = vld [vmem:[%s21229_s3 + $0x1c8] sm:$0xff]  }
 0x55a   : > { %v10873_v5 = vsel %vm19262_vm15, %v10871_v54, %v10872_v4  ;;  %v12376_v14 = vrot.slane %v12374_v26, 4 }
 0x55b   : > { %11517 = vmatmul.mubr.bf16.gmra.mrb[20].mxu1 %v14752_v60  ;;  %v14770_v60 = vcombine.low %v10792_v49, %v10802_v41  ;;  %v10804_v49 = vld [vmem:[#allocation3 + $0x18] sm:$0xe]  ;;  %v10805_v41 = vld [vmem:[#allocation3 + $0x24] sm:$0xe] }
 0x55c   : > { %11524 = vmatprep.mubr.bf16.mxu1 %v14769_v48  ;;  %v14724_v58 = vrot.slane %v10804_v49, 9  ;;  %v14725_v4 = vrot.slane %v10805_v41, 9 }
 0x55f   : > { %v15483_v11 = vpop.f32.mrb[180].mxu1 }
 0x560   : > { %v15484_v24 = vpop.f32.mrb[181].mxu1 }
 0x561   : > { %v15485_v20 = vadd.f32 %v15484_v24, %v15483_v11  ;;  %v15486_v53 = vpop.f32.mrb[182].mxu1  ;;  %v10870_v11 = vsel %vm19262_vm15, %v14723_v30, %v10869_v1 }
 0x562   : > { %v15487_v38 = vpop.f32.mrb[183].mxu1  ;;  %v14771_v24 = vcombine.low %v10870_v11, %v10873_v5  ;;  %v10890_v11 = vrot.slane %v18222_v29, 5 }
 0x563   : > { %17217 = vst [vmem:[#allocation4 + $0xd0] sm:$0xff] %v15485_v20  ;;  %v15488_v48 = vadd.f32 %v15487_v38, %v15486_v53  ;;  %11525 = vmatmul.mubr.bf16.gmra.mrb[24].mxu1 %v14753_v33  ;;  %v10878_v33 = vrot.slane %v10876_v28, 4  ;;  %v11842_v20 = vld [vmem:[#allocation3 + $0xa4] sm:$0x1]  ;;  %v12242_v53 = vld [vmem:[#allocation3 + $0x9c] sm:$0xe] }
 0x564   : > { %11532 = vmatprep.mubr.bf16.mxu1 %v14770_v60  ;;  %v10885_v38 = vrot.slane %v10883_v19, 4  ;;  %v14870_v60 = vrot.slane %v12242_v53, 9  ;;  %v12377_v1 = vrot.slane %v11842_v20, 5 }
 0x565   : > { %17235 = vst [vmem:[#allocation4 + $0xd8] sm:$0xff] %v15488_v48  ;;  %v18220_v48 = vld [vmem:[#allocation3 + $0x20] sm:$0x1] }
 0x566   : > { %v10879_v54 = vrot.slane %v18220_v48, 5  ;;  %v10887_v53 = vsel %vm19262_vm15, %v10885_v38, %v10886_v25  ;;  %v20565_v49 = vsel %vm19262_vm15, %v14870_v60, %v12374_v26  ;;  %v20569_v41 = vsel %vm19262_vm15, %v12376_v14, %v12377_v1  ;;  %v18169_v48 = vld [vmem:[%s21229_s3 + $0x180] sm:$0xff]   ;;  %v10806_v26 = vld [vmem:[#allocation3 + $0x30] sm:$0xe]  ;;  %v10807_v14 = vld [vmem:[#allocation3 + $0x3c] sm:$0xe] }
 0x567   : > { %v10884_v60 = vsel %vm19262_vm15, %v14725_v4, %v10883_v19  ;;  %v10899_v1 = vrot.slane %v10897_v6, 4  ;;  %v18171_v19 = vld [vmem:[%s21229_s3 + $0x188] sm:$0xff]   ;;  %v14727_v4 = vrot.slane %v10807_v14, 9 }
 0x568   : > { %v10880_v5 = vsel %vm19262_vm15, %v10878_v33, %v10879_v54  ;;  %v10877_v33 = vsel %vm19262_vm15, %v14724_v58, %v10876_v28  ;;  %v14773_v28 = vcombine.low %v10884_v60, %v10887_v53  ;;  %v10892_v58 = vrot.slane %v10890_v11, 4  ;;  %v18172_v53 = vld [vmem:[%s21229_s3 + $0x1d0] sm:$0xff]  }
 0x569   : > { %v14772_v54 = vcombine.low %v10877_v33, %v10880_v5  ;;  %v18224_v5 = vld [vmem:[#allocation3 + $0x38] sm:$0x1]  ;;  %v10898_v60 = vsel %vm19262_vm15, %v14727_v4, %v10897_v6 }
 0x56a   : > { %v10893_v29 = vrot.slane %v18224_v5, 5  ;;  %v18175_v6 = vld [vmem:[%s21229_s3 + $0x198] sm:$0xff]  }
 0x56b   : > { %11533 = vmatmul.mubr.bf16.gmra.mrb[28].mxu1 %v14754_v44 }
 0x56c   : > { %16531 = vmatprep.mubr.bf16.mxu1 %v14771_v24 }
 0x56e   : > { %v15489_v30 = vpop.f32.mrb[184].mxu1 }
 0x56f   : > { %v15490_v44 = vpop.f32.mrb[185].mxu1 }
 0x570   : > { %v15491_v24 = vadd.f32 %v15490_v44, %v15489_v30  ;;  %v15492_v20 = vpop.f32.mrb[186].mxu1  ;;  %v14726_v30 = vrot.slane %v10806_v26, 9  ;;  %v10900_v44 = vrot.slane %v20149_v9, 5  ;;  %v18173_v9 = vld [vmem:[%s21229_s3 + $0x190] sm:$0xff]   ;;  %v10808_v26 = vld [vmem:[#allocation3 + $0x48] sm:$0xe] }
 0x571   : > { %v15493_v38 = vpop.f32.mrb[187].mxu1 }
 0x572   : > { %17262 = vst [vmem:[#allocation4 + $0xe0] sm:$0xff] %v15491_v24  ;;  %v15494_v25 = vadd.f32 %v15493_v38, %v15492_v20  ;;  %v10894_v24 = vsel %vm19262_vm15, %v10892_v58, %v10893_v29  ;;  %v10904_v20 = vrot.slane %v20146_v10, 5  ;;  %v10901_v33 = vsel %vm19262_vm15, %v10899_v1, %v10900_v44  ;;  %v18174_v10 = vld [vmem:[%s21229_s3 + $0x1d8] sm:$0xff]  }
 0x573   : > { %16532 = vmatmul.mubr.bf16.vlgmr.msra.gmra.mrb[192].mxu1 %v14772_v54  ;;  %v10891_v38 = vsel %vm19262_vm15, %v14726_v30, %v10890_v11  ;;  %v10907_v58 = vrot.slane %v20186_v18, 5  ;;  %v10914_v1 = vrot.slane %v20229_v61, 5  ;;  %v18176_v30 = vld [vmem:[%s21229_s3 + $0x1e0] sm:$0xff]   ;;  %v10925_v44 = vrot.slane %v20249_v35, 5  ;;  %v18178_v35 = vld [vmem:[%s21229_s3 + $0x1e8] sm:$0xff]  }
 0x574   : > { %17280 = vst [vmem:[#allocation4 + $0xe8] sm:$0xff] %v15494_v25  ;;  %16535 = vmatprep.mubr.bf16.mxu1 %v14773_v28  ;;  %15662 = vmatpush3.bf16.msra.mxu1 %v18169_v48  ;;  %v10911_v48 = vrot.slane %v20184_v31, 5  ;;  %v14774_v54 = vcombine.low %v10891_v38, %v10894_v24  ;;  %v10906_v31 = vrot.slane %v10904_v20, 4  ;;  %v10809_v25 = vld [vmem:[#allocation3 + $0x54] sm:$0xe]  ;;  %v14728_v28 = vrot.slane %v10808_v26, 9 }
 0x575   : > { %15663 = vmatprep.subr.bf16.mxu1 %v18170_v52  ;;  %v14775_v52 = vcombine.low %v10898_v60, %v10901_v33  ;;  %v14729_v14 = vrot.slane %v10809_v25, 9  ;;  %v18177_v33 = vld [vmem:[%s21229_s3 + $0x1a0] sm:$0xff]   ;;  %v10921_v25 = vrot.slane %v20255_v23, 5 }
 0x576   : > { %v10913_v11 = vrot.slane %v10911_v48, 4  ;;  %v10908_v29 = vsel %vm19262_vm15, %v10906_v31, %v10907_v58  ;;  %v10905_v61 = vsel %vm19262_vm15, %v14728_v28, %v10904_v20  ;;  %v10928_v28 = vrot.slane %v20267_v17, 5  ;;  %v18180_v58 = vld [vmem:[%s21229_s3 + $0x1f0] sm:$0xff]  }
 0x578   : > { %15664 = vmatpush3.bf16.msra.mxu1 %v18171_v19  ;;  %v10918_v19 = vrot.slane %v20216_v39, 5  ;;  %v10915_v4 = vsel %vm19262_vm15, %v10913_v11, %v10914_v1  ;;  %v10912_v39 = vsel %vm19262_vm15, %v14729_v14, %v10911_v48  ;;  %v18179_v48 = vld [vmem:[%s21229_s3 + $0x1a8] sm:$0xff]   ;;  %v18181_v1 = vld [vmem:[%s21229_s3 + $0x1b0] sm:$0xff]  }
 0x579   : > { %15665 = vmatprep.subr.bf16.mxu1 %v18172_v53  ;;  %v14777_v26 = vcombine.low %v10912_v39, %v10915_v4  ;;  %v10953_v4 = vrot.slane %v20321_v27, 5  ;;  %v10956_v27 = vrot.slane %v20352_v13, 5  ;;  %v10960_v39 = vrot.slane %v20337_v15, 5  ;;  %v10817_v15 = vld [vmem:[#allocation3 + $0xb4] sm:$0xe] }
 0x57a   : > { %v10920_v20 = vrot.slane %v10918_v19, 4 }
 0x57b   : > { %16536 = vmatmul.mubr.bf16.gmra.mrb[196].mxu1 %v14774_v54  ;;  %v10810_v54 = vld [vmem:[#allocation3 + $0x60] sm:$0xe] }
 0x57c   : > { %16539 = vmatprep.mubr.bf16.mxu1 %v14775_v52  ;;  %15666 = vmatpush3.bf16.msra.mxu1 %v18173_v9  ;;  %v14776_v9 = vcombine.low %v10905_v61, %v10908_v29  ;;  %v10927_v52 = vrot.slane %v10925_v44, 4  ;;  %v14730_v31 = vrot.slane %v10810_v54, 9  ;;  %v20665_v61 = vld [vmem:[#allocation3 + $0x18] sm:$0xf] }
 0x57d   : > { %15667 = vmatprep.subr.bf16.mxu1 %v18174_v10  ;;  %v10811_v10 = vld [vmem:[#allocation3 + $0x6c] sm:$0xe]  ;;  %v11848_v54 = vshrl.u32 %v20665_v61, 16 }
 0x57e   : > { %v15495_v5 = vpop.f32.mrb[188].mxu1  ;;  %v14731_v11 = vrot.slane %v10811_v10, 9  ;;  %v10929_v14 = vsel %vm19262_vm15, %v10927_v52, %v10928_v28  ;;  %v10919_v23 = vsel %vm19262_vm15, %v14730_v31, %v10918_v19  ;;  %v18183_v19 = vld [vmem:[%s21229_s3 + $0x1b8] sm:$0xff]   ;;  %v21315_v31 = vcombine.low %v20234_v45, %v20238_v0 }
 0x57f   : > { %v15496_v18 = vpop.f32.mrb[189].mxu1  ;;  %v11850_v10 = vrot.slane %v11848_v54, 4 }
 0x580   : > { %v15497_v53 = vadd.f32 %v15496_v18, %v15495_v5  ;;  %v15498_v24 = vpop.f32.mrb[190].mxu1  ;;  %15668 = vmatpush3.bf16.msra.mxu1 %v18175_v6  ;;  %v10922_v6 = vsel %vm19262_vm15, %v10920_v20, %v10921_v25  ;;  %v18182_v5 = vld [vmem:[%s21229_s3 + $0x1f8] sm:$0xff]   ;;  %v20658_v18 = vld [vmem:[%s21229_s3 + $0x200] sm:$0xff]   ;;  %v10962_v20 = vrot.slane %v10960_v39, 4 }
 0x581   : > { %v15499_v38 = vpop.f32.mrb[191].mxu1  ;;  %15669 = vmatprep.subr.bf16.mxu1 %v18176_v30  ;;  %v14778_v17 = vcombine.low %v10919_v23, %v10922_v6  ;;  %v10926_v30 = vsel %vm19262_vm15, %v14731_v11, %v10925_v44  ;;  %v10815_v44 = vld [vmem:[#allocation3 + $0x9c] sm:$0xe]  ;;  %v20686_v11 = vld [vmem:[#allocation3 + $0x24] sm:$0xf]  ;;  %v10970_v23 = vrot.slane %v20422_v43, 5 }
 0x582   : > { %17253 = vst [vmem:[#allocation4 + $0xf0] sm:$0xff] %v15497_v53  ;;  %v15500_v60 = vadd.f32 %v15499_v38, %v15498_v24  ;;  %v14779_v29 = vcombine.low %v10926_v30, %v10929_v14  ;;  %v21313_v53 = vcombine.low %v20118_v36, %v20122_v32  ;;  %v10955_v24 = vrot.slane %v10953_v4, 4  ;;  %v20670_v38 = vld [vmem:[#allocation3 + $0x1c] sm:$0xf]  ;;  %v20689_v6 = vld [vmem:[#allocation3 + $0x28] sm:$0xf] }
 0x583   : > { %16540 = vmatmul.mubr.bf16.gmra.mrb[200].mxu1 %v14776_v9  ;;  %v14735_v9 = vrot.slane %v10815_v44, 9  ;;  %v10967_v32 = vrot.slane %v20381_v59, 5  ;;  %v14737_v14 = vrot.slane %v10817_v15, 9  ;;  %v11872_v0 = vshrl.u32 %v20686_v11, 16 }
 0x584   : > { %17271 = vst [vmem:[#allocation4 + $0xf8] sm:$0xff] %v15500_v60  ;;  %16543 = vmatprep.mubr.bf16.mxu1 %v14777_v26  ;;  %15670 = vmatpush3.bf16.msra.mxu1 %v18177_v33  ;;  %v21314_v33 = vcombine.low %v20161_v12, %v20165_v8  ;;  %v10957_v36 = vsel %vm19262_vm15, %v10955_v24, %v10956_v27  ;;  %v11857_v60 = vshll.u32 %v20670_v38, 16  ;;  %v11861_v12 = vshrl.u32 %v20670_v38, 16  ;;  %v10816_v26 = vld [vmem:[#allocation3 + $0xa8] sm:$0xe] }
 0x585   : > { %15671 = vmatprep.subr.bf16.mxu1 %v18178_v35  ;;  %v11851_v35 = vshll.u32 %v20665_v61, 16  ;;  %v10954_v8 = vsel %vm19262_vm15, %v14735_v9, %v10953_v4  ;;  %v10969_v25 = vrot.slane %v10967_v32, 4  ;;  %v14736_v28 = vrot.slane %v10816_v26, 9  ;;  %v20707_v24 = vld [vmem:[#allocation3 + $0x30] sm:$0xf] }
 0x586   : > { %v14783_v13 = vcombine.low %v10954_v8, %v10957_v36  ;;  %v11863_v59 = vrot.slane %v11861_v12, 4  ;;  %v11875_v30 = vshll.u32 %v20686_v11, 16  ;;  %v10968_v44 = vsel %vm19262_vm15, %v14737_v14, %v10967_v32  ;;  %v20709_v12 = vld [vmem:[#allocation3 + $0x34] sm:$0xf]  ;;  %v20713_v26 = vld [vmem:[#allocation3 + $0x2c] sm:$0x1] }
 0x587   : > { %v11853_v52 = vrot.slane %v11851_v35, 5  ;;  %v10961_v43 = vsel %vm19262_vm15, %v14736_v28, %v10960_v39  ;;  %v11874_v27 = vrot.slane %v11872_v0, 4  ;;  %v11896_v39 = vshrl.u32 %v20707_v24, 16 }
 0x588   : > { %15672 = vmatpush3.bf16.msra.mxu1 %v18179_v48  ;;  %v11859_v48 = vrot.slane %v11857_v60, 5  ;;  %v11877_v35 = vrot.slane %v11875_v30, 5  ;;  %v11899_v8 = vshll.u32 %v20707_v24, 16 }
 0x589   : > { %15673 = vmatprep.subr.bf16.mxu1 %v18180_v58  ;;  %v10963_v58 = vrot.slane %v20360_v42, 5  ;;  %v11854_v45 = vor.u32 %v11853_v52, %v11850_v10  ;;  %v11881_v42 = vshll.u32 %v20689_v6, 16 }
 0x58a   : > { %v11878_v52 = vor.u32 %v11877_v35, %v11874_v27  ;;  %v11901_v28 = vrot.slane %v11899_v8, 5 }
 0x58b   : > { %16544 = vmatmul.mubr.bf16.gmra.mrb[204].mxu1 %v14778_v17  ;;  %v20694_v17 = vld [vmem:[#allocation3 + $0x20] sm:$0x1]  ;;  %v11855_v9 = vrot.slane %v11854_v45, 4  ;;  %v11883_v36 = vrot.slane %v11881_v42, 5  ;;  %v21316_v45 = vcombine.low %v20303_v63, %v20307_v34 }
 0x58c   : > { %16547 = vmatprep.mubr.bf16.mxu1 %v14779_v29  ;;  %15674 = vmatpush3.bf16.msra.mxu1 %v18181_v1  ;;  %v10964_v1 = vsel %vm19262_vm15, %v10962_v20, %v10963_v58  ;;  %v11864_v29 = vor.u32 %v11863_v59, %v11859_v48  ;;  %v11909_v20 = vshrl.u32 %v20709_v12, 16  ;;  %v11898_v59 = vrot.slane %v11896_v39, 4 }
 0x58d   : > { %15675 = vmatprep.subr.bf16.mxu1 %v18182_v5  ;;  %v10971_v5 = vsel %vm19262_vm15, %v10969_v25, %v10970_v23  ;;  %v14784_v4 = vcombine.low %v10961_v43, %v10964_v1  ;;  %v11860_v15 = vsel %vm19068_vm9, %v11855_v9, %v11859_v48  ;;  %v11891_v25 = vshll.u32 %v20713_v26, 16  ;;  %v20722_v1 = vld [vmem:[#allocation3 + $0x3c] sm:$0xf]  ;;  %v21317_v43 = vld [vmem:[#allocation6_spill] sm:$0xff] }
 0x58e   : > { %v11865_v54 = vrot.slane %v11864_v29, 4  ;;  %v11911_v23 = vrot.slane %v11909_v20, 4  ;;  %v11879_v0 = vrot.slane %v11878_v52, 4  ;;  %v20727_v29 = vld [vmem:[#allocation3 + $0x38] sm:$0x1]  ;;  %v11920_v42 = vshrl.u32 %v20722_v1, 16 }
 0x58f   : > { %v11893_v30 = vrot.slane %v11891_v25, 5  ;;  %v11915_v27 = vshll.u32 %v20727_v29, 16 }
 0x590   : > { %15676 = vmatpush3.bf16.msra.mxu1 %v18183_v19  ;;  %v11885_v19 = vshrl.u32 %v20689_v6, 16  ;;  %v11884_v63 = vsel %vm19068_vm9, %v11879_v0, %v11883_v36  ;;  %v11922_v35 = vrot.slane %v11920_v42, 4 }
 0x591   : > { %16563 = vmatprep.subr.bf16.mxu1 %v20658_v18 }
 0x592   : > { %v11887_v60 = vrot.slane %v11885_v19, 4  ;;  %v11923_v19 = vshll.u32 %v20722_v1, 16 }
 0x593   : > { %16548 = vmatmul.mubr.bf16.gmra.mrb[208].mxu1 %v21313_v53  ;;  %v11867_v53 = vshll.u32 %v20694_v17, 16 }
 0x594   : > { %16551 = vmatprep.mubr.bf16.mxu1 %v21314_v33  ;;  %v14785_v33 = vcombine.low %v10968_v44, %v10971_v5  ;;  %v11902_v5 = vor.u32 %v11901_v28, %v11898_v59  ;;  %v11933_v44 = vshrl.u32 %v21317_v43, 16  ;;  %v11957_v28 = vshrl.u32 %v20375_v46, 16 }
 0x595   : > { %v11869_v32 = vrot.slane %v11867_v53, 5 }
 0x596   : > { %v11903_v9 = vrot.slane %v11902_v5, 4  ;;  %v11935_v8 = vrot.slane %v11933_v44, 4  ;;  %v20763_v44 = vld [vmem:[#allocation3 + $0x54] sm:$0xf] }
 0x597   : > { %v11870_v10 = vsel %vm19068_vm9, %v11865_v54, %v11869_v32  ;;  %v18188_v54 = vld [vmem:[%s21229_s3 + $0x208] sm:$0xff]  }
 0x598   : > { %v14891_v58 = vcombine.low %v11860_v15, %v11870_v10 }
 0x59b   : > { %16552 = vmatmul.mubr.bf16.gmra.mrb[212].mxu1 %v21315_v31  ;;  %v11888_v31 = vor.u32 %v11887_v60, %v11883_v36  ;;  %v11925_v60 = vrot.slane %v11923_v19, 5  ;;  %v20743_v36 = vld [vmem:[#allocation3 + $0x48] sm:$0xf] }
 0x59c   : > { %16555 = vmatprep.mubr.bf16.mxu1 %v14783_v13  ;;  %v11905_v13 = vshll.u32 %v20709_v12, 16  ;;  %v11944_v52 = vshrl.u32 %v20743_v36, 16  ;;  %v11947_v59 = vshll.u32 %v20743_v36, 16 }
 0x59d   : > { %v11889_v48 = vrot.slane %v11888_v31, 4  ;;  %v11926_v15 = vor.u32 %v11925_v60, %v11922_v35  ;;  %v18191_v31 = vld [vmem:[%s21229_s3 + $0x210] sm:$0xff]  }
 0x59e   : > { %v11907_v14 = vrot.slane %v11905_v13, 5  ;;  %v11946_v5 = vrot.slane %v11944_v52, 4  ;;  %v11949_v42 = vrot.slane %v11947_v59, 5  ;;  %v20784_v59 = vld [vmem:[#allocation3 + $0x60] sm:$0xf] }
 0x59f   : > { %v11894_v34 = vsel %vm19068_vm9, %v11889_v48, %v11893_v30  ;;  %v11927_v0 = vrot.slane %v11926_v15, 4  ;;  %v18194_v30 = vld [vmem:[%s21229_s3 + $0x218] sm:$0xff]   ;;  %v18200_v15 = vld [vmem:[%s21229_s3 + $0x228] sm:$0xff]  }
 0x5a0   : > { %v11912_v53 = vor.u32 %v11911_v23, %v11907_v14  ;;  %v14892_v32 = vcombine.low %v11884_v63, %v11894_v34  ;;  %v11908_v20 = vsel %vm19068_vm9, %v11903_v9, %v11907_v14  ;;  %v14876_v23 = vcombine.low %v20686_v11, %v20689_v6 }
 0x5a1   : > { %v11968_v63 = vshrl.u32 %v20763_v44, 16  ;;  %v11971_v34 = vshll.u32 %v20763_v44, 16  ;;  %v11950_v9 = vor.u32 %v11949_v42, %v11946_v5  ;;  %v21321_v5 = vld [vmem:[#allocation10_spill] sm:$0xff] }
 0x5a2   : > { %v11913_v13 = vrot.slane %v11912_v53, 4  ;;  %v12001_v42 = vshll.u32 %v21321_v5, 16 }
 0x5a3   : > { %16556 = vmatmul.mubr.bf16.gmra.mrb[216].mxu1 %v14784_v4  ;;  %v11929_v4 = vshll.u32 %v21317_v43, 16 }
 0x5a4   : > { %16559 = vmatprep.mubr.bf16.mxu1 %v14785_v33  ;;  %v14875_v33 = vcombine.low %v20665_v61, %v20670_v38  ;;  %v11917_v61 = vrot.slane %v11915_v27, 5 }
 0x5a5   : > { %v11931_v39 = vrot.slane %v11929_v4, 5  ;;  %v11959_v4 = vrot.slane %v11957_v28, 4  ;;  %v18203_v28 = vld [vmem:[%s21229_s3 + $0x230] sm:$0xff]  }
 0x5a6   : > { %v11918_v25 = vsel %vm19068_vm9, %v11913_v13, %v11917_v61  ;;  %v11970_v61 = vrot.slane %v11968_v63, 4  ;;  %v17011_v63 = vld [vmem:[#allocation4] sm:$0xff] }
 0x5a7   : > { %v11936_v10 = vor.u32 %v11935_v8, %v11931_v39  ;;  %v11932_v11 = vsel %vm19068_vm9, %v11927_v0, %v11931_v39  ;;  %v21320_v8 = vld [vmem:[#allocation8_spill] sm:$0xff]  ;;  %v11992_v0 = vshrl.u32 %v20784_v59, 16 }
 0x5a8   : > { %v11963_v39 = vshll.u32 %v21320_v8, 16 }
 0x5a9   : > { %v11937_v48 = vrot.slane %v11936_v10, 4  ;;  %v11951_v10 = vrot.slane %v11950_v9, 4 }
 0x5ab   : > { %16560 = vmatmul.mubr.bf16.gmra.mrb[220].mxu1 %v21316_v45  ;;  %v14893_v45 = vcombine.low %v11908_v20, %v11918_v25  ;;  %v11973_v20 = vrot.slane %v11971_v34, 5 }
 0x5ac   : > { %12840 = vmatprep.mubr.bf16.mxu1 %v14891_v58  ;;  %v21318_v58 = vld [vmem:[#allocation7_spill] sm:$0xff] }
 0x5ad   : > { %v11939_v14 = vshll.u32 %v21318_v58, 16 }
 0x5b3   : > { %12841 = vmatmul.mubr.bf16.vlgmr.msra.gmra.mrb[32].mxu1 %v14875_v33  ;;  %v18197_v33 = vld [vmem:[%s21229_s3 + $0x220] sm:$0xff]  }
 0x5b4   : > { %12848 = vmatprep.mubr.bf16.mxu1 %v14892_v32  ;;  %16564 = vmatpush3.bf16.msra.mxu1 %v20658_v18  ;;  %v11953_v18 = vshll.u32 %v20375_v46, 16  ;;  %v11941_v46 = vrot.slane %v11939_v14, 5  ;;  %v14877_v32 = vcombine.low %v20707_v24, %v20709_v12  ;;  %v11974_v24 = vor.u32 %v11973_v20, %v11970_v61 }
 0x5b5   : > { %16565 = vmatprep.subr.bf16.mxu1 %v18188_v54  ;;  %v20806_v20 = vrot.slane %v12001_v42, 5 }
 0x5b6   : > { %v11955_v19 = vrot.slane %v11953_v18, 5  ;;  %v11942_v53 = vsel %vm19068_vm9, %v11937_v48, %v11941_v46  ;;  %v11965_v18 = vrot.slane %v11963_v39, 5  ;;  %v11975_v9 = vrot.slane %v11974_v24, 4 }
 0x5b7   : > { %v14894_v13 = vcombine.low %v11932_v11, %v11942_v53  ;;  %v20798_v53 = vld [vmem:[#allocation3 + $0x6c] sm:$0xf] }
 0x5b8   : > { %16566 = vmatpush3.bf16.msra.mxu1 %v18188_v54  ;;  %v11960_v27 = vor.u32 %v11959_v4, %v11955_v19  ;;  %v21319_v54 = vld [vmem:[#allocation5_spill] sm:$0xff]  ;;  %v11956_v14 = vsel %vm19068_vm9, %v11951_v10, %v11955_v19  ;;  %v12005_v4 = vshrl.u32 %v21321_v5, 16  ;;  %v14878_v19 = vcombine.low %v20722_v1, %v21317_v43 }
 0x5b9   : > { %16567 = vmatprep.subr.bf16.mxu1 %v18191_v31  ;;  %v11977_v35 = vshll.u32 %v21319_v54, 16  ;;  %v11981_v60 = vshrl.u32 %v21319_v54, 16  ;;  %v12016_v43 = vshrl.u32 %v20798_v53, 16  ;;  %v12019_v10 = vshll.u32 %v20798_v53, 16 }
 0x5ba   : > { %v11961_v52 = vrot.slane %v11960_v27, 4  ;;  %v21322_v27 = vld [vmem:[#allocation9_spill] sm:$0xff]  ;;  %v12007_v1 = vrot.slane %v12005_v4, 4 }
 0x5bb   : > { %12849 = vmatmul.mubr.bf16.gmra.mrb[36].mxu1 %v14876_v23  ;;  %v11983_v25 = vrot.slane %v11981_v60, 4  ;;  %v11987_v54 = vshll.u32 %v21322_v27, 16  ;;  %v12018_v42 = vrot.slane %v12016_v43, 4 }
 0x5bc   : > { %12856 = vmatprep.mubr.bf16.mxu1 %v14893_v45  ;;  %16568 = vmatpush3.bf16.msra.mxu1 %v18191_v31  ;;  %v20782_v31 = vrot.slane %v11977_v35, 5  ;;  %v11966_v23 = vsel %vm19068_vm9, %v11961_v52, %v11965_v18  ;;  %v18206_v35 = vld [vmem:[%s21229_s3 + $0x238] sm:$0xff]   ;;  %v21323_v52 = vld [vmem:[#allocation15_spill] sm:$0xff]  ;;  %v12008_v5 = vor.u32 %v12007_v1, %v20806_v20 }
 0x5bd   : > { %16569 = vmatprep.subr.bf16.mxu1 %v18194_v30  ;;  %v12029_v18 = vshrl.u32 %v21323_v52, 16  ;;  %v11989_v24 = vrot.slane %v11987_v54, 5 }
 0x5be   : > { %v11984_v45 = vor.u32 %v11983_v25, %v20782_v31  ;;  %v12025_v25 = vshll.u32 %v21323_v52, 16 }
 0x5c0   : > { %16570 = vmatpush3.bf16.msra.mxu1 %v18194_v30  ;;  %v11995_v30 = vshll.u32 %v20784_v59, 16  ;;  %v11985_v39 = vrot.slane %v11984_v45, 4 }
 0x5c1   : > { %16571 = vmatprep.subr.bf16.mxu1 %v18197_v33 }
 0x5c2   : > { %v11997_v61 = vrot.slane %v11995_v30, 5 }
 0x5c3   : > { %12857 = vmatmul.mubr.bf16.gmra.mrb[40].mxu1 %v14877_v32  ;;  %v11994_v32 = vrot.slane %v11992_v0, 4 }
 0x5c4   : > { %12864 = vmatprep.mubr.bf16.mxu1 %v14894_v13  ;;  %16572 = vmatpush3.bf16.msra.mxu1 %v18197_v33  ;;  %v14895_v33 = vcombine.low %v11956_v14, %v11966_v23  ;;  %v17029_v13 = vld [vmem:[#allocation4 + $0x8] sm:$0xff]  ;;  %v11980_v14 = vsel %vm19068_vm9, %v11975_v9, %v20782_v31  ;;  %v21324_v23 = vld [vmem:[#allocation13_spill] sm:$0xff] }
 0x5c5   : > { %16573 = vmatprep.subr.bf16.mxu1 %v18200_v15  ;;  %v12011_v45 = vshll.u32 %v21324_v23, 16  ;;  %v11998_v30 = vor.u32 %v11997_v61, %v11994_v32  ;;  %v12009_v32 = vrot.slane %v12008_v5, 4 }
 0x5c6   : > { %v15541_v58 = vpop.f32.mrb[224].mxu1 }
 0x5c7   : > { %v15542_v48 = vpop.f32.mrb[225].mxu1  ;;  %v12013_v61 = vrot.slane %v12011_v45, 5  ;;  %v18226_v45 = vld [vmem:[#allocation3 + $0x58] sm:$0xf] }
 0x5c8   : > { %v15543_v46 = vadd.f32 %v15542_v48, %v15541_v58  ;;  %v15544_v11 = vpop.f32.mrb[226].mxu1  ;;  %16574 = vmatpush3.bf16.msra.mxu1 %v18200_v15  ;;  %v11990_v48 = vsel %vm19068_vm9, %v11985_v39, %v11989_v24  ;;  %v11999_v39 = vrot.slane %v11998_v30, 4 }
 0x5c9   : > { %v15545_v34 = vpop.f32.mrb[227].mxu1  ;;  %16575 = vmatprep.subr.bf16.mxu1 %v18203_v28  ;;  %v14896_v54 = vcombine.low %v11980_v14, %v11990_v48  ;;  %v12014_v23 = vsel %vm19068_vm9, %v12009_v32, %v12013_v61  ;;  %v21327_v61 = vld [vmem:[#allocation21_spill] sm:$0xff] }
 0x5ca   : > { %v17012_v60 = vadd.f32 %v17011_v63, %v15543_v46  ;;  %v15546_v8 = vadd.f32 %v15545_v34, %v15544_v11  ;;  %v12021_v46 = vrot.slane %v12019_v10, 5  ;;  %v20819_v11 = vrot.slane %v12025_v25, 5  ;;  %v18225_v63 = vld [vmem:[#allocation3 + $0x4c] sm:$0xf] }
 0x5cb   : > { %12865 = vmatmul.mubr.bf16.gmra.mrb[44].mxu1 %v14878_v19  ;;  %v12031_v19 = vrot.slane %v12029_v18, 4  ;;  %v14879_v31 = vcombine.low %v20743_v36, %v18225_v63  ;;  %v17002_v34 = vld [vmem:[#allocation4 + $0x10] sm:$0xff]  ;;  %v21326_v18 = vld [vmem:[#allocation17_spill] sm:$0xff]  ;;  %v12004_v14 = vsel %vm19068_vm9, %v11999_v39, %v20806_v20 }
 0x5cc   : > { %17013 = vst [vmem:[#allocation4] sm:$0xff] %v17012_v60  ;;  %v17030_v15 = vadd.f32 %v17029_v13, %v15546_v8  ;;  %12872 = vmatprep.mubr.bf16.mxu1 %v14895_v33  ;;  %16576 = vmatpush3.bf16.msra.mxu1 %v18203_v28  ;;  %v20822_v60 = vld [vmem:[#allocation3 + $0x78] sm:$0xf]  ;;  %v17020_v8 = vld [vmem:[#allocation4 + $0x18] sm:$0xff]  ;;  %v12022_v1 = vor.u32 %v12021_v46, %v12018_v42  ;;  %v12035_v24 = vshll.u32 %v21326_v18, 16 }
 0x5cd   : > { %16577 = vmatprep.subr.bf16.mxu1 %v18206_v35  ;;  %v12040_v36 = vshrl.u32 %v20822_v60, 16  ;;  %v12043_v43 = vshll.u32 %v20822_v60, 16  ;;  %v14897_v20 = vcombine.low %v12004_v14, %v12014_v23  ;;  %v17038_v14 = vld [vmem:[#allocation4 + $0x30] sm:$0xff] }
 0x5ce   : > { %17031 = vst [vmem:[#allocation4 + $0x8] sm:$0xff] %v17030_v15  ;;  %v15547_v58 = vpop.f32.mrb[228].mxu1  ;;  %v21325_v15 = vld [vmem:[#allocation18_spill] sm:$0xff]  ;;  %v12023_v5 = vrot.slane %v12022_v1, 4  ;;  %v12059_v1 = vshll.u32 %v21327_v61, 16  ;;  %v12097_v61 = vshll.u32 %v20528_v16, 16 }
 0x5cf   : > { %v15548_v0 = vpop.f32.mrb[229].mxu1  ;;  %v12049_v10 = vshll.u32 %v21325_v15, 16  ;;  %v12053_v52 = vshrl.u32 %v21325_v15, 16  ;;  %v12042_v46 = vrot.slane %v12040_v36, 4  ;;  %v12073_v15 = vshll.u32 %v20471_v50, 16 }
 0x5d0   : > { %v15549_v4 = vadd.f32 %v15548_v0, %v15547_v58  ;;  %v15550_v28 = vpop.f32.mrb[230].mxu1  ;;  %16578 = vmatpush3.bf16.msra.mxu1 %v18206_v35  ;;  %v12032_v35 = vor.u32 %v12031_v19, %v20819_v11  ;;  %v14880_v0 = vcombine.low %v20763_v44, %v18226_v45  ;;  %v12045_v19 = vrot.slane %v12043_v43, 5 }
 0x5d1   : > { %v15551_v33 = vpop.f32.mrb[231].mxu1  ;;  %v20836_v63 = vrot.slane %v12049_v10, 5 }
 0x5d2   : > { %v17003_v9 = vadd.f32 %v17002_v34, %v15549_v4  ;;  %v15552_v27 = vadd.f32 %v15551_v33, %v15550_v28  ;;  %v12033_v42 = vrot.slane %v12032_v35, 4  ;;  %v17047_v4 = vld [vmem:[#allocation4 + $0x20] sm:$0xff]  ;;  %v12046_v32 = vor.u32 %v12045_v19, %v12042_v46  ;;  %v20854_v46 = vld [vmem:[#allocation3 + $0x90] sm:$0xf] }
 0x5d3   : > { %12873 = vmatmul.mubr.bf16.gmra.mrb[48].mxu1 %v14879_v31  ;;  %v12055_v31 = vrot.slane %v12053_v52, 4  ;;  %v12077_v52 = vshrl.u32 %v20471_v50, 16  ;;  %v17056_v50 = vld [vmem:[#allocation4 + $0x38] sm:$0xff] }
 0x5d4   : > { %17004 = vst [vmem:[#allocation4 + $0x10] sm:$0xff] %v17003_v9  ;;  %v17021_v13 = vadd.f32 %v17020_v8, %v15552_v27  ;;  %12880 = vmatprep.mubr.bf16.mxu1 %v14896_v54  ;;  %v12037_v9 = vrot.slane %v12035_v24, 5  ;;  %v20838_v27 = vld [vmem:[#allocation3 + $0x84] sm:$0xf]  ;;  %v12028_v8 = vsel %vm19068_vm9, %v12023_v5, %v20819_v11  ;;  %v12047_v45 = vrot.slane %v12046_v32, 4 }
 0x5d5   : > { %v17065_v54 = vld [vmem:[#allocation4 + $0x28] sm:$0xff]  ;;  %v12064_v35 = vshrl.u32 %v20838_v27, 16  ;;  %v12067_v43 = vshll.u32 %v20838_v27, 16  ;;  %v12079_v19 = vrot.slane %v12077_v52, 4  ;;  %v12088_v32 = vshrl.u32 %v20854_v46, 16 }
 0x5d6   : > { %17022 = vst [vmem:[#allocation4 + $0x18] sm:$0xff] %v17021_v13  ;;  %v15553_v25 = vpop.f32.mrb[232].mxu1  ;;  %v12038_v39 = vsel %vm19068_vm9, %v12033_v42, %v12037_v9  ;;  %v12056_v13 = vor.u32 %v12055_v31, %v20836_v63  ;;  %v18227_v11 = vld [vmem:[#allocation3 + $0x64] sm:$0xf]  ;;  %v20858_v31 = vld [vmem:[#allocation3 + $0xd4] sm:$0x1] }
 0x5d7   : > { %v15554_v58 = vpop.f32.mrb[233].mxu1  ;;  %v12405_v9 = vrot.slane %v20858_v31, 5 }
 0x5d8   : > { %v15555_v48 = vadd.f32 %v15554_v58, %v15553_v25  ;;  %v15556_v30 = vpop.f32.mrb[234].mxu1  ;;  %v14881_v25 = vcombine.low %v20784_v59, %v18227_v11  ;;  %v14898_v58 = vcombine.low %v12028_v8, %v12038_v39  ;;  %v20856_v59 = vld [vmem:[#allocation3 + $0xd0] sm:$0xf] }
 0x5d9   : > { %v15557_v28 = vpop.f32.mrb[235].mxu1 }
 0x5da   : > { %v17048_v34 = vadd.f32 %v17047_v4, %v15555_v48  ;;  %v15558_v33 = vadd.f32 %v15557_v28, %v15556_v30  ;;  %v12061_v48 = vrot.slane %v12059_v1, 5  ;;  %v12066_v30 = vrot.slane %v12064_v35, 4 }
 0x5db   : > { %12881 = vmatmul.mubr.bf16.gmra.mrb[52].mxu1 %v14880_v0  ;;  %v12057_v0 = vrot.slane %v12056_v13, 4  ;;  %v12069_v4 = vrot.slane %v12067_v43, 5  ;;  %v20852_v28 = vrot.slane %v12073_v15, 5  ;;  %v12091_v13 = vshll.u32 %v20854_v46, 16 }
 0x5dc   : > { %17049 = vst [vmem:[#allocation4 + $0x20] sm:$0xff] %v17048_v34  ;;  %v17066_v44 = vadd.f32 %v17065_v54, %v15558_v33  ;;  %12888 = vmatprep.mubr.bf16.mxu1 %v14897_v20  ;;  %v12246_v33 = vld [vmem:[#allocation3 + $0xcc] sm:$0xe]  ;;  %v12402_v20 = vrot.slane %v20856_v59, 5  ;;  %v12052_v54 = vsel %vm19068_vm9, %v12047_v45, %v20836_v63  ;;  %v12101_v15 = vshrl.u32 %v20528_v16, 16 }
 0x5dd   : > { %v14874_v8 = vrot.slane %v12246_v33, 9  ;;  %v12080_v43 = vor.u32 %v12079_v19, %v20852_v28 }
 0x5de   : > { %17067 = vst [vmem:[#allocation4 + $0x28] sm:$0xff] %v17066_v44  ;;  %v15559_v36 = vpop.f32.mrb[236].mxu1  ;;  %v12062_v44 = vsel %vm19068_vm9, %v12057_v0, %v12061_v48  ;;  %v12404_v1 = vrot.slane %v12402_v20, 4  ;;  %v20881_v0 = vld [vmem:[#allocation3 + $0x9c] sm:$0xf] }
 0x5df   : > { %v15560_v10 = vpop.f32.mrb[237].mxu1  ;;  %v20874_v63 = vsel %vm19262_vm15, %v14874_v8, %v12402_v20  ;;  %v12081_v19 = vrot.slane %v12080_v43, 4  ;;  %v12112_v20 = vshrl.u32 %v20881_v0, 16 }
 0x5e0   : > { %v15561_v18 = vadd.f32 %v15560_v10, %v15559_v36  ;;  %v15562_v24 = vpop.f32.mrb[238].mxu1  ;;  %v12070_v36 = vor.u32 %v12069_v4, %v12066_v30  ;;  %v20878_v11 = vsel %vm19262_vm15, %v12404_v1, %v12405_v9  ;;  %v17101_v4 = vld [vmem:[#allocation4 + $0x48] sm:$0xff]  ;;  %v12115_v9 = vshll.u32 %v20881_v0, 16 }
 0x5e1   : > { %v15563_v23 = vpop.f32.mrb[239].mxu1 }
 0x5e2   : > { %v17039_v5 = vadd.f32 %v17038_v14, %v15561_v18  ;;  %v15564_v42 = vadd.f32 %v15563_v23, %v15562_v24  ;;  %v17083_v24 = vld [vmem:[#allocation4 + $0x40] sm:$0xff]  ;;  %v14899_v14 = vcombine.low %v12052_v54, %v12062_v44  ;;  %v18229_v23 = vld [vmem:[#allocation3 + $0x8c] sm:$0x1]  ;;  %v12121_v44 = vshll.u32 %v20552_v51, 16 }
 0x5e3   : > { %12889 = vmatmul.mubr.bf16.gmra.mrb[56].mxu1 %v14881_v25  ;;  %v18228_v25 = vld [vmem:[#allocation3 + $0x70] sm:$0xf]  ;;  %v12083_v45 = vshll.u32 %v18229_v23, 16 }
 0x5e4   : > { %17040 = vst [vmem:[#allocation4 + $0x30] sm:$0xff] %v17039_v5  ;;  %v17057_v34 = vadd.f32 %v17056_v50, %v15564_v42  ;;  %12896 = vmatprep.mubr.bf16.mxu1 %v14898_v58  ;;  %v14882_v18 = vcombine.low %v20798_v53, %v18228_v25  ;;  %v12090_v5 = vrot.slane %v12088_v32, 4  ;;  %v12093_v42 = vrot.slane %v12091_v13, 5 }
 0x5e5   : > { %v12071_v50 = vrot.slane %v12070_v36, 4  ;;  %v12103_v53 = vrot.slane %v12101_v15, 4  ;;  %v12085_v54 = vrot.slane %v12083_v45, 5  ;;  %v18230_v15 = vld [vmem:[#allocation3 + $0x98] sm:$0x1]  ;;  %v12117_v25 = vrot.slane %v12115_v9, 5 }
 0x5e6   : > { %17058 = vst [vmem:[#allocation4 + $0x38] sm:$0xff] %v17057_v34  ;;  %v15565_v39 = vpop.f32.mrb[240].mxu1  ;;  %v20885_v34 = vrot.slane %v12097_v61, 5  ;;  %v12094_v1 = vor.u32 %v12093_v42, %v12090_v5  ;;  %v20902_v5 = vld [vmem:[#allocation3 + $0xac] sm:$0xf]  ;;  %v17092_v42 = vld [vmem:[#allocation4 + $0x58] sm:$0xff] }
 0x5e7   : > { %v15566_v35 = vpop.f32.mrb[241].mxu1  ;;  %v12076_v13 = vsel %vm19068_vm9, %v12071_v50, %v20852_v28  ;;  %v12086_v61 = vsel %vm19068_vm9, %v12081_v19, %v12085_v54  ;;  %v12145_v9 = vshll.u32 %v20902_v5, 16  ;;  %v12149_v54 = vshrl.u32 %v20902_v5, 16 }
 0x5e8   : > { %v15567_v10 = vadd.f32 %v15566_v35, %v15565_v39  ;;  %v15568_v52 = vpop.f32.mrb[242].mxu1  ;;  %v12125_v39 = vshrl.u32 %v20552_v51, 16  ;;  %v12104_v35 = vor.u32 %v12103_v53, %v20885_v34  ;;  %v14900_v45 = vcombine.low %v12076_v13, %v12086_v61  ;;  %v18232_v61 = vld [vmem:[#allocation3 + $0x88] sm:$0xf] }
 0x5e9   : > { %v15569_v58 = vpop.f32.mrb[243].mxu1 }
 0x5ea   : > { %v17084_v48 = vadd.f32 %v17083_v24, %v15567_v10  ;;  %v15570_v30 = vadd.f32 %v15569_v58, %v15568_v52  ;;  %v12107_v10 = vshll.u32 %v18230_v15, 16  ;;  %v12114_v52 = vrot.slane %v12112_v20, 4  ;;  %v17074_v24 = vld [vmem:[#allocation4 + $0x50] sm:$0xff]  ;;  %v18233_v15 = vld [vmem:[#allocation3 + $0xa4] sm:$0x1] }
 0x5eb   : > { %12897 = vmatmul.mubr.bf16.gmra.mrb[60].mxu1 %v14882_v18  ;;  %v18231_v18 = vld [vmem:[#allocation3 + $0x7c] sm:$0xf]  ;;  %v12105_v50 = vrot.slane %v12104_v35, 4 }
 0x5ec   : > { %17085 = vst [vmem:[#allocation4 + $0x40] sm:$0xff] %v17084_v48  ;;  %v17102_v33 = vadd.f32 %v17101_v4, %v15570_v30  ;;  %12904 = vmatprep.mubr.bf16.mxu1 %v14899_v14  ;;  %v14883_v51 = vcombine.low %v20822_v60, %v18231_v18  ;;  %v20898_v14 = vrot.slane %v12121_v44, 5  ;;  %v12127_v48 = vrot.slane %v12125_v39, 4  ;;  %v20900_v30 = vld [vmem:[#allocation3 + $0xa8] sm:$0xf] }
 0x5ed   : > { %v12095_v4 = vrot.slane %v12094_v1, 4  ;;  %v12109_v60 = vrot.slane %v12107_v10, 5  ;;  %v12118_v53 = vor.u32 %v12117_v25, %v12114_v52  ;;  %v12139_v20 = vshll.u32 %v20900_v30, 16 }
 0x5ee   : > { %17103 = vst [vmem:[#allocation4 + $0x48] sm:$0xff] %v17102_v33  ;;  %v15571_v8 = vpop.f32.mrb[244].mxu1  ;;  %v12136_v33 = vshrl.u32 %v20900_v30, 16  ;;  %v14884_v1 = vcombine.low %v20838_v27, %v18232_v61  ;;  %v12131_v10 = vshll.u32 %v18233_v15, 16 }
 0x5ef   : > { %v15572_v32 = vpop.f32.mrb[245].mxu1  ;;  %v12110_v13 = vsel %vm19068_vm9, %v12105_v50, %v12109_v60  ;;  %v12141_v18 = vrot.slane %v12139_v20, 5 }
 0x5f0   : > { %v15573_v36 = vadd.f32 %v15572_v32, %v15571_v8  ;;  %v15574_v43 = vpop.f32.mrb[246].mxu1  ;;  %v12128_v8 = vor.u32 %v12127_v48, %v20898_v14  ;;  %v12100_v32 = vsel %vm19068_vm9, %v12095_v4, %v20885_v34  ;;  %v12138_v25 = vrot.slane %v12136_v33, 4 }
 0x5f1   : > { %v15575_v58 = vpop.f32.mrb[247].mxu1  ;;  %v14901_v34 = vcombine.low %v12100_v32, %v12110_v13  ;;  %v12133_v27 = vrot.slane %v12131_v10, 5 }
 0x5f2   : > { %v17075_v28 = vadd.f32 %v17074_v24, %v15573_v36  ;;  %v15576_v23 = vadd.f32 %v15575_v58, %v15574_v43  ;;  %v12119_v43 = vrot.slane %v12118_v53, 4  ;;  %v12151_v24 = vrot.slane %v12149_v54, 4 }
 0x5f3   : > { %12905 = vmatmul.mubr.bf16.gmra.mrb[64].mxu1 %v14883_v51  ;;  %v12147_v51 = vrot.slane %v12145_v9, 5  ;;  %v12142_v4 = vor.u32 %v12141_v18, %v12138_v25 }
 0x5f4   : > { %17076 = vst [vmem:[#allocation4 + $0x50] sm:$0xff] %v17075_v28  ;;  %v17093_v19 = vadd.f32 %v17092_v42, %v15576_v23  ;;  %12912 = vmatprep.mubr.bf16.mxu1 %v14900_v45  ;;  %v12129_v28 = vrot.slane %v12128_v8, 4  ;;  %v20919_v23 = vld [vmem:[#allocation3 + $0xb4] sm:$0xf]  ;;  %v20921_v45 = vld [vmem:[#allocation3 + $0xb8] sm:$0xf]  ;;  %v12124_v48 = vsel %vm19068_vm9, %v12119_v43, %v20898_v14 }
 0x5f5   : > { %v20926_v42 = vld [vmem:[#allocation3 + $0xb0] sm:$0x1]  ;;  %v12152_v50 = vor.u32 %v12151_v24, %v12147_v51  ;;  %v12163_v33 = vshll.u32 %v20919_v23, 16  ;;  %v12169_v20 = vshll.u32 %v20921_v45, 16  ;;  %v12173_v9 = vshrl.u32 %v20921_v45, 16 }
 0x5f6   : > { %17094 = vst [vmem:[#allocation4 + $0x58] sm:$0xff] %v17093_v19  ;;  %v15577_v44 = vpop.f32.mrb[248].mxu1  ;;  %v12160_v19 = vshrl.u32 %v20919_v23, 16  ;;  %v12134_v53 = vsel %vm19068_vm9, %v12129_v28, %v12133_v27  ;;  %v12155_v32 = vshll.u32 %v20926_v42, 16  ;;  %v20940_v24 = vld [vmem:[#allocation3 + $0xc0] sm:$0xf] }
 0x5f7   : > { %v15578_v39 = vpop.f32.mrb[249].mxu1  ;;  %v14902_v61 = vcombine.low %v12124_v48, %v12134_v53  ;;  %v12165_v10 = vrot.slane %v12163_v33, 5  ;;  %v12175_v25 = vrot.slane %v12173_v9, 4  ;;  %v12187_v53 = vshll.u32 %v20940_v24, 16 }
 0x5f8   : > { %v20915_v35 = vadd.f32 %v15578_v39, %v15577_v44  ;;  %v15580_v36 = vpop.f32.mrb[250].mxu1  ;;  %v18234_v44 = vld [vmem:[#allocation3 + $0x94] sm:$0xf]  ;;  %v12162_v43 = vrot.slane %v12160_v19, 4  ;;  %v12157_v18 = vrot.slane %v12155_v32, 5 }
 0x5f9   : > { %v15581_v52 = vpop.f32.mrb[251].mxu1  ;;  %v14885_v14 = vcombine.low %v20854_v46, %v18234_v44  ;;  %v20942_v46 = vld [vmem:[#allocation3 + $0xc4] sm:$0xf] }
 0x5fa   : > { %v20917_v58 = vadd.f32 %v15581_v52, %v15580_v36  ;;  %v12153_v36 = vrot.slane %v12152_v50, 4  ;;  %v12171_v52 = vrot.slane %v12169_v20, 5  ;;  %v12193_v33 = vshll.u32 %v20942_v46, 16 }
 0x5fb   : > { %12913 = vmatmul.mubr.bf16.gmra.mrb[68].mxu1 %v14884_v1  ;;  %v12143_v1 = vrot.slane %v12142_v4, 4  ;;  %v12166_v4 = vor.u32 %v12165_v10, %v12162_v43  ;;  %v12197_v20 = vshrl.u32 %v20942_v46, 16  ;;  %v12189_v10 = vrot.slane %v12187_v53, 5 }
 0x5fc   : > { %12920 = vmatprep.mubr.bf16.mxu1 %v14901_v34  ;;  %v20944_v34 = vld [vmem:[#allocation3 + $0xbc] sm:$0x1]  ;;  %v12158_v48 = vsel %vm19068_vm9, %v12153_v36, %v12157_v18  ;;  %v12176_v50 = vor.u32 %v12175_v25, %v12171_v52  ;;  %v20960_v36 = vld [vmem:[#allocation3 + $0xcc] sm:$0xf]  ;;  %v12195_v25 = vrot.slane %v12193_v33, 5 }
 0x5fd   : > { %v12148_v27 = vsel %vm19068_vm9, %v12143_v1, %v12147_v51  ;;  %v12179_v44 = vshll.u32 %v20944_v34, 16  ;;  %v18235_v51 = vld [vmem:[#allocation3 + $0xa0] sm:$0xf]  ;;  %v12199_v18 = vrot.slane %v12197_v20, 4  ;;  %v12208_v16 = vshrl.u32 %v20960_v36, 16 }
 0x5fe   : > { %v15583_v60 = vpop.f32.mrb[252].mxu1  ;;  %v12177_v1 = vrot.slane %v12176_v50, 4  ;;  %v14887_v20 = vcombine.low %v20900_v30, %v20902_v5 }
 0x5ff   : > { %v15584_v54 = vpop.f32.mrb[253].mxu1  ;;  %v12200_v33 = vor.u32 %v12199_v18, %v12195_v25  ;;  %v12227_v18 = vshll.u32 %v20858_v31, 16 }
 0x600   : > { %v20935_v8 = vadd.f32 %v15584_v54, %v15583_v60  ;;  %v15586_v39 = vpop.f32.mrb[254].mxu1  ;;  %v12184_v60 = vshrl.u32 %v20940_v24, 16 }
 0x601   : > { %v15587_v13 = vpop.f32.mrb[255].mxu1 }
 0x602   : > { %v20938_v15 = vadd.f32 %v15587_v13, %v15586_v39  ;;  %v14903_v13 = vcombine.low %v12148_v27, %v12158_v48  ;;  %v12186_v43 = vrot.slane %v12184_v60, 4  ;;  %v12221_v27 = vshrl.u32 %v20856_v59, 16 }
 0x603   : > { %12921 = vmatmul.mubr.bf16.gmra.mrb[72].mxu1 %v14885_v14  ;;  %v14886_v14 = vcombine.low %v20881_v0, %v18235_v51  ;;  %v12211_v0 = vshll.u32 %v20960_v36, 16 }
 0x604   : > { %12928 = vmatprep.mubr.bf16.mxu1 %v14902_v61  ;;  %v12167_v61 = vrot.slane %v12166_v4, 4  ;;  %v12190_v53 = vor.u32 %v12189_v10, %v12186_v43 }
 0x605   : > { %v12213_v3 = vrot.slane %v12211_v0, 5 }
 0x606   : > { %v15589_v28 = vpop.f32.mrb[0].mxu1  ;;  %v12172_v50 = vsel %vm19068_vm9, %v12167_v61, %v12171_v52  ;;  %v12191_v61 = vrot.slane %v12190_v53, 4 }
 0x607   : > { %v15590_v19 = vpop.f32.mrb[1].mxu1 }
 0x608   : > { %v20954_v9 = vadd.f32 %v15590_v19, %v15589_v28  ;;  %v15592_v54 = vpop.f32.mrb[2].mxu1  ;;  %v12181_v28 = vrot.slane %v12179_v44, 5  ;;  %v20962_v19 = vld [vmem:[#allocation3 + $0xc8] sm:$0x1] }
 0x609   : > { %v15593_v39 = vpop.f32.mrb[3].mxu1 }
 0x60a   : > { %21328 = vst [vmem:[#allocation6_spill] sm:$0xff] %v20954_v9  ;;  %v20958_v32 = vadd.f32 %v15593_v39, %v15592_v54  ;;  %v12217_v54 = vshll.u32 %v20856_v59, 16  ;;  %v12182_v60 = vsel %vm19068_vm9, %v12177_v1, %v12181_v28  ;;  %v12201_v1 = vrot.slane %v12200_v33, 4 }
 0x60b   : > { %12929 = vmatmul.mubr.bf16.gmra.mrb[76].mxu1 %v14886_v14  ;;  %v12203_v14 = vshll.u32 %v20962_v19, 16  ;;  %v14904_v52 = vcombine.low %v12172_v50, %v12182_v60 }
 0x60c   : > { %21329 = vst [vmem:[#allocation7_spill] sm:$0xff] %v20958_v32  ;;  %12936 = vmatprep.mubr.bf16.mxu1 %v14903_v13  ;;  %v12210_v13 = vrot.slane %v12208_v16, 4  ;;  %v12219_v21 = vrot.slane %v12217_v54, 5  ;;  %v12223_v32 = vrot.slane %v12221_v27, 4  ;;  %v12196_v16 = vsel %vm19068_vm9, %v12191_v61, %v12195_v25 }
 0x60d   : > { %v12205_v43 = vrot.slane %v12203_v14, 5  ;;  %v12297_v14 = vrot.slane %v20670_v38, 5  ;;  %v12304_v38 = vrot.slane %v20689_v6, 5 }
 0x60e   : > { %v15595_v48 = vpop.f32.mrb[4].mxu1  ;;  %v12214_v10 = vor.u32 %v12213_v3, %v12210_v13  ;;  %v12224_v30 = vor.u32 %v12223_v32, %v12219_v21  ;;  %v12229_v32 = vrot.slane %v12227_v18, 5 }
 0x60f   : > { %v15596_v4 = vpop.f32.mrb[5].mxu1  ;;  %v12206_v0 = vsel %vm19068_vm9, %v12201_v1, %v12205_v43  ;;  %v12231_v43 = vld [vmem:[#allocation3 + $0x18] sm:$0xe] }
 0x610   : > { %v20974_v44 = vadd.f32 %v15596_v4, %v15595_v48  ;;  %v15598_v51 = vpop.f32.mrb[6].mxu1  ;;  %v14888_v4 = vcombine.low %v20919_v23, %v20921_v45  ;;  %v12215_v60 = vrot.slane %v12214_v10, 4  ;;  %v12225_v3 = vrot.slane %v12224_v30, 4 }
 0x611   : > { %v15599_v39 = vpop.f32.mrb[7].mxu1  ;;  %v14905_v31 = vcombine.low %v12196_v16, %v12206_v0  ;;  %v14859_v7 = vrot.slane %v12231_v43, 9  ;;  %v12300_v10 = vrot.slane %v20694_v17, 5  ;;  %v12232_v17 = vld [vmem:[#allocation3 + $0x24] sm:$0xe] }
 0x612   : > { %v20977_v9 = vadd.f32 %v15599_v39, %v15598_v51  ;;  %v12220_v25 = vsel %vm19068_vm9, %v12215_v60, %v12219_v21  ;;  %v12230_v33 = vsel %vm19068_vm9, %v12225_v3, %v12229_v32  ;;  %v12299_v21 = vrot.slane %v12297_v14, 4  ;;  %v12233_v3 = vld [vmem:[#allocation3 + $0x30] sm:$0xe] }
 0x613   : > { %12937 = vmatmul.mubr.bf16.gmra.mrb[80].mxu1 %v14887_v20  ;;  %v14906_v13 = vcombine.low %v12220_v25, %v12230_v33  ;;  %v12306_v60 = vrot.slane %v12304_v38, 4  ;;  %v14860_v32 = vrot.slane %v12232_v17, 9 }
 0x614   : > { %12944 = vmatprep.mubr.bf16.mxu1 %v14904_v52  ;;  %v14889_v52 = vcombine.low %v20940_v24, %v20942_v46  ;;  %v12301_v24 = vsel %vm19262_vm15, %v12299_v21, %v12300_v10 }
 0x616   : > { %v15601_v28 = vpop.f32.mrb[8].mxu1 }
 0x617   : > { %v15602_v48 = vpop.f32.mrb[9].mxu1 }
 0x618   : > { %v20984_v54 = vadd.f32 %v15602_v48, %v15601_v28  ;;  %v15604_v27 = vpop.f32.mrb[10].mxu1  ;;  %v14890_v28 = vcombine.low %v20960_v36, %v20856_v59  ;;  %v12311_v48 = vrot.slane %v20709_v12, 5  ;;  %v12307_v36 = vrot.slane %v20713_v26, 5 }
 0x619   : > { %v15605_v50 = vpop.f32.mrb[11].mxu1  ;;  %v14861_v12 = vrot.slane %v12233_v3, 9 }
 0x61a   : > { %v20988_v53 = vadd.f32 %v15605_v50, %v15604_v27  ;;  %v12313_v59 = vrot.slane %v12311_v48, 4  ;;  %v12308_v33 = vsel %vm19262_vm15, %v12306_v60, %v12307_v36 }
 0x61b   : > { %12945 = vmatmul.mubr.bf16.gmra.mrb[84].mxu1 %v14888_v4  ;;  %v12298_v4 = vsel %vm19262_vm15, %v14859_v7, %v12297_v14 }
 0x61c   : > { %12952 = vmatprep.mubr.bf16.mxu1 %v14905_v31  ;;  %v14907_v6 = vcombine.low %v12298_v4, %v12301_v24  ;;  %v12314_v31 = vrot.slane %v20727_v29, 5  ;;  %v21330_v24 = vld [vmem:[#allocation12_spill] sm:$0xff]  ;;  %v21334_v4 = vld [vmem:[#allocation14_spill] sm:$0xff] }
 0x61e   : > { %v15607_v20 = vpop.f32.mrb[12].mxu1 }
 0x61f   : > { %v15608_v51 = vpop.f32.mrb[13].mxu1 }
 0x620   : > { %v20995_v23 = vadd.f32 %v15608_v51, %v15607_v20  ;;  %v15610_v39 = vpop.f32.mrb[14].mxu1  ;;  %v12315_v51 = vsel %vm19262_vm15, %v12313_v59, %v12314_v31 }
 0x621   : > { %v15611_v61 = vpop.f32.mrb[15].mxu1 }
 0x622   : > { %v20999_v1 = vadd.f32 %v15611_v61, %v15610_v39  ;;  %v12312_v61 = vsel %vm19262_vm15, %v14861_v12, %v12311_v48  ;;  %v21337_v12 = vld [vmem:[#allocation20_spill] sm:$0xff] }
 0x623   : > { %12953 = vmatmul.mubr.bf16.gmra.mrb[88].mxu1 %v14889_v52  ;;  %v14909_v43 = vcombine.low %v12312_v61, %v12315_v51  ;;  %v21342_v51 = vcombine.low %v20489_v55, %v20493_v2  ;;  %v12384_v55 = vrot.slane %v20926_v42, 5  ;;  %v12388_v2 = vrot.slane %v20921_v45, 5 }
 0x624   : > { %12960 = vmatprep.mubr.bf16.mxu1 %v14906_v13  ;;  %v12305_v13 = vsel %vm19262_vm15, %v14860_v32, %v12304_v38  ;;  %v21331_v38 = vld [vmem:[#allocation11_spill] sm:$0xff]  ;;  %v12391_v45 = vrot.slane %v20944_v34, 5  ;;  %v21347_v34 = vcombine.low %v20874_v63, %v20878_v11 }
 0x625   : > { %v14908_v52 = vcombine.low %v12305_v13, %v12308_v33  ;;  %v21336_v32 = vld [vmem:[#allocation19_spill] sm:$0xff]  ;;  %v12381_v13 = vrot.slane %v20902_v5, 5 }
 0x626   : > { %v15613_v30 = vpop.f32.mrb[16].mxu1  ;;  %v21338_v31 = vcombine.low %v21336_v32, %v21337_v12  ;;  %v21340_v33 = vld [vmem:[#allocation23_spill] sm:$0xff] }
 0x627   : > { %v15614_v18 = vpop.f32.mrb[17].mxu1  ;;  %v12383_v61 = vrot.slane %v12381_v13, 4 }
 0x628   : > { %v21008_v16 = vadd.f32 %v15614_v18, %v15613_v30  ;;  %v15616_v0 = vpop.f32.mrb[18].mxu1 }
 0x629   : > { %v15617_v27 = vpop.f32.mrb[19].mxu1 }
 0x62a   : > { %v21012_v50 = vadd.f32 %v15617_v27, %v15616_v0  ;;  %v21332_v0 = vcombine.low %v21330_v24, %v21331_v38  ;;  %v21333_v27 = vld [vmem:[#allocation16_spill] sm:$0xff]  ;;  %v12398_v24 = vrot.slane %v20962_v19, 5 }
 0x62b   : > { %12961 = vmatmul.mubr.bf16.gmra.mrb[92].mxu1 %v14890_v28  ;;  %v21335_v48 = vcombine.low %v21333_v27, %v21334_v4 }
 0x62c   : > { %16579 = vmatprep.mubr.bf16.mxu1 %v14907_v6 }
 0x62e   : > { %v15619_v25 = vpop.f32.mrb[20].mxu1 }
 0x62f   : > { %v15620_v20 = vpop.f32.mrb[21].mxu1 }
 0x630   : > { %v21020_v14 = vadd.f32 %v15620_v20, %v15619_v25  ;;  %v15622_v39 = vpop.f32.mrb[22].mxu1  ;;  %v21339_v25 = vld [vmem:[#allocation22_spill] sm:$0xff] }
 0x631   : > { %v15623_v26 = vpop.f32.mrb[23].mxu1  ;;  %v21341_v20 = vcombine.low %v21339_v25, %v21340_v33 }
 0x632   : > { %v21026_v29 = vadd.f32 %v15623_v26, %v15622_v39  ;;  %v21343_v39 = vcombine.low %v20501_v47, %v20505_v40  ;;  %v12243_v26 = vld [vmem:[#allocation3 + $0xa8] sm:$0xe]  ;;  %v12385_v47 = vsel %vm19262_vm15, %v12383_v61, %v12384_v55  ;;  %v12395_v40 = vrot.slane %v20942_v46, 5 }
 0x633   : > { %16580 = vmatmul.mubr.bf16.vlgmr.msra.gmra.mrb[192].mxu1 %v14908_v52  ;;  %v21344_v52 = vcombine.low %v20515_v37, %v20519_v22  ;;  %v12244_v37 = vld [vmem:[#allocation3 + $0xb4] sm:$0xe] }
 0x634   : > { %16583 = vmatprep.mubr.bf16.mxu1 %v14909_v43  ;;  %v21345_v43 = vcombine.low %v20540_v57, %v20544_v62  ;;  %v21346_v57 = vcombine.low %v20565_v49, %v20569_v41  ;;  %v12397_v62 = vrot.slane %v12395_v40, 4  ;;  %v14872_v42 = vrot.slane %v12244_v37, 9 }
 0x636   : > { %v15625_v21 = vpop.f32.mrb[24].mxu1  ;;  %v12399_v38 = vsel %vm19262_vm15, %v12397_v62, %v12398_v24 }
 0x637   : > { %v15626_v7 = vpop.f32.mrb[25].mxu1 }
 0x638   : > { %v21028_v10 = vadd.f32 %v15626_v7, %v15625_v21  ;;  %v15628_v30 = vpop.f32.mrb[26].mxu1  ;;  %v14871_v21 = vrot.slane %v12243_v26, 9  ;;  %v12390_v7 = vrot.slane %v12388_v2, 4 }
 0x639   : > { %v15629_v18 = vpop.f32.mrb[27].mxu1 }
 0x63a   : > { %v21030_v28 = vadd.f32 %v15629_v18, %v15628_v30  ;;  %v12382_v5 = vsel %vm19262_vm15, %v14871_v21, %v12381_v13  ;;  %v12245_v30 = vld [vmem:[#allocation3 + $0xc0] sm:$0xe]  ;;  %v12392_v46 = vsel %vm19262_vm15, %v12390_v7, %v12391_v45 }
 0x63b   : > { %16584 = vmatmul.mubr.bf16.gmra.mrb[196].mxu1 %v21332_v0  ;;  %v14919_v22 = vcombine.low %v12382_v5, %v12385_v47  ;;  %v14873_v18 = vrot.slane %v12245_v30, 9  ;;  %v12389_v0 = vsel %vm19262_vm15, %v14872_v42, %v12388_v2 }
 0x63c   : > { %16587 = vmatprep.mubr.bf16.mxu1 %v21335_v48  ;;  %v14920_v27 = vcombine.low %v12389_v0, %v12392_v46 }
 0x63d   : > { %v12396_v49 = vsel %vm19262_vm15, %v14873_v18, %v12395_v40  ;;  %v17119_v18 = vld [vmem:[#allocation4 + $0x60] sm:$0xff] }
 0x63e   : > { %v15631_v17 = vpop.f32.mrb[28].mxu1  ;;  %v14921_v41 = vcombine.low %v12396_v49, %v12399_v38  ;;  %v17120_v46 = vadd.f32 %v17119_v18, %v20915_v35  ;;  %v17146_v18 = vld [vmem:[#allocation4 + $0x90] sm:$0xff] }
 0x63f   : > { %v15632_v6 = vpop.f32.mrb[29].mxu1 }
 0x640   : > { %v21038_v60 = vadd.f32 %v15632_v6, %v15631_v17  ;;  %v15634_v3 = vpop.f32.mrb[30].mxu1 }
 0x641   : > { %v15635_v59 = vpop.f32.mrb[31].mxu1 }
 0x642   : > { %v21040_v36 = vadd.f32 %v15635_v59, %v15634_v3 }
 0x643   : > { %16588 = vmatmul.mubr.bf16.gmra.mrb[200].mxu1 %v21338_v31 }
 0x644   : > { %16591 = vmatprep.mubr.bf16.mxu1 %v21341_v20 }
 0x64b   : > { %16592 = vmatmul.mubr.bf16.gmra.mrb[204].mxu1 %v21342_v51 }
 0x64c   : > { %16595 = vmatprep.mubr.bf16.mxu1 %v21343_v39 }
 0x653   : > { %16596 = vmatmul.mubr.bf16.gmra.mrb[208].mxu1 %v21344_v52 }
 0x654   : > { %16599 = vmatprep.mubr.bf16.mxu1 %v21345_v43 }
 0x65b   : > { %16600 = vmatmul.mubr.bf16.gmra.mrb[212].mxu1 %v21346_v57 }
 0x65c   : > { %16603 = vmatprep.mubr.bf16.mxu1 %v14919_v22 }
 0x663   : > { %16604 = vmatmul.mubr.bf16.gmra.mrb[216].mxu1 %v14920_v27  ;;  %v17137_v27 = vld [vmem:[#allocation4 + $0x68] sm:$0xff] }
 0x664   : > { %16607 = vmatprep.mubr.bf16.mxu1 %v14921_v41  ;;  %v17138_v41 = vadd.f32 %v17137_v27, %v20917_v58  ;;  %v17164_v27 = vld [vmem:[#allocation4 + $0x98] sm:$0xff] }
 0x66b   : > { %16608 = vmatmul.mubr.bf16.gmra.mrb[220].mxu1 %v21347_v34 }
 0x686   : > { %v15677_v19 = vpop.f32.mrb[32].mxu1 }
 0x687   : > { %v15678_v4 = vpop.f32.mrb[33].mxu1 }
 0x688   : > { %v21084_v48 = vadd.f32 %v15678_v4, %v15677_v19  ;;  %v15680_v17 = vpop.f32.mrb[34].mxu1 }
 0x689   : > { %v15681_v6 = vpop.f32.mrb[35].mxu1 }
 0x68a   : > { %v21086_v3 = vadd.f32 %v15681_v6, %v15680_v17  ;;  %v17110_v6 = vld [vmem:[#allocation4 + $0x70] sm:$0xff] }
 0x68e   : > { %v15683_v59 = vpop.f32.mrb[36].mxu1 }
 0x68f   : > { %v15684_v32 = vpop.f32.mrb[37].mxu1 }
 0x690   : > { %v21088_v12 = vadd.f32 %v15684_v32, %v15683_v59  ;;  %v15686_v56 = vpop.f32.mrb[38].mxu1  ;;  %v17111_v32 = vadd.f32 %v17110_v6, %v20935_v8 }
 0x691   : > { %v15687_v31 = vpop.f32.mrb[39].mxu1 }
 0x692   : > { %v21090_v25 = vadd.f32 %v15687_v31, %v15686_v56 }
 0x696   : > { %v15689_v33 = vpop.f32.mrb[40].mxu1 }
 0x697   : > { %v15690_v20 = vpop.f32.mrb[41].mxu1 }
 0x698   : > { %v21092_v63 = vadd.f32 %v15690_v20, %v15689_v33  ;;  %v15692_v11 = vpop.f32.mrb[42].mxu1  ;;  %v17128_v33 = vld [vmem:[#allocation4 + $0x78] sm:$0xff] }
 0x699   : > { %v15693_v51 = vpop.f32.mrb[43].mxu1  ;;  %v17129_v20 = vadd.f32 %v17128_v33, %v20938_v15 }
 0x69a   : > { %v21094_v39 = vadd.f32 %v15693_v51, %v15692_v11 }
 0x69e   : > { %v15695_v13 = vpop.f32.mrb[44].mxu1 }
 0x69f   : > { %v15696_v26 = vpop.f32.mrb[45].mxu1 }
 0x6a0   : > { %v21096_v52 = vadd.f32 %v15696_v26, %v15695_v13  ;;  %v15698_v61 = vpop.f32.mrb[46].mxu1  ;;  %v17155_v26 = vld [vmem:[#allocation4 + $0x80] sm:$0xff] }
 0x6a1   : > { %v15699_v43 = vpop.f32.mrb[47].mxu1 }
 0x6a2   : > { %v21098_v21 = vadd.f32 %v15699_v43, %v15698_v61  ;;  %v21348_v43 = vld [vmem:[#allocation6_spill] sm:$0xff] }
 0x6a6   : > { %v15701_v55 = vpop.f32.mrb[48].mxu1 }
 0x6a7   : > { %v15702_v2 = vpop.f32.mrb[49].mxu1 }
 0x6a8   : > { %v21100_v47 = vadd.f32 %v15702_v2, %v15701_v55  ;;  %v15704_v40 = vpop.f32.mrb[50].mxu1  ;;  %v17156_v55 = vadd.f32 %v17155_v26, %v21348_v43  ;;  %v17182_v43 = vld [vmem:[#allocation4 + $0xb0] sm:$0xff] }
 0x6a9   : > { %v15705_v5 = vpop.f32.mrb[51].mxu1 }
 0x6aa   : > { %v21102_v37 = vadd.f32 %v15705_v5, %v15704_v40  ;;  %v17173_v5 = vld [vmem:[#allocation4 + $0x88] sm:$0xff] }
 0x6ae   : > { %v15707_v22 = vpop.f32.mrb[52].mxu1 }
 0x6af   : > { %v15708_v7 = vpop.f32.mrb[53].mxu1 }
 0x6b0   : > { %v21104_v30 = vadd.f32 %v15708_v7, %v15707_v22  ;;  %v15710_v57 = vpop.f32.mrb[54].mxu1  ;;  %v21349_v22 = vld [vmem:[#allocation7_spill] sm:$0xff] }
 0x6b1   : > { %v15711_v62 = vpop.f32.mrb[55].mxu1  ;;  %v17174_v7 = vadd.f32 %v17173_v5, %v21349_v22 }
 0x6b2   : > { %v21106_v42 = vadd.f32 %v15711_v62, %v15710_v57 }
 0x6b6   : > { %v15713_v45 = vpop.f32.mrb[56].mxu1 }
 0x6b7   : > { %v15714_v24 = vpop.f32.mrb[57].mxu1 }
 0x6b8   : > { %v15715_v38 = vadd.f32 %v15714_v24, %v15713_v45  ;;  %v15716_v0 = vpop.f32.mrb[58].mxu1 }
 0x6b9   : > { %v15717_v49 = vpop.f32.mrb[59].mxu1 }
 0x6ba   : > { %v21110_v34 = vadd.f32 %v17120_v46, %v15715_v38  ;;  %v15718_v19 = vadd.f32 %v15717_v49, %v15716_v0  ;;  %v17147_v46 = vadd.f32 %v17146_v18, %v20974_v44  ;;  %v17227_v18 = vld [vmem:[#allocation4 + $0xc0] sm:$0xff] }
 0x6bc   : > { %v21112_v4 = vadd.f32 %v17138_v41, %v15718_v19  ;;  %v17165_v41 = vadd.f32 %v17164_v27, %v20977_v9  ;;  %v17245_v27 = vld [vmem:[#allocation4 + $0xc8] sm:$0xff] }
 0x6be   : > { %v15719_v17 = vpop.f32.mrb[60].mxu1 }
 0x6bf   : > { %v15720_v59 = vpop.f32.mrb[61].mxu1 }
 0x6c0   : > { %v15721_v56 = vadd.f32 %v15720_v59, %v15719_v17  ;;  %v15722_v31 = vpop.f32.mrb[62].mxu1 }
 0x6c1   : > { %v15723_v35 = vpop.f32.mrb[63].mxu1 }
 0x6c2   : > { %v21116_v11 = vadd.f32 %v17111_v32, %v15721_v56  ;;  %v15724_v51 = vadd.f32 %v15723_v35, %v15722_v31  ;;  %v17191_v32 = vld [vmem:[#allocation4 + $0xa0] sm:$0xff] }
 0x6c3   : > { %v17192_v31 = vadd.f32 %v17191_v32, %v20984_v54  ;;  %v17218_v32 = vld [vmem:[#allocation4 + $0xd0] sm:$0xff] }
 0x6c4   : > { %v21118_v58 = vadd.f32 %v17129_v20, %v15724_v51  ;;  %v17209_v20 = vld [vmem:[#allocation4 + $0xa8] sm:$0xff] }
 0x6c5   : > { %v17210_v51 = vadd.f32 %v17209_v20, %v20988_v53  ;;  %v17236_v20 = vld [vmem:[#allocation4 + $0xd8] sm:$0xff] }
 0x6c6   : > { %v15725_v13 = vpop.f32.mrb[64].mxu1 }
 0x6c7   : > { %v15726_v61 = vpop.f32.mrb[65].mxu1 }
 0x6c8   : > { %v15727_v2 = vadd.f32 %v15726_v61, %v15725_v13  ;;  %v15728_v40 = vpop.f32.mrb[66].mxu1 }
 0x6c9   : > { %v15729_v8 = vpop.f32.mrb[67].mxu1 }
 0x6ca   : > { %v21122_v57 = vadd.f32 %v17156_v55, %v15727_v2  ;;  %v15730_v62 = vadd.f32 %v15729_v8, %v15728_v40  ;;  %v17183_v2 = vadd.f32 %v17182_v43, %v20995_v23  ;;  %v17200_v8 = vld [vmem:[#allocation4 + $0xb8] sm:$0xff]  ;;  %v17263_v43 = vld [vmem:[#allocation4 + $0xe0] sm:$0xff] }
 0x6cb   : > { %v17201_v22 = vadd.f32 %v17200_v8, %v20999_v1  ;;  %v17281_v8 = vld [vmem:[#allocation4 + $0xe8] sm:$0xff] }
 0x6cc   : > { %v21124_v15 = vadd.f32 %v17174_v7, %v15730_v62 }
 0x6ce   : > { %v15731_v45 = vpop.f32.mrb[68].mxu1 }
 0x6cf   : > { %v15732_v24 = vpop.f32.mrb[69].mxu1 }
 0x6d0   : > { %v15733_v38 = vadd.f32 %v15732_v24, %v15731_v45  ;;  %v15734_v0 = vpop.f32.mrb[70].mxu1 }
 0x6d1   : > { %v15735_v49 = vpop.f32.mrb[71].mxu1 }
 0x6d2   : > { %v21128_v19 = vadd.f32 %v17147_v46, %v15733_v38  ;;  %v15736_v17 = vadd.f32 %v15735_v49, %v15734_v0  ;;  %v17228_v46 = vadd.f32 %v17227_v18, %v21008_v16  ;;  %v17246_v49 = vadd.f32 %v17245_v27, %v21012_v50  ;;  %v17254_v18 = vld [vmem:[#allocation4 + $0xf0] sm:$0xff]  ;;  %v17272_v27 = vld [vmem:[#allocation4 + $0xf8] sm:$0xff] }
 0x6d4   : > { %v21130_v6 = vadd.f32 %v17165_v41, %v15736_v17 }
 0x6d6   : > { %v15737_v59 = vpop.f32.mrb[72].mxu1 }
 0x6d7   : > { %v15738_v56 = vpop.f32.mrb[73].mxu1 }
 0x6d8   : > { %v15739_v33 = vadd.f32 %v15738_v56, %v15737_v59  ;;  %v15740_v35 = vpop.f32.mrb[74].mxu1 }
 0x6d9   : > { %v15741_v44 = vpop.f32.mrb[75].mxu1 }
 0x6da   : > { %v21134_v13 = vadd.f32 %v17192_v31, %v15739_v33  ;;  %v15742_v26 = vadd.f32 %v15741_v44, %v15740_v35  ;;  %v17219_v31 = vadd.f32 %v17218_v32, %v21020_v14  ;;  %v17237_v44 = vadd.f32 %v17236_v20, %v21026_v29  ;;  %v17014_v32 = vld [vmem:[#allocation4] sm:$0xff] }
 0x6dc   : > { %v21136_v9 = vadd.f32 %v17210_v51, %v15742_v26 }
 0x6de   : > { %v15743_v61 = vpop.f32.mrb[76].mxu1 }
 0x6df   : > { %v15744_v55 = vpop.f32.mrb[77].mxu1 }
 0x6e0   : > { %v15745_v40 = vadd.f32 %v15744_v55, %v15743_v61  ;;  %v15746_v5 = vpop.f32.mrb[78].mxu1 }
 0x6e1   : > { %v15747_v54 = vpop.f32.mrb[79].mxu1 }
 0x6e2   : > { %v21140_v7 = vadd.f32 %v17183_v2, %v15745_v40  ;;  %v15748_v62 = vadd.f32 %v15747_v54, %v15746_v5  ;;  %v17264_v2 = vadd.f32 %v17263_v43, %v21028_v10  ;;  %v17282_v54 = vadd.f32 %v17281_v8, %v21030_v28  ;;  %v17005_v28 = vld [vmem:[#allocation4 + $0x10] sm:$0xff] }
 0x6e4   : > { %v21142_v53 = vadd.f32 %v17201_v22, %v15748_v62 }
 0x6e6   : > { %v15749_v45 = vpop.f32.mrb[80].mxu1 }
 0x6e7   : > { %v15750_v24 = vpop.f32.mrb[81].mxu1 }
 0x6e8   : > { %v15751_v38 = vadd.f32 %v15750_v24, %v15749_v45  ;;  %v15752_v0 = vpop.f32.mrb[82].mxu1 }
 0x6e9   : > { %v15753_v23 = vpop.f32.mrb[83].mxu1 }
 0x6ea   : > { %v21146_v41 = vadd.f32 %v17228_v46, %v15751_v38  ;;  %v15754_v17 = vadd.f32 %v15753_v23, %v15752_v0  ;;  %v17255_v46 = vadd.f32 %v17254_v18, %v21038_v60  ;;  %v17273_v23 = vadd.f32 %v17272_v27, %v21040_v36  ;;  %v17032_v60 = vld [vmem:[#allocation4 + $0x8] sm:$0xff] }
 0x6eb   : > { %v17033_v36 = vadd.f32 %v17032_v60, %v21086_v3 }
 0x6ec   : > { %v21148_v1 = vadd.f32 %v17246_v49, %v15754_v17 }
 0x6ee   : > { %v15755_v59 = vpop.f32.mrb[84].mxu1 }
 0x6ef   : > { %v15756_v56 = vpop.f32.mrb[85].mxu1 }
 0x6f0   : > { %v15757_v33 = vadd.f32 %v15756_v56, %v15755_v59  ;;  %v15758_v35 = vpop.f32.mrb[86].mxu1  ;;  %v17006_v56 = vadd.f32 %v17005_v28, %v21088_v12  ;;  %v17041_v12 = vld [vmem:[#allocation4 + $0x30] sm:$0xff] }
 0x6f1   : > { %v15759_v16 = vpop.f32.mrb[87].mxu1 }
 0x6f2   : > { %v21152_v51 = vadd.f32 %v17219_v31, %v15757_v33  ;;  %v15760_v26 = vadd.f32 %v15759_v16, %v15758_v35  ;;  %v17015_v31 = vadd.f32 %v17014_v32, %v21084_v48  ;;  %v17023_v33 = vld [vmem:[#allocation4 + $0x18] sm:$0xff]  ;;  %v17050_v48 = vld [vmem:[#allocation4 + $0x20] sm:$0xff] }
 0x6f3   : > { %v17024_v20 = vadd.f32 %v17023_v33, %v21090_v25  ;;  %v17059_v25 = vld [vmem:[#allocation4 + $0x38] sm:$0xff]  ;;  %v17104_v33 = vld [vmem:[#allocation4 + $0x48] sm:$0xff] }
 0x6f4   : > { %v21154_v50 = vadd.f32 %v17237_v44, %v15760_v26  ;;  %v17060_v3 = vadd.f32 %v17059_v25, %v21098_v21 }
 0x6f6   : > { %v15761_v61 = vpop.f32.mrb[88].mxu1 }
 0x6f7   : > { %v15762_v55 = vpop.f32.mrb[89].mxu1 }
 0x6f8   : > { %v15763_v40 = vadd.f32 %v15762_v55, %v15761_v61  ;;  %v15764_v5 = vpop.f32.mrb[90].mxu1 }
 0x6f9   : > { %v15765_v14 = vpop.f32.mrb[91].mxu1 }
 0x6fa   : > { %v21158_v22 = vadd.f32 %v17264_v2, %v15763_v40  ;;  %v15766_v62 = vadd.f32 %v15765_v14, %v15764_v5  ;;  %v17042_v40 = vadd.f32 %v17041_v12, %v21096_v52  ;;  %v17051_v5 = vadd.f32 %v17050_v48, %v21092_v63  ;;  %v17068_v14 = vld [vmem:[#allocation4 + $0x28] sm:$0xff] }
 0x6fc   : > { %v21160_v29 = vadd.f32 %v17282_v54, %v15766_v62 }
 0x6fe   : > { %v15767_v45 = vpop.f32.mrb[92].mxu1 }
 0x6ff   : > { %v15768_v24 = vpop.f32.mrb[93].mxu1 }
 0x700   : > { %v15769_v38 = vadd.f32 %v15768_v24, %v15767_v45  ;;  %v15770_v0 = vpop.f32.mrb[94].mxu1  ;;  %v17069_v45 = vadd.f32 %v17068_v14, %v21094_v39  ;;  %v17095_v39 = vld [vmem:[#allocation4 + $0x58] sm:$0xff] }
 0x701   : > { %v15771_v10 = vpop.f32.mrb[95].mxu1 }
 0x702   : > { %v21164_v49 = vadd.f32 %v17255_v46, %v15769_v38  ;;  %v15772_v17 = vadd.f32 %v15771_v10, %v15770_v0 }
 0x704   : > { %v21166_v59 = vadd.f32 %v17273_v23, %v15772_v17  ;;  %v17077_v23 = vld [vmem:[#allocation4 + $0x50] sm:$0xff]  ;;  %v17086_v17 = vld [vmem:[#allocation4 + $0x40] sm:$0xff] }
 0x705   : > { %v17078_v21 = vadd.f32 %v17077_v23, %v21104_v30  ;;  %v17087_v28 = vadd.f32 %v17086_v17, %v21100_v47 }
 0x706   : > { %v16581_v35 = vpop.f32.mrb[192].mxu1 }
 0x707   : > { %v17009_v16 = vadd.f32 %v17006_v56, %v16581_v35  ;;  %v13003_v44 = vpop.f32.mrb[193].mxu1  ;;  %v17096_v35 = vadd.f32 %v17095_v39, %v21106_v42 }
 0x708   : > { %v17018_v26 = vadd.f32 %v17015_v31, %v13003_v44  ;;  %v16582_v61 = vpop.f32.mrb[194].mxu1 }
 0x709   : > { %13196 = vst [vmem:[#allocation4 + $0x10] sm:$0xff] %v17009_v16  ;;  %v17027_v43 = vadd.f32 %v17024_v20, %v16582_v61  ;;  %v13006_v55 = vpop.f32.mrb[195].mxu1  ;;  %v17105_v16 = vadd.f32 %v17104_v33, %v21102_v37 }
 0x70a   : > { %13194 = vst [vmem:[#allocation4] sm:$0xff] %v17018_v26  ;;  %v17036_v2 = vadd.f32 %v17033_v36, %v13006_v55 }
 0x70b   : > { %13197 = vst [vmem:[#allocation4 + $0x18] sm:$0xff] %v17027_v43 }
 0x70c   : > { %13195 = vst [vmem:[#allocation4 + $0x8] sm:$0xff] %v17036_v2  ;;  %v21183_v2 = vld [vmem:[%s21230_s4] ss:$0 sm:$0xff] }
 0x70e   : > { %v16585_v8 = vpop.f32.mrb[196].mxu1 }
 0x70f   : > { %v17045_v54 = vadd.f32 %v17042_v40, %v16585_v8  ;;  %v13019_v62 = vpop.f32.mrb[197].mxu1 }
 0x710   : > { %v17054_v18 = vadd.f32 %v17051_v5, %v13019_v62  ;;  %v16586_v24 = vpop.f32.mrb[198].mxu1 }
 0x711   : > { %13200 = vst [vmem:[#allocation4 + $0x30] sm:$0xff] %v17045_v54  ;;  %v17063_v46 = vadd.f32 %v17060_v3, %v16586_v24  ;;  %v13022_v38 = vpop.f32.mrb[199].mxu1 }
 0x712   : > { %v13228_v0 = vld [vmem:[#allocation4 + $0x10] ss:$2 sm:$0xff]  ;;  %13198 = vst [vmem:[#allocation4 + $0x20] sm:$0xff] %v17054_v18  ;;  %v17072_v27 = vadd.f32 %v17069_v45, %v13022_v38  ;;  %v13260_v52 = vld [vmem:[#allocation4 + $0x11] ss:$2 sm:$0xff] }
 0x713   : > { %v13226_v10 = vld [vmem:[#allocation4] ss:$2 sm:$0xff]  ;;  %v13258_v63 = vld [vmem:[#allocation4 + $0x1] ss:$2 sm:$0xff]  ;;  %13201 = vst [vmem:[#allocation4 + $0x38] sm:$0xff] %v17063_v46  ;;  %v13290_v32 = vmax.f32 %v13228_v0, %v13260_v52 }
 0x714   : > { %13199 = vst [vmem:[#allocation4 + $0x28] sm:$0xff] %v17072_v27  ;;  %v13289_v56 = vmax.f32 %v13226_v10, %v13258_v63 }
 0x716   : > { %v16589_v31 = vpop.f32.mrb[200].mxu1  ;;  %v13305_v43 = vmax.f32 %v13289_v56, %v13290_v32 }
 0x717   : > { %v17081_v60 = vadd.f32 %v17078_v21, %v16589_v31  ;;  %v13035_v20 = vpop.f32.mrb[201].mxu1 }
 0x718   : > { %v17090_v44 = vadd.f32 %v17087_v28, %v13035_v20  ;;  %v16590_v36 = vpop.f32.mrb[202].mxu1  ;;  %v13320_v40 = vadd.f32 %v21183_v2, %v13305_v43 }
 0x719   : > { %13204 = vst [vmem:[#allocation4 + $0x50] sm:$0xff] %v17081_v60  ;;  %v17099_v26 = vadd.f32 %v17096_v35, %v16590_v36  ;;  %v13038_v61 = vpop.f32.mrb[203].mxu1 }
 0x71a   : > { %v13232_v30 = vld [vmem:[#allocation4 + $0x30] ss:$2 sm:$0xff]  ;;  %v13264_v47 = vld [vmem:[#allocation4 + $0x31] ss:$2 sm:$0xff]  ;;  %13202 = vst [vmem:[#allocation4 + $0x40] sm:$0xff] %v17090_v44  ;;  %v17108_v55 = vadd.f32 %v17105_v16, %v13038_v61  ;;  %v13328_v24 = vmax.f32 %v13320_v40, 0.0 }
 0x71b   : > { %v13292_v42 = vmax.f32 %v13232_v30, %v13264_v47  ;;  %v13230_v12 = vld [vmem:[#allocation4 + $0x20] ss:$2 sm:$0xff]  ;;  %v13262_v48 = vld [vmem:[#allocation4 + $0x21] ss:$2 sm:$0xff]  ;;  %13205 = vst [vmem:[#allocation4 + $0x58] sm:$0xff] %v17099_v26 }
 0x71c   : > { %v13291_v37 = vmax.f32 %v13230_v12, %v13262_v48  ;;  %13203 = vst [vmem:[#allocation4 + $0x48] sm:$0xff] %v17108_v55 }
 0x71e   : > { %v13306_v5 = vmax.f32 %v13291_v37, %v13292_v42  ;;  %v16593_v25 = vpop.f32.mrb[204].mxu1 }
 0x71f   : > { %v17117_v8 = vadd.f32 %v21116_v11, %v16593_v25  ;;  %v13051_v14 = vpop.f32.mrb[205].mxu1 }
 0x720   : > { %v13321_v3 = vadd.f32 %v21183_v2, %v13306_v5  ;;  %v17126_v54 = vadd.f32 %v21110_v34, %v13051_v14  ;;  %v16594_v62 = vpop.f32.mrb[206].mxu1 }
 0x721   : > { %13208 = vst [vmem:[#allocation4 + $0x70] sm:$0xff] %v17117_v8  ;;  %v17135_v45 = vadd.f32 %v21118_v58, %v16594_v62  ;;  %v13054_v18 = vpop.f32.mrb[207].mxu1 }
 0x722   : > { %v13329_v46 = vmax.f32 %v13321_v3, 0.0  ;;  %v13236_v38 = vld [vmem:[#allocation4 + $0x50] ss:$2 sm:$0xff]  ;;  %13206 = vst [vmem:[#allocation4 + $0x60] sm:$0xff] %v17126_v54  ;;  %v17144_v0 = vadd.f32 %v21112_v4, %v13054_v18  ;;  %v13268_v11 = vld [vmem:[#allocation4 + $0x51] ss:$2 sm:$0xff] }
 0x723   : > { %v13234_v27 = vld [vmem:[#allocation4 + $0x40] ss:$2 sm:$0xff]  ;;  %v13266_v34 = vld [vmem:[#allocation4 + $0x41] ss:$2 sm:$0xff]  ;;  %13209 = vst [vmem:[#allocation4 + $0x78] sm:$0xff] %v17135_v45  ;;  %v13294_v58 = vmax.f32 %v13236_v38, %v13268_v11 }
 0x724   : > { %v15034_v52 = vpack.c.bf16 %v13329_v46, %v13328_v24  ;;  %13207 = vst [vmem:[#allocation4 + $0x68] sm:$0xff] %v17144_v0  ;;  %v13293_v10 = vmax.f32 %v13234_v27, %v13266_v34 }
 0x726   : > { %15035 = vst [vmem:[%s21195_s10] sm:$0xff] %v15034_v52   ;;  %v16597_v63 = vpop.f32.mrb[208].mxu1  ;;  %v13307_v32 = vmax.f32 %v13293_v10, %v13294_v58 }
 0x727   : > { %v17153_v23 = vadd.f32 %v21128_v19, %v16597_v63  ;;  %v13067_v17 = vpop.f32.mrb[209].mxu1 }
 0x728   : > { %v17162_v4 = vadd.f32 %v21122_v57, %v13067_v17  ;;  %v16598_v21 = vpop.f32.mrb[210].mxu1  ;;  %v13322_v19 = vadd.f32 %v21183_v2, %v13307_v32 }
 0x729   : > { %13212 = vst [vmem:[#allocation4 + $0x90] sm:$0xff] %v17153_v23  ;;  %v17171_v28 = vadd.f32 %v21130_v6, %v16598_v21  ;;  %v13070_v39 = vpop.f32.mrb[211].mxu1 }
 0x72a   : > { %v13240_v56 = vld [vmem:[#allocation4 + $0x70] ss:$2 sm:$0xff]  ;;  %v13272_v31 = vld [vmem:[#allocation4 + $0x71] ss:$2 sm:$0xff]  ;;  %13210 = vst [vmem:[#allocation4 + $0x80] sm:$0xff] %v17162_v4  ;;  %v17180_v33 = vadd.f32 %v21124_v15, %v13070_v39  ;;  %v13330_v47 = vmax.f32 %v13322_v19, 0.0 }
 0x72b   : > { %v13296_v35 = vmax.f32 %v13240_v56, %v13272_v31  ;;  %v13238_v60 = vld [vmem:[#allocation4 + $0x60] ss:$2 sm:$0xff]  ;;  %v13270_v20 = vld [vmem:[#allocation4 + $0x61] ss:$2 sm:$0xff]  ;;  %13213 = vst [vmem:[#allocation4 + $0x98] sm:$0xff] %v17171_v28 }
 0x72c   : > { %v13295_v16 = vmax.f32 %v13238_v60, %v13270_v20  ;;  %13211 = vst [vmem:[#allocation4 + $0x88] sm:$0xff] %v17180_v33 }
 0x72e   : > { %v13308_v57 = vmax.f32 %v13295_v16, %v13296_v35  ;;  %v16601_v44 = vpop.f32.mrb[212].mxu1 }
 0x72f   : > { %v17189_v36 = vadd.f32 %v21140_v7, %v16601_v44  ;;  %v13083_v6 = vpop.f32.mrb[213].mxu1 }
 0x730   : > { %v13323_v26 = vadd.f32 %v21183_v2, %v13308_v57  ;;  %v17198_v61 = vadd.f32 %v21134_v13, %v13083_v6  ;;  %v16602_v43 = vpop.f32.mrb[214].mxu1 }
 0x731   : > { %13216 = vst [vmem:[#allocation4 + $0xb0] sm:$0xff] %v17189_v36  ;;  %v17207_v15 = vadd.f32 %v21142_v53, %v16602_v43  ;;  %v13086_v30 = vpop.f32.mrb[215].mxu1 }
 0x732   : > { %v13331_v55 = vmax.f32 %v13323_v26, 0.0  ;;  %v13244_v42 = vld [vmem:[#allocation4 + $0x90] ss:$2 sm:$0xff]  ;;  %13214 = vst [vmem:[#allocation4 + $0xa0] sm:$0xff] %v17198_v61  ;;  %v17216_v12 = vadd.f32 %v21136_v9, %v13086_v30  ;;  %v13276_v48 = vld [vmem:[#allocation4 + $0x91] ss:$2 sm:$0xff] }
 0x733   : > { %v13242_v37 = vld [vmem:[#allocation4 + $0x80] ss:$2 sm:$0xff]  ;;  %v13274_v7 = vld [vmem:[#allocation4 + $0x81] ss:$2 sm:$0xff]  ;;  %13217 = vst [vmem:[#allocation4 + $0xb8] sm:$0xff] %v17207_v15  ;;  %v13298_v13 = vmax.f32 %v13244_v42, %v13276_v48 }
 0x734   : > { %v15039_v40 = vpack.c.bf16 %v13331_v55, %v13330_v47  ;;  %13215 = vst [vmem:[#allocation4 + $0xa8] sm:$0xff] %v17216_v12  ;;  %v13297_v5 = vmax.f32 %v13242_v37, %v13274_v7 }
 0x736   : > { %15051 = vst [vmem:[%s21195_s10 + $0x8] sm:$0xff] %v15039_v40   ;;  %v16605_v25 = vpop.f32.mrb[216].mxu1  ;;  %v13309_v62 = vmax.f32 %v13297_v5, %v13298_v13 }
 0x737   : > { %v17225_v8 = vadd.f32 %v21152_v51, %v16605_v25  ;;  %v13099_v53 = vpop.f32.mrb[217].mxu1 }
 0x738   : > { %v17234_v14 = vadd.f32 %v21146_v41, %v13099_v53  ;;  %v16606_v3 = vpop.f32.mrb[218].mxu1  ;;  %v13324_v51 = vadd.f32 %v21183_v2, %v13309_v62 }
 0x739   : > { %13220 = vst [vmem:[#allocation4 + $0xd0] sm:$0xff] %v17225_v8  ;;  %v17243_v54 = vadd.f32 %v21154_v50, %v16606_v3  ;;  %v13102_v9 = vpop.f32.mrb[219].mxu1 }
 0x73a   : > { %v13248_v45 = vld [vmem:[#allocation4 + $0xb0] ss:$2 sm:$0xff]  ;;  %v13280_v18 = vld [vmem:[#allocation4 + $0xb1] ss:$2 sm:$0xff]  ;;  %13218 = vst [vmem:[#allocation4 + $0xc0] sm:$0xff] %v17234_v14  ;;  %v17252_v24 = vadd.f32 %v21148_v1, %v13102_v9  ;;  %v13332_v23 = vmax.f32 %v13324_v51, 0.0 }
 0x73b   : > { %v13300_v46 = vmax.f32 %v13248_v45, %v13280_v18  ;;  %v13246_v38 = vld [vmem:[#allocation4 + $0xa0] ss:$2 sm:$0xff]  ;;  %v13278_v0 = vld [vmem:[#allocation4 + $0xa1] ss:$2 sm:$0xff]  ;;  %13221 = vst [vmem:[#allocation4 + $0xd8] sm:$0xff] %v17243_v54 }
 0x73c   : > { %v13299_v11 = vmax.f32 %v13246_v38, %v13278_v0  ;;  %13219 = vst [vmem:[#allocation4 + $0xc8] sm:$0xff] %v17252_v24 }
 0x73e   : > { %v13310_v41 = vmax.f32 %v13299_v11, %v13300_v46  ;;  %v16609_v27 = vpop.f32.mrb[220].mxu1 }
 0x73f   : > { %v17261_v34 = vadd.f32 %v21164_v49, %v16609_v27  ;;  %v13115_v50 = vpop.f32.mrb[221].mxu1 }
 0x740   : > { %v13325_v52 = vadd.f32 %v21183_v2, %v13310_v41  ;;  %v17270_v58 = vadd.f32 %v21158_v22, %v13115_v50  ;;  %v16610_v10 = vpop.f32.mrb[222].mxu1 }
 0x741   : > { %13224 = vst [vmem:[#allocation4 + $0xf0] sm:$0xff] %v17261_v34  ;;  %v17279_v1 = vadd.f32 %v21166_v59, %v16610_v10  ;;  %v13118_v63 = vpop.f32.mrb[223].mxu1 }
 0x742   : > { %v13333_v17 = vmax.f32 %v13325_v52, 0.0  ;;  %v13252_v4 = vld [vmem:[#allocation4 + $0xd0] ss:$2 sm:$0xff]  ;;  %13222 = vst [vmem:[#allocation4 + $0xe0] sm:$0xff] %v17270_v58  ;;  %v17288_v21 = vadd.f32 %v21160_v29, %v13118_v63  ;;  %v13284_v28 = vld [vmem:[#allocation4 + $0xd1] ss:$2 sm:$0xff] }
 0x743   : > { %v13250_v39 = vld [vmem:[#allocation4 + $0xc0] ss:$2 sm:$0xff]  ;;  %v13282_v49 = vld [vmem:[#allocation4 + $0xc1] ss:$2 sm:$0xff]  ;;  %13225 = vst [vmem:[#allocation4 + $0xf8] sm:$0xff] %v17279_v1  ;;  %v13302_v22 = vmax.f32 %v13252_v4, %v13284_v28 }
 0x744   : > { %v15044_v32 = vpack.c.bf16 %v13333_v17, %v13332_v23  ;;  %13223 = vst [vmem:[#allocation4 + $0xe8] sm:$0xff] %v17288_v21  ;;  %v13301_v56 = vmax.f32 %v13250_v39, %v13282_v49 }
 0x746   : > { %15052 = vst [vmem:[%s21195_s10 + $0x10] sm:$0xff] %v15044_v32   ;;  %v13311_v31 = vmax.f32 %v13301_v56, %v13302_v22 }
 0x748   : > { %v13326_v19 = vadd.f32 %v21183_v2, %v13311_v31 }
 0x74a   : > { %v13256_v33 = vld [vmem:[#allocation4 + $0xf0] ss:$2 sm:$0xff]  ;;  %v13288_v59 = vld [vmem:[#allocation4 + $0xf1] ss:$2 sm:$0xff]  ;;  %v13334_v44 = vmax.f32 %v13326_v19, 0.0 }
 0x74b   : > { %v13304_v35 = vmax.f32 %v13256_v33, %v13288_v59  ;;  %v13254_v60 = vld [vmem:[#allocation4 + $0xe0] ss:$2 sm:$0xff]  ;;  %v13286_v20 = vld [vmem:[#allocation4 + $0xe1] ss:$2 sm:$0xff] }
 0x74c   : > { %v13303_v16 = vmax.f32 %v13254_v60, %v13286_v20 }
 0x74e   : > { %v13312_v29 = vmax.f32 %v13303_v16, %v13304_v35 }
 0x750   : > { %v13327_v57 = vadd.f32 %v21183_v2, %v13312_v29 }
 0x752   : > { %v13335_v36 = vmax.f32 %v13327_v57, 0.0 }
 0x754   : > { %v15049_v6 = vpack.c.bf16 %v13335_v36, %v13334_v44 }
 0x756   : > { %15053 = vst [vmem:[%s21195_s10 + $0x18] sm:$0xff] %v15049_v6  }
 0x757 PF: > { %s15_s18 = sadd.s32 1, %s18242_s18  }
 0x758   : > { %p12_p4 = scmp.ge.s32.totalorder %s15_s18, 4  }
 0x75a   :  { %14 = sbr.rel (!%p12_p4) target bundleno = 1 (0x1), region = 241 }

</bundles_post_ra>
